<compile_context>
chip_gen: v5e
topology: v5e:2x2
jax: 0.10.0
libtpu: 0.0.40
codegen_flags: <defaults>
</compile_context>

<pallas_src>
import functools

import jax
import jax.numpy as jnp
from jax import lax
from jax.experimental import pallas as pl
from jax.experimental.pallas import tpu as pltpu


# --------------------------------------------------------------------------
# helpers
# --------------------------------------------------------------------------
def _round_up(x, m):
    return ((x + m - 1) // m) * m


def _lane_pad(n):
    # VMEM arrays are lane-padded to 128.
    return _round_up(max(n, 1), 128)


def _vmem_capacity_bytes():
    try:
        return int(pltpu.get_tpu_info().vmem_capacity_bytes)
    except Exception:
        return 64 * 1024 * 1024          # conservative: v7x per-TensorCore VMEM


def _estimate_tile_vmem(TH, H, W, C, itemsize):
    """Rough per-grid-step VMEM live-set (lane-padded), in bytes."""
    Wp = _round_up(W + 4, 8)
    H1, H2 = TH + 8, TH + 4
    Hpad = _round_up(H, TH)
    b = 0
    b += 2 * (Hpad + 16) * W * _lane_pad(9 * C) * itemsize   # resident input x2
    b += H1 * W * _lane_pad(81 * C) * itemsize               # conv1 im2col lhs
    b += 2 * H1 * W * _lane_pad(64) * 4                      # conv1 acc / masked
    b += (H1 + 1) * Wp * _lane_pad(64) * itemsize            # y1 flat
    b += H1 * Wp * _lane_pad(5 * 64) * itemsize              # conv2 lhs
    b += H1 * Wp * _lane_pad(5 * 32) * 4                     # conv2 partials
    b += 2 * H2 * Wp * _lane_pad(32) * 4                     # conv2 acc / masked
    b += (H2 + 1) * Wp * _lane_pad(32) * itemsize            # y2 flat
    b += H2 * Wp * _lane_pad(5 * 32) * itemsize              # conv3 lhs
    b += H2 * Wp * _lane_pad(5 * C) * 4                      # conv3 partials
    b += 2 * TH * _lane_pad(W * C) * 4                       # output block x2
    return b


def _pick_row_tile(H, W, C, desired, itemsize, budget_bytes):
    cap = min(_round_up(max(desired, 8), 8), _round_up(H, 8))
    th = cap
    while th > 8 and _estimate_tile_vmem(th, H, W, C, itemsize) > budget_bytes:
        th -= 8
    return max(th, 8)


# --------------------------------------------------------------------------
# fused kernel
# --------------------------------------------------------------------------
def _srcnn_fused_kernel(xf_ref, w1_ref, b1_ref, w2_ref, b2_ref, w3_ref, b3_ref,
                        out_ref, *, H, W, C, TH, Wp, cdtype):
    """One (batch, row-tile) grid step.

    xf_ref : (1, (Hpad+16)*W, 9*C)  padded input, kw taps pre-folded on lanes,
                                    (row, col) flattened on sublanes (resident)
    w1_ref : (81*C, 64)   K rows ordered (kh, kw, cin)
    w2_ref : (320, 160)   K rows (kw, cin), N cols (kh, cout)
    w3_ref : (160, 5*C)   K rows (kw, cin), N cols (kh, cout)
    b*_ref : (1, Cout)    f32
    out_ref: (1, TH, W*C)
    """
    K1, K2 = 9, 5
    H1 = TH + 8                      # conv1 rows needed (conv2+conv3 halo)
    H2 = TH + 4                      # conv2 rows needed (conv3 halo)
    M1 = H1 * Wp
    M2 = H2 * Wp
    M3 = TH * Wp

    t = pl.program_id(1)
    r0 = t * TH                                   # first output image row
    base = pl.multiple_of(t * (TH * W), 8)        # flat row offset into xf

    # ---- conv1: 9x9, C -> 64.  kw pre-folded in the wrapper; kh folded here
    #      via 9 contiguous row-shifted views -> one deep-K (81*C) MXU dot.
    pieces = [xf_ref[0, pl.ds(base + kh * W, H1 * W), :] for kh in range(K1)]
    lhs1 = jnp.concatenate(pieces, axis=1)                        # (H1*W, 81C)
    acc1 = jnp.dot(lhs1, w1_ref[...], preferred_element_type=jnp.float32)
    y1 = jnp.maximum(acc1 + b1_ref[...], 0.0).reshape(H1, W, 64)
    # Rows outside the image must be ZERO (that is conv2's zero row padding).
    g1 = (r0 - 4) + lax.broadcasted_iota(jnp.int32, (H1, 1, 1), 0)
    y1 = jnp.where((g1 >= 0) & (g1 < H), y1, 0.0).astype(cdtype)
    # Embed conv2's zero columns (Wp is 8-aligned) + one slack row; flatten
    # rows so every (kh, kw) tap becomes a contiguous row-shifted view.
    y1p = jnp.concatenate(
        [jnp.zeros((H1, 2, 64), cdtype), y1,
         jnp.zeros((H1, Wp - W - 2, 64), cdtype)], axis=1)        # (H1, Wp, 64)
    y1p = jnp.concatenate([y1p, jnp.zeros((1, Wp, 64), cdtype)], axis=0)
    y1f = y1p.reshape((H1 + 1) * Wp, 64)

    # ---- conv2: 5x5, 64 -> 32.  (kw,cin) folded into K=320, (kh,cout) folded
    #      into N=160: one MXU dot + 5 row/lane-shifted VPU adds.
    lhs2 = jnp.concatenate([y1f[kw:kw + M1, :] for kw in range(K2)], axis=1)
    p2 = jnp.dot(lhs2, w2_ref[...], preferred_element_type=jnp.float32)  # (M1,160)
    acc2 = p2[0:M2, 0:32]
    for kh in range(1, K2):
        acc2 = acc2 + p2[kh * Wp:kh * Wp + M2, kh * 32:(kh + 1) * 32]
    y2 = jnp.maximum(acc2 + b2_ref[...], 0.0).reshape(H2, Wp, 32)[:, :W, :]
    g2 = (r0 - 2) + lax.broadcasted_iota(jnp.int32, (H2, 1, 1), 0)
    y2 = jnp.where((g2 >= 0) & (g2 < H), y2, 0.0).astype(cdtype)   # conv3 pad
    y2p = jnp.concatenate(
        [jnp.zeros((H2, 2, 32), cdtype), y2,
         jnp.zeros((H2, Wp - W - 2, 32), cdtype)], axis=1)         # (H2, Wp, 32)
    y2p = jnp.concatenate([y2p, jnp.zeros((1, Wp, 32), cdtype)], axis=0)
    y2f = y2p.reshape((H2 + 1) * Wp, 32)

    # ---- conv3: 5x5, 32 -> C (no ReLU).  K=160, N=5*C: one dot + 5 adds.
    lhs3 = jnp.concatenate([y2f[kw:kw + M2, :] for kw in range(K2)], axis=1)
    p3 = jnp.dot(lhs3, w3_ref[...], preferred_element_type=jnp.float32)  # (M2,5C)
    acc3 = p3[0:M3, 0:C]
    for kh in range(1, K2):
        acc3 = acc3 + p3[kh * Wp:kh * Wp + M3, kh * C:(kh + 1) * C]
    y3 = (acc3 + b3_ref[...]).reshape(TH, Wp, C)[:, :W, :]
    out_ref[0] = y3.reshape(TH, W * C).astype(out_ref.dtype)


# --------------------------------------------------------------------------
# wrapper
# --------------------------------------------------------------------------
def srcnn_pallas(x_nchw, params, *, row_tile=None, compute_dtype="bfloat16"):
    """Fused SRCNN forward.  x_nchw: (N, C, H, W), matching the PyTorch API."""
    N, C, H, W = x_nchw.shape
    cdtype = jnp.dtype(compute_dtype)
    itemsize = cdtype.itemsize

    vmem_cap = _vmem_capacity_bytes()
    vmem_limit = min(max(vmem_cap * 3 // 4, 32 * 1024 * 1024), 100 * 1024 * 1024)
    budget = min(vmem_cap // 2, 64 * 1024 * 1024)

    desired = 64 if row_tile is None else row_tile
    TH = _pick_row_tile(H, W, C, desired, itemsize, budget)
    T = -(-H // TH)                  # cdiv; ragged heights handled via padding
    Hpad = T * TH
    Wp = _round_up(W + 4, 8)

    # Input: NCHW -> NHWC, zero-pad rows (conv1 halo + ragged bottom) and
    # conv1's 4 columns, pre-fold the 9 kw taps on the lane axis, then flatten
    # (row, col) so kh taps are contiguous row shifts in the kernel.
    x = jnp.transpose(x_nchw, (0, 2, 3, 1)).astype(jnp.float32)
    xpad = jnp.pad(x, ((0, 0), (8, Hpad - H + 8), (4, 4), (0, 0)))
    xf = jnp.stack([xpad[:, :, kw:kw + W, :] for kw in range(9)], axis=3)
    xf = xf.reshape(N, (Hpad + 16) * W, 9 * C).astype(cdtype)

    # Weights reordered once so the in-kernel K / N orderings line up.
    w1b = params["w1"].reshape(81 * C, 64).astype(cdtype)              # (kh,kw,ci)
    w2b = jnp.transpose(params["w2"], (1, 2, 0, 3)).reshape(320, 160).astype(cdtype)
    w3b = jnp.transpose(params["w3"], (1, 2, 0, 3)).reshape(160, 5 * C).astype(cdtype)
    b1 = params["b1"].reshape(1, 64).astype(jnp.float32)
    b2 = params["b2"].reshape(1, 32).astype(jnp.float32)
    b3 = params["b3"].reshape(1, C).astype(jnp.float32)

    kernel = functools.partial(_srcnn_fused_kernel, H=H, W=W, C=C, TH=TH,
                               Wp=Wp, cdtype=cdtype)

    flops = 2 * N * H * W * (81 * C * 64 + 25 * 64 * 32 + 25 * 32 * C)
    bytes_accessed = int(xf.size * itemsize
                         + (w1b.size + w2b.size + w3b.size) * itemsize
                         + 4 * (64 + 32 + C + N * Hpad * W * C))

    out = pl.pallas_call(
        kernel,
        out_shape=jax.ShapeDtypeStruct((N, Hpad, W * C), jnp.float32),
        grid=(N, T),
        in_specs=[
            # Whole pre-folded image per batch element; constant along the
            # tile axis => one DMA per image, stays VMEM-resident.
            pl.BlockSpec((1, (Hpad + 16) * W, 9 * C), lambda n, t: (n, 0, 0)),
            pl.BlockSpec((81 * C, 64), lambda n, t: (0, 0)),
            pl.BlockSpec((1, 64), lambda n, t: (0, 0)),
            pl.BlockSpec((320, 160), lambda n, t: (0, 0)),
            pl.BlockSpec((1, 32), lambda n, t: (0, 0)),
            pl.BlockSpec((160, 5 * C), lambda n, t: (0, 0)),
            pl.BlockSpec((1, C), lambda n, t: (0, 0)),
        ],
        out_specs=pl.BlockSpec((1, TH, W * C), lambda n, t: (n, t, 0)),
        compiler_params=pltpu.CompilerParams(
            dimension_semantics=("parallel", "parallel"),
            vmem_limit_bytes=int(vmem_limit)),
        cost_estimate=pl.CostEstimate(flops=flops, transcendentals=0,
                                      bytes_accessed=bytes_accessed),
    )(xf, w1b, b1, w2b, b2, w3b, b3)

    out = out.reshape(N, Hpad, W, C)[:, :H]
    return jnp.transpose(out, (0, 3, 1, 2))             # NHWC -> NCHW


@functools.partial(jax.jit, static_argnames=("row_tile", "compute_dtype"))
def srcnn_forward(x_nchw, params, row_tile=None, compute_dtype="bfloat16"):
    """Matches SRCNN.forward: relu(conv1) -> relu(conv2) -> conv3."""
    return srcnn_pallas(x_nchw, params, row_tile=row_tile,
                        compute_dtype=compute_dtype)


# --------------------------------------------------------------------------
# parameters + pure-JAX reference
# --------------------------------------------------------------------------
def init_srcnn_params(key, num_channels=1, dtype=jnp.float32):
    """Deterministic synthetic parameters matching SRCNN.__init__ (HWIO)."""
    k1, k2, k3, k4, k5, k6 = jax.random.split(key, 6)

    def winit(k, kh, kw, cin, cout):
        fan_in = kh * kw * cin
        return (jax.random.normal(k, (kh, kw, cin, cout), dtype)
                * (1.0 / jnp.sqrt(fan_in)))

    return {
        "w1": winit(k1, 9, 9, num_channels, 64),
        "b1": jax.random.normal(k2, (64,), dtype) * 0.01,
        "w2": winit(k3, 5, 5, 64, 32),
        "b2": jax.random.normal(k4, (32,), dtype) * 0.01,
        "w3": winit(k5, 5, 5, 32, num_channels),
        "b3": jax.random.normal(k6, (num_channels,), dtype) * 0.01,
    }


def _reference_forward(x_nchw, params):
    """Pure-JAX reference using lax.conv_general_dilated."""
    x = jnp.transpose(x_nchw, (0, 2, 3, 1))

    def conv(x, w, b, pad):
        y = jax.lax.conv_general_dilated(
            x, w, window_strides=(1, 1),
            padding=[(pad, pad), (pad, pad)],
            dimension_numbers=("NHWC", "HWIO", "NHWC"))
        return y + b[None, None, None, :]

    x = jnp.maximum(conv(x, params["w1"], params["b1"], 4), 0.0)
    x = jnp.maximum(conv(x, params["w2"], params["b2"], 2), 0.0)
    x = conv(x, params["w3"], params["b3"], 2)
    return jnp.transpose(x, (0, 3, 1, 2))


if __name__ == "__main__":
    key = jax.random.PRNGKey(0)
    kx, kp, kx2, kp3, kx3 = jax.random.split(key, 5)

    # Shapes consistent with SRCNN(num_channels=1): NCHW input.
    N, C, H, W = 2, 1, 16, 16
    x = jax.random.uniform(kx, (N, C, H, W), jnp.float32)
    params = init_srcnn_params(kp, num_channels=C)
    ref = _reference_forward(x, params)

    # f32-operand path: tight parity with the lax.conv reference (2 row tiles).
    out_f32 = jax.block_until_ready(
        srcnn_forward(x, params, row_tile=8, compute_dtype="float32"))
    assert out_f32.shape == (N, C, H, W), out_f32.shape
    assert jnp.allclose(out_f32, ref, atol=2e-4, rtol=2e-4), "f32 mismatch"

    # Default bf16-operand / f32-accumulation path: looser tolerance.
    out_bf16 = jax.block_until_ready(srcnn_forward(x, params, row_tile=8))
    assert jnp.allclose(out_bf16, ref, atol=2e-2, rtol=2e-2), "bf16 mismatch"

    # Ragged height exercises the cdiv grid + padded bottom rows.
    x2 = jax.random.uniform(kx2, (N, C, 20, 16), jnp.float32)
    out2 = jax.block_until_ready(
        srcnn_forward(x2, params, compute_dtype="float32"))
    ref2 = _reference_forward(x2, params)
    assert jnp.allclose(out2, ref2, atol=2e-4, rtol=2e-4), "ragged mismatch"

    # Multi-channel input (num_channels=3).
    C3 = 3
    x3 = jax.random.uniform(kx3, (N, C3, H, W), jnp.float32)
    params3 = init_srcnn_params(kp3, num_channels=C3)
    out3 = jax.block_until_ready(
        srcnn_forward(x3, params3, row_tile=8, compute_dtype="float32"))
    ref3 = _reference_forward(x3, params3)
    assert jnp.allclose(out3, ref3, atol=2e-4, rtol=2e-4), "C=3 mismatch"

    print("KERNEL_OK")
</pallas_src>

<mosaic_0001>
module attributes {stable_mosaic.version = 11 : i64} {
  func.func @_srcnn_fused_kernel(%arg0: i32, %arg1: i32, %arg2: memref<1x512x9xf32, #tpu.memory_space<vmem>>, %arg3: memref<81x64xf32, #tpu.memory_space<vmem>>, %arg4: memref<1x64xf32, #tpu.memory_space<vmem>>, %arg5: memref<320x160xf32, #tpu.memory_space<vmem>>, %arg6: memref<1x32xf32, #tpu.memory_space<vmem>>, %arg7: memref<160x5xf32, #tpu.memory_space<vmem>>, %arg8: memref<1x1xf32, #tpu.memory_space<vmem>>, %arg9: memref<1x8x16xf32, #tpu.memory_space<vmem>>) attributes {dimension_semantics = [#tpu.dimension_semantics<parallel>, #tpu.dimension_semantics<parallel>], iteration_bounds = array<i64: 2, 2>, scalar_prefetch = 0 : i64, scratch_operands = 0 : i64, tpu.core_type = #tpu.core_type<tc>, window_params = [{transform_indices = @transform_0, window_bounds = array<i64: 1, 512, 9>}, {pipeline_mode = #tpu.pipeline_mode<synchronous>, transform_indices = @transform_1, window_bounds = array<i64: 81, 64>}, {pipeline_mode = #tpu.pipeline_mode<synchronous>, transform_indices = @transform_2, window_bounds = array<i64: 1, 64>}, {pipeline_mode = #tpu.pipeline_mode<synchronous>, transform_indices = @transform_3, window_bounds = array<i64: 320, 160>}, {pipeline_mode = #tpu.pipeline_mode<synchronous>, transform_indices = @transform_4, window_bounds = array<i64: 1, 32>}, {pipeline_mode = #tpu.pipeline_mode<synchronous>, transform_indices = @transform_5, window_bounds = array<i64: 160, 5>}, {pipeline_mode = #tpu.pipeline_mode<synchronous>, transform_indices = @transform_6, window_bounds = array<i64: 1, 1>}, {transform_indices = @transform_7, window_bounds = array<i64: 1, 8, 16>}]} {
    %c8_i32 = arith.constant 8 : i32
    %0 = arith.muli %arg1, %c8_i32 : i32
    %c128_i32 = arith.constant 128 : i32
    %1 = arith.muli %arg1, %c128_i32 : i32
    %2 = tpu.assume_multiple %1, 8 : i32
    %c0_i32 = arith.constant 0 : i32
    %3 = arith.addi %2, %c0_i32 : i32
    %c0 = arith.constant 0 : index
    %4 = arith.index_cast %3 : i32 to index
    %c0_0 = arith.constant 0 : index
    %5 = vector.load %arg2[%c0, %4, %c0_0] : memref<1x512x9xf32, #tpu.memory_space<vmem>>, vector<1x256x9xf32>
    %6 = vector.shape_cast %5 : vector<1x256x9xf32> to vector<256x9xf32>
    %c16_i32 = arith.constant 16 : i32
    %7 = arith.addi %2, %c16_i32 : i32
    %c0_1 = arith.constant 0 : index
    %8 = arith.index_cast %7 : i32 to index
    %c0_2 = arith.constant 0 : index
    %9 = vector.load %arg2[%c0_1, %8, %c0_2] : memref<1x512x9xf32, #tpu.memory_space<vmem>>, vector<1x256x9xf32>
    %10 = vector.shape_cast %9 : vector<1x256x9xf32> to vector<256x9xf32>
    %c32_i32 = arith.constant 32 : i32
    %11 = arith.addi %2, %c32_i32 : i32
    %c0_3 = arith.constant 0 : index
    %12 = arith.index_cast %11 : i32 to index
    %c0_4 = arith.constant 0 : index
    %13 = vector.load %arg2[%c0_3, %12, %c0_4] : memref<1x512x9xf32, #tpu.memory_space<vmem>>, vector<1x256x9xf32>
    %14 = vector.shape_cast %13 : vector<1x256x9xf32> to vector<256x9xf32>
    %c48_i32 = arith.constant 48 : i32
    %15 = arith.addi %2, %c48_i32 : i32
    %c0_5 = arith.constant 0 : index
    %16 = arith.index_cast %15 : i32 to index
    %c0_6 = arith.constant 0 : index
    %17 = vector.load %arg2[%c0_5, %16, %c0_6] : memref<1x512x9xf32, #tpu.memory_space<vmem>>, vector<1x256x9xf32>
    %18 = vector.shape_cast %17 : vector<1x256x9xf32> to vector<256x9xf32>
    %c64_i32 = arith.constant 64 : i32
    %19 = arith.addi %2, %c64_i32 : i32
    %c0_7 = arith.constant 0 : index
    %20 = arith.index_cast %19 : i32 to index
    %c0_8 = arith.constant 0 : index
    %21 = vector.load %arg2[%c0_7, %20, %c0_8] : memref<1x512x9xf32, #tpu.memory_space<vmem>>, vector<1x256x9xf32>
    %22 = vector.shape_cast %21 : vector<1x256x9xf32> to vector<256x9xf32>
    %c80_i32 = arith.constant 80 : i32
    %23 = arith.addi %2, %c80_i32 : i32
    %c0_9 = arith.constant 0 : index
    %24 = arith.index_cast %23 : i32 to index
    %c0_10 = arith.constant 0 : index
    %25 = vector.load %arg2[%c0_9, %24, %c0_10] : memref<1x512x9xf32, #tpu.memory_space<vmem>>, vector<1x256x9xf32>
    %26 = vector.shape_cast %25 : vector<1x256x9xf32> to vector<256x9xf32>
    %c96_i32 = arith.constant 96 : i32
    %27 = arith.addi %2, %c96_i32 : i32
    %c0_11 = arith.constant 0 : index
    %28 = arith.index_cast %27 : i32 to index
    %c0_12 = arith.constant 0 : index
    %29 = vector.load %arg2[%c0_11, %28, %c0_12] : memref<1x512x9xf32, #tpu.memory_space<vmem>>, vector<1x256x9xf32>
    %30 = vector.shape_cast %29 : vector<1x256x9xf32> to vector<256x9xf32>
    %c112_i32 = arith.constant 112 : i32
    %31 = arith.addi %2, %c112_i32 : i32
    %c0_13 = arith.constant 0 : index
    %32 = arith.index_cast %31 : i32 to index
    %c0_14 = arith.constant 0 : index
    %33 = vector.load %arg2[%c0_13, %32, %c0_14] : memref<1x512x9xf32, #tpu.memory_space<vmem>>, vector<1x256x9xf32>
    %34 = vector.shape_cast %33 : vector<1x256x9xf32> to vector<256x9xf32>
    %c128_i32_15 = arith.constant 128 : i32
    %35 = arith.addi %2, %c128_i32_15 : i32
    %c0_16 = arith.constant 0 : index
    %36 = arith.index_cast %35 : i32 to index
    %c0_17 = arith.constant 0 : index
    %37 = vector.load %arg2[%c0_16, %36, %c0_17] : memref<1x512x9xf32, #tpu.memory_space<vmem>>, vector<1x256x9xf32>
    %38 = vector.shape_cast %37 : vector<1x256x9xf32> to vector<256x9xf32>
    %39 = tpu.concatenate %6, %10, %14, %18, %22, %26, %30, %34, %38 in 1 : vector<256x9xf32>, vector<256x9xf32>, vector<256x9xf32>, vector<256x9xf32>, vector<256x9xf32>, vector<256x9xf32>, vector<256x9xf32>, vector<256x9xf32>, vector<256x9xf32> -> vector<256x81xf32>
    %c0_18 = arith.constant 0 : index
    %c0_19 = arith.constant 0 : index
    %40 = vector.load %arg3[%c0_18, %c0_19] : memref<81x64xf32, #tpu.memory_space<vmem>>, vector<81x64xf32>
    %cst = arith.constant dense<0.000000e+00> : vector<256x64xf32>
    %41 = tpu.matmul %39, %40, %cst {dimension_numbers = #tpu.dot_dimension_numbers<[1], [0], [0], [1], [0, 0, 1, 1], [], []>} : vector<256x81xf32>, vector<81x64xf32>, vector<256x64xf32> -> vector<256x64xf32>
    %c0_20 = arith.constant 0 : index
    %c0_21 = arith.constant 0 : index
    %42 = vector.load %arg4[%c0_20, %c0_21] : memref<1x64xf32, #tpu.memory_space<vmem>>, vector<1x64xf32>
    %43 = vector.broadcast %42 : vector<1x64xf32> to vector<256x64xf32>
    %44 = arith.addf %41, %43 : vector<256x64xf32>
    %cst_22 = arith.constant 0.000000e+00 : f32
    %45 = vector.broadcast %cst_22 : f32 to vector<256x64xf32>
    %46 = arith.maximumf %44, %45 : vector<256x64xf32>
    %47 = vector.shape_cast %46 : vector<256x64xf32> to vector<16x16x64xf32>
    %c4_i32 = arith.constant 4 : i32
    %48 = arith.subi %0, %c4_i32 : i32
    %49 = tpu.iota {dimensions = array<i32: 0>} : vector<16x1x1xi32>
    %50 = vector.broadcast %48 : i32 to vector<16x1x1xi32>
    %51 = arith.addi %50, %49 : vector<16x1x1xi32>
    %c0_i32_23 = arith.constant 0 : i32
    %52 = vector.broadcast %c0_i32_23 : i32 to vector<16x1x1xi32>
    %53 = arith.cmpi sge, %51, %52 : vector<16x1x1xi32>
    %c16_i32_24 = arith.constant 16 : i32
    %54 = vector.broadcast %c16_i32_24 : i32 to vector<16x1x1xi32>
    %55 = arith.cmpi slt, %51, %54 : vector<16x1x1xi32>
    %56 = arith.andi %53, %55 : vector<16x1x1xi1>
    %cst_25 = arith.constant 0.000000e+00 : f32
    %57 = vector.shape_cast %56 : vector<16x1x1xi1> to vector<16x1x1xi1>
    %58 = vector.broadcast %57 : vector<16x1x1xi1> to vector<16x16x64xi1>
    %59 = vector.broadcast %cst_25 : f32 to vector<16x16x64xf32>
    %60 = arith.select %58, %47, %59 : vector<16x16x64xi1>, vector<16x16x64xf32>
    %cst_26 = arith.constant 0.000000e+00 : f32
    %61 = vector.broadcast %cst_26 : f32 to vector<16x2x64xf32>
    %cst_27 = arith.constant 0.000000e+00 : f32
    %62 = vector.broadcast %cst_27 : f32 to vector<16x6x64xf32>
    %63 = tpu.concatenate %61, %60, %62 in 1 : vector<16x2x64xf32>, vector<16x16x64xf32>, vector<16x6x64xf32> -> vector<16x24x64xf32>
    %cst_28 = arith.constant 0.000000e+00 : f32
    %64 = vector.broadcast %cst_28 : f32 to vector<1x24x64xf32>
    %65 = tpu.concatenate %63, %64 in 0 : vector<16x24x64xf32>, vector<1x24x64xf32> -> vector<17x24x64xf32>
    %66 = vector.shape_cast %65 : vector<17x24x64xf32> to vector<408x64xf32>
    %67 = vector.extract_strided_slice %66 {offsets = [0, 0], sizes = [384, 64], strides = [1, 1]} : vector<408x64xf32> to vector<384x64xf32>
    %68 = vector.extract_strided_slice %66 {offsets = [1, 0], sizes = [384, 64], strides = [1, 1]} : vector<408x64xf32> to vector<384x64xf32>
    %69 = vector.extract_strided_slice %66 {offsets = [2, 0], sizes = [384, 64], strides = [1, 1]} : vector<408x64xf32> to vector<384x64xf32>
    %70 = vector.extract_strided_slice %66 {offsets = [3, 0], sizes = [384, 64], strides = [1, 1]} : vector<408x64xf32> to vector<384x64xf32>
    %71 = vector.extract_strided_slice %66 {offsets = [4, 0], sizes = [384, 64], strides = [1, 1]} : vector<408x64xf32> to vector<384x64xf32>
    %72 = tpu.concatenate %67, %68, %69, %70, %71 in 1 : vector<384x64xf32>, vector<384x64xf32>, vector<384x64xf32>, vector<384x64xf32>, vector<384x64xf32> -> vector<384x320xf32>
    %c0_29 = arith.constant 0 : index
    %c0_30 = arith.constant 0 : index
    %73 = vector.load %arg5[%c0_29, %c0_30] : memref<320x160xf32, #tpu.memory_space<vmem>>, vector<320x160xf32>
    %cst_31 = arith.constant dense<0.000000e+00> : vector<384x160xf32>
    %74 = tpu.matmul %72, %73, %cst_31 {dimension_numbers = #tpu.dot_dimension_numbers<[1], [0], [0], [1], [0, 0, 1, 1], [], []>} : vector<384x320xf32>, vector<320x160xf32>, vector<384x160xf32> -> vector<384x160xf32>
    %75 = vector.extract_strided_slice %74 {offsets = [0, 0], sizes = [288, 32], strides = [1, 1]} : vector<384x160xf32> to vector<288x32xf32>
    %76 = vector.extract_strided_slice %74 {offsets = [24, 32], sizes = [288, 32], strides = [1, 1]} : vector<384x160xf32> to vector<288x32xf32>
    %77 = arith.addf %75, %76 : vector<288x32xf32>
    %78 = vector.extract_strided_slice %74 {offsets = [48, 64], sizes = [288, 32], strides = [1, 1]} : vector<384x160xf32> to vector<288x32xf32>
    %79 = arith.addf %77, %78 : vector<288x32xf32>
    %80 = vector.extract_strided_slice %74 {offsets = [72, 96], sizes = [288, 32], strides = [1, 1]} : vector<384x160xf32> to vector<288x32xf32>
    %81 = arith.addf %79, %80 : vector<288x32xf32>
    %82 = vector.extract_strided_slice %74 {offsets = [96, 128], sizes = [288, 32], strides = [1, 1]} : vector<384x160xf32> to vector<288x32xf32>
    %83 = arith.addf %81, %82 : vector<288x32xf32>
    %c0_32 = arith.constant 0 : index
    %c0_33 = arith.constant 0 : index
    %84 = vector.load %arg6[%c0_32, %c0_33] : memref<1x32xf32, #tpu.memory_space<vmem>>, vector<1x32xf32>
    %85 = vector.broadcast %84 : vector<1x32xf32> to vector<288x32xf32>
    %86 = arith.addf %83, %85 : vector<288x32xf32>
    %cst_34 = arith.constant 0.000000e+00 : f32
    %87 = vector.broadcast %cst_34 : f32 to vector<288x32xf32>
    %88 = arith.maximumf %86, %87 : vector<288x32xf32>
    %89 = vector.shape_cast %88 : vector<288x32xf32> to vector<12x24x32xf32>
    %90 = vector.extract_strided_slice %89 {offsets = [0, 0, 0], sizes = [12, 16, 32], strides = [1, 1, 1]} : vector<12x24x32xf32> to vector<12x16x32xf32>
    %c2_i32 = arith.constant 2 : i32
    %91 = arith.subi %0, %c2_i32 : i32
    %92 = tpu.iota {dimensions = array<i32: 0>} : vector<12x1x1xi32>
    %93 = vector.broadcast %91 : i32 to vector<12x1x1xi32>
    %94 = arith.addi %93, %92 : vector<12x1x1xi32>
    %c0_i32_35 = arith.constant 0 : i32
    %95 = vector.broadcast %c0_i32_35 : i32 to vector<12x1x1xi32>
    %96 = arith.cmpi sge, %94, %95 : vector<12x1x1xi32>
    %c16_i32_36 = arith.constant 16 : i32
    %97 = vector.broadcast %c16_i32_36 : i32 to vector<12x1x1xi32>
    %98 = arith.cmpi slt, %94, %97 : vector<12x1x1xi32>
    %99 = arith.andi %96, %98 : vector<12x1x1xi1>
    %cst_37 = arith.constant 0.000000e+00 : f32
    %100 = vector.shape_cast %99 : vector<12x1x1xi1> to vector<12x1x1xi1>
    %101 = vector.broadcast %100 : vector<12x1x1xi1> to vector<12x16x32xi1>
    %102 = vector.broadcast %cst_37 : f32 to vector<12x16x32xf32>
    %103 = arith.select %101, %90, %102 : vector<12x16x32xi1>, vector<12x16x32xf32>
    %cst_38 = arith.constant 0.000000e+00 : f32
    %104 = vector.broadcast %cst_38 : f32 to vector<12x2x32xf32>
    %cst_39 = arith.constant 0.000000e+00 : f32
    %105 = vector.broadcast %cst_39 : f32 to vector<12x6x32xf32>
    %106 = tpu.concatenate %104, %103, %105 in 1 : vector<12x2x32xf32>, vector<12x16x32xf32>, vector<12x6x32xf32> -> vector<12x24x32xf32>
    %cst_40 = arith.constant 0.000000e+00 : f32
    %107 = vector.broadcast %cst_40 : f32 to vector<1x24x32xf32>
    %108 = tpu.concatenate %106, %107 in 0 : vector<12x24x32xf32>, vector<1x24x32xf32> -> vector<13x24x32xf32>
    %109 = vector.shape_cast %108 : vector<13x24x32xf32> to vector<312x32xf32>
    %110 = vector.extract_strided_slice %109 {offsets = [0, 0], sizes = [288, 32], strides = [1, 1]} : vector<312x32xf32> to vector<288x32xf32>
    %111 = vector.extract_strided_slice %109 {offsets = [1, 0], sizes = [288, 32], strides = [1, 1]} : vector<312x32xf32> to vector<288x32xf32>
    %112 = vector.extract_strided_slice %109 {offsets = [2, 0], sizes = [288, 32], strides = [1, 1]} : vector<312x32xf32> to vector<288x32xf32>
    %113 = vector.extract_strided_slice %109 {offsets = [3, 0], sizes = [288, 32], strides = [1, 1]} : vector<312x32xf32> to vector<288x32xf32>
    %114 = vector.extract_strided_slice %109 {offsets = [4, 0], sizes = [288, 32], strides = [1, 1]} : vector<312x32xf32> to vector<288x32xf32>
    %115 = tpu.concatenate %110, %111, %112, %113, %114 in 1 : vector<288x32xf32>, vector<288x32xf32>, vector<288x32xf32>, vector<288x32xf32>, vector<288x32xf32> -> vector<288x160xf32>
    %c0_41 = arith.constant 0 : index
    %c0_42 = arith.constant 0 : index
    %116 = vector.load %arg7[%c0_41, %c0_42] : memref<160x5xf32, #tpu.memory_space<vmem>>, vector<160x5xf32>
    %cst_43 = arith.constant dense<0.000000e+00> : vector<288x5xf32>
    %117 = tpu.matmul %115, %116, %cst_43 {dimension_numbers = #tpu.dot_dimension_numbers<[1], [0], [0], [1], [0, 0, 1, 1], [], []>} : vector<288x160xf32>, vector<160x5xf32>, vector<288x5xf32> -> vector<288x5xf32>
    %118 = vector.extract_strided_slice %117 {offsets = [0, 0], sizes = [192, 1], strides = [1, 1]} : vector<288x5xf32> to vector<192x1xf32>
    %119 = vector.extract_strided_slice %117 {offsets = [24, 1], sizes = [192, 1], strides = [1, 1]} : vector<288x5xf32> to vector<192x1xf32>
    %120 = arith.addf %118, %119 : vector<192x1xf32>
    %121 = vector.extract_strided_slice %117 {offsets = [48, 2], sizes = [192, 1], strides = [1, 1]} : vector<288x5xf32> to vector<192x1xf32>
    %122 = arith.addf %120, %121 : vector<192x1xf32>
    %123 = vector.extract_strided_slice %117 {offsets = [72, 3], sizes = [192, 1], strides = [1, 1]} : vector<288x5xf32> to vector<192x1xf32>
    %124 = arith.addf %122, %123 : vector<192x1xf32>
    %125 = vector.extract_strided_slice %117 {offsets = [96, 4], sizes = [192, 1], strides = [1, 1]} : vector<288x5xf32> to vector<192x1xf32>
    %126 = arith.addf %124, %125 : vector<192x1xf32>
    %c0_44 = arith.constant 0 : index
    %c0_45 = arith.constant 0 : index
    %127 = vector.load %arg8[%c0_44, %c0_45] : memref<1x1xf32, #tpu.memory_space<vmem>>, vector<1x1xf32>
    %128 = vector.broadcast %127 : vector<1x1xf32> to vector<192x1xf32>
    %129 = arith.addf %126, %128 : vector<192x1xf32>
    %130 = vector.shape_cast %129 : vector<192x1xf32> to vector<8x24x1xf32>
    %131 = vector.extract_strided_slice %130 {offsets = [0, 0, 0], sizes = [8, 16, 1], strides = [1, 1, 1]} : vector<8x24x1xf32> to vector<8x16x1xf32>
    %132 = vector.shape_cast %131 : vector<8x16x1xf32> to vector<8x16xf32>
    %c0_46 = arith.constant 0 : index
    %c0_47 = arith.constant 0 : index
    %c0_48 = arith.constant 0 : index
    %133 = vector.load %arg9[%c0_46, %c0_47, %c0_48] : memref<1x8x16xf32, #tpu.memory_space<vmem>>, vector<1x8x16xf32>
    %134 = vector.shape_cast %133 : vector<1x8x16xf32> to vector<8x16xf32>
    %135 = vector.shape_cast %132 : vector<8x16xf32> to vector<1x8x16xf32>
    tpu.vector_store %arg9[%c0_46, %c0_47, %c0_48], %135 {strides = array<i32>} : memref<1x8x16xf32, #tpu.memory_space<vmem>>, vector<1x8x16xf32>,
    return
  }
  func.func @transform_0(%arg0: i32, %arg1: i32) -> (i32, i32, i32) {
    %c0_i32 = arith.constant 0 : i32
    %c0_i32_0 = arith.constant 0 : i32
    %c0_i32_1 = arith.constant 0 : i32
    return %arg0, %c0_i32, %c0_i32_0 : i32, i32, i32
  }
  func.func @transform_1(%arg0: i32, %arg1: i32) -> (i32, i32) {
    %c0_i32 = arith.constant 0 : i32
    %c0_i32_0 = arith.constant 0 : i32
    %c0_i32_1 = arith.constant 0 : i32
    return %c0_i32, %c0_i32_0 : i32, i32
  }
  func.func @transform_2(%arg0: i32, %arg1: i32) -> (i32, i32) {
    %c0_i32 = arith.constant 0 : i32
    %c0_i32_0 = arith.constant 0 : i32
    %c0_i32_1 = arith.constant 0 : i32
    return %c0_i32, %c0_i32_0 : i32, i32
  }
  func.func @transform_3(%arg0: i32, %arg1: i32) -> (i32, i32) {
    %c0_i32 = arith.constant 0 : i32
    %c0_i32_0 = arith.constant 0 : i32
    %c0_i32_1 = arith.constant 0 : i32
    return %c0_i32, %c0_i32_0 : i32, i32
  }
  func.func @transform_4(%arg0: i32, %arg1: i32) -> (i32, i32) {
    %c0_i32 = arith.constant 0 : i32
    %c0_i32_0 = arith.constant 0 : i32
    %c0_i32_1 = arith.constant 0 : i32
    return %c0_i32, %c0_i32_0 : i32, i32
  }
  func.func @transform_5(%arg0: i32, %arg1: i32) -> (i32, i32) {
    %c0_i32 = arith.constant 0 : i32
    %c0_i32_0 = arith.constant 0 : i32
    %c0_i32_1 = arith.constant 0 : i32
    return %c0_i32, %c0_i32_0 : i32, i32
  }
  func.func @transform_6(%arg0: i32, %arg1: i32) -> (i32, i32) {
    %c0_i32 = arith.constant 0 : i32
    %c0_i32_0 = arith.constant 0 : i32
    %c0_i32_1 = arith.constant 0 : i32
    return %c0_i32, %c0_i32_0 : i32, i32
  }
  func.func @transform_7(%arg0: i32, %arg1: i32) -> (i32, i32, i32) {
    %c0_i32 = arith.constant 0 : i32
    %c0_i32_0 = arith.constant 0 : i32
    return %arg0, %arg1, %c0_i32 : i32, i32, i32
  }
}

</mosaic_0001>

<bundles_post_ra>
// kernel: srcnn_forward.1
= control target key start
LH: loop header
LB: loop body
LE: loop exit
PB: predicated region body
PF: predicated region fallthrough
CT: control target
= control target key end

     0   :  { %s13130_s0 = inlined_call_operand.vmem [shape: f32[2,512,9], index: 0, kind: input, shape index: {}]   ;;  %s13131_s1 = inlined_call_operand.vmem [shape: f32[81,64], index: 1, kind: input, shape index: {}]   ;;  %s13132_s2 = inlined_call_operand.vmem [shape: f32[1,64], index: 2, kind: input, shape index: {}]   ;;  %s13133_s3 = inlined_call_operand.vmem [shape: f32[320,160], index: 3, kind: input, shape index: {}]   ;;  %s13134_s4 = inlined_call_operand.vmem [shape: f32[1,32], index: 4, kind: input, shape index: {}]   ;;  %s13135_s5 = inlined_call_operand.vmem [shape: f32[160,5], index: 5, kind: input, shape index: {}]   ;;  %s13136_s6 = inlined_call_operand.<no memory space> [shape: f32[1,1], index: 6, kind: input, shape index: {}]   ;;  %s13137_s7 = inlined_call_operand.hbm [shape: f32[2,16,16], index: 7, kind: output, shape index: {}]  }
   0x1   :  { %v12_v0 = vstv %s13136_s6 }
   0x2   :  { %13 = vst [vmem:[#allocation2] sm:$0x1] %v12_v0 }
   0x3   :  { %14 = vsyncpa [#allocation4], 0 }
   0x4   :  { %16 = vsyncpa [#allocation4 + $0x1], 0  ;;  %s7611_s26 = smov 0   ;;  %s7613_s27 = smov 0  }
   0x5   :  { %s7615_s28 = smov 0   ;;  %s7617_s29 = smov 0  }
   0x6   :  { %s7619_s30 = smov 0   ;;  %s7621_s8 = smov 0  }
   0x7   :  { %s7623_s9 = smov 0   ;;  %s7625_s10 = smov 0  }
   0x8 LB: > { %s6509_s6 = sadd.s32 4294967295, %s7549_s10   ;;  %s6510_s11 = sadd.s32 4294967294, %s7549_s10   ;;  %s7549_s10 = sphi %s7625_s10, %s22_s10   ;;  %s7545_s9 = sphi %s7623_s9, %s13926_s9   ;;  %s7541_s8 = sphi %s7621_s8, %s13925_s8   ;;  %s7537_s30 = sphi %s7619_s30, %s13924_s30   ;;  %s7533_s29 = sphi %s7617_s29, %s13923_s29   ;;  %s7529_s28 = sphi %s7615_s28, %s13922_s28   ;;  %s7525_s27 = sphi %s7613_s27, %s13921_s27   ;;  %s7521_s26 = sphi %s7611_s26, %s13920_s26  }
   0x9   : > { %s31_s12 = sadd.s32 1, %s7541_s8  ;;  %s34_s13 = sadd.s32 1, %s7545_s9 }
   0xa   : > { %p32_p0 = scmp.ge.s32.totalorder %s31_s12, 2  ;;  %p205_p1 = scmp.ne.s32.totalorder %s7529_s28, %s7525_s27 }
   0xb   : > { %p206_p2 = scmp.eq.s32.totalorder %s6509_s6, 3  ;;  %p211_p5 = scmp.ne.s32.totalorder %s7525_s27, %s7521_s26 }
   0xc   : > { %s13928_s12 = smov (%p32_p0, %s31_s12), 0  ;;  %s13930_s13 = smov (!%p32_p0, %s34_s13), %s7545_s9 }
   0xd   : > { %s191_s14 = ssub.s32 %s7541_s8, %s13928_s12  ;;  %p7662_p3 = por %p206_p2, %p205_p1 }
   0xe   : > { %p36_p4 = scmp.ge.s32.totalorder %s13930_s13, 2  ;;  %p212_p6 = scmp.eq.s32.totalorder %s6510_s11, 3 }
   0xf   : > { %p6513_p7 = scmp.ge.s32.totalorder %s7549_s10, 1  ;;  %p256_p9 = scmp.lt.s32.totalorder %s7549_s10, 5 }
  0x10   : > { %s13932_s13 = smov (%p36_p4, %s13930_s13), 0  ;;  %p7671_p8 = por %p212_p6, %p211_p5 }
  0x11   : > { %s190_s17 = ssub.s32 %s7545_s9, %s13932_s13  ;;  %s195_s18 = sadd.s32 1, %s7529_s28 }
  0x12   : > { %s192_s19 = sor.u32 %s191_s14, %s190_s17  ;;  %p257_p10 = pnand %p6513_p7, %p256_p9 }
  0x13   : > { %p193_p11 = scmp.eq.s32.totalorder %s192_s19, 0 }
  0x14   : > { %260 = sbr.rel (%p257_p10) target bundleno = 2621 (0xa3d), region = 48 }
  0x15   : > { %s7680_s20 = scalar_select %p193_p11, %s7529_s28, %s195_s18  }
  0x19   : > { %p288_p12 = scmp.lt.s32.totalorder %s7537_s30, 1  ;;  %s6518_s22 = sshll.u32 %s7533_s29, 7  ;;  %vm2000_vm0 = vcmask 1040384   ;;  %vm1624_vm1 = vcmask 72704   ;;  %vm1657_vm2 = vcmask 146432   ;;  %vm1690_vm3 = vcmask 220160  }
  0x1a   : > { %s7551_s14 = smov 9   ;;  %s7552_s17 = smov 18   ;;  %vm1756_vm4 = vcmask 367616   ;;  %vm1723_vm5 = vcmask 293888   ;;  %vm1789_vm6 = vcmask 441344   ;;  %vm1855_vm7 = vcmask 588800  }
  0x1b   : > { %s289_s21 = scalar_select %p288_p12, %s7537_s30, 1  ;;  %vm1822_vm8 = vcmask 515072   ;;  %vm1903_vm9 = vcmask 662528   ;;  %vm2310_vm13 = vcmask 1041408   ;;  %vm2472_vm14 = vcmask 1046528  }
  0x1c   : > { %s7553_s18 = smov 27   ;;  %s7554_s19 = smov 36  }
  0x1d   : > { %s6955_s23 = sshll.u32 %s289_s21, 9  ;;  %s7555_s21 = smov 45  }
  0x1e   : > { %s292_s6 = scalar_lea.vmem %s13130_s0, %s6955_s23  ;;  %s13143_s23 = smov 72  }
  0x1f   : > { %s7688_s11 = scalar_lea.vmem %s292_s6, %s6518_s22  ;;  %s7556_s22 = smov 54  }
  0x20   : > { %v7691_v1 = vld [vmem:[%s7688_s11 + $0x30] sm:$0xff]  ;;  %v6522_v2 = vld [vmem:[%s7688_s11 + $0x20] sm:$0xff]  ;;  %v7700_v4 = vld [vmem:[%s7688_s11 + $0x38] sm:$0xff]  ;;  %s7558_s24 = smov 63  }
  0x21   : > { %v6520_v3 = vld [vmem:[%s7688_s11 + $0x10] sm:$0xff]  ;;  %640 = vrot.lane.b32.xlu2 %v7691_v1, %s7551_s14  ;;  %636 = vrot.lane.b32.xlu1 %v6522_v2, %s7551_s14  ;;  %v6523_v5 = vld [vmem:[%s7688_s11 + $0x28] sm:$0xff] }
  0x22   : > { %632 = vrot.lane.b32.xlu0 %v6520_v3, %s7551_s14  ;;  %v6521_v6 = vld [vmem:[%s7688_s11 + $0x18] sm:$0xff]  ;;  %v7709_v7 = vld [vmem:[%s7688_s11 + $0x50] sm:$0xff]  ;;  %v7712_v8 = vld [vmem:[%s7688_s11 + $0x48] sm:$0xff] }
  0x23   : > { %v7715_v9 = vld [vmem:[%s7688_s11 + $0x40] sm:$0xff]  ;;  %v7724_v10 = vld [vmem:[%s7688_s11 + $0x68] sm:$0xff]  ;;  %v7730_v12 = vld [vmem:[%s7688_s11 + $0x58] sm:$0xff] }
  0x24   : > { %v7727_v11 = vld [vmem:[%s7688_s11 + $0x60] sm:$0xff]  ;;  %v7742_v14 = vld [vmem:[%s7688_s11 + $0x78] sm:$0xff]  ;;  %v7745_v15 = vld [vmem:[%s7688_s11 + $0x70] sm:$0xff] }
  0x25   : > { %v7739_v13 = vld [vmem:[%s7688_s11 + $0x80] sm:$0xff]  ;;  %v7754_v16 = vld [vmem:[%s7688_s11 + $0x98] sm:$0xff]  ;;  %v7757_v17 = vld [vmem:[%s7688_s11 + $0x90] sm:$0xff] }
  0x26   : > { %v7760_v18 = vld [vmem:[%s7688_s11 + $0x88] sm:$0xff]  ;;  %v7769_v19 = vld [vmem:[%s7688_s11 + $0xb0] sm:$0xff]  ;;  %v7775_v21 = vld [vmem:[%s7688_s11 + $0xa0] sm:$0xff] }
  0x27   : > { %v7772_v20 = vld [vmem:[%s7688_s11 + $0xa8] sm:$0xff]  ;;  %v7787_v23 = vld [vmem:[%s7688_s11 + $0xc0] sm:$0xff]  ;;  %v7790_v24 = vld [vmem:[%s7688_s11 + $0xb8] sm:$0xff] }
  0x28   : > { %v7784_v22 = vld [vmem:[%s7688_s11 + $0xc8] sm:$0xff]  ;;  %v7799_v25 = vld [vmem:[%s7688_s11 + $0xe0] sm:$0xff]  ;;  %v7802_v26 = vld [vmem:[%s7688_s11 + $0xd8] sm:$0xff] }
  0x29   : > { %642 = vrot.lane.b32.xlu2 %v7700_v4, %s7551_s14  ;;  %638 = vrot.lane.b32.xlu1 %v6523_v5, %s7551_s14  ;;  %v7805_v27 = vld [vmem:[%s7688_s11 + $0xd0] sm:$0xff]  ;;  %v7814_v28 = vld [vmem:[%s7688_s11 + $0xf8] sm:$0xff] }
  0x2a   : > { %634 = vrot.lane.b32.xlu0 %v6521_v6, %s7551_s14  ;;  %v7817_v29 = vld [vmem:[%s7688_s11 + $0xf0] sm:$0xff]  ;;  %v7820_v30 = vld [vmem:[%s7688_s11 + $0xe8] sm:$0xff]  ;;  %v7832_v32 = vld [vmem:[%s7688_s11 + $0x100] sm:$0xff] }
  0x2b   : > { %v7829_v31 = vld [vmem:[%s7688_s11 + $0x108] sm:$0xff]  ;;  %v7935_v54 = vld [vmem:[%s7688_s11 + $0x110] sm:$0xff]  ;;  %v7950_v58 = vld [vmem:[%s7688_s11 + $0x118] sm:$0xff] }
  0x31   : > { %648 = vrot.lane.b32.xlu2 %v7709_v7, %s7551_s14  ;;  %646 = vrot.lane.b32.xlu1 %v7712_v8, %s7551_s14 }
  0x32   : > { %644 = vrot.lane.b32.xlu0 %v7715_v9, %s7551_s14 }
  0x39   : > { %654 = vrot.lane.b32.xlu2 %v7724_v10, %s7551_s14  ;;  %652 = vrot.lane.b32.xlu1 %v7727_v11, %s7551_s14 }
  0x3a   : > { %650 = vrot.lane.b32.xlu0 %v7730_v12, %s7551_s14 }
  0x41   : > { %660 = vrot.lane.b32.xlu2 %v7739_v13, %s7551_s14  ;;  %658 = vrot.lane.b32.xlu1 %v7742_v14, %s7551_s14 }
  0x42   : > { %656 = vrot.lane.b32.xlu0 %v7745_v15, %s7551_s14 }
  0x49   : > { %666 = vrot.lane.b32.xlu2 %v7754_v16, %s7551_s14  ;;  %664 = vrot.lane.b32.xlu1 %v7757_v17, %s7551_s14 }
  0x4a   : > { %662 = vrot.lane.b32.xlu0 %v7760_v18, %s7551_s14 }
  0x51   : > { %672 = vrot.lane.b32.xlu2 %v7769_v19, %s7551_s14  ;;  %670 = vrot.lane.b32.xlu1 %v7772_v20, %s7551_s14 }
  0x52   : > { %668 = vrot.lane.b32.xlu0 %v7775_v21, %s7551_s14 }
  0x59   : > { %678 = vrot.lane.b32.xlu2 %v7784_v22, %s7551_s14  ;;  %676 = vrot.lane.b32.xlu1 %v7787_v23, %s7551_s14 }
  0x5a   : > { %674 = vrot.lane.b32.xlu0 %v7790_v24, %s7551_s14 }
  0x61   : > { %684 = vrot.lane.b32.xlu2 %v7799_v25, %s7551_s14  ;;  %682 = vrot.lane.b32.xlu1 %v7802_v26, %s7551_s14 }
  0x62   : > { %680 = vrot.lane.b32.xlu0 %v7805_v27, %s7551_s14 }
  0x69   : > { %690 = vrot.lane.b32.xlu2 %v7814_v28, %s7551_s14  ;;  %688 = vrot.lane.b32.xlu1 %v7817_v29, %s7551_s14 }
  0x6a   : > { %686 = vrot.lane.b32.xlu0 %v7820_v30, %s7551_s14 }
  0x71   : > { %760 = vrot.lane.b32.xlu2 %v6522_v2, %s7552_s17  ;;  %694 = vrot.lane.b32.xlu1 %v7829_v31, %s7551_s14 }
  0x72   : > { %692 = vrot.lane.b32.xlu0 %v7832_v32, %s7551_s14  ;;  %s7566_s14 = smov 124  }
  0x79   : > { %766 = vrot.lane.b32.xlu2 %v7700_v4, %s7552_s17  ;;  %764 = vrot.lane.b32.xlu1 %v7691_v1, %s7552_s17 }
  0x7a   : > { %762 = vrot.lane.b32.xlu0 %v6523_v5, %s7552_s17 }
  0x7b   : > { %v7844_v33 = vpop.permute.xlu2 %640 }
  0x81   : > { %772 = vrot.lane.b32.xlu2 %v7709_v7, %s7552_s17  ;;  %770 = vrot.lane.b32.xlu1 %v7712_v8, %s7552_s17 }
  0x82   : > { %768 = vrot.lane.b32.xlu0 %v7715_v9, %s7552_s17 }
  0x83   : > { %v7852_v34 = vpop.permute.xlu2 %642 }
  0x89   : > { %778 = vrot.lane.b32.xlu2 %v7724_v10, %s7552_s17  ;;  %776 = vrot.lane.b32.xlu1 %v7727_v11, %s7552_s17 }
  0x8a   : > { %774 = vrot.lane.b32.xlu0 %v7730_v12, %s7552_s17 }
  0x8b   : > { %v7860_v35 = vpop.permute.xlu2 %648 }
  0x8c   : > { %13241 = vst [vmem:[#allocation6_spill] sm:$0xff] %v7860_v35  ;;  %v8541_v35 = vld [vmem:[%s7688_s11 + $0x100] sm:$0xff] }
  0x91   : > { %784 = vrot.lane.b32.xlu2 %v7739_v13, %s7552_s17  ;;  %782 = vrot.lane.b32.xlu1 %v7742_v14, %s7552_s17 }
  0x92   : > { %780 = vrot.lane.b32.xlu0 %v7745_v15, %s7552_s17 }
  0x93   : > { %v7868_v36 = vpop.permute.xlu2 %654  ;;  %v7870_v37 = vpop.permute.xlu1 %636 }
  0x94   : > { %13242 = vst [vmem:[#allocation7_spill] sm:$0xff] %v7868_v36  ;;  %v7872_v38 = vpop.permute.xlu0 %632 }
  0x99   : > { %790 = vrot.lane.b32.xlu2 %v7754_v16, %s7552_s17  ;;  %788 = vrot.lane.b32.xlu1 %v7757_v17, %s7552_s17 }
  0x9a   : > { %786 = vrot.lane.b32.xlu0 %v7760_v18, %s7552_s17 }
  0x9b   : > { %v7880_v39 = vpop.permute.xlu2 %660  ;;  %v7882_v40 = vpop.permute.xlu1 %638 }
  0x9c   : > { %13243 = vst [vmem:[#allocation8_spill] sm:$0xff] %v7880_v39  ;;  %v7884_v41 = vpop.permute.xlu0 %634 }
  0xa1   : > { %796 = vrot.lane.b32.xlu2 %v7769_v19, %s7552_s17  ;;  %794 = vrot.lane.b32.xlu1 %v7772_v20, %s7552_s17 }
  0xa2   : > { %792 = vrot.lane.b32.xlu0 %v7775_v21, %s7552_s17 }
  0xa3   : > { %v7892_v42 = vpop.permute.xlu2 %666  ;;  %v7894_v43 = vpop.permute.xlu1 %646 }
  0xa4   : > { %13244 = vst [vmem:[#allocation9_spill] sm:$0xff] %v7892_v42  ;;  %v7896_v44 = vpop.permute.xlu0 %644 }
  0xa9   : > { %802 = vrot.lane.b32.xlu2 %v7784_v22, %s7552_s17  ;;  %800 = vrot.lane.b32.xlu1 %v7787_v23, %s7552_s17 }
  0xaa   : > { %798 = vrot.lane.b32.xlu0 %v7790_v24, %s7552_s17 }
  0xab   : > { %v7904_v45 = vpop.permute.xlu2 %672  ;;  %v7906_v46 = vpop.permute.xlu1 %652 }
  0xac   : > { %13245 = vst [vmem:[#allocation10_spill] sm:$0xff] %v7904_v45  ;;  %v7908_v47 = vpop.permute.xlu0 %650 }
  0xad   : > { %13246 = vst [vmem:[#allocation11_spill] sm:$0xff] %v7906_v46 }
  0xae   : > { %13247 = vst [vmem:[#allocation12_spill] sm:$0xff] %v7908_v47  ;;  %v8473_v47 = vld [vmem:[%s7688_s11 + $0xd0] sm:$0xff] }
  0xb1   : > { %808 = vrot.lane.b32.xlu2 %v7799_v25, %s7552_s17  ;;  %806 = vrot.lane.b32.xlu1 %v7802_v26, %s7552_s17 }
  0xb2   : > { %804 = vrot.lane.b32.xlu0 %v7805_v27, %s7552_s17 }
  0xb3   : > { %v7916_v48 = vpop.permute.xlu2 %678  ;;  %v7918_v49 = vpop.permute.xlu1 %658 }
  0xb4   : > { %13248 = vst [vmem:[#allocation13_spill] sm:$0xff] %v7916_v48  ;;  %v7920_v50 = vpop.permute.xlu0 %656 }
  0xb5   : > { %13249 = vst [vmem:[#allocation14_spill] sm:$0xff] %v7918_v49 }
  0xb6   : > { %13250 = vst [vmem:[#allocation15_spill] sm:$0xff] %v7920_v50 }
  0xb9   : > { %814 = vrot.lane.b32.xlu2 %v7814_v28, %s7552_s17  ;;  %812 = vrot.lane.b32.xlu1 %v7817_v29, %s7552_s17 }
  0xba   : > { %810 = vrot.lane.b32.xlu0 %v7820_v30, %s7552_s17 }
  0xbb   : > { %v7928_v51 = vpop.permute.xlu2 %684  ;;  %v7930_v52 = vpop.permute.xlu1 %664 }
  0xbc   : > { %13251 = vst [vmem:[#allocation16_spill] sm:$0xff] %v7928_v51  ;;  %v7932_v53 = vpop.permute.xlu0 %662 }
  0xbd   : > { %13252 = vst [vmem:[#allocation17_spill] sm:$0xff] %v7930_v52 }
  0xbe   : > { %13253 = vst [vmem:[#allocation18_spill] sm:$0xff] %v7932_v53 }
  0xc1   : > { %820 = vrot.lane.b32.xlu2 %v7935_v54, %s7552_s17  ;;  %818 = vrot.lane.b32.xlu1 %v7829_v31, %s7552_s17 }
  0xc2   : > { %816 = vrot.lane.b32.xlu0 %v7832_v32, %s7552_s17 }
  0xc3   : > { %v7943_v55 = vpop.permute.xlu2 %690  ;;  %v7945_v56 = vpop.permute.xlu1 %670 }
  0xc4   : > { %13254 = vst [vmem:[#allocation19_spill] sm:$0xff] %v7943_v55  ;;  %v7947_v57 = vpop.permute.xlu0 %668 }
  0xc5   : > { %13255 = vst [vmem:[#allocation20_spill] sm:$0xff] %v7945_v56 }
  0xc6   : > { %13256 = vst [vmem:[#allocation21_spill] sm:$0xff] %v7947_v57 }
  0xc9   : > { %890 = vrot.lane.b32.xlu2 %v7700_v4, %s7553_s18  ;;  %888 = vrot.lane.b32.xlu1 %v7691_v1, %s7553_s18 }
  0xca   : > { %822 = vrot.lane.b32.xlu0 %v7950_v58, %s7552_s17 }
  0xcb   : > { %v7958_v59 = vpop.permute.xlu2 %760  ;;  %v7960_v60 = vpop.permute.xlu1 %676 }
  0xcc   : > { %13257 = vst [vmem:[#allocation22_spill] sm:$0xff] %v7960_v60  ;;  %v7962_v61 = vpop.permute.xlu0 %674 }
  0xcd   : > { %13258 = vst [vmem:[#allocation23_spill] sm:$0xff] %v7962_v61 }
  0xd1   : > { %896 = vrot.lane.b32.xlu2 %v7709_v7, %s7553_s18  ;;  %894 = vrot.lane.b32.xlu1 %v7712_v8, %s7553_s18 }
  0xd2   : > { %892 = vrot.lane.b32.xlu0 %v7715_v9, %s7553_s18 }
  0xd3   : > { %v7970_v62 = vpop.permute.xlu2 %766  ;;  %v7972_v63 = vpop.permute.xlu1 %682 }
  0xd4   : > { %13259 = vst [vmem:[#allocation24_spill] sm:$0xff] %v7972_v63  ;;  %v7974_v0 = vpop.permute.xlu0 %680 }
  0xd5   : > { %13260 = vst [vmem:[#allocation25_spill] sm:$0xff] %v7974_v0 }
  0xd9   : > { %902 = vrot.lane.b32.xlu2 %v7724_v10, %s7553_s18  ;;  %900 = vrot.lane.b32.xlu1 %v7727_v11, %s7553_s18 }
  0xda   : > { %898 = vrot.lane.b32.xlu0 %v7730_v12, %s7553_s18 }
  0xdb   : > { %v7982_v1 = vpop.permute.xlu2 %772  ;;  %v7984_v2 = vpop.permute.xlu1 %688 }
  0xdc   : > { %13261 = vst [vmem:[#allocation26_spill] sm:$0xff] %v7984_v2  ;;  %v7986_v3 = vpop.permute.xlu0 %686 }
  0xdd   : > { %13262 = vst [vmem:[#allocation27_spill] sm:$0xff] %v7986_v3 }
  0xe1   : > { %908 = vrot.lane.b32.xlu2 %v7739_v13, %s7553_s18  ;;  %906 = vrot.lane.b32.xlu1 %v7742_v14, %s7553_s18 }
  0xe2   : > { %904 = vrot.lane.b32.xlu0 %v7745_v15, %s7553_s18 }
  0xe3   : > { %v7994_v4 = vpop.permute.xlu2 %778  ;;  %v7996_v5 = vpop.permute.xlu1 %694 }
  0xe4   : > { %13263 = vst [vmem:[#allocation28_spill] sm:$0xff] %v7994_v4  ;;  %v7998_v6 = vpop.permute.xlu0 %692 }
  0xe5   : > { %13264 = vst [vmem:[#allocation29_spill] sm:$0xff] %v7996_v5  ;;  %v8076_v5 = vld [vmem:[%s7688_s11 + $0x120] sm:$0xff] }
  0xe6   : > { %13265 = vst [vmem:[#allocation30_spill] sm:$0xff] %v7998_v6 }
  0xe9   : > { %914 = vrot.lane.b32.xlu2 %v7754_v16, %s7553_s18  ;;  %912 = vrot.lane.b32.xlu1 %v7757_v17, %s7553_s18 }
  0xea   : > { %910 = vrot.lane.b32.xlu0 %v7760_v18, %s7553_s18 }
  0xeb   : > { %v8006_v55 = vpop.permute.xlu2 %784  ;;  %v8008_v2 = vpop.permute.xlu1 %764 }
  0xec   : > { %13266 = vst [vmem:[#allocation31_spill] sm:$0xff] %v8006_v55  ;;  %v8010_v3 = vpop.permute.xlu0 %762 }
  0xf1   : > { %920 = vrot.lane.b32.xlu2 %v7769_v19, %s7553_s18  ;;  %918 = vrot.lane.b32.xlu1 %v7772_v20, %s7553_s18 }
  0xf2   : > { %916 = vrot.lane.b32.xlu0 %v7775_v21, %s7553_s18 }
  0xf3   : > { %v8018_v51 = vpop.permute.xlu2 %790  ;;  %v8020_v63 = vpop.permute.xlu1 %770 }
  0xf4   : > { %13267 = vst [vmem:[#allocation32_spill] sm:$0xff] %v8018_v51  ;;  %v8022_v0 = vpop.permute.xlu0 %768 }
  0xf9   : > { %926 = vrot.lane.b32.xlu2 %v7784_v22, %s7553_s18  ;;  %924 = vrot.lane.b32.xlu1 %v7787_v23, %s7553_s18 }
  0xfa   : > { %922 = vrot.lane.b32.xlu0 %v7790_v24, %s7553_s18 }
  0xfb   : > { %v8030_v48 = vpop.permute.xlu2 %796  ;;  %v8032_v60 = vpop.permute.xlu1 %776 }
  0xfc   : > { %13268 = vst [vmem:[#allocation33_spill] sm:$0xff] %v8030_v48  ;;  %v8034_v61 = vpop.permute.xlu0 %774 }
  0xfd   : > { %13269 = vst [vmem:[#allocation34_spill] sm:$0xff] %v8032_v60  ;;  %v1892_v60 = vld [vmem:[%s13131_s1 + $0x20] sm:$0xff] }
 0x101   : > { %932 = vrot.lane.b32.xlu2 %v7799_v25, %s7553_s18  ;;  %930 = vrot.lane.b32.xlu1 %v7802_v26, %s7553_s18 }
 0x102   : > { %928 = vrot.lane.b32.xlu0 %v7805_v27, %s7553_s18 }
 0x103   : > { %v8042_v45 = vpop.permute.xlu2 %802  ;;  %v8044_v56 = vpop.permute.xlu1 %782 }
 0x104   : > { %13270 = vst [vmem:[#allocation35_spill] sm:$0xff] %v8042_v45  ;;  %v8046_v48 = vpop.permute.xlu0 %780 }
 0x105   : > { %13271 = vst [vmem:[#allocation36_spill] sm:$0xff] %v8044_v56 }
 0x106   : > { %13272 = vst [vmem:[#allocation37_spill] sm:$0xff] %v8046_v48 }
 0x109   : > { %938 = vrot.lane.b32.xlu2 %v7814_v28, %s7553_s18  ;;  %936 = vrot.lane.b32.xlu1 %v7817_v29, %s7553_s18 }
 0x10a   : > { %934 = vrot.lane.b32.xlu0 %v7820_v30, %s7553_s18 }
 0x10b   : > { %v8054_v57 = vpop.permute.xlu2 %808  ;;  %v8056_v42 = vpop.permute.xlu1 %788 }
 0x10c   : > { %13273 = vst [vmem:[#allocation38_spill] sm:$0xff] %v8054_v57  ;;  %v8058_v52 = vpop.permute.xlu0 %786  ;;  %v8073_v57 = vld [vmem:[%s7688_s11 + $0x128] sm:$0xff] }
 0x10d   : > { %13274 = vst [vmem:[#allocation39_spill] sm:$0xff] %v8056_v42 }
 0x10e   : > { %13275 = vst [vmem:[#allocation40_spill] sm:$0xff] %v8058_v52 }
 0x111   : > { %944 = vrot.lane.b32.xlu2 %v7935_v54, %s7553_s18  ;;  %942 = vrot.lane.b32.xlu1 %v7829_v31, %s7553_s18 }
 0x112   : > { %940 = vrot.lane.b32.xlu0 %v7832_v32, %s7553_s18 }
 0x113   : > { %v8066_v45 = vpop.permute.xlu2 %814  ;;  %v8068_v51 = vpop.permute.xlu1 %794 }
 0x114   : > { %13276 = vst [vmem:[#allocation41_spill] sm:$0xff] %v8066_v45  ;;  %v8070_v53 = vpop.permute.xlu0 %792 }
 0x115   : > { %13277 = vst [vmem:[#allocation42_spill] sm:$0xff] %v8068_v51 }
 0x116   : > { %13278 = vst [vmem:[#allocation43_spill] sm:$0xff] %v8070_v53 }
 0x119   : > { %950 = vrot.lane.b32.xlu2 %v8073_v57, %s7553_s18  ;;  %948 = vrot.lane.b32.xlu1 %v8076_v5, %s7553_s18 }
 0x11a   : > { %946 = vrot.lane.b32.xlu0 %v7950_v58, %s7553_s18 }
 0x11b   : > { %v8084_v42 = vpop.permute.xlu2 %820  ;;  %v8086_v45 = vpop.permute.xlu1 %800 }
 0x11c   : > { %13279 = vst [vmem:[#allocation44_spill] sm:$0xff] %v8084_v42  ;;  %v8088_v51 = vpop.permute.xlu0 %798 }
 0x11d   : > { %13280 = vst [vmem:[#allocation45_spill] sm:$0xff] %v8086_v45 }
 0x11e   : > { %13281 = vst [vmem:[#allocation46_spill] sm:$0xff] %v8088_v51 }
 0x121   : > { %1020 = vrot.lane.b32.xlu2 %v7709_v7, %s7554_s19  ;;  %1018 = vrot.lane.b32.xlu1 %v7712_v8, %s7554_s19 }
 0x122   : > { %1016 = vrot.lane.b32.xlu0 %v7715_v9, %s7554_s19 }
 0x123   : > { %v8096_v53 = vpop.permute.xlu2 %890  ;;  %v8098_v39 = vpop.permute.xlu1 %806 }
 0x124   : > { %13282 = vst [vmem:[#allocation47_spill] sm:$0xff] %v8098_v39  ;;  %v8100_v6 = vpop.permute.xlu0 %804 }
 0x125   : > { %13283 = vst [vmem:[#allocation48_spill] sm:$0xff] %v8100_v6 }
 0x129   : > { %1026 = vrot.lane.b32.xlu2 %v7724_v10, %s7554_s19  ;;  %1024 = vrot.lane.b32.xlu1 %v7727_v11, %s7554_s19 }
 0x12a   : > { %1022 = vrot.lane.b32.xlu0 %v7730_v12, %s7554_s19 }
 0x12b   : > { %v8108_v45 = vpop.permute.xlu2 %896  ;;  %v8110_v8 = vpop.permute.xlu1 %812 }
 0x12c   : > { %13284 = vst [vmem:[#allocation49_spill] sm:$0xff] %v8110_v8  ;;  %v8112_v9 = vpop.permute.xlu0 %810 }
 0x12d   : > { %13285 = vst [vmem:[#allocation50_spill] sm:$0xff] %v8112_v9 }
 0x131   : > { %1032 = vrot.lane.b32.xlu2 %v7739_v13, %s7554_s19  ;;  %1030 = vrot.lane.b32.xlu1 %v7742_v14, %s7554_s19 }
 0x132   : > { %1028 = vrot.lane.b32.xlu0 %v7745_v15, %s7554_s19 }
 0x133   : > { %v8120_v39 = vpop.permute.xlu2 %902  ;;  %v8122_v6 = vpop.permute.xlu1 %818 }
 0x134   : > { %13286 = vst [vmem:[#allocation51_spill] sm:$0xff] %v8120_v39  ;;  %v8124_v51 = vpop.permute.xlu0 %816 }
 0x135   : > { %13287 = vst [vmem:[#allocation52_spill] sm:$0xff] %v8122_v6 }
 0x136   : > { %13288 = vst [vmem:[#allocation53_spill] sm:$0xff] %v8124_v51 }
 0x139   : > { %1038 = vrot.lane.b32.xlu2 %v7754_v16, %s7554_s19  ;;  %1036 = vrot.lane.b32.xlu1 %v7757_v17, %s7554_s19 }
 0x13a   : > { %1034 = vrot.lane.b32.xlu0 %v7760_v18, %s7554_s19 }
 0x13b   : > { %v8132_v8 = vpop.permute.xlu2 %908  ;;  %v8134_v9 = vpop.permute.xlu1 %888 }
 0x13c   : > { %13289 = vst [vmem:[#allocation54_spill] sm:$0xff] %v8132_v8  ;;  %v8136_v42 = vpop.permute.xlu0 %822 }
 0x13d   : > { %13290 = vst [vmem:[#allocation55_spill] sm:$0xff] %v8136_v42 }
 0x141   : > { %1044 = vrot.lane.b32.xlu2 %v7769_v19, %s7554_s19  ;;  %1042 = vrot.lane.b32.xlu1 %v7772_v20, %s7554_s19 }
 0x142   : > { %1040 = vrot.lane.b32.xlu0 %v7775_v21, %s7554_s19 }
 0x143   : > { %v8144_v6 = vpop.permute.xlu2 %914  ;;  %v8146_v51 = vpop.permute.xlu1 %894 }
 0x144   : > { %13291 = vst [vmem:[#allocation56_spill] sm:$0xff] %v8144_v6  ;;  %v8148_v52 = vpop.permute.xlu0 %892 }
 0x149   : > { %1050 = vrot.lane.b32.xlu2 %v7784_v22, %s7554_s19  ;;  %1048 = vrot.lane.b32.xlu1 %v7787_v23, %s7554_s19 }
 0x14a   : > { %1046 = vrot.lane.b32.xlu0 %v7790_v24, %s7554_s19 }
 0x14b   : > { %v8156_v42 = vpop.permute.xlu2 %920  ;;  %v8158_v49 = vpop.permute.xlu1 %900 }
 0x14c   : > { %13292 = vst [vmem:[#allocation57_spill] sm:$0xff] %v8156_v42  ;;  %v8160_v55 = vpop.permute.xlu0 %898 }
 0x151   : > { %1056 = vrot.lane.b32.xlu2 %v7799_v25, %s7554_s19  ;;  %1054 = vrot.lane.b32.xlu1 %v7802_v26, %s7554_s19 }
 0x152   : > { %1052 = vrot.lane.b32.xlu0 %v7805_v27, %s7554_s19 }
 0x153   : > { %v8168_v6 = vpop.permute.xlu2 %926  ;;  %v8170_v50 = vpop.permute.xlu1 %906 }
 0x154   : > { %13293 = vst [vmem:[#allocation58_spill] sm:$0xff] %v8168_v6  ;;  %v8172_v56 = vpop.permute.xlu0 %904 }
 0x155   : > { %13294 = vst [vmem:[#allocation59_spill] sm:$0xff] %v8170_v50 }
 0x156   : > { %13295 = vst [vmem:[#allocation60_spill] sm:$0xff] %v8172_v56  ;;  %v8514_v56 = vld [vmem:[%s7688_s11 + $0xf0] sm:$0xff] }
 0x159   : > { %1062 = vrot.lane.b32.xlu2 %v7814_v28, %s7554_s19  ;;  %1060 = vrot.lane.b32.xlu1 %v7817_v29, %s7554_s19 }
 0x15a   : > { %1058 = vrot.lane.b32.xlu0 %v7820_v30, %s7554_s19 }
 0x15b   : > { %v8180_v42 = vpop.permute.xlu2 %932  ;;  %v8182_v36 = vpop.permute.xlu1 %912 }
 0x15c   : > { %13296 = vst [vmem:[#allocation61_spill] sm:$0xff] %v8180_v42  ;;  %v8184_v6 = vpop.permute.xlu0 %910 }
 0x15d   : > { %13297 = vst [vmem:[#allocation62_spill] sm:$0xff] %v8182_v36 }
 0x15e   : > { %13298 = vst [vmem:[#allocation63_spill] sm:$0xff] %v8184_v6 }
 0x161   : > { %1068 = vrot.lane.b32.xlu2 %v7935_v54, %s7554_s19  ;;  %1066 = vrot.lane.b32.xlu1 %v7829_v31, %s7554_s19 }
 0x162   : > { %1064 = vrot.lane.b32.xlu0 %v7832_v32, %s7554_s19 }
 0x163   : > { %v8192_v8 = vpop.permute.xlu2 %938  ;;  %v8194_v48 = vpop.permute.xlu1 %918 }
 0x164   : > { %13299 = vst [vmem:[#allocation64_spill] sm:$0xff] %v8192_v8  ;;  %v8196_v46 = vpop.permute.xlu0 %916  ;;  %v8211_v8 = vld [vmem:[%s7688_s11 + $0x138] sm:$0xff] }
 0x165   : > { %13300 = vst [vmem:[#allocation65_spill] sm:$0xff] %v8194_v48  ;;  %v8214_v48 = vld [vmem:[%s7688_s11 + $0x130] sm:$0xff] }
 0x166   : > { %13301 = vst [vmem:[#allocation66_spill] sm:$0xff] %v8196_v46 }
 0x169   : > { %1074 = vrot.lane.b32.xlu2 %v8073_v57, %s7554_s19  ;;  %1072 = vrot.lane.b32.xlu1 %v8076_v5, %s7554_s19 }
 0x16a   : > { %1070 = vrot.lane.b32.xlu0 %v7950_v58, %s7554_s19 }
 0x16b   : > { %v8204_v42 = vpop.permute.xlu2 %944  ;;  %v8206_v36 = vpop.permute.xlu1 %924 }
 0x16c   : > { %13302 = vst [vmem:[#allocation67_spill] sm:$0xff] %v8204_v42  ;;  %v8208_v6 = vpop.permute.xlu0 %922 }
 0x16d   : > { %13303 = vst [vmem:[#allocation68_spill] sm:$0xff] %v8206_v36 }
 0x16e   : > { %13304 = vst [vmem:[#allocation69_spill] sm:$0xff] %v8208_v6 }
 0x171   : > { %1144 = vrot.lane.b32.xlu2 %v7709_v7, %s7555_s21  ;;  %1078 = vrot.lane.b32.xlu1 %v8211_v8, %s7554_s19 }
 0x172   : > { %1076 = vrot.lane.b32.xlu0 %v8214_v48, %s7554_s19  ;;  %s13448_s19 = smov 72  }
 0x173   : > { %v8222_v46 = vpop.permute.xlu2 %950  ;;  %v8224_v42 = vpop.permute.xlu1 %930 }
 0x174   : > { %13305 = vst [vmem:[#allocation70_spill] sm:$0xff] %v8222_v46  ;;  %v8226_v36 = vpop.permute.xlu0 %928 }
 0x175   : > { %13306 = vst [vmem:[#allocation71_spill] sm:$0xff] %v8224_v42 }
 0x176   : > { %13307 = vst [vmem:[#allocation72_spill] sm:$0xff] %v8226_v36  ;;  %v6688_v36 = vld [vmem:[%s7688_s11 + $0x78] sm:$0xff] }
 0x179   : > { %1150 = vrot.lane.b32.xlu2 %v7724_v10, %s7555_s21  ;;  %1148 = vrot.lane.b32.xlu1 %v7727_v11, %s7555_s21 }
 0x17a   : > { %1146 = vrot.lane.b32.xlu0 %v7730_v12, %s7555_s21 }
 0x17b   : > { %v8234_v7 = vpop.permute.xlu2 %1020  ;;  %v8236_v6 = vpop.permute.xlu1 %936 }
 0x17c   : > { %13308 = vst [vmem:[#allocation73_spill] sm:$0xff] %v8236_v6  ;;  %v8238_v50 = vpop.permute.xlu0 %934  ;;  %v6685_v6 = vld [vmem:[%s7688_s11 + $0x60] sm:$0xff] }
 0x17d   : > { %13309 = vst [vmem:[#allocation74_spill] sm:$0xff] %v8238_v50 }
 0x181   : > { %1156 = vrot.lane.b32.xlu2 %v7739_v13, %s7555_s21  ;;  %1154 = vrot.lane.b32.xlu1 %v7742_v14, %s7555_s21 }
 0x182   : > { %1152 = vrot.lane.b32.xlu0 %v7745_v15, %s7555_s21 }
 0x183   : > { %v8246_v10 = vpop.permute.xlu2 %1026  ;;  %v8248_v11 = vpop.permute.xlu1 %942 }
 0x184   : > { %13310 = vst [vmem:[#allocation75_spill] sm:$0xff] %v8248_v11  ;;  %v8250_v12 = vpop.permute.xlu0 %940 }
 0x185   : > { %13311 = vst [vmem:[#allocation76_spill] sm:$0xff] %v8250_v12  ;;  %v6686_v12 = vld [vmem:[%s7688_s11 + $0x68] sm:$0xff] }
 0x189   : > { %1162 = vrot.lane.b32.xlu2 %v7754_v16, %s7555_s21  ;;  %1160 = vrot.lane.b32.xlu1 %v7757_v17, %s7555_s21 }
 0x18a   : > { %1158 = vrot.lane.b32.xlu0 %v7760_v18, %s7555_s21 }
 0x18b   : > { %v8258_v13 = vpop.permute.xlu2 %1032  ;;  %v8260_v14 = vpop.permute.xlu1 %948 }
 0x18c   : > { %13312 = vst [vmem:[#allocation77_spill] sm:$0xff] %v8258_v13  ;;  %v8262_v15 = vpop.permute.xlu0 %946 }
 0x18d   : > { %13313 = vst [vmem:[#allocation78_spill] sm:$0xff] %v8260_v14 }
 0x18e   : > { %13314 = vst [vmem:[#allocation79_spill] sm:$0xff] %v8262_v15  ;;  %v8337_v15 = vld [vmem:[%s7688_s11 + $0x140] sm:$0xff] }
 0x191   : > { %1168 = vrot.lane.b32.xlu2 %v7769_v19, %s7555_s21  ;;  %1166 = vrot.lane.b32.xlu1 %v7772_v20, %s7555_s21 }
 0x192   : > { %1164 = vrot.lane.b32.xlu0 %v7775_v21, %s7555_s21 }
 0x193   : > { %v8270_v16 = vpop.permute.xlu2 %1038  ;;  %v8272_v17 = vpop.permute.xlu1 %1018 }
 0x194   : > { %13315 = vst [vmem:[#allocation80_spill] sm:$0xff] %v8270_v16  ;;  %v8274_v18 = vpop.permute.xlu0 %1016  ;;  %v8440_v16 = vld [vmem:[%s7688_s11 + $0xc0] sm:$0xff] }
 0x199   : > { %1174 = vrot.lane.b32.xlu2 %v7784_v22, %s7555_s21  ;;  %1172 = vrot.lane.b32.xlu1 %v7787_v23, %s7555_s21 }
 0x19a   : > { %1170 = vrot.lane.b32.xlu0 %v7790_v24, %s7555_s21 }
 0x19b   : > { %v8282_v19 = vpop.permute.xlu2 %1044  ;;  %v8284_v20 = vpop.permute.xlu1 %1024 }
 0x19c   : > { %13316 = vst [vmem:[#allocation81_spill] sm:$0xff] %v8282_v19  ;;  %v8286_v21 = vpop.permute.xlu0 %1022 }
 0x1a1   : > { %1180 = vrot.lane.b32.xlu2 %v7799_v25, %s7555_s21  ;;  %1178 = vrot.lane.b32.xlu1 %v7802_v26, %s7555_s21 }
 0x1a2   : > { %1176 = vrot.lane.b32.xlu0 %v7805_v27, %s7555_s21 }
 0x1a3   : > { %v8294_v22 = vpop.permute.xlu2 %1050  ;;  %v8296_v23 = vpop.permute.xlu1 %1030 }
 0x1a4   : > { %13317 = vst [vmem:[#allocation82_spill] sm:$0xff] %v8294_v22  ;;  %v8298_v24 = vpop.permute.xlu0 %1028  ;;  %v6690_v22 = vld [vmem:[%s7688_s11 + $0x88] sm:$0xff] }
 0x1a5   : > { %13318 = vst [vmem:[#allocation83_spill] sm:$0xff] %v8296_v23  ;;  %v8568_v23 = vld [vmem:[%s7688_s11 + $0x108] sm:$0xff] }
 0x1a9   : > { %1186 = vrot.lane.b32.xlu2 %v7814_v28, %s7555_s21  ;;  %1184 = vrot.lane.b32.xlu1 %v7817_v29, %s7555_s21 }
 0x1aa   : > { %1182 = vrot.lane.b32.xlu0 %v7820_v30, %s7555_s21 }
 0x1ab   : > { %v8306_v25 = vpop.permute.xlu2 %1056  ;;  %v8308_v26 = vpop.permute.xlu1 %1036 }
 0x1ac   : > { %13319 = vst [vmem:[#allocation84_spill] sm:$0xff] %v8306_v25  ;;  %v8310_v27 = vpop.permute.xlu0 %1034  ;;  %v6689_v25 = vld [vmem:[%s7688_s11 + $0x80] sm:$0xff] }
 0x1ad   : > { %13320 = vst [vmem:[#allocation85_spill] sm:$0xff] %v8308_v26 }
 0x1ae   : > { %13321 = vst [vmem:[#allocation86_spill] sm:$0xff] %v8310_v27  ;;  %v8453_v27 = vld [vmem:[%s7688_s11 + $0xc8] sm:$0xff] }
 0x1b1   : > { %1192 = vrot.lane.b32.xlu2 %v7935_v54, %s7555_s21  ;;  %1190 = vrot.lane.b32.xlu1 %v7829_v31, %s7555_s21 }
 0x1b2   : > { %1188 = vrot.lane.b32.xlu0 %v7832_v32, %s7555_s21 }
 0x1b3   : > { %v8318_v28 = vpop.permute.xlu2 %1062  ;;  %v8320_v29 = vpop.permute.xlu1 %1042 }
 0x1b4   : > { %13322 = vst [vmem:[#allocation87_spill] sm:$0xff] %v8318_v28  ;;  %v8322_v30 = vpop.permute.xlu0 %1040  ;;  %v8354_v28 = vld [vmem:[%s7688_s11 + $0x148] sm:$0xff] }
 0x1b5   : > { %13323 = vst [vmem:[#allocation88_spill] sm:$0xff] %v8320_v29  ;;  %v8423_v29 = vld [vmem:[%s7688_s11 + $0xb8] sm:$0xff] }
 0x1b6   : > { %13324 = vst [vmem:[#allocation89_spill] sm:$0xff] %v8322_v30 }
 0x1b9   : > { %1198 = vrot.lane.b32.xlu2 %v8073_v57, %s7555_s21  ;;  %1196 = vrot.lane.b32.xlu1 %v8076_v5, %s7555_s21 }
 0x1ba   : > { %1194 = vrot.lane.b32.xlu0 %v7950_v58, %s7555_s21 }
 0x1bb   : > { %v8330_v31 = vpop.permute.xlu2 %1068  ;;  %v8332_v32 = vpop.permute.xlu1 %1048 }
 0x1bc   : > { %13325 = vst [vmem:[#allocation90_spill] sm:$0xff] %v8330_v31  ;;  %v8334_v54 = vpop.permute.xlu0 %1046 }
 0x1bd   : > { %13326 = vst [vmem:[#allocation91_spill] sm:$0xff] %v8332_v32 }
 0x1be   : > { %13327 = vst [vmem:[#allocation92_spill] sm:$0xff] %v8334_v54 }
 0x1c1   : > { %1204 = vrot.lane.b32.xlu2 %v8337_v15, %s7555_s21  ;;  %1202 = vrot.lane.b32.xlu1 %v8211_v8, %s7555_s21 }
 0x1c2   : > { %1200 = vrot.lane.b32.xlu0 %v8214_v48, %s7555_s21 }
 0x1c3   : > { %v8345_v58 = vpop.permute.xlu2 %1074  ;;  %v8347_v11 = vpop.permute.xlu1 %1054 }
 0x1c4   : > { %13328 = vst [vmem:[#allocation93_spill] sm:$0xff] %v8345_v58  ;;  %v8349_v31 = vpop.permute.xlu0 %1052 }
 0x1c5   : > { %13329 = vst [vmem:[#allocation94_spill] sm:$0xff] %v8347_v11  ;;  %v6687_v11 = vld [vmem:[%s7688_s11 + $0x70] sm:$0xff] }
 0x1c6   : > { %13330 = vst [vmem:[#allocation95_spill] sm:$0xff] %v8349_v31 }
 0x1c9   : > { %1274 = vrot.lane.b32.xlu2 %v6686_v12, %s7556_s22  ;;  %1272 = vrot.lane.b32.xlu1 %v6685_v6, %s7556_s22 }
 0x1ca   : > { %1206 = vrot.lane.b32.xlu0 %v8354_v28, %s7555_s21  ;;  %s7559_s21 = smov 64  }
 0x1cb   : > { %v8360_v50 = vpop.permute.xlu2 %1144  ;;  %v8362_v58 = vpop.permute.xlu1 %1060 }
 0x1cc   : > { %13331 = vst [vmem:[#allocation96_spill] sm:$0xff] %v8362_v58  ;;  %v8364_v42 = vpop.permute.xlu0 %1058 }
 0x1cd   : > { %13332 = vst [vmem:[#allocation97_spill] sm:$0xff] %v8364_v42 }
 0x1d1   : > { %1280 = vrot.lane.b32.xlu2 %v6689_v25, %s7556_s22  ;;  %1278 = vrot.lane.b32.xlu1 %v6688_v36, %s7556_s22 }
 0x1d2   : > { %1276 = vrot.lane.b32.xlu0 %v6687_v11, %s7556_s22 }
 0x1d3   : > { %v8372_v6 = vpop.permute.xlu2 %1150  ;;  %v8374_v12 = vpop.permute.xlu1 %1066 }
 0x1d4   : > { %13333 = vst [vmem:[#allocation98_spill] sm:$0xff] %v8374_v12  ;;  %v8376_v31 = vpop.permute.xlu0 %1064  ;;  %v6691_v12 = vld [vmem:[%s7688_s11 + $0x90] sm:$0xff] }
 0x1d5   : > { %13334 = vst [vmem:[#allocation99_spill] sm:$0xff] %v8376_v31 }
 0x1d9   : > { %1282 = vrot.lane.b32.xlu2 %v6690_v22, %s7556_s22  ;;  %1528 = vrot.lane.b32.xlu1 %v6689_v25, %s13143_s23 }
 0x1da   : > { %1400 = vrot.lane.b32.xlu0 %v6687_v11, %s7558_s24  ;;  %v6693_v11 = vld [vmem:[%s7688_s11 + $0xa0] sm:$0xff] }
 0x1db   : > { %v8382_v58 = vpop.permute.xlu2 %1156  ;;  %v8384_v42 = vpop.permute.xlu1 %1072 }
 0x1dc   : > { %13335 = vst [vmem:[#allocation100_spill] sm:$0xff] %v8384_v42  ;;  %v8386_v32 = vpop.permute.xlu0 %1070  ;;  %v6692_v42 = vld [vmem:[%s7688_s11 + $0x98] sm:$0xff] }
 0x1dd   : > { %13336 = vst [vmem:[#allocation101_spill] sm:$0xff] %v8386_v32 }
 0x1e1   : > { %1284 = vrot.lane.b32.xlu2 %v6691_v12, %s7556_s22  ;;  %1530 = vrot.lane.b32.xlu1 %v6690_v22, %s13143_s23 }
 0x1e2   : > { %1402 = vrot.lane.b32.xlu0 %v6688_v36, %s7558_s24 }
 0x1e3   : > { %v8392_v31 = vpop.permute.xlu2 %1162  ;;  %v8394_v54 = vpop.permute.xlu1 %1078 }
 0x1e4   : > { %13337 = vst [vmem:[#allocation102_spill] sm:$0xff] %v8392_v31  ;;  %v8396_v46 = vpop.permute.xlu0 %1076 }
 0x1e5   : > { %13338 = vst [vmem:[#allocation103_spill] sm:$0xff] %v8394_v54  ;;  %v8410_v54 = vld [vmem:[%s7688_s11 + $0xa8] sm:$0xff] }
 0x1e6   : > { %13339 = vst [vmem:[#allocation104_spill] sm:$0xff] %v8396_v46 }
 0x1e9   : > { %1404 = vrot.lane.b32.xlu2 %v6689_v25, %s7558_s24  ;;  %1288 = vrot.lane.b32.xlu1 %v6693_v11, %s7556_s22 }
 0x1ea   : > { %1286 = vrot.lane.b32.xlu0 %v6692_v42, %s7556_s22 }
 0x1eb   : > { %v8403_v32 = vpop.permute.xlu2 %1168  ;;  %v8405_v19 = vpop.permute.xlu1 %1148 }
 0x1ec   : > { %13340 = vst [vmem:[#allocation105_spill] sm:$0xff] %v8403_v32  ;;  %v8407_v36 = vpop.permute.xlu0 %1146  ;;  %v8426_v32 = vld [vmem:[%s7688_s11 + $0xb0] sm:$0xff] }
 0x1f1   : > { %1406 = vrot.lane.b32.xlu2 %v6690_v22, %s7558_s24  ;;  %1290 = vrot.lane.b32.xlu1 %v8410_v54, %s7556_s22 }
 0x1f2   : > { %1532 = vrot.lane.b32.xlu0 %v6691_v12, %s13143_s23 }
 0x1f3   : > { %v8416_v25 = vpop.permute.xlu2 %1174  ;;  %v8418_v46 = vpop.permute.xlu1 %1154 }
 0x1f4   : > { %13341 = vst [vmem:[#allocation106_spill] sm:$0xff] %v8416_v25  ;;  %v8420_v14 = vpop.permute.xlu0 %1152 }
 0x1f9   : > { %1294 = vrot.lane.b32.xlu2 %v8423_v29, %s7556_s22  ;;  %1292 = vrot.lane.b32.xlu1 %v8426_v32, %s7556_s22 }
 0x1fa   : > { %1534 = vrot.lane.b32.xlu0 %v6692_v42, %s13143_s23 }
 0x1fb   : > { %v8433_v22 = vpop.permute.xlu2 %1180  ;;  %v8435_v25 = vpop.permute.xlu1 %1160 }
 0x1fc   : > { %13342 = vst [vmem:[#allocation107_spill] sm:$0xff] %v8433_v22  ;;  %v8437_v30 = vpop.permute.xlu0 %1158 }
 0x1fd   : > { %13343 = vst [vmem:[#allocation108_spill] sm:$0xff] %v8435_v25  ;;  %v8491_v25 = vld [vmem:[%s7688_s11 + $0xe8] sm:$0xff] }
 0x1fe   : > { %13344 = vst [vmem:[#allocation109_spill] sm:$0xff] %v8437_v30  ;;  %v8544_v30 = vld [vmem:[%s7688_s11 + $0xf8] sm:$0xff] }
 0x201   : > { %1536 = vrot.lane.b32.xlu2 %v6693_v11, %s13143_s23  ;;  %1408 = vrot.lane.b32.xlu1 %v6691_v12, %s7558_s24 }
 0x202   : > { %1296 = vrot.lane.b32.xlu0 %v8440_v16, %s7556_s22 }
 0x203   : > { %v8446_v26 = vpop.permute.xlu2 %1186  ;;  %v8448_v31 = vpop.permute.xlu1 %1166 }
 0x204   : > { %13345 = vst [vmem:[#allocation110_spill] sm:$0xff] %v8446_v26  ;;  %v8450_v22 = vpop.permute.xlu0 %1164 }
 0x205   : > { %13346 = vst [vmem:[#allocation111_spill] sm:$0xff] %v8448_v31  ;;  %v8467_v31 = vld [vmem:[%s7688_s11 + $0xe0] sm:$0xff] }
 0x206   : > { %13347 = vst [vmem:[#allocation112_spill] sm:$0xff] %v8450_v22  ;;  %v8470_v22 = vld [vmem:[%s7688_s11 + $0xd8] sm:$0xff] }
 0x209   : > { %1538 = vrot.lane.b32.xlu2 %v8410_v54, %s13143_s23  ;;  %1410 = vrot.lane.b32.xlu1 %v6692_v42, %s7558_s24 }
 0x20a   : > { %1298 = vrot.lane.b32.xlu0 %v8453_v27, %s7556_s22 }
 0x20b   : > { %v8460_v12 = vpop.permute.xlu2 %1192  ;;  %v8462_v4 = vpop.permute.xlu1 %1172 }
 0x20c   : > { %13348 = vst [vmem:[#allocation113_spill] sm:$0xff] %v8460_v12  ;;  %v8464_v26 = vpop.permute.xlu0 %1170 }
 0x20d   : > { %13349 = vst [vmem:[#allocation114_spill] sm:$0xff] %v8462_v4 }
 0x20e   : > { %13350 = vst [vmem:[#allocation115_spill] sm:$0xff] %v8464_v26  ;;  %v1898_v26 = vld [vmem:[%s13131_s1 + $0x50] sm:$0x1] }
 0x20f   : > { %6783 = vmatpush.msk.msra.mxu0 %vm2000_vm0, %v1898_v26  ;;  %6957 = vmatpush.msk.msra.mxu3 %vm2000_vm0, %v1898_v26 }
 0x210   : > { %6956 = vmatpush.msk.msra.mxu2 %vm2000_vm0, %v1898_v26  ;;  %v1896_v26 = vld [vmem:[%s13131_s1 + $0x40] sm:$0xff] }
 0x211   : > { %1304 = vrot.lane.b32.xlu2 %v8467_v31, %s7556_s22  ;;  %1302 = vrot.lane.b32.xlu1 %v8470_v22, %s7556_s22 }
 0x212   : > { %1300 = vrot.lane.b32.xlu0 %v8473_v47, %s7556_s22 }
 0x213   : > { %v8481_v42 = vpop.permute.xlu2 %1198  ;;  %v8483_v12 = vpop.permute.xlu1 %1178 }
 0x214   : > { %13351 = vst [vmem:[#allocation116_spill] sm:$0xff] %v8481_v42  ;;  %v8485_v4 = vpop.permute.xlu0 %1176  ;;  %v1897_v42 = vld [vmem:[%s13131_s1 + $0x48] sm:$0xff] }
 0x215   : > { %13352 = vst [vmem:[#allocation117_spill] sm:$0xff] %v8483_v12  ;;  %2010 = vmatpush.msra.mxu0 %v1897_v42  ;;  %6959 = vmatpush.msra.mxu3 %v1897_v42 }
 0x216   : > { %13353 = vst [vmem:[#allocation118_spill] sm:$0xff] %v8485_v4  ;;  %6958 = vmatpush.msra.mxu2 %v1897_v42  ;;  %v1893_v42 = vld [vmem:[%s13131_s1 + $0x28] sm:$0xff] }
 0x217   : > { %2011 = vmatpush.msra.mxu0 %v1896_v26  ;;  %6961 = vmatpush.msra.mxu3 %v1896_v26 }
 0x218   : > { %6960 = vmatpush.msra.mxu2 %v1896_v26 }
 0x219   : > { %1306 = vrot.lane.b32.xlu2 %v8491_v25, %s7556_s22  ;;  %1540 = vrot.lane.b32.xlu1 %v8426_v32, %s13143_s23 }
 0x21a   : > { %1412 = vrot.lane.b32.xlu0 %v6693_v11, %s7558_s24  ;;  %v1895_v11 = vld [vmem:[%s13131_s1 + $0x38] sm:$0xff] }
 0x21b   : > { %v8501_v12 = vpop.permute.xlu2 %1204  ;;  %v8503_v4 = vpop.permute.xlu1 %1184  ;;  %2012 = vmatpush.msra.mxu0 %v1895_v11  ;;  %6963 = vmatpush.msra.mxu3 %v1895_v11 }
 0x21c   : > { %13354 = vst [vmem:[#allocation119_spill] sm:$0xff] %v8501_v12  ;;  %v8505_v13 = vpop.permute.xlu0 %1182  ;;  %6962 = vmatpush.msra.mxu2 %v1895_v11  ;;  %v1890_v11 = vld [vmem:[%s13131_s1 + $0x10] sm:$0xff] }
 0x21d   : > { %13355 = vst [vmem:[#allocation120_spill] sm:$0xff] %v8503_v4  ;;  %v1894_v4 = vld [vmem:[%s13131_s1 + $0x30] sm:$0xff] }
 0x21e   : > { %13356 = vst [vmem:[#allocation121_spill] sm:$0xff] %v8505_v13  ;;  %2013 = vmatpush.msra.mxu0 %v1894_v4  ;;  %6965 = vmatpush.msra.mxu3 %v1894_v4 }
 0x21f   : > { %6964 = vmatpush.msra.mxu2 %v1894_v4  ;;  %v1889_v4 = vld [vmem:[%s13131_s1 + $0x8] sm:$0xff] }
 0x220   : > { %2014 = vmatpush.msra.mxu0 %v1893_v42  ;;  %6967 = vmatpush.msra.mxu3 %v1893_v42 }
 0x221   : > { %1308 = vrot.lane.b32.xlu2 %v8514_v56, %s7556_s22  ;;  %1542 = vrot.lane.b32.xlu1 %v8423_v29, %s13143_s23 }
 0x222   : > { %1414 = vrot.lane.b32.xlu0 %v8410_v54, %s7558_s24  ;;  %v1891_v54 = vld [vmem:[%s13131_s1 + $0x18] sm:$0xff]  ;;  %2015 = vmatpush.msra.mxu0 %v1892_v60 }
 0x223   : > { %v8528_v13 = vpop.permute.xlu2 %1274  ;;  %v8530_v26 = vpop.permute.xlu1 %1190  ;;  %6969 = vmatpush.msra.mxu3 %v1892_v60  ;;  %6966 = vmatpush.msra.mxu2 %v1893_v42 }
 0x224   : > { %13357 = vst [vmem:[#allocation122_spill] sm:$0xff] %v8530_v26  ;;  %v8532_v12 = vpop.permute.xlu0 %1188  ;;  %2016 = vmatpush.msra.mxu0 %v1891_v54 }
 0x225   : > { %13358 = vst [vmem:[#allocation123_spill] sm:$0xff] %v8532_v12  ;;  %6971 = vmatpush.msra.mxu3 %v1891_v54  ;;  %6968 = vmatpush.msra.mxu2 %v1892_v60 }
 0x226   : > { %2017 = vmatpush.msra.mxu0 %v1890_v11 }
 0x227   : > { %6973 = vmatpush.msra.mxu3 %v1890_v11  ;;  %6970 = vmatpush.msra.mxu2 %v1891_v54 }
 0x228   : > { %2018 = vmatpush.msra.mxu0 %v1889_v4 }
 0x229   : > { %1416 = vrot.lane.b32.xlu2 %v8426_v32, %s7558_s24  ;;  %1312 = vrot.lane.b32.xlu1 %v8541_v35, %s7556_s22  ;;  %v1888_v32 = vld [vmem:[%s13131_s1] sm:$0xff] }
 0x22a   : > { %1310 = vrot.lane.b32.xlu0 %v8544_v30, %s7556_s22  ;;  %2019 = vmatpush.msra.mxu0 %v1888_v32 }
 0x22b   : > { %v8558_v26 = vpop.permute.xlu2 %1280  ;;  %v8560_v12 = vpop.permute.xlu1 %1196  ;;  %6975 = vmatpush.msra.mxu3 %v1889_v4  ;;  %6972 = vmatpush.msra.mxu2 %v1890_v11  ;;  %v8583_v11 = vld [vmem:[%s7688_s11 + $0x118] sm:$0xff] }
 0x22c   : > { %13359 = vst [vmem:[#allocation124_spill] sm:$0xff] %v8560_v12  ;;  %v8562_v42 = vpop.permute.xlu0 %1194 }
 0x22d   : > { %13360 = vst [vmem:[#allocation125_spill] sm:$0xff] %v8562_v42  ;;  %6977 = vmatpush.msra.mxu3 %v1888_v32  ;;  %6974 = vmatpush.msra.mxu2 %v1889_v4  ;;  %v8586_v42 = vld [vmem:[%s7688_s11 + $0x110] sm:$0xff] }
 0x22e   : > { %13363 = vst [vmem:[#allocation128_spill] sm:$0xff] %v8583_v11 }
 0x22f   : > { %6976 = vmatpush.msra.mxu2 %v1888_v32  ;;  %13364 = vst [vmem:[#allocation129_spill] sm:$0xff] %v8586_v42 }
 0x231   : > { %1418 = vrot.lane.b32.xlu2 %v8423_v29, %s7558_s24  ;;  %1314 = vrot.lane.b32.xlu1 %v8568_v23, %s7556_s22 }
 0x232   : > { %1544 = vrot.lane.b32.xlu0 %v8440_v16, %s13143_s23 }
 0x233   : > { %v8576_v60 = vpop.permute.xlu2 %1282  ;;  %v8578_v12 = vpop.permute.xlu1 %1202 }
 0x234   : > { %13361 = vst [vmem:[#allocation126_spill] sm:$0xff] %v8578_v12  ;;  %v8580_v54 = vpop.permute.xlu0 %1200 }
 0x235   : > { %13362 = vst [vmem:[#allocation127_spill] sm:$0xff] %v8580_v54 }
 0x239   : > { %1318 = vrot.lane.b32.xlu2 %v8583_v11, %s7556_s22  ;;  %1316 = vrot.lane.b32.xlu1 %v8586_v42, %s7556_s22  ;;  %v296_v11 = vld [vmem:[%s7688_s11] sm:$0xff] }
 0x23a   : > { %1546 = vrot.lane.b32.xlu0 %v8453_v27, %s13143_s23 }
 0x23b   : > { %v8594_v29 = vpop.permute.xlu2 %1284  ;;  %v1273_v4 = vpop.permute.xlu1 %1272 }
 0x23c   : > { %v8596_v12 = vpop.permute.xlu0 %1206 }
 0x23d   : > { %13365 = vst [vmem:[#allocation130_spill] sm:$0xff] %v8596_v12  ;;  %v1625_v12 = vsel %vm1624_vm1, %v296_v11, %v7872_v38 }
 0x23e   : > { %v1658_v39 = vsel %vm1657_vm2, %v1625_v12, %v7958_v59 }
 0x241   : > { %1548 = vrot.lane.b32.xlu2 %v8473_v47, %s13143_s23  ;;  %1420 = vrot.lane.b32.xlu1 %v8440_v16, %s7558_s24 }
 0x242   : > { %1320 = vrot.lane.b32.xlu0 %v8076_v5, %s7556_s22  ;;  %v1691_v5 = vsel %vm1690_vm3, %v1658_v39, %v8134_v9  ;;  %v297_v9 = vld [vmem:[%s7688_s11 + $0x8] sm:$0xff] }
 0x243   : > { %v8604_v32 = vpop.permute.xlu2 %1404  ;;  %v8606_v54 = vpop.permute.xlu1 %1278  ;;  %v1724_v16 = vsel %vm1723_vm5, %v1691_v5, %v8274_v18 }
 0x244   : > { %v1277_v42 = vpop.permute.xlu0 %1276  ;;  %v1757_v38 = vsel %vm1756_vm4, %v1724_v16, %v8360_v50 }
 0x245   : > { %v1790_v12 = vsel %vm1789_vm6, %v1757_v38, %v1273_v4 }
 0x249   : > { %1550 = vrot.lane.b32.xlu2 %v8470_v22, %s13143_s23  ;;  %1422 = vrot.lane.b32.xlu1 %v8453_v27, %s7558_s24 }
 0x24a   : > { %1322 = vrot.lane.b32.xlu0 %v8073_v57, %s7556_s22  ;;  %v1626_v57 = vsel %vm1624_vm1, %v297_v9, %v7884_v41 }
 0x24b   : > { %v8625_v59 = vpop.permute.xlu2 %1406  ;;  %v1529_v39 = vpop.permute.xlu1 %1528  ;;  %v1659_v50 = vsel %vm1657_vm2, %v1626_v57, %v8010_v3  ;;  %v6716_v57 = vld [vmem:[%s7688_s11 + $0x158] sm:$0xff] }
 0x24c   : > { %v1401_v11 = vpop.permute.xlu0 %1400  ;;  %v1692_v5 = vsel %vm1690_vm3, %v1659_v50, %v8096_v53  ;;  %v6781_v50 = vld [vmem:[%s7688_s11 + $0x170] sm:$0xff] }
 0x24d   : > { %v1823_v27 = vsel %vm1822_vm8, %v1790_v12, %v1401_v11  ;;  %v1725_v4 = vsel %vm1723_vm5, %v1692_v5, %v8272_v17  ;;  %v6715_v12 = vld [vmem:[%s7688_s11 + $0x150] sm:$0xff]  ;;  %v6748_v5 = vld [vmem:[%s7688_s11 + $0x160] sm:$0xff] }
 0x24e   : > { %v1856_v18 = vsel %vm1855_vm7, %v1823_v27, %v1529_v39  ;;  %v1758_v41 = vsel %vm1756_vm4, %v1725_v4, %v8407_v36 }
 0x24f   : > { %6784 = vmatmul.msk.f32.vlgmr.msra.gmra.mxu0 %vm1903_vm9, %v1856_v18  ;;  %v1791_v53 = vsel %vm1789_vm6, %v1758_v41, %v8528_v13  ;;  %v7422_v13 = vld [vmem:[%s7688_s11 + $0x10] sm:$0xff]  ;;  %v7423_v18 = vld [vmem:[%s7688_s11 + $0x18] sm:$0xff] }
 0x250   : > { %v1627_v36 = vsel %vm1624_vm1, %v7422_v13, %v7870_v37 }
 0x251   : > { %1328 = vrot.lane.b32.xlu2 %v8337_v15, %s7556_s22  ;;  %1326 = vrot.lane.b32.xlu1 %v8211_v8, %s7556_s22  ;;  %v1660_v9 = vsel %vm1657_vm2, %v1627_v36, %v8008_v2 }
 0x252   : > { %1324 = vrot.lane.b32.xlu0 %v8214_v48, %s7556_s22 }
 0x253   : > { %v8648_v3 = vpop.permute.xlu2 %1294  ;;  %v1531_v16 = vpop.permute.xlu1 %1530 }
 0x254   : > { %v1403_v15 = vpop.permute.xlu0 %1402 }
 0x255   : > { %v1824_v8 = vsel %vm1822_vm8, %v1791_v53, %v1403_v15  ;;  %v7424_v15 = vld [vmem:[%s7688_s11 + $0x20] sm:$0xff] }
 0x256   : > { %v1857_v38 = vsel %vm1855_vm7, %v1824_v8, %v1531_v16  ;;  %v1629_v8 = vsel %vm1624_vm1, %v7424_v15, %v7844_v33 }
 0x257   : > { %6785 = vmatmul.msk.f32.gmra.mxu0 %vm1903_vm9, %v1857_v38 }
 0x259   : > { %1330 = vrot.lane.b32.xlu2 %v8354_v28, %s7556_s22  ;;  %1552 = vrot.lane.b32.xlu1 %v8467_v31, %s13143_s23  ;;  %v1693_v28 = vsel %vm1690_vm3, %v1660_v9, %v8148_v52 }
 0x25a   : > { %1424 = vrot.lane.b32.xlu0 %v8473_v47, %s7558_s24  ;;  %v1726_v47 = vsel %vm1723_vm5, %v1693_v28, %v8234_v7  ;;  %v7425_v28 = vld [vmem:[%s7688_s11 + $0x28] sm:$0xff] }
 0x25b   : > { %v1537_v48 = vpop.permute.xlu2 %1536  ;;  %v8661_v17 = vpop.permute.xlu1 %1288  ;;  %v1759_v11 = vsel %vm1756_vm4, %v1726_v47, %v8405_v19 }
 0x25c   : > { %v8666_v39 = vpop.permute.xlu0 %1286  ;;  %v1792_v37 = vsel %vm1789_vm6, %v1759_v11, %v1277_v42  ;;  %v1628_v42 = vsel %vm1624_vm1, %v7423_v18, %v7882_v40 }
 0x25d   : > { %v1825_v7 = vsel %vm1822_vm8, %v1792_v37, %v8604_v32 }
 0x261   : > { %1332 = vrot.lane.b32.xlu2 %v6715_v12, %s7556_s22  ;;  %1554 = vrot.lane.b32.xlu1 %v8491_v25, %s13143_s23  ;;  %v1630_v12 = vsel %vm1624_vm1, %v7425_v28, %v7852_v34 }
 0x262   : > { %1426 = vrot.lane.b32.xlu0 %v8470_v22, %s7558_s24  ;;  %v1661_v22 = vsel %vm1657_vm2, %v1628_v42, %v7970_v62 }
 0x263   : > { %v1539_v52 = vpop.permute.xlu2 %1538  ;;  %v8683_v2 = vpop.permute.xlu1 %1290  ;;  %v1694_v4 = vsel %vm1690_vm3, %v1661_v22, %v8146_v51 }
 0x264   : > { %v1533_v27 = vpop.permute.xlu0 %1532  ;;  %v1727_v32 = vsel %vm1723_vm5, %v1694_v4, %v8286_v21 }
 0x265   : > { %v1858_v19 = vsel %vm1855_vm7, %v1825_v7, %v1533_v27  ;;  %v1760_v40 = vsel %vm1756_vm4, %v1727_v32, %v8372_v6  ;;  %v6749_v6 = vld [vmem:[%s7688_s11 + $0x168] sm:$0xff]  ;;  %v7426_v27 = vld [vmem:[%s7688_s11 + $0x30] sm:$0xff] }
 0x266   : > { %6786 = vmatmul.msk.f32.gmra.mxu0 %vm1903_vm9, %v1858_v19  ;;  %v1793_v62 = vsel %vm1789_vm6, %v1760_v40, %v8606_v54  ;;  %v1662_v54 = vsel %vm1657_vm2, %v1629_v8, %v8022_v0  ;;  %v1631_v7 = vsel %vm1624_vm1, %v7426_v27, %v7896_v44  ;;  %v13368_v32 = vld [vmem:[#allocation109_spill] sm:$0xff] }
 0x267   : > { %v1826_v51 = vsel %vm1822_vm8, %v1793_v62, %v8625_v59  ;;  %v1695_v38 = vsel %vm1690_vm3, %v1662_v54, %v8108_v45  ;;  %v13369_v54 = vld [vmem:[#allocation6_spill] sm:$0xff] }
 0x268   : > { %v1728_v59 = vsel %vm1723_vm5, %v1695_v38, %v8284_v20 }
 0x269   : > { %1334 = vrot.lane.b32.xlu2 %v6716_v57, %s7556_s22  ;;  %1588 = vrot.lane.b32.xlu1 %v6781_v50, %s13143_s23  ;;  %v1761_v33 = vsel %vm1756_vm4, %v1728_v59, %v8420_v14  ;;  %v6782_v14 = vld [vmem:[%s7688_s11 + $0x178] sm:$0xff]  ;;  %s13142_s22 = sshll.u32 %s7533_s29, 3 }
 0x26a   : > { %1460 = vrot.lane.b32.xlu0 %v6748_v5, %s7558_s24  ;;  %v1794_v0 = vsel %vm1789_vm6, %v1761_v33, %v8558_v26  ;;  %v7427_v50 = vld [vmem:[%s7688_s11 + $0x38] sm:$0xff]  ;;  %v13371_v33 = vld [vmem:[#allocation60_spill] sm:$0xff]  ;;  %s6816_s17 = sadd.s32 4294967292, %s13142_s22  ;;  %s285_s22 = sand.u32 1, %s7525_s27  }
 0x26b   : > { %v8708_v41 = vpop.permute.xlu2 %1304  ;;  %v8710_v16 = vpop.permute.xlu1 %1292  ;;  %v1632_v22 = vsel %vm1624_vm1, %v7427_v50, %v7894_v43  ;;  %v13370_v59 = vld [vmem:[#allocation34_spill] sm:$0xff] }
 0x26c   : > { %v1535_v21 = vpop.permute.xlu0 %1534  ;;  %v7430_v50 = vld [vmem:[%s7688_s11 + $0x50] sm:$0xff] }
 0x26d   : > { %v1859_v53 = vsel %vm1855_vm7, %v1826_v51, %v1535_v21 }
 0x26e   : > { %6787 = vmatmul.msk.f32.gmra.mxu0 %vm1903_vm9, %v1859_v53 }
 0x271   : > { %1462 = vrot.lane.b32.xlu1 %v6749_v6, %s7558_s24  ;;  %1556 = vrot.lane.b32.xlu2 %v8514_v56, %s13143_s23  ;;  %v7428_v6 = vld [vmem:[%s7688_s11 + $0x40] sm:$0xff] }
 0x272   : > { %1428 = vrot.lane.b32.xlu0 %v8467_v31, %s7558_s24  ;;  %v1663_v31 = vsel %vm1657_vm2, %v1630_v12, %v8020_v63  ;;  %v1633_v38 = vsel %vm1624_vm1, %v7428_v6, %v13369_v54  ;;  %v7431_v6 = vld [vmem:[%s7688_s11 + $0x58] sm:$0xff] }
 0x273   : > { %v8735_v13 = vpop.permute.xlu2 %1306  ;;  %v1409_v45 = vpop.permute.xlu1 %1408  ;;  %v1696_v26 = vsel %vm1690_vm3, %v1663_v31, %v8160_v55  ;;  %v13384_v54 = vld [vmem:[#allocation7_spill] sm:$0xff] }
 0x274   : > { %v1827_v36 = vsel %vm1822_vm8, %v1794_v0, %v1409_v45  ;;  %v8738_v20 = vpop.permute.xlu0 %1296  ;;  %v1729_v47 = vsel %vm1723_vm5, %v1696_v26, %v8246_v10  ;;  %v13372_v45 = vld [vmem:[#allocation77_spill] sm:$0xff] }
 0x275   : > { %v1860_v9 = vsel %vm1855_vm7, %v1827_v36, %v1537_v48  ;;  %v1762_v34 = vsel %vm1756_vm4, %v1729_v47, %v8418_v46 }
 0x276   : > { %6788 = vmatmul.msk.f32.gmra.mxu0 %vm1903_vm9, %v1860_v9  ;;  %v1795_v63 = vsel %vm1789_vm6, %v1762_v34, %v8576_v60  ;;  %v13373_v9 = vld [vmem:[#allocation108_spill] sm:$0xff] }
 0x279   : > { %1590 = vrot.lane.b32.xlu1 %v6782_v14, %s13143_s23  ;;  %1558 = vrot.lane.b32.xlu2 %v8544_v30, %s13143_s23 }
 0x27a   : > { %1430 = vrot.lane.b32.xlu0 %v8491_v25, %s7558_s24 }
 0x27b   : > { %v8761_v48 = vpop.permute.xlu2 %1308  ;;  %v1411_v55 = vpop.permute.xlu1 %1410 }
 0x27c   : > { %v1828_v10 = vsel %vm1822_vm8, %v1795_v63, %v1411_v55  ;;  %v8764_v11 = vpop.permute.xlu0 %1298  ;;  %v7429_v63 = vld [vmem:[%s7688_s11 + $0x48] sm:$0xff] }
 0x27d   : > { %v1861_v37 = vsel %vm1855_vm7, %v1828_v10, %v1539_v52  ;;  %v1664_v52 = vsel %vm1657_vm2, %v1631_v7, %v7982_v1  ;;  %v13374_v55 = vld [vmem:[#allocation12_spill] sm:$0xff]  ;;  %v13376_v7 = vld [vmem:[#allocation59_spill] sm:$0xff] }
 0x27e   : > { %6789 = vmatmul.msk.f32.gmra.mxu0 %vm1903_vm9, %v1861_v37  ;;  %v1697_v19 = vsel %vm1690_vm3, %v1664_v52, %v8158_v49  ;;  %v1634_v10 = vsel %vm1624_vm1, %v7429_v63, %v13374_v55  ;;  %v13375_v37 = vld [vmem:[#allocation28_spill] sm:$0xff]  ;;  %v13377_v52 = vld [vmem:[#allocation86_spill] sm:$0xff] }
 0x27f   : > { %v1667_v27 = vsel %vm1657_vm2, %v1634_v10, %v13375_v37  ;;  %v7432_v37 = vld [vmem:[%s7688_s11 + $0x60] sm:$0xff] }
 0x281   : > { %1560 = vrot.lane.b32.xlu2 %v8541_v35, %s13143_s23 }
 0x282   : > { %1432 = vrot.lane.b32.xlu0 %v8514_v56, %s7558_s24  ;;  %v1730_v56 = vsel %vm1723_vm5, %v1697_v19, %v8298_v24 }
 0x283   : > { %v8772_v46 = vpop.permute.xlu1 %1302  ;;  %v1417_v60 = vpop.permute.xlu2 %1416  ;;  %v1763_v18 = vsel %vm1756_vm4, %v1730_v56, %v8382_v58  ;;  %v13366_v58 = vld [vmem:[#allocation51_spill] sm:$0xff] }
 0x284   : > { %v8774_v25 = vpop.permute.xlu0 %1300  ;;  %v1796_v44 = vsel %vm1789_vm6, %v1763_v18, %v8594_v29  ;;  %v13367_v29 = vld [vmem:[#allocation83_spill] sm:$0xff] }
 0x289   : > { %1562 = vrot.lane.b32.xlu2 %v8568_v23, %s13143_s23 }
 0x28a   : > { %1434 = vrot.lane.b32.xlu0 %v8544_v30, %s7558_s24  ;;  %v1665_v30 = vsel %vm1657_vm2, %v1632_v22, %v8034_v61  ;;  %v13379_v22 = vld [vmem:[#allocation11_spill] sm:$0xff] }
 0x28b   : > { %v1541_v42 = vpop.permute.xlu1 %1540  ;;  %v1419_v24 = vpop.permute.xlu2 %1418  ;;  %v1698_v5 = vsel %vm1690_vm3, %v1665_v30, %v13366_v58  ;;  %v1635_v30 = vsel %vm1624_vm1, %v7430_v50, %v13379_v22  ;;  %v13380_v58 = vld [vmem:[#allocation37_spill] sm:$0xff] }
 0x28c   : > { %v1413_v1 = vpop.permute.xlu0 %1412  ;;  %v1731_v4 = vsel %vm1723_vm5, %v1698_v5, %v13367_v29  ;;  %v1668_v5 = vsel %vm1657_vm2, %v1635_v30, %v13380_v58  ;;  %v13381_v29 = vld [vmem:[#allocation54_spill] sm:$0xff]  ;;  %v13393_v50 = vld [vmem:[#allocation105_spill] sm:$0xff] }
 0x28d   : > { %v1829_v57 = vsel %vm1822_vm8, %v1796_v44, %v1413_v1  ;;  %v1764_v40 = vsel %vm1756_vm4, %v1731_v4, %v13368_v32  ;;  %v13382_v4 = vld [vmem:[#allocation85_spill] sm:$0xff]  ;;  %v13383_v32 = vld [vmem:[#allocation112_spill] sm:$0xff] }
 0x28e   : > { %v1862_v49 = vsel %vm1855_vm7, %v1829_v57, %v1541_v42  ;;  %v1797_v43 = vsel %vm1789_vm6, %v1764_v40, %v8666_v39  ;;  %v1666_v39 = vsel %vm1657_vm2, %v1633_v38, %v13370_v59  ;;  %v1636_v38 = vsel %vm1624_vm1, %v7431_v6, %v13384_v54  ;;  %v13385_v59 = vld [vmem:[#allocation36_spill] sm:$0xff] }
 0x28f   : > { %6790 = vmatmul.msk.f32.gmra.mxu0 %vm1903_vm9, %v1862_v49  ;;  %v1699_v0 = vsel %vm1690_vm3, %v1666_v39, %v13371_v33  ;;  %v1669_v39 = vsel %vm1657_vm2, %v1636_v38, %v13385_v59  ;;  %v13395_v6 = vld [vmem:[#allocation40_spill] sm:$0xff] }
 0x290   : > { %v1732_v36 = vsel %vm1723_vm5, %v1699_v0, %v13372_v45  ;;  %v13387_v45 = vld [vmem:[#allocation80_spill] sm:$0xff] }
 0x291   : > { %v1765_v28 = vsel %vm1756_vm4, %v1732_v36, %v13373_v9  ;;  %v13388_v9 = vld [vmem:[#allocation111_spill] sm:$0xff] }
 0x292   : > { %v1798_v12 = vsel %vm1789_vm6, %v1765_v28, %v8661_v17  ;;  %v1700_v17 = vsel %vm1690_vm3, %v1667_v27, %v13376_v7  ;;  %v13389_v27 = vld [vmem:[#allocation15_spill] sm:$0xff] }
 0x293   : > { %v1543_v62 = vpop.permute.xlu1 %1542  ;;  %v8812_v61 = vpop.permute.xlu2 %1318  ;;  %v1831_v26 = vsel %vm1822_vm8, %v1798_v12, %v1417_v60  ;;  %v1733_v19 = vsel %vm1723_vm5, %v1700_v17, %v13377_v52  ;;  %v13378_v60 = vld [vmem:[#allocation102_spill] sm:$0xff]  ;;  %v1637_v7 = vsel %vm1624_vm1, %v7432_v37, %v13389_v27  ;;  %v13390_v17 = vld [vmem:[#allocation31_spill] sm:$0xff] }
 0x294   : > { %v1415_v51 = vpop.permute.xlu0 %1414  ;;  %v1766_v56 = vsel %vm1756_vm4, %v1733_v19, %v13378_v60  ;;  %v1670_v52 = vsel %vm1657_vm2, %v1637_v7, %v13390_v17  ;;  %v3373_v19 = vld [vmem:[%s13133_s3 + $0x260] sm:$0xff]  ;;  %v13391_v60 = vld [vmem:[#allocation62_spill] sm:$0xff] }
 0x295   : > { %v1830_v21 = vsel %vm1822_vm8, %v1797_v43, %v1415_v51  ;;  %v1799_v18 = vsel %vm1789_vm6, %v1766_v56, %v8683_v2  ;;  %v1701_v2 = vsel %vm1690_vm3, %v1668_v5, %v13381_v29  ;;  %v1703_v56 = vsel %vm1690_vm3, %v1670_v52, %v13391_v60  ;;  %v3365_v59 = vld [vmem:[%s13133_s3 + $0x220] sm:$0xff]  ;;  %v7434_v60 = vld [vmem:[%s7688_s11 + $0xf0] sm:$0xff] }
 0x296   : > { %v1863_v53 = vsel %vm1855_vm7, %v1830_v21, %v1543_v62  ;;  %v1832_v44 = vsel %vm1822_vm8, %v1799_v18, %v1419_v24  ;;  %v1734_v24 = vsel %vm1723_vm5, %v1701_v2, %v13382_v4  ;;  %v8917_v18 = vld [vmem:[%s13132_s2] ss:$0 sm:$0xff] }
 0x297   : > { %6791 = vmatmul.msk.f32.gmra.mxu0 %vm1903_vm9, %v1863_v53  ;;  %v1767_v40 = vsel %vm1756_vm4, %v1734_v24, %v13383_v32  ;;  %v3369_v4 = vld [vmem:[%s13133_s3 + $0x240] sm:$0xff] }
 0x298   : > { %v1800_v62 = vsel %vm1789_vm6, %v1767_v40, %v8710_v16  ;;  %v13386_v16 = vld [vmem:[#allocation63_spill] sm:$0xff] }
 0x299   : > { %v1702_v0 = vsel %vm1690_vm3, %v1669_v39, %v13386_v16  ;;  %v13398_v39 = vld [vmem:[#allocation56_spill] sm:$0xff] }
 0x29a   : > { %v1735_v36 = vsel %vm1723_vm5, %v1702_v0, %v13387_v45  ;;  %v13399_v0 = vld [vmem:[#allocation88_spill] sm:$0xff] }
 0x29b   : > { %v8814_v15 = vpop.permute.xlu1 %1312  ;;  %v1549_v14 = vpop.permute.xlu2 %1548  ;;  %v1768_v28 = vsel %vm1756_vm4, %v1735_v36, %v13388_v9  ;;  %v3363_v36 = vld [vmem:[%s13133_s3 + $0x210] sm:$0xff]  ;;  %v13400_v9 = vld [vmem:[#allocation115_spill] sm:$0xff] }
 0x29c   : > { %v8816_v8 = vpop.permute.xlu0 %1310  ;;  %v1801_v12 = vsel %vm1789_vm6, %v1768_v28, %v8648_v3  ;;  %v3375_v3 = vld [vmem:[%s13133_s3 + $0x270] sm:$0xff]  ;;  %v3361_v37 = vld [vmem:[%s13133_s3 + $0x200] sm:$0xff] }
 0x29d   : > { %3767 = vmatpush.msrb.mxu3 %v3375_v3 }
 0x29f   : > { %3768 = vmatpush.msrb.mxu3 %v3373_v19 }
 0x2a3   : > { %v8831_v31 = vpop.permute.xlu1 %1314  ;;  %v1551_v57 = vpop.permute.xlu2 %1550 }
 0x2a4   : > { %v1545_v47 = vpop.permute.xlu0 %1544 }
 0x2a5   : > { %v1864_v34 = vsel %vm1855_vm7, %v1831_v26, %v1545_v47 }
 0x2a6   : > { %6792 = vmatmul.msk.f32.gmra.mxu0 %vm1903_vm9, %v1864_v34 }
 0x2ab   : > { %v8849_v42 = vpop.permute.xlu1 %1316  ;;  %v8877_v33 = vpop.permute.xlu2 %1328 }
 0x2ac   : > { %v1547_v1 = vpop.permute.xlu0 %1546 }
 0x2ad   : > { %v1865_v49 = vsel %vm1855_vm7, %v1832_v44, %v1547_v1  ;;  %v13392_v44 = vld [vmem:[#allocation89_spill] sm:$0xff] }
 0x2ae   : > { %6793 = vmatmul.msk.f32.gmra.mxu0 %vm1903_vm9, %v1865_v49  ;;  %v1736_v1 = vsel %vm1723_vm5, %v1703_v56, %v13392_v44  ;;  %v3371_v49 = vld [vmem:[%s13133_s3 + $0x250] sm:$0xff] }
 0x2af   : > { %v1769_v22 = vsel %vm1756_vm4, %v1736_v1, %v13393_v50  ;;  %3769 = vmatpush.msrb.mxu3 %v3371_v49  ;;  %v13401_v56 = vld [vmem:[#allocation30_spill] sm:$0xff]  ;;  %v13402_v1 = vld [vmem:[#allocation44_spill] sm:$0xff] }
 0x2b0   : > { %v1802_v5 = vsel %vm1789_vm6, %v1769_v22, %v8738_v20  ;;  %v3367_v20 = vld [vmem:[%s13133_s3 + $0x230] sm:$0xff] }
 0x2b1   : > { %3770 = vmatpush.msrb.mxu3 %v3369_v4  ;;  %v13403_v50 = vld [vmem:[#allocation78_spill] sm:$0xff] }
 0x2b3   : > { %v1421_v43 = vpop.permute.xlu1 %1420  ;;  %v8892_v63 = vpop.permute.xlu2 %1330  ;;  %3771 = vmatpush.msrb.mxu3 %v3367_v20 }
 0x2b4   : > { %v1833_v51 = vsel %vm1822_vm8, %v1800_v62, %v1421_v43  ;;  %v8868_v21 = vpop.permute.xlu0 %1320  ;;  %v7433_v62 = vld [vmem:[%s7688_s11 + $0x68] sm:$0xff]  ;;  %v13394_v43 = vld [vmem:[#allocation14_spill] sm:$0xff] }
 0x2b5   : > { %v1866_v53 = vsel %vm1855_vm7, %v1833_v51, %v1549_v14  ;;  %v1638_v51 = vsel %vm1624_vm1, %v7433_v62, %v13394_v43  ;;  %3772 = vmatpush.msrb.mxu3 %v3365_v59 }
 0x2b6   : > { %6794 = vmatmul.msk.f32.gmra.mxu0 %vm1903_vm9, %v1866_v53  ;;  %v1671_v54 = vsel %vm1657_vm2, %v1638_v51, %v13395_v6 }
 0x2b7   : > { %v1704_v16 = vsel %vm1690_vm3, %v1671_v54, %v13398_v39  ;;  %3773 = vmatpush.msrb.mxu3 %v3363_v36  ;;  %v7435_v39 = vld [vmem:[%s7688_s11 + $0x70] sm:$0xff] }
 0x2b8   : > { %v1737_v45 = vsel %vm1723_vm5, %v1704_v16, %v13399_v0  ;;  %v13406_v16 = vld [vmem:[#allocation8_spill] sm:$0xff] }
 0x2b9   : > { %v1770_v28 = vsel %vm1756_vm4, %v1737_v45, %v13400_v9  ;;  %3774 = vmatpush.msrb.mxu3 %v3361_v37  ;;  %v13407_v45 = vld [vmem:[#allocation39_spill] sm:$0xff] }
 0x2bb   : > { %v1423_v14 = vpop.permute.xlu1 %1422  ;;  %v1333_v30 = vpop.permute.xlu2 %1332 }
 0x2bc   : > { %v1834_v26 = vsel %vm1822_vm8, %v1801_v12, %v1423_v14  ;;  %v8888_v47 = vpop.permute.xlu0 %1322 }
 0x2bd   : > { %v1867_v34 = vsel %vm1855_vm7, %v1834_v26, %v1551_v57  ;;  %v8921_v57 = vstv %s6816_s17  ;;  %v1803_v26 = vsel %vm1789_vm6, %v1770_v28, %v8764_v11  ;;  %v1655_v11 = vsel %vm1624_vm1, %v7434_v60, %v13401_v56  ;;  %v13408_v28 = vld [vmem:[#allocation66_spill] sm:$0xff]  ;;  %s7562_s17 = smov 32  }
 0x2be   : > { %6795 = vmatmul.msk.f32.gmra.mxu0 %vm1903_vm9, %v1867_v34  ;;  %vm2166_vm10 = vcmp.ge.s32.totalorder %v8921_v57, 0  ;;  %vm2182_vm11 = vcmp.lt.s32.totalorder %v8921_v57, 16  ;;  %v1688_v49 = vsel %vm1657_vm2, %v1655_v11, %v13402_v1  ;;  %v2151_v59 = vadd.s32 1, %v8921_v57  ;;  %v7436_v56 = vld [vmem:[%s7688_s11 + $0xf8] sm:$0xff]  ;;  %v13411_v11 = vld [vmem:[#allocation29_spill] sm:$0xff] }
 0x2bf   : > { %vm8947_vm12 = vmand %vm2166_vm10, %vm2182_vm11  ;;  %v1721_v22 = vsel %vm1690_vm3, %v1688_v49, %v13403_v50  ;;  %v13414_v50 = vld [vmem:[#allocation55_spill] sm:$0xff]  ;;  %vm3102_vm11 = vcmask 1043456  }
 0x2c0   : > { %vm2167_vm15 = vcmp.ge.s32.totalorder %v2151_v59, 0  ;;  %vm2183_vm0 = vcmp.lt.s32.totalorder %v2151_v59, 16  ;;  %v13419_v59 = vld [vmem:[#allocation65_spill] sm:$0xff] }
 0x2c1   : > { %vm9025_vm10 = vmand %vm2167_vm15, %vm2183_vm0  ;;  %vm3200_vm0 = vcmask 523264  }
 0x2c3   : > { %v8894_v55 = vpop.permute.xlu1 %1326  ;;  %v8970_v27 = vpop.permute.xlu2 %1334 }
 0x2c4   : > { %v8896_v10 = vpop.permute.xlu0 %1324 }
 0x2cb   : > { %v1553_v58 = vpop.permute.xlu1 %1552  ;;  %v1557_v54 = vpop.permute.xlu2 %1556 }
 0x2cc   : > { %v1425_v29 = vpop.permute.xlu0 %1424  ;;  %v2021_v2 = vpop.f32.mrf.mxu0 }
 0x2cd   : > { %v1835_v24 = vsel %vm1822_vm8, %v1802_v5, %v1425_v29  ;;  %v2022_v32 = vadd.f32 %v8917_v18, %v2021_v2  ;;  %v13404_v5 = vld [vmem:[#allocation104_spill] sm:$0xff] }
 0x2ce   : > { %v1868_v40 = vsel %vm1855_vm7, %v1835_v24, %v1553_v58  ;;  %v1754_v29 = vsel %vm1723_vm5, %v1721_v22, %v13404_v5  ;;  %v13405_v24 = vld [vmem:[#allocation119_spill] sm:$0xff] }
 0x2cf   : > { %v2117_v53 = vmax.f32 %v2022_v32, 0.0  ;;  %6796 = vmatmul.msk.f32.gmra.mxu0 %vm1903_vm9, %v1868_v40  ;;  %v1787_v32 = vsel %vm1756_vm4, %v1754_v29, %v13405_v24  ;;  %v13415_v29 = vld [vmem:[#allocation18_spill] sm:$0xff] }
 0x2d0   : > { %v1820_v20 = vsel %vm1789_vm6, %v1787_v32, %v1333_v30  ;;  %v1639_v30 = vsel %vm1624_vm1, %v7435_v39, %v13406_v16  ;;  %v13416_v24 = vld [vmem:[#allocation70_spill] sm:$0xff] }
 0x2d1   : > { %v2246_v12 = vsel %vm8947_vm12, %v2117_v53, 0.0  ;;  %v1672_v36 = vsel %vm1657_vm2, %v1639_v30, %v13407_v45  ;;  %v13420_v16 = vld [vmem:[#allocation130_spill] sm:$0xff] }
 0x2d2   : > { %v2311_v52 = vrot.slane %v2246_v12, 6  ;;  %v1705_v12 = vsel %vm1690_vm3, %v1672_v36, %v13408_v28  ;;  %v13422_v28 = vld [vmem:[#allocation106_spill] sm:$0xff] }
 0x2d3   : > { %v1555_v14 = vpop.permute.xlu1 %1554 }
 0x2d4   : > { %v1427_v34 = vpop.permute.xlu0 %1426  ;;  %v2024_v3 = vpop.f32.mrf.mxu0  ;;  %v8988_v2 = vsel %vm2310_vm13, 0.0, %v2311_v52 }
 0x2d5   : > { %v1836_v7 = vsel %vm1822_vm8, %v1803_v26, %v1427_v34  ;;  %v2025_v17 = vadd.f32 %v8917_v18, %v2024_v3  ;;  %v2473_v53 = vrot.slane %v8988_v2, 1  ;;  %v13410_v34 = vld [vmem:[#allocation114_spill] sm:$0xff] }
 0x2d6   : > { %v1869_v19 = vsel %vm1855_vm7, %v1836_v7, %v1555_v14  ;;  %v13409_v14 = vld [vmem:[#allocation81_spill] sm:$0xff] }
 0x2d7   : > { %v2118_v44 = vmax.f32 %v2025_v17, 0.0  ;;  %6797 = vmatmul.msk.f32.gmra.mxu0 %vm1903_vm9, %v1869_v19  ;;  %v1738_v26 = vsel %vm1723_vm5, %v1705_v12, %v13409_v14 }
 0x2d8   : > { %v1771_v3 = vsel %vm1756_vm4, %v1738_v26, %v13410_v34 }
 0x2d9   : > { %v2247_v58 = vsel %vm8947_vm12, %v2118_v44, 0.0  ;;  %v1656_v44 = vsel %vm1624_vm1, %v7436_v56, %v13411_v11  ;;  %v7438_v56 = vld [vmem:[%s7688_s11 + $0x80] sm:$0xff]  ;;  %v13424_v11 = vld [vmem:[#allocation17_spill] sm:$0xff] }
 0x2da   : > { %v2312_v4 = vrot.slane %v2247_v58, 6  ;;  %v1689_v22 = vsel %vm1657_vm2, %v1656_v44, %v13414_v50  ;;  %v1641_v44 = vsel %vm1624_vm1, %v7438_v56, %v13424_v11  ;;  %v13437_v11 = vld [vmem:[#allocation82_spill] sm:$0xff] }
 0x2db   : > { %v1589_v40 = vpop.permute.xlu1 %1588  ;;  %v1722_v32 = vsel %vm1690_vm3, %v1689_v22, %v13416_v24  ;;  %v2152_v22 = vadd.s32 2, %v8921_v57  ;;  %v13427_v24 = vld [vmem:[#allocation91_spill] sm:$0xff] }
 0x2dc   : > { %v8994_v62 = vsel %vm2310_vm13, %v2311_v52, %v2312_v4  ;;  %v1461_v43 = vpop.permute.xlu0 %1460  ;;  %v9009_v9 = vsel %vm2310_vm13, %v2312_v4, 0.0  ;;  %v1804_v52 = vsel %vm1789_vm6, %v1771_v3, %v8774_v25  ;;  %v7437_v25 = vld [vmem:[%s7688_s11 + $0x78] sm:$0xff] }
 0x2dd   : > { %v1853_v51 = vsel %vm1822_vm8, %v1820_v20, %v1461_v43  ;;  %v2474_v6 = vrot.slane %v8994_v62, 1  ;;  %v2476_v17 = vrot.slane %v9009_v9, 1  ;;  %v1640_v4 = vsel %vm1624_vm1, %v7437_v25, %v13415_v29  ;;  %v1559_v20 = vpop.permute.xlu2 %1558  ;;  %v13417_v43 = vld [vmem:[#allocation32_spill] sm:$0xff]  ;;  %v13426_v25 = vld [vmem:[#allocation57_spill] sm:$0xff] }
 0x2de   : > { %v1886_v38 = vsel %vm1855_vm7, %v1853_v51, %v1589_v40  ;;  %v1673_v51 = vsel %vm1657_vm2, %v1640_v4, %v13417_v43  ;;  %vm2168_vm12 = vcmp.ge.s32.totalorder %v2152_v22, 0  ;;  %vm2184_vm15 = vcmp.lt.s32.totalorder %v2152_v22, 16 }
 0x2df   : > { %6814 = vmatmul.msk.f32.vlgmr.msra.gmra.mxu3 %vm1903_vm9, %v1886_v38  ;;  %v2475_v0 = vsel %vm2472_vm14, %v2473_v53, %v2474_v6  ;;  %v2477_v40 = vsel %vm2472_vm14, %v2474_v6, %v2476_v17  ;;  %v13418_v53 = vld [vmem:[#allocation103_spill] sm:$0xff]  ;;  %v1706_v39 = vsel %vm1690_vm3, %v1673_v51, %v13419_v59  ;;  %v3103_v43 = vrot.slane %v8988_v2, 4  ;;  %v13428_v51 = vld [vmem:[#allocation118_spill] sm:$0xff] }
 0x2e0   : > { %2570 = vrot.lane.b32.xlu1 %v2475_v0, %s7559_s21  ;;  %v1755_v38 = vsel %vm1723_vm5, %v1722_v32, %v13418_v53  ;;  %v13421_v0 = vld [vmem:[#allocation92_spill] sm:$0xff] }
 0x2e1   : > { %v1788_v30 = vsel %vm1756_vm4, %v1755_v38, %v13420_v16  ;;  %v1739_v45 = vsel %vm1723_vm5, %v1706_v39, %v13421_v0 }
 0x2e2   : > { %v1821_v36 = vsel %vm1789_vm6, %v1788_v30, %v8970_v27  ;;  %v1772_v12 = vsel %vm1756_vm4, %v1739_v45, %v13422_v28  ;;  %v13433_v28 = vld [vmem:[#allocation9_spill] sm:$0xff] }
 0x2e3   : > { %v2027_v37 = vpop.f32.mrf.mxu0  ;;  %v1463_v7 = vpop.permute.xlu1 %1462 }
 0x2e4   : > { %v2028_v19 = vadd.f32 %v8917_v18, %v2027_v37  ;;  %v1429_v60 = vpop.permute.xlu0 %1428  ;;  %v1854_v26 = vsel %vm1822_vm8, %v1821_v36, %v1463_v7  ;;  %v1805_v37 = vsel %vm1789_vm6, %v1772_v12, %v8772_v46  ;;  %v7439_v36 = vld [vmem:[%s7688_s11 + $0x88] sm:$0xff] }
 0x2e5   : > { %v1837_v49 = vsel %vm1822_vm8, %v1804_v52, %v1429_v60  ;;  %v1642_v12 = vsel %vm1624_vm1, %v7439_v36, %v13433_v28 }
 0x2e6   : > { %v2119_v58 = vmax.f32 %v2028_v19, 0.0  ;;  %v1870_v5 = vsel %vm1855_vm7, %v1837_v49, %v1557_v54 }
 0x2e7   : > { %6798 = vmatmul.msk.f32.gmra.mxu0 %vm1903_vm9, %v1870_v5 }
 0x2e8   : > { %v2248_v54 = vsel %vm9025_vm10, %v2119_v58, 0.0  ;;  %2572 = vrot.lane.b32.xlu1 %v2477_v40, %s7559_s21  ;;  %v13425_v58 = vld [vmem:[#allocation43_spill] sm:$0xff] }
 0x2e9   : > { %v2314_v6 = vrot.slane %v2248_v54, 6  ;;  %v1674_v5 = vsel %vm1657_vm2, %v1641_v44, %v13425_v58 }
 0x2ea   : > { %v1707_v29 = vsel %vm1690_vm3, %v1674_v5, %v13426_v25 }
 0x2eb   : > { %v9058_v14 = vsel %vm2310_vm13, 0.0, %v2314_v6  ;;  %v2030_v34 = vpop.f32.mrf.mxu0  ;;  %v1591_v3 = vpop.permute.xlu1 %1590  ;;  %v1740_v32 = vsel %vm1723_vm5, %v1707_v29, %v13427_v24 }
 0x2ec   : > { %13423 = vst [vmem:[#allocation51_spill] sm:$0xff] %v9058_v14  ;;  %v2031_v52 = vadd.f32 %v8917_v18, %v2030_v34  ;;  %v1431_v19 = vpop.permute.xlu0 %1430  ;;  %v1887_v60 = vsel %vm1855_vm7, %v1854_v26, %v1591_v3  ;;  %v2478_v27 = vrot.slane %v9058_v14, 1  ;;  %v1773_v1 = vsel %vm1756_vm4, %v1740_v32, %v13428_v51  ;;  %v13434_v34 = vld [vmem:[#allocation42_spill] sm:$0xff] }
 0x2ed   : > { %v1838_v49 = vsel %vm1822_vm8, %v1805_v37, %v1431_v19  ;;  %6815 = vmatmul.msk.f32.gmra.mxu3 %vm1903_vm9, %v1887_v60  ;;  %v1806_v38 = vsel %vm1789_vm6, %v1773_v1, %v8708_v41  ;;  %v1675_v3 = vsel %vm1657_vm2, %v1642_v12, %v13434_v34  ;;  %v3106_v19 = vrot.slane %v9009_v9, 4  ;;  %v13436_v60 = vld [vmem:[#allocation69_spill] sm:$0xff]  ;;  %v3316_v34 = vld [vmem:[%s13133_s3 + $0x98] sm:$0xff] }
 0x2ee   : > { %v2120_v7 = vmax.f32 %v2031_v52, 0.0  ;;  %v1871_v50 = vsel %vm1855_vm7, %v1838_v49, %v1559_v20  ;;  %v2479_v46 = vsel %vm2472_vm14, %v2476_v17, %v2478_v27  ;;  %v3104_v17 = vrot.slane %v8994_v62, 4  ;;  %v1561_v20 = vpop.permute.xlu2 %1560  ;;  %v13435_v52 = vld [vmem:[#allocation129_spill] sm:$0xff] }
 0x2ef   : > { %6799 = vmatmul.msk.f32.vlgmr.msra.gmra.mxu2 %vm1903_vm9, %v1871_v50  ;;  %2574 = vrot.lane.b32.xlu0 %v2479_v46, %s7559_s21  ;;  %v3108_v51 = vrot.slane %v9058_v14, 4  ;;  %v6772_v12 = vld [vmem:[%s7688_s11 + $0x128] sm:$0xff] }
 0x2f0   : > { %v2249_v4 = vsel %vm9025_vm10, %v2120_v7, 0.0  ;;  %1436 = vrot.lane.b32.xlu1 %v8541_v35, %s7558_s24  ;;  %v9097_v39 = vsel %vm3102_vm11, %v3103_v43, %v3104_v17  ;;  %vm9101_vm10 = vmand %vm2168_vm12, %vm2184_vm15  ;;  %v13438_v7 = vld [vmem:[#allocation117_spill] sm:$0xff]  ;;  %v9140_v29 = vsel %vm3102_vm11, %v3104_v17, %v3106_v19  ;;  %v13440_v43 = vld [vmem:[#allocation128_spill] sm:$0xff] }
 0x2f1   : > { %v2315_v40 = vrot.slane %v2249_v4, 6  ;;  %13430 = vst [vmem:[#allocation109_spill] sm:$0xff] %v9097_v39 }
 0x2f2   : > { %13439 = vst [vmem:[#allocation6_spill] sm:$0xff] %v9140_v29 }
 0x2f3   : > { %v9091_v53 = vsel %vm2310_vm13, %v2314_v6, %v2315_v40  ;;  %v2033_v35 = vpop.f32.mrf.mxu0  ;;  %v9113_v26 = vsel %vm2310_vm13, %v2315_v40, 0.0 }
 0x2f4   : > { %13429 = vst [vmem:[#allocation83_spill] sm:$0xff] %v9091_v53  ;;  %v1433_v54 = vpop.permute.xlu0 %1432  ;;  %v2034_v59 = vadd.f32 %v8917_v18, %v2033_v35  ;;  %v2480_v16 = vrot.slane %v9091_v53, 1  ;;  %v2482_v49 = vrot.slane %v9113_v26, 1 }
 0x2f5   : > { %v1839_v30 = vsel %vm1822_vm8, %v1806_v38, %v1433_v54  ;;  %6817 = vmatmul.msk.f32.vlgmr.msrb.gmra.mxu3 %vm3200_vm0, %v9097_v39  ;;  %v9161_v38 = vsel %vm3102_vm11, %v3106_v19, %v3108_v51  ;;  %v13193_v39 = vrot.slane %v9113_v26, 3 }
 0x2f6   : > { %v2121_v6 = vmax.f32 %v2034_v59, 0.0  ;;  %v1872_v41 = vsel %vm1855_vm7, %v1839_v30, %v1561_v20  ;;  %v2481_v45 = vsel %vm2472_vm14, %v2478_v27, %v2480_v16  ;;  %v1708_v27 = vsel %vm1690_vm3, %v1675_v3, %v13436_v60  ;;  %v1563_v58 = vpop.permute.xlu2 %1562  ;;  %13441 = vst [vmem:[#allocation34_spill] sm:$0xff] %v9161_v38  ;;  %v6771_v59 = vld [vmem:[%s7688_s11 + $0x120] sm:$0xff] }
 0x2f7   : > { %6800 = vmatmul.msk.f32.gmra.mxu2 %vm1903_vm9, %v1872_v41  ;;  %2576 = vrot.lane.b32.xlu2 %v2481_v45, %s7559_s21  ;;  %v1741_v44 = vsel %vm1723_vm5, %v1708_v27, %v13437_v11  ;;  %v2483_v20 = vsel %vm2472_vm14, %v2480_v16, %v2482_v49  ;;  %v2153_v30 = vadd.s32 3, %v8921_v57 }
 0x2f8   : > { %v2250_v37 = vsel %vm9101_vm10, %v2121_v6, 0.0  ;;  %1564 = vrot.lane.b32.xlu0 %v13435_v52, %s13143_s23  ;;  %1438 = vrot.lane.b32.xlu1 %v8568_v23, %s7558_s24  ;;  %v1774_v50 = vsel %vm1756_vm4, %v1741_v44, %v13438_v7  ;;  %v3110_v6 = vrot.slane %v9091_v53, 4  ;;  %v3327_v7 = vld [vmem:[%s13133_s3 + $0xf0] sm:$0xff] }
 0x2f9   : > { %v2317_v56 = vrot.slane %v2250_v37, 6  ;;  %v1807_v23 = vsel %vm1789_vm6, %v1774_v50, %v8735_v13  ;;  %vm2169_vm12 = vcmp.ge.s32.totalorder %v2153_v30, 0  ;;  %vm2185_vm15 = vcmp.lt.s32.totalorder %v2153_v30, 16  ;;  %v3328_v50 = vld [vmem:[%s13133_s3 + $0xf8] sm:$0xff]  ;;  %3473 = vmatpush.msra.mxu1 %v3327_v7 }
 0x2fa   : > { %v9179_v36 = vsel %vm3102_vm11, %v3108_v51, %v3110_v6  ;;  %3902 = vmatpush.msrb.mxu0 %v3328_v50  ;;  %v3311_v50 = vld [vmem:[%s13133_s3 + $0x70] sm:$0xff] }
 0x2fb   : > { %v9134_v46 = vsel %vm2310_vm13, 0.0, %v2317_v56  ;;  %v2036_v22 = vpop.f32.mrf.mxu0  ;;  %13442 = vst [vmem:[#allocation60_spill] sm:$0xff] %v9179_v36 }
 0x2fc   : > { %v1435_v5 = vpop.permute.xlu0 %1434  ;;  %v2037_v25 = vadd.f32 %v8917_v18, %v2036_v22  ;;  %v2484_v4 = vrot.slane %v9134_v46, 1 }
 0x2fd   : > { %v1840_v24 = vsel %vm1822_vm8, %v1807_v23, %v1435_v5  ;;  %6818 = vmatmul.msk.f32.gmra.mxu3 %vm3200_vm0, %v9140_v29  ;;  %v3325_v23 = vld [vmem:[%s13133_s3 + $0xe0] sm:$0xff]  ;;  %v3326_v5 = vld [vmem:[%s13133_s3 + $0xe8] sm:$0xff] }
 0x2fe   : > { %v2122_v32 = vmax.f32 %v2037_v25, 0.0  ;;  %v1873_v40 = vsel %vm1855_vm7, %v1840_v24, %v1563_v58  ;;  %v2485_v13 = vsel %vm2472_vm14, %v2482_v49, %v2484_v4  ;;  %v3114_v25 = vrot.slane %v9134_v46, 4  ;;  %3474 = vmatpush.msra.mxu1 %v3325_v23  ;;  %v3323_v24 = vld [vmem:[%s13133_s3 + $0xd0] sm:$0xff]  ;;  %3903 = vmatpush.msrb.mxu0 %v3326_v5 }
 0x2ff   : > { %6801 = vmatmul.msk.f32.gmra.mxu2 %vm1903_vm9, %v1873_v40  ;;  %2578 = vrot.lane.b32.xlu2 %v2483_v20, %s7559_s21  ;;  %v3321_v20 = vld [vmem:[%s13133_s3 + $0xc0] sm:$0xff] }
 0x300   : > { %v2251_v17 = vsel %vm9101_vm10, %v2122_v32, 0.0  ;;  %1566 = vrot.lane.b32.xlu0 %v13440_v43, %s13143_s23  ;;  %2580 = vrot.lane.b32.xlu1 %v2485_v13, %s7559_s21  ;;  %vm9185_vm10 = vmand %vm2169_vm12, %vm2185_vm15  ;;  %v3324_v32 = vld [vmem:[%s13133_s3 + $0xd8] sm:$0xff]  ;;  %v3322_v13 = vld [vmem:[%s13133_s3 + $0xc8] sm:$0xff] }
 0x301   : > { %v2318_v1 = vrot.slane %v2251_v17, 6  ;;  %3475 = vmatpush.msra.mxu1 %v3323_v24  ;;  %3904 = vmatpush.msrb.mxu0 %v3324_v32  ;;  %v3307_v32 = vld [vmem:[%s13133_s3 + $0x50] sm:$0xff] }
 0x303   : > { %v9158_v35 = vsel %vm2310_vm13, %v2317_v56, %v2318_v1  ;;  %v9172_v0 = vsel %vm2310_vm13, %v2318_v1, 0.0  ;;  %v6773_v1 = vld [vmem:[%s7688_s11 + $0x130] sm:$0xff]  ;;  %3476 = vmatpush.msra.mxu1 %v3321_v20  ;;  %3905 = vmatpush.msrb.mxu0 %v3322_v13  ;;  %v3308_v13 = vld [vmem:[%s13133_s3 + $0x58] sm:$0xff] }
 0x304   : > { %v2486_v54 = vrot.slane %v9158_v35, 1  ;;  %v2488_v41 = vrot.slane %v9172_v0, 1  ;;  %v3118_v5 = vrot.slane %v9172_v0, 4 }
 0x305   : > { %6819 = vmatmul.msk.f32.gmra.mxu3 %vm3200_vm0, %v9161_v38 }
 0x306   : > { %v2487_v16 = vsel %vm2472_vm14, %v2484_v4, %v2486_v54  ;;  %v2489_v37 = vsel %vm2472_vm14, %v2486_v54, %v2488_v41  ;;  %v3319_v54 = vld [vmem:[%s13133_s3 + $0xb0] sm:$0xff] }
 0x307   : > { %1440 = vrot.lane.b32.xlu2 %v13435_v52, %s7558_s24  ;;  %v3112_v52 = vrot.slane %v9113_v26, 4  ;;  %3477 = vmatpush.msra.mxu1 %v3319_v54 }
 0x308   : > { %2582 = vrot.lane.b32.xlu0 %v2487_v16, %s7559_s21  ;;  %1568 = vrot.lane.b32.xlu1 %v6771_v59, %s13143_s23  ;;  %v3320_v16 = vld [vmem:[%s13133_s3 + $0xb8] sm:$0xff] }
 0x309   : > { %v9201_v11 = vsel %vm3102_vm11, %v3110_v6, %v3112_v52  ;;  %v3317_v6 = vld [vmem:[%s13133_s3 + $0xa0] sm:$0xff]  ;;  %3906 = vmatpush.msrb.mxu0 %v3320_v16 }
 0x30a   : > { %13445 = vst [vmem:[#allocation77_spill] sm:$0xff] %v9201_v11  ;;  %3478 = vmatpush.msra.mxu1 %v3317_v6  ;;  %v6744_v16 = vld [vmem:[%s7688_s11 + $0x140] sm:$0xff] }
 0x30c   : > { %v2039_v45 = vpop.f32.mrf.mxu0 }
 0x30d   : > { %v2040_v28 = vadd.f32 %v8917_v18, %v2039_v45  ;;  %6820 = vmatmul.msk.f32.gmra.mxu3 %vm3200_vm0, %v9179_v36  ;;  %v3116_v45 = vrot.slane %v9158_v35, 4 }
 0x30f   : > { %v2123_v3 = vmax.f32 %v2040_v28, 0.0  ;;  %1442 = vrot.lane.b32.xlu2 %v13440_v43, %s7558_s24  ;;  %v9242_v43 = vsel %vm3102_vm11, %v3112_v52, %v3114_v25  ;;  %v3318_v28 = vld [vmem:[%s13133_s3 + $0xa8] sm:$0xff]  ;;  %v3313_v52 = vld [vmem:[%s13133_s3 + $0x80] sm:$0xff] }
 0x310   : > { %2584 = vrot.lane.b32.xlu0 %v2489_v37, %s7559_s21  ;;  %1570 = vrot.lane.b32.xlu1 %v6772_v12, %s13143_s23  ;;  %13447 = vst [vmem:[#allocation12_spill] sm:$0xff] %v9242_v43  ;;  %s6951_s23 = sshll.u32 %s7537_s30, 1  ;;  %s13075_s30 = sshll.u32 %s285_s22, 3 }
 0x311   : > { %v2252_v19 = vsel %vm9185_vm10, %v2123_v3, 0.0  ;;  %3907 = vmatpush.msrb.mxu0 %v3318_v28  ;;  %v2155_v28 = vadd.s32 5, %v8921_v57  ;;  %s6404_s18 = sadd.s32 %s7533_s29, %s6951_s23  ;;  %s287_s6 = scalar_lea.vmem [#allocation3], %s13075_s30 }
 0x312   : > { %v2320_v60 = vrot.slane %v2252_v19, 6 }
 0x313   : > { %3908 = vmatpush.msrb.mxu0 %v3316_v34 }
 0x314   : > { %v9198_v27 = vsel %vm2310_vm13, 0.0, %v2320_v60  ;;  %v2042_v56 = vpop.f32.mrf.mxu0 }
 0x315   : > { %v2043_v44 = vadd.f32 %v8917_v18, %v2042_v56  ;;  %6821 = vmatmul.msk.f32.gmra.mxu3 %vm3200_vm0, %v9201_v11  ;;  %v2490_v49 = vrot.slane %v9198_v27, 1  ;;  %v3314_v56 = vld [vmem:[%s13133_s3 + $0x88] sm:$0xff] }
 0x316   : > { %3909 = vmatpush.msrb.mxu0 %v3314_v56  ;;  %v3302_v56 = vld [vmem:[%s13133_s3 + $0x28] sm:$0xff] }
 0x317   : > { %v2124_v22 = vmax.f32 %v2043_v44, 0.0  ;;  %v2491_v58 = vsel %vm2472_vm14, %v2488_v41, %v2490_v49 }
 0x318   : > { %2586 = vrot.lane.b32.xlu2 %v2491_v58, %s7559_s21  ;;  %1444 = vrot.lane.b32.xlu0 %v6771_v59, %s7558_s24  ;;  %v2154_v59 = vadd.s32 4, %v8921_v57 }
 0x319   : > { %v2253_v4 = vsel %vm9185_vm10, %v2124_v22, 0.0  ;;  %1446 = vrot.lane.b32.xlu1 %v6772_v12, %s7558_s24  ;;  %v3315_v12 = vld [vmem:[%s13133_s3 + $0x90] sm:$0xff]  ;;  %v3312_v22 = vld [vmem:[%s13133_s3 + $0x78] sm:$0xff] }
 0x31a   : > { %v2321_v40 = vrot.slane %v2253_v4, 6  ;;  %vm2170_vm12 = vcmp.ge.s32.totalorder %v2154_v59, 0  ;;  %vm2186_vm15 = vcmp.lt.s32.totalorder %v2154_v59, 16  ;;  %3479 = vmatpush.msra.mxu1 %v3315_v12  ;;  %v3310_v4 = vld [vmem:[%s13133_s3 + $0x68] sm:$0xff]  ;;  %3910 = vmatpush.msrb.mxu0 %v3312_v22  ;;  %v3305_v59 = vld [vmem:[%s13133_s3 + $0x40] sm:$0xff]  ;;  %v3303_v12 = vld [vmem:[%s13133_s3 + $0x30] sm:$0xff] }
 0x31b   : > { %vm9286_vm10 = vmand %vm2170_vm12, %vm2186_vm15  ;;  %vm2171_vm12 = vcmp.ge.s32.totalorder %v2155_v28, 0  ;;  %vm2187_vm15 = vcmp.lt.s32.totalorder %v2155_v28, 16 }
 0x31c   : > { %v9239_v17 = vsel %vm2310_vm13, %v2320_v60, %v2321_v40  ;;  %v9260_v41 = vsel %vm2310_vm13, %v2321_v40, 0.0  ;;  %v9281_v60 = vsel %vm3102_vm11, %v3114_v25, %v3116_v45  ;;  %3480 = vmatpush.msra.mxu1 %v3313_v52  ;;  %v3309_v25 = vld [vmem:[%s13133_s3 + $0x60] sm:$0xff]  ;;  %3911 = vmatpush.msrb.mxu0 %v3310_v4  ;;  %v6745_v4 = vld [vmem:[%s7688_s11 + $0x148] sm:$0xff] }
 0x31d   : > { %13446 = vst [vmem:[#allocation108_spill] sm:$0xff] %v9239_v17  ;;  %6822 = vmatmul.msk.f32.gmra.mxu3 %vm3200_vm0, %v9242_v43  ;;  %v2492_v51 = vrot.slane %v9239_v17, 1  ;;  %v2494_v37 = vrot.slane %v9260_v41, 1  ;;  %v3301_v52 = vld [vmem:[%s13133_s3 + $0x20] sm:$0xff] }
 0x31e   : > { %13449 = vst [vmem:[#allocation28_spill] sm:$0xff] %v9281_v60  ;;  %3481 = vmatpush.msra.mxu1 %v3311_v50  ;;  %3912 = vmatpush.msrb.mxu0 %v3308_v13 }
 0x31f   : > { %v2493_v30 = vsel %vm2472_vm14, %v2490_v49, %v2492_v51  ;;  %v6774_v49 = vld [vmem:[%s7688_s11 + $0x138] sm:$0xff]  ;;  %v2495_v58 = vsel %vm2472_vm14, %v2492_v51, %v2494_v37 }
 0x320   : > { %2588 = vrot.lane.b32.xlu2 %v2493_v30, %s7559_s21  ;;  %1572 = vrot.lane.b32.xlu0 %v6773_v1, %s13448_s19 }
 0x321   : > { %1448 = vrot.lane.b32.xlu1 %v6773_v1, %s7558_s24  ;;  %3482 = vmatpush.msra.mxu1 %v3309_v25  ;;  %v9322_v1 = vsel %vm3102_vm11, %v3116_v45, %v3118_v5  ;;  %v3306_v45 = vld [vmem:[%s13133_s3 + $0x48] sm:$0xff]  ;;  %v2156_v25 = vadd.s32 6, %v8921_v57 }
 0x322   : > { %13452 = vst [vmem:[#allocation59_spill] sm:$0xff] %v9322_v1  ;;  %3913 = vmatpush.msrb.mxu0 %v3306_v45 }
 0x323   : > { %v2045_v3 = vpop.f32.mrf.mxu0  ;;  %3483 = vmatpush.msra.mxu1 %v3307_v32 }
 0x324   : > { %v2046_v19 = vadd.f32 %v8917_v18, %v2045_v3  ;;  %v3120_v3 = vrot.slane %v9198_v27, 4 }
 0x325   : > { %6823 = vmatmul.msk.f32.gmra.mxu3 %vm3200_vm0, %v9281_v60  ;;  %3484 = vmatpush.msra.mxu1 %v3305_v59  ;;  %v13476_v60 = vld [vmem:[#allocation121_spill] sm:$0xff] }
 0x326   : > { %v2125_v7 = vmax.f32 %v2046_v19, 0.0  ;;  %v9362_v22 = vsel %vm3102_vm11, %v3118_v5, %v3120_v3  ;;  %v3297_v5 = vld [vmem:[%s13133_s3] sm:$0xff] }
 0x327   : > { %3485 = vmatpush.msra.mxu1 %v3303_v12  ;;  %13453 = vst [vmem:[#allocation86_spill] sm:$0xff] %v9362_v22 }
 0x328   : > { %v2254_v23 = vsel %vm9286_vm10, %v2125_v7, 0.0  ;;  %2590 = vrot.lane.b32.xlu2 %v2495_v58, %s7559_s21  ;;  %1574 = vrot.lane.b32.xlu0 %v6774_v49, %s13448_s19  ;;  %v3299_v7 = vld [vmem:[%s13133_s3 + $0x10] sm:$0xff] }
 0x329   : > { %v2323_v24 = vrot.slane %v2254_v23, 6  ;;  %3486 = vmatpush.msra.mxu1 %v3301_v52  ;;  %v3300_v23 = vld [vmem:[%s13133_s3 + $0x18] sm:$0xff] }
 0x32b   : > { %v9315_v40 = vsel %vm2310_vm13, 0.0, %v2323_v24  ;;  %v2048_v20 = vpop.f32.mrf.mxu0  ;;  %3487 = vmatpush.msra.mxu1 %v3299_v7 }
 0x32c   : > { %v2049_v51 = vadd.f32 %v8917_v18, %v2048_v20  ;;  %v2496_v54 = vrot.slane %v9315_v40, 1  ;;  %v3298_v20 = vld [vmem:[%s13133_s3 + $0x8] sm:$0xff] }
 0x32d   : > { %6824 = vmatmul.msk.f32.gmra.mxu3 %vm3200_vm0, %v9322_v1  ;;  %3488 = vmatpush.msra.mxu1 %v3297_v5  ;;  %v13471_v1 = vld [vmem:[#allocation20_spill] sm:$0xff] }
 0x32e   : > { %v2126_v30 = vmax.f32 %v2049_v51, 0.0  ;;  %v2497_v6 = vsel %vm2472_vm14, %v2494_v37, %v2496_v54  ;;  %v3304_v37 = vld [vmem:[%s13133_s3 + $0x38] sm:$0xff] }
 0x32f   : > { %2592 = vrot.lane.b32.xlu1 %v2497_v6, %s7559_s21  ;;  %3914 = vmatpush.msrb.mxu0 %v3304_v37 }
 0x330   : > { %v2255_v34 = vsel %vm9286_vm10, %v2126_v30, 0.0  ;;  %1450 = vrot.lane.b32.xlu2 %v6774_v49, %s7558_s24  ;;  %1452 = vrot.lane.b32.xlu0 %v6744_v16, %s7558_s24  ;;  %vm9368_vm10 = vmand %vm2171_vm12, %vm2187_vm15  ;;  %vm2172_vm12 = vcmp.ge.s32.totalorder %v2156_v25, 0  ;;  %vm2188_vm15 = vcmp.lt.s32.totalorder %v2156_v25, 16 }
 0x331   : > { %v2324_v19 = vrot.slane %v2255_v34, 6  ;;  %3915 = vmatpush.msrb.mxu0 %v3302_v56 }
 0x333   : > { %v9355_v44 = vsel %vm2310_vm13, %v2323_v24, %v2324_v19  ;;  %v2051_v49 = vpop.f32.mrf.mxu0  ;;  %v9383_v13 = vsel %vm2310_vm13, %v2324_v19, 0.0  ;;  %3916 = vmatpush.msrb.mxu0 %v3300_v23  ;;  %v7440_v23 = vld [vmem:[%s7688_s11 + $0x150] sm:$0xff] }
 0x334   : > { %v2052_v50 = vadd.f32 %v8917_v18, %v2051_v49  ;;  %v2498_v58 = vrot.slane %v9355_v44, 1  ;;  %v2500_v30 = vrot.slane %v9383_v13, 1 }
 0x335   : > { %6825 = vmatmul.msk.f32.gmra.mxu3 %vm3200_vm0, %v9362_v22  ;;  %3917 = vmatpush.msrb.mxu0 %v3298_v20  ;;  %v7443_v22 = vld [vmem:[%s7688_s11 + $0x98] sm:$0xff] }
 0x336   : > { %v2127_v24 = vmax.f32 %v2052_v50, 0.0  ;;  %v2499_v32 = vsel %vm2472_vm14, %v2496_v54, %v2498_v58  ;;  %v3122_v54 = vrot.slane %v9239_v17, 4  ;;  %v2501_v37 = vsel %vm2472_vm14, %v2498_v58, %v2500_v30 }
 0x337   : > { %2594 = vrot.lane.b32.xlu1 %v2499_v32, %s7559_s21  ;;  %v3126_v32 = vrot.slane %v9315_v40, 4 }
 0x338   : > { %v2256_v51 = vsel %vm9368_vm10, %v2127_v24, 0.0  ;;  %1576 = vrot.lane.b32.xlu2 %v6744_v16, %s13448_s19  ;;  %1454 = vrot.lane.b32.xlu0 %v6745_v4, %s7558_s24  ;;  %v9397_v12 = vsel %vm3102_vm11, %v3120_v3, %v3122_v54  ;;  %v3124_v3 = vrot.slane %v9260_v41, 4  ;;  %v7441_v24 = vld [vmem:[%s7688_s11 + $0x158] sm:$0xff] }
 0x339   : > { %v2326_v59 = vrot.slane %v2256_v51, 6  ;;  %13456 = vst [vmem:[#allocation102_spill] sm:$0xff] %v9397_v12 }
 0x33a   : > { %v9414_v7 = vsel %vm3102_vm11, %v3122_v54, %v3124_v3  ;;  %v9432_v51 = vsel %vm3102_vm11, %v3124_v3, %v3126_v32  ;;  %v6777_v54 = vld [vmem:[%s7688_s11 + $0x150] sm:$0xff] }
 0x33b   : > { %v9393_v6 = vsel %vm2310_vm13, 0.0, %v2326_v59  ;;  %v2054_v28 = vpop.f32.mrf.mxu0  ;;  %13457 = vst [vmem:[#allocation11_spill] sm:$0xff] %v9414_v7 }
 0x33c   : > { %v2055_v45 = vadd.f32 %v8917_v18, %v2054_v28  ;;  %v2502_v16 = vrot.slane %v9393_v6, 1  ;;  %13458 = vst [vmem:[#allocation37_spill] sm:$0xff] %v9432_v51 }
 0x33d   : > { %6826 = vmatmul.msk.f32.gmra.mxu3 %vm3200_vm0, %v9397_v12 }
 0x33e   : > { %v2128_v34 = vmax.f32 %v2055_v45, 0.0  ;;  %v2503_v52 = vsel %vm2472_vm14, %v2500_v30, %v2502_v16  ;;  %v6778_v30 = vld [vmem:[%s7688_s11 + $0x158] sm:$0xff] }
 0x33f   : > { %2596 = vrot.lane.b32.xlu1 %v2501_v37, %s7559_s21 }
 0x340   : > { %v2257_v19 = vsel %vm9368_vm10, %v2128_v34, 0.0  ;;  %1578 = vrot.lane.b32.xlu2 %v6745_v4, %s13448_s19  ;;  %2598 = vrot.lane.b32.xlu0 %v2503_v52, %s7559_s21  ;;  %vm9439_vm10 = vmand %vm2172_vm12, %vm2188_vm15  ;;  %v3128_v34 = vrot.slane %v9355_v44, 4 }
 0x341   : > { %v2327_v56 = vrot.slane %v2257_v19, 6 }
 0x343   : > { %v9411_v49 = vsel %vm2310_vm13, %v2326_v59, %v2327_v56  ;;  %v9424_v4 = vsel %vm2310_vm13, %v2327_v56, 0.0 }
 0x344   : > { %v2504_v50 = vrot.slane %v9411_v49, 1  ;;  %v2506_v5 = vrot.slane %v9424_v4, 1  ;;  %v3136_v43 = vrot.slane %v9424_v4, 4 }
 0x345   : > { %6827 = vmatmul.msk.f32.gmra.mxu3 %vm3200_vm0, %v9414_v7 }
 0x346   : > { %v2505_v58 = vsel %vm2472_vm14, %v2502_v16, %v2504_v50  ;;  %v2507_v16 = vsel %vm2472_vm14, %v2504_v50, %v2506_v5  ;;  %v9455_v50 = vsel %vm3102_vm11, %v3126_v32, %v3128_v34 }
 0x347   : > { %1456 = vrot.lane.b32.xlu1 %v7440_v23, %s7558_s24  ;;  %13461 = vst [vmem:[#allocation54_spill] sm:$0xff] %v9455_v50  ;;  %v6779_v23 = vld [vmem:[%s7688_s11 + $0x160] sm:$0xff] }
 0x348   : > { %1458 = vrot.lane.b32.xlu2 %v7441_v24, %s7558_s24  ;;  %2600 = vrot.lane.b32.xlu0 %v2505_v58, %s7559_s21  ;;  %v6780_v24 = vld [vmem:[%s7688_s11 + $0x168] sm:$0xff]  ;;  %s13822_s24 = sshll.u32 %s7533_s29, 3 }
 0x34c   : > { %v2057_v20 = vpop.f32.mrf.mxu0 }
 0x34d   : > { %v2058_v59 = vadd.f32 %v8917_v18, %v2057_v20  ;;  %6828 = vmatmul.msk.f32.gmra.mxu3 %vm3200_vm0, %v9432_v51 }
 0x34f   : > { %v2129_v45 = vmax.f32 %v2058_v59, 0.0  ;;  %1580 = vrot.lane.b32.xlu1 %v6777_v54, %s13448_s19  ;;  %v3130_v59 = vrot.slane %v9383_v13, 4 }
 0x350   : > { %2602 = vrot.lane.b32.xlu0 %v2507_v16, %s7559_s21  ;;  %1582 = vrot.lane.b32.xlu2 %v6778_v30, %s13448_s19 }
 0x351   : > { %v2258_v37 = vsel %vm9439_vm10, %v2129_v45, 0.0  ;;  %v9450_v52 = vpop.permute.xlu2 %2576 }
 0x352   : > { %v2571_v19 = vpop.permute.xlu1 %2570  ;;  %v2329_v56 = vrot.slane %v2258_v37, 6 }
 0x353   : > { %v3201_v3 = vsel %vm3200_vm0, %v8988_v2, %v2571_v19 }
 0x354   : > { %v2060_v58 = vpop.f32.mrf.mxu0  ;;  %3489 = vmatmul.f32.vlgmr.msra.gmra.mxu1 %v3201_v3  ;;  %3918 = vmatmul.f32.vlgmr.msrb.gmra.mxu0 %v3201_v3  ;;  %v9464_v54 = vsel %vm2310_vm13, 0.0, %v2329_v56 }
 0x355   : > { %v2061_v25 = vadd.f32 %v8917_v18, %v2060_v58  ;;  %6829 = vmatmul.msk.f32.gmra.mxu3 %vm3200_vm0, %v9455_v50  ;;  %v2508_v37 = vrot.slane %v9464_v54, 1  ;;  %v9479_v58 = vsel %vm3102_vm11, %v3128_v34, %v3130_v59 }
 0x356   : > { %13462 = vst [vmem:[#allocation85_spill] sm:$0xff] %v9479_v58 }
 0x357   : > { %v2130_v20 = vmax.f32 %v2061_v25, 0.0  ;;  %1584 = vrot.lane.b32.xlu1 %v6779_v23, %s13448_s19  ;;  %v2509_v23 = vsel %vm2472_vm14, %v2506_v5, %v2508_v37  ;;  %v13463_v5 = vld [vmem:[#allocation21_spill] sm:$0xff] }
 0x358   : > { %1586 = vrot.lane.b32.xlu0 %v6780_v24, %s13448_s19  ;;  %v2157_v24 = vadd.s32 7, %v8921_v57  ;;  %s6913_s19 = sadd.s32 4294967294, %s13822_s24  ;;  %s6952_s24 = sshll.u32 %s6404_s18, 3 }
 0x359   : > { %v2259_v32 = vsel %vm9439_vm10, %v2130_v20, 0.0  ;;  %v9470_v30 = vpop.permute.xlu2 %2578  ;;  %s6406_s25 = scalar_lea.hbm %s13137_s7, %s6952_s24  ;;  %s7475_s24 = scalar_lea.hbm %s13137_s7, 32 }
 0x35a   : > { %v2330_v45 = vrot.slane %v2259_v32, 6  ;;  %v2573_v16 = vpop.permute.xlu1 %2572  ;;  %vm2173_vm12 = vcmp.ge.s32.totalorder %v2157_v24, 0  ;;  %vm2189_vm15 = vcmp.lt.s32.totalorder %v2157_v24, 16 }
 0x35b   : > { %v3202_v19 = vsel %vm3200_vm0, %v8994_v62, %v2573_v16  ;;  %vm9506_vm10 = vmand %vm2173_vm12, %vm2189_vm15 }
 0x35c   : > { %v9476_v3 = vsel %vm2310_vm13, %v2329_v56, %v2330_v45  ;;  %3492 = vmatmul.f32.gmra.mxu1 %v3202_v19  ;;  %3920 = vmatmul.f32.gmra.mxu0 %v3202_v19  ;;  %v3132_v56 = vrot.slane %v9393_v6, 4 }
 0x35d   : > { %6830 = vmatmul.msk.f32.gmra.mxu3 %vm3200_vm0, %v9479_v58  ;;  %v2510_v28 = vrot.slane %v9476_v3, 1  ;;  %v7442_v58 = vld [vmem:[%s7688_s11 + $0x90] sm:$0xff] }
 0x35f   : > { %v2511_v25 = vsel %vm2472_vm14, %v2508_v37, %v2510_v28  ;;  %v1643_v37 = vsel %vm1624_vm1, %v7442_v58, %v13463_v5  ;;  %v13469_v58 = vld [vmem:[#allocation95_spill] sm:$0xff] }
 0x360   : > { %v7066_v20 = vpack.i.bf16 %v2511_v25, %v2509_v23  ;;  %v9497_v23 = vsel %vm3102_vm11, %v3130_v59, %v3132_v56  ;;  %v13465_v25 = vld [vmem:[#allocation33_spill] sm:$0xff]  ;;  %v13470_v5 = vld [vmem:[#allocation107_spill] sm:$0xff] }
 0x361   : > { %v2575_v32 = vpop.permute.xlu0 %2574  ;;  %v9488_v16 = vpop.permute.xlu2 %1440  ;;  %13464 = vst [vmem:[#allocation112_spill] sm:$0xff] %v9497_v23  ;;  %v1676_v51 = vsel %vm1657_vm2, %v1643_v37, %v13465_v25 }
 0x362   : > { %7067 = vrot.lane.b32.xlu2 %v7066_v20, %s7559_s21  ;;  %v1437_v34 = vpop.permute.xlu1 %1436  ;;  %v3203_v19 = vsel %vm3200_vm0, %v9009_v9, %v2575_v32  ;;  %v13466_v32 = vld [vmem:[#allocation68_spill] sm:$0xff]  ;;  %v9517_v25 = vpop.f32.mrf.mxu3 }
 0x363   : > { %v1709_v24 = vsel %vm1690_vm3, %v1676_v51, %v13466_v32 }
 0x364   : > { %v2063_v50 = vpop.f32.mrf.mxu0  ;;  %3495 = vmatmul.f32.gmra.mxu1 %v3203_v19  ;;  %3922 = vmatmul.f32.gmra.mxu0 %v3203_v19  ;;  %v1742_v59 = vsel %vm1723_vm5, %v1709_v24, %v13469_v58 }
 0x365   : > { %v2064_v20 = vadd.f32 %v8917_v18, %v2063_v50  ;;  %6831 = vmatmul.msk.f32.gmra.mxu3 %vm3200_vm0, %v9497_v23  ;;  %v1775_v37 = vsel %vm1756_vm4, %v1742_v59, %v13470_v5  ;;  %v9515_v50 = vsel %vm2310_vm13, %v2330_v45, 0.0  ;;  %v3134_v23 = vrot.slane %v9411_v49, 4 }
 0x366   : > { %v1808_v51 = vsel %vm1789_vm6, %v1775_v37, %v8761_v48  ;;  %v2512_v59 = vrot.slane %v9515_v50, 1  ;;  %v3204_v5 = vsel %vm3200_vm0, %v9058_v14, %v9450_v52  ;;  %v1644_v48 = vsel %vm1624_vm1, %v7443_v22, %v13471_v1  ;;  %v13474_v1 = vld [vmem:[#allocation58_spill] sm:$0xff] }
 0x367   : > { %v2131_v19 = vmax.f32 %v2064_v20, 0.0  ;;  %v1841_v12 = vsel %vm1822_vm8, %v1808_v51, %v1437_v34  ;;  %v9540_v34 = vsel %vm3102_vm11, %v3132_v56, %v3134_v23 }
 0x368   : > { %13472 = vst [vmem:[#allocation7_spill] sm:$0xff] %v9540_v34 }
 0x369   : > { %v2260_v32 = vsel %vm9506_vm10, %v2131_v19, 0.0  ;;  %v9536_v19 = vpop.permute.xlu2 %1442 }
 0x36a   : > { %v2332_v24 = vrot.slane %v2260_v32, 6  ;;  %v1565_v20 = vpop.permute.xlu0 %1564  ;;  %v1439_v58 = vpop.permute.xlu1 %1438  ;;  %v13475_v32 = vld [vmem:[#allocation94_spill] sm:$0xff] }
 0x36b   : > { %v1874_v45 = vsel %vm1855_vm7, %v1841_v12, %v1565_v20  ;;  %v13473_v12 = vld [vmem:[#allocation46_spill] sm:$0xff] }
 0x36c   : > { %v9534_v37 = vsel %vm2310_vm13, 0.0, %v2332_v24  ;;  %6802 = vmatmul.msk.f32.gmra.mxu2 %vm1903_vm9, %v1874_v45  ;;  %3497 = vmatmul.f32.gmra.mxu1 %v3204_v5  ;;  %v1677_v51 = vsel %vm1657_vm2, %v1644_v48, %v13473_v12  ;;  %v2513_v45 = vsel %vm2472_vm14, %v2510_v28, %v2512_v59 }
 0x36d   : > { %v2514_v52 = vrot.slane %v9534_v37, 1  ;;  %3924 = vmatmul.f32.gmra.mxu0 %v3204_v5  ;;  %6832 = vmatmul.msk.f32.gmra.mxu3 %vm3200_vm0, %v9540_v34  ;;  %v1710_v22 = vsel %vm1690_vm3, %v1677_v51, %v13474_v1 }
 0x36e   : > { %v1743_v20 = vsel %vm1723_vm5, %v1710_v22, %v13475_v32 }
 0x36f   : > { %v2515_v56 = vsel %vm2472_vm14, %v2512_v59, %v2514_v52  ;;  %v1776_v48 = vsel %vm1756_vm4, %v1743_v20, %v13476_v60  ;;  %v3205_v60 = vsel %vm3200_vm0, %v9091_v53, %v9470_v30  ;;  %v7444_v20 = vld [vmem:[%s7688_s11 + $0xa0] sm:$0xff]  ;;  %v2158_v30 = vadd.s32 8, %v8921_v57 }
 0x370   : > { %v9555_v12 = vpop.f32.mrf.mxu3  ;;  %v7071_v5 = vpack.i.bf16 %v2515_v56, %v2513_v45  ;;  %v1809_v34 = vsel %vm1789_vm6, %v1776_v48, %v8816_v8  ;;  %v13477_v45 = vld [vmem:[#allocation10_spill] sm:$0xff]  ;;  %v9572_v8 = vsel %vm3102_vm11, %v3134_v23, %v3136_v43  ;;  %v13480_v48 = vld [vmem:[#allocation72_spill] sm:$0xff] }
 0x371   : > { %v1842_v51 = vsel %vm1822_vm8, %v1809_v34, %v1439_v58  ;;  %v1645_v56 = vsel %vm1624_vm1, %v7444_v20, %v13477_v45  ;;  %13478 = vst [vmem:[#allocation36_spill] sm:$0xff] %v9572_v8  ;;  %v13479_v58 = vld [vmem:[#allocation45_spill] sm:$0xff]  ;;  %vm2174_vm12 = vcmp.ge.s32.totalorder %v2158_v30, 0  ;;  %vm2190_vm15 = vcmp.lt.s32.totalorder %v2158_v30, 16 }
 0x372   : > { %v1567_v1 = vpop.permute.xlu0 %1566  ;;  %v2066_v22 = vpop.f32.mrf.mxu2  ;;  %7072 = vrot.lane.b32.xlu1 %v7071_v5, %s7559_s21 }
 0x373   : > { %v2067_v28 = vadd.f32 %v8917_v18, %v2066_v22  ;;  %v2581_v59 = vpop.permute.xlu1 %2580  ;;  %v1875_v32 = vsel %vm1855_vm7, %v1842_v51, %v1567_v1  ;;  %v1678_v18 = vsel %vm1657_vm2, %v1645_v56, %v13479_v58  ;;  %v9581_v51 = vpop.permute.xlu2 %2586  ;;  %v13481_v1 = vld [vmem:[#allocation84_spill] sm:$0xff]  ;;  %v3138_v56 = vrot.slane %v9464_v54, 4 }
 0x374   : > { %6803 = vmatmul.msk.f32.gmra.mxu2 %vm1903_vm9, %v1875_v32  ;;  %3500 = vmatmul.f32.gmra.mxu1 %v3205_v60  ;;  %v1711_v5 = vsel %vm1690_vm3, %v1678_v18, %v13480_v48  ;;  %v13482_v32 = vld [vmem:[#allocation120_spill] sm:$0xff] }
 0x375   : > { %v2132_v34 = vmax.f32 %v2067_v28, 0.0  ;;  %3926 = vmatmul.f32.gmra.mxu0 %v3205_v60  ;;  %6833 = vmatmul.msk.f32.gmra.mxu3 %vm3200_vm0, %v9572_v8  ;;  %v1744_v22 = vsel %vm1723_vm5, %v1711_v5, %v13481_v1 }
 0x376   : > { %v1777_v28 = vsel %vm1756_vm4, %v1744_v22, %v13482_v32  ;;  %v13484_v32 = vld [vmem:[#allocation23_spill] sm:$0xff] }
 0x377   : > { %v2261_v23 = vsel %vm9506_vm10, %v2132_v34, 0.0  ;;  %v1810_v45 = vsel %vm1789_vm6, %v1777_v28, %v8814_v15  ;;  %v9606_v15 = vld [vmem:[%s13132_s2] ss:$0 sm:$0xff]  ;;  %vm9617_vm10 = vmand %vm2174_vm12, %vm2190_vm15 }
 0x378   : > { %v2333_v60 = vrot.slane %v2261_v23, 6  ;;  %v9589_v20 = vpop.f32.mrf.mxu3  ;;  %v1843_v58 = vsel %vm1822_vm8, %v1810_v45, %v9488_v16  ;;  %v3206_v16 = vsel %vm3200_vm0, %v9113_v26, %v2581_v59  ;;  %v7446_v23 = vld [vmem:[%s7688_s11 + $0xa8] sm:$0xff]  ;;  %v9624_v59 = vsel %vm3102_vm11, %v3136_v43, %v3138_v56 }
 0x379   : > { %13483 = vst [vmem:[#allocation63_spill] sm:$0xff] %v9589_v20  ;;  %v1646_v28 = vsel %vm1624_vm1, %v7446_v23, %v13484_v32  ;;  %v13488_v32 = vld [vmem:[#allocation35_spill] sm:$0xff] }
 0x37a   : > { %v9597_v7 = vsel %vm2310_vm13, %v2332_v24, %v2333_v60  ;;  %v9600_v18 = vsel %vm2310_vm13, %v2333_v60, 0.0  ;;  %v2069_v34 = vpop.f32.mrf.mxu2  ;;  %v2583_v48 = vpop.permute.xlu0 %2582  ;;  %13487 = vst [vmem:[#allocation80_spill] sm:$0xff] %v9624_v59  ;;  %v1679_v30 = vsel %vm1657_vm2, %v1646_v28, %v13488_v32 }
 0x37b   : > { %v2518_v5 = vrot.slane %v9600_v18, 1  ;;  %v2070_v1 = vadd.f32 %v9606_v15, %v2069_v34  ;;  %v1569_v22 = vpop.permute.xlu1 %1568  ;;  %v2516_v24 = vrot.slane %v9597_v7, 1 }
 0x37c   : > { %v1876_v45 = vsel %vm1855_vm7, %v1843_v58, %v1569_v22  ;;  %3503 = vmatmul.f32.gmra.mxu1 %v3206_v16  ;;  %v13489_v58 = vld [vmem:[#allocation71_spill] sm:$0xff] }
 0x37d   : > { %v2133_v34 = vmax.f32 %v2070_v1, 0.0  ;;  %6804 = vmatmul.msk.f32.gmra.mxu2 %vm1903_vm9, %v1876_v45  ;;  %3928 = vmatmul.f32.gmra.mxu0 %v3206_v16  ;;  %v2517_v20 = vsel %vm2472_vm14, %v2514_v52, %v2516_v24  ;;  %v2519_v23 = vsel %vm2472_vm14, %v2516_v24, %v2518_v5  ;;  %v1712_v1 = vsel %vm1690_vm3, %v1679_v30, %v13489_v58  ;;  %v13490_v16 = vld [vmem:[#allocation97_spill] sm:$0xff]  ;;  %v9638_v45 = vpop.permute.xlu2 %2588  ;;  %v13492_v24 = vld [vmem:[#allocation110_spill] sm:$0xff] }
 0x37e   : > { %6834 = vmatmul.msk.f32.gmra.mxu3 %vm3200_vm0, %v9624_v59  ;;  %v7076_v8 = vpack.i.bf16 %v2519_v23, %v2517_v20  ;;  %v1745_v43 = vsel %vm1723_vm5, %v1712_v1, %v13490_v16  ;;  %v3140_v20 = vrot.slane %v9476_v3, 4 }
 0x37f   : > { %v2262_v22 = vsel %vm9617_vm10, %v2133_v34, 0.0  ;;  %v1778_v28 = vsel %vm1756_vm4, %v1745_v43, %v13492_v24 }
 0x380   : > { %7077 = vrot.lane.b32.xlu2 %v7076_v8, %s7559_s21  ;;  %v9641_v52 = vpop.f32.mrf.mxu3  ;;  %v1811_v23 = vsel %vm1789_vm6, %v1778_v28, %v8831_v31  ;;  %v2335_v32 = vrot.slane %v2262_v22, 6  ;;  %v3207_v8 = vsel %vm3200_vm0, %v9134_v46, %v2583_v48  ;;  %v9656_v31 = vsel %vm3102_vm11, %v3138_v56, %v3140_v20 }
 0x381   : > { %13491 = vst [vmem:[#allocation111_spill] sm:$0xff] %v9641_v52  ;;  %v1844_v58 = vsel %vm1822_vm8, %v1811_v23, %v9536_v19 }
 0x382   : > { %v2072_v30 = vpop.f32.mrf.mxu2  ;;  %v2585_v34 = vpop.permute.xlu0 %2584  ;;  %13493 = vst [vmem:[#allocation15_spill] sm:$0xff] %v9656_v31  ;;  %v9659_v22 = vsel %vm2310_vm13, 0.0, %v2335_v32 }
 0x383   : > { %v2073_v1 = vadd.f32 %v9606_v15, %v2072_v30  ;;  %v1571_v16 = vpop.permute.xlu1 %1570  ;;  %v2520_v28 = vrot.slane %v9659_v22, 1  ;;  %v3208_v60 = vsel %vm3200_vm0, %v9158_v35, %v2585_v34 }
 0x384   : > { %v1877_v52 = vsel %vm1855_vm7, %v1844_v58, %v1571_v16  ;;  %3505 = vmatmul.f32.gmra.mxu1 %v3207_v8  ;;  %v13494_v16 = vld [vmem:[#allocation22_spill] sm:$0xff] }
 0x385   : > { %v2134_v43 = vmax.f32 %v2073_v1, 0.0  ;;  %6805 = vmatmul.msk.f32.gmra.mxu2 %vm1903_vm9, %v1877_v52  ;;  %3930 = vmatmul.f32.gmra.mxu0 %v3207_v8  ;;  %v3142_v52 = vrot.slane %v9515_v50, 4  ;;  %v9675_v23 = vpop.permute.xlu2 %2590  ;;  %v7447_v1 = vld [vmem:[%s7688_s11 + $0xb0] sm:$0xff] }
 0x386   : > { %6835 = vmatmul.msk.f32.gmra.mxu3 %vm3200_vm0, %v9656_v31  ;;  %v1647_v8 = vsel %vm1624_vm1, %v7447_v1, %v13494_v16  ;;  %v13497_v31 = vld [vmem:[#allocation61_spill] sm:$0xff]  ;;  %v13498_v16 = vld [vmem:[#allocation96_spill] sm:$0xff] }
 0x387   : > { %v9665_v19 = vsel %vm9617_vm10, %v2134_v43, 0.0  ;;  %v13495_v43 = vld [vmem:[#allocation48_spill] sm:$0xff] }
 0x388   : > { %v13157_v48 = vrot.slane %v9665_v19, 6  ;;  %v3782_v24 = vpop.f32.mrf.mxu3 }
 0x389   : > { %v1680_v24 = vsel %vm1657_vm2, %v1647_v8, %v13495_v43 }
 0x38a   : > { %v9673_v56 = vsel %vm2310_vm13, %v2335_v32, %v13157_v48  ;;  %v1445_v30 = vpop.permute.xlu0 %1444  ;;  %v9686_v32 = vsel %vm3102_vm11, %v3140_v20, %v3142_v52  ;;  %v2521_v48 = vsel %vm2472_vm14, %v2518_v5, %v2520_v28  ;;  %v1713_v59 = vsel %vm1690_vm3, %v1680_v24, %v13497_v31  ;;  %v13499_v20 = vld [vmem:[#allocation123_spill] sm:$0xff] }
 0x38b   : > { %v13160_v58 = vrot.slane %v9673_v56, 1  ;;  %13496 = vst [vmem:[#allocation31_spill] sm:$0xff] %v9686_v32  ;;  %v1447_v8 = vpop.permute.xlu1 %1446  ;;  %v3144_v31 = vrot.slane %v9534_v37, 4 }
 0x38c   : > { %3508 = vmatmul.f32.gmra.mxu1 %v3208_v60 }
 0x38d   : > { %3932 = vmatmul.f32.gmra.mxu0 %v3208_v60  ;;  %v2523_v34 = vsel %vm2472_vm14, %v2520_v28, %v13160_v58  ;;  %v1746_v60 = vsel %vm1723_vm5, %v1713_v59, %v13498_v16  ;;  %v3209_v59 = vsel %vm3200_vm0, %v9172_v0, %v9581_v51  ;;  %v13501_v16 = vld [vmem:[#allocation13_spill] sm:$0xff]  ;;  %v13505_v51 = vld [vmem:[#allocation87_spill] sm:$0xff] }
 0x38e   : > { %6836 = vmatmul.msk.f32.gmra.mxu3 %vm3200_vm0, %v9686_v32  ;;  %v7081_v1 = vpack.i.bf16 %v2523_v34, %v2521_v48  ;;  %v1779_v43 = vsel %vm1756_vm4, %v1746_v60, %v13499_v20  ;;  %v7448_v34 = vld [vmem:[%s7688_s11 + $0xb8] sm:$0xff]  ;;  %v1451_v60 = vpop.permute.xlu2 %1450 }
 0x38f   : > { %v1812_v28 = vsel %vm1789_vm6, %v1779_v43, %v8849_v42  ;;  %v13502_v42 = vld [vmem:[#allocation47_spill] sm:$0xff]  ;;  %v13509_v32 = vld [vmem:[#allocation38_spill] sm:$0xff] }
 0x390   : > { %7082 = vrot.lane.b32.xlu0 %v7081_v1, %s7559_s21  ;;  %v9701_v5 = vpop.f32.mrf.mxu3  ;;  %v1845_v24 = vsel %vm1822_vm8, %v1812_v28, %v1445_v30  ;;  %v1648_v1 = vsel %vm1624_vm1, %v7448_v34, %v13501_v16  ;;  %v9718_v30 = vsel %vm3102_vm11, %v3142_v52, %v3144_v31  ;;  %v3146_v52 = vrot.slane %v9597_v7, 4 }
 0x391   : > { %13500 = vst [vmem:[#allocation62_spill] sm:$0xff] %v9701_v5  ;;  %v1681_v20 = vsel %vm1657_vm2, %v1648_v1, %v13502_v42  ;;  %v7449_v1 = vld [vmem:[%s7688_s11 + $0xc0] sm:$0xff]  ;;  %v13508_v42 = vld [vmem:[#allocation25_spill] sm:$0xff] }
 0x392   : > { %v1573_v58 = vpop.permute.xlu0 %1572  ;;  %13503 = vst [vmem:[#allocation89_spill] sm:$0xff] %v9718_v30 }
 0x393   : > { %v1878_v48 = vsel %vm1855_vm7, %v1845_v24, %v1573_v58  ;;  %v13504_v58 = vld [vmem:[#allocation74_spill] sm:$0xff]  ;;  %v1449_v16 = vpop.permute.xlu1 %1448 }
 0x394   : > { %6806 = vmatmul.msk.f32.gmra.mxu2 %vm1903_vm9, %v1878_v48  ;;  %3511 = vmatmul.f32.gmra.mxu1 %v3209_v59  ;;  %v1714_v43 = vsel %vm1690_vm3, %v1681_v20, %v13504_v58  ;;  %v13506_v24 = vld [vmem:[#allocation122_spill] sm:$0xff]  ;;  %v1649_v20 = vsel %vm1624_vm1, %v7449_v1, %v13508_v42 }
 0x395   : > { %3934 = vmatmul.f32.gmra.mxu0 %v3209_v59  ;;  %v1747_v28 = vsel %vm1723_vm5, %v1714_v43, %v13505_v51  ;;  %v1682_v43 = vsel %vm1657_vm2, %v1649_v20, %v13509_v32  ;;  %v13513_v32 = vld [vmem:[#allocation113_spill] sm:$0xff] }
 0x396   : > { %6837 = vmatmul.msk.f32.gmra.mxu3 %vm3200_vm0, %v9718_v30  ;;  %v1780_v48 = vsel %vm1756_vm4, %v1747_v28, %v13506_v24  ;;  %v3210_v28 = vsel %vm3200_vm0, %v9198_v27, %v9638_v45  ;;  %v1577_v1 = vpop.permute.xlu2 %1576 }
 0x397   : > { %v1813_v59 = vsel %vm1789_vm6, %v1780_v48, %v8812_v61  ;;  %v13510_v61 = vld [vmem:[#allocation73_spill] sm:$0xff]  ;;  %v13511_v48 = vld [vmem:[#allocation99_spill] sm:$0xff] }
 0x398   : > { %v9728_v34 = vpop.f32.mrf.mxu3  ;;  %v1846_v58 = vsel %vm1822_vm8, %v1813_v59, %v1447_v8  ;;  %v1715_v24 = vsel %vm1690_vm3, %v1682_v43, %v13510_v61  ;;  %v9749_v59 = vsel %vm3102_vm11, %v3144_v31, %v3146_v52  ;;  %v3148_v43 = vrot.slane %v9600_v18, 4  ;;  %v13514_v61 = vld [vmem:[#allocation24_spill] sm:$0xff] }
 0x399   : > { %13507 = vst [vmem:[#allocation105_spill] sm:$0xff] %v9728_v34  ;;  %v1748_v8 = vsel %vm1723_vm5, %v1715_v24, %v13511_v48  ;;  %v3211_v31 = vsel %vm3200_vm0, %v9239_v17, %v9675_v23  ;;  %v13518_v23 = vld [vmem:[#allocation98_spill] sm:$0xff] }
 0x39a   : > { %v1575_v30 = vpop.permute.xlu0 %1574  ;;  %13512 = vst [vmem:[#allocation14_spill] sm:$0xff] %v9749_v59 }
 0x39b   : > { %v1879_v51 = vsel %vm1855_vm7, %v1846_v58, %v1575_v30  ;;  %v1781_v30 = vsel %vm1756_vm4, %v1748_v8, %v13513_v32  ;;  %v9770_v8 = vsel %vm3102_vm11, %v3146_v52, %v3148_v43  ;;  %v13517_v32 = vld [vmem:[#allocation64_spill] sm:$0xff] }
 0x39c   : > { %6807 = vmatmul.msk.f32.gmra.mxu2 %vm1903_vm9, %v1879_v51  ;;  %3513 = vmatmul.f32.gmra.mxu1 %v3210_v28  ;;  %v1814_v45 = vsel %vm1789_vm6, %v1781_v30, %v8868_v21  ;;  %v13515_v21 = vld [vmem:[#allocation50_spill] sm:$0xff]  ;;  %13516 = vst [vmem:[#allocation40_spill] sm:$0xff] %v9770_v8 }
 0x39d   : > { %3936 = vmatmul.f32.gmra.mxu0 %v3210_v28  ;;  %v1847_v42 = vsel %vm1822_vm8, %v1814_v45, %v1449_v16  ;;  %v7450_v28 = vld [vmem:[%s7688_s11 + $0xc8] sm:$0xff] }
 0x39e   : > { %6838 = vmatmul.msk.f32.gmra.mxu3 %vm3200_vm0, %v9749_v59  ;;  %v1880_v51 = vsel %vm1855_vm7, %v1847_v42, %v1577_v1  ;;  %v1650_v24 = vsel %vm1624_vm1, %v7450_v28, %v13514_v61  ;;  %v13519_v45 = vld [vmem:[#allocation125_spill] sm:$0xff]  ;;  %v3150_v28 = vrot.slane %v9659_v22, 4 }
 0x39f   : > { %v1683_v16 = vsel %vm1657_vm2, %v1650_v24, %v13515_v21 }
 0x3a0   : > { %v3790_v20 = vpop.f32.mrf.mxu3  ;;  %v1716_v30 = vsel %vm1690_vm3, %v1683_v16, %v13517_v32  ;;  %v9791_v16 = vsel %vm3102_vm11, %v3148_v43, %v3150_v28  ;;  %v13524_v43 = vrot.slane %v9665_v19, 6  ;;  %v13526_v19 = vld [vmem:[#allocation49_spill] sm:$0xff] }
 0x3a1   : > { %v2593_v58 = vpop.permute.xlu1 %2592  ;;  %v1749_v1 = vsel %vm1723_vm5, %v1716_v30, %v13518_v23  ;;  %v1579_v20 = vpop.permute.xlu2 %1578  ;;  %13521 = vst [vmem:[#allocation88_spill] sm:$0xff] %v9791_v16  ;;  %v3152_v30 = vrot.slane %v9673_v56, 4 }
 0x3a2   : > { %v1453_v48 = vpop.permute.xlu0 %1452  ;;  %v1782_v42 = vsel %vm1756_vm4, %v1749_v1, %v13519_v45  ;;  %v3212_v21 = vsel %vm3200_vm0, %v9260_v41, %v2593_v58  ;;  %v9806_v1 = vsel %vm2310_vm13, %v13524_v43, 0.0 }
 0x3a3   : > { %v9801_v23 = vsel %vm3102_vm11, %v3150_v28, %v3152_v30 }
 0x3a4   : > { %6808 = vmatmul.msk.f32.gmra.mxu2 %vm1903_vm9, %v1880_v51  ;;  %3516 = vmatmul.f32.gmra.mxu1 %v3211_v31  ;;  %13523 = vst [vmem:[#allocation30_spill] sm:$0xff] %v9801_v23 }
 0x3a5   : > { %3938 = vmatmul.f32.gmra.mxu0 %v3211_v31  ;;  %v1815_v31 = vsel %vm1789_vm6, %v1782_v42, %v8888_v47 }
 0x3a6   : > { %6839 = vmatmul.msk.f32.gmra.mxu3 %vm3200_vm0, %v9770_v8  ;;  %v1848_v61 = vsel %vm1822_vm8, %v1815_v31, %v1451_v60  ;;  %v13165_v31 = vrot.slane %v9806_v1, 4  ;;  %v13533_v8 = vld [vmem:[#allocation41_spill] sm:$0xff] }
 0x3a7   : > { %v1881_v24 = vsel %vm1855_vm7, %v1848_v61, %v1579_v20  ;;  %v13525_v61 = vld [vmem:[#allocation16_spill] sm:$0xff] }
 0x3a8   : > { %v9780_v51 = vpop.f32.mrf.mxu3 }
 0x3a9   : > { %13520 = vst [vmem:[#allocation56_spill] sm:$0xff] %v9780_v51  ;;  %v2595_v52 = vpop.permute.xlu1 %2594 }
 0x3aa   : > { %v1455_v47 = vpop.permute.xlu0 %1454  ;;  %v3213_v58 = vsel %vm3200_vm0, %v9315_v40, %v2595_v52  ;;  %v7451_v52 = vld [vmem:[%s7688_s11 + $0xd0] sm:$0xff] }
 0x3ac   : > { %6809 = vmatmul.msk.f32.gmra.mxu2 %vm1903_vm9, %v1881_v24  ;;  %3519 = vmatmul.f32.gmra.mxu1 %v3212_v21  ;;  %v1651_v24 = vsel %vm1624_vm1, %v7451_v52, %v13525_v61 }
 0x3ad   : > { %3940 = vmatmul.f32.gmra.mxu0 %v3212_v21  ;;  %v1684_v21 = vsel %vm1657_vm2, %v1651_v24, %v13526_v19 }
 0x3ae   : > { %6840 = vmatmul.msk.f32.gmra.mxu3 %vm3200_vm0, %v9791_v16  ;;  %v13529_v16 = vld [vmem:[#allocation90_spill] sm:$0xff] }
 0x3b0   : > { %v9795_v32 = vpop.f32.mrf.mxu3 }
 0x3b1   : > { %13522 = vst [vmem:[#allocation115_spill] sm:$0xff] %v9795_v32  ;;  %v2597_v60 = vpop.permute.xlu1 %2596 }
 0x3b2   : > { %v2599_v42 = vpop.permute.xlu0 %2598  ;;  %v3214_v28 = vsel %vm3200_vm0, %v9355_v44, %v2597_v60  ;;  %v13530_v60 = vld [vmem:[#allocation124_spill] sm:$0xff] }
 0x3b4   : > { %3521 = vmatmul.f32.gmra.mxu1 %v3213_v58 }
 0x3b5   : > { %3942 = vmatmul.f32.gmra.mxu0 %v3213_v58  ;;  %v13527_v58 = vld [vmem:[#allocation76_spill] sm:$0xff] }
 0x3b6   : > { %6841 = vmatmul.msk.f32.gmra.mxu3 %vm3200_vm0, %v9801_v23  ;;  %v1717_v43 = vsel %vm1690_vm3, %v1684_v21, %v13527_v58  ;;  %v9823_v23 = vsel %vm3102_vm11, %v3152_v30, %v13165_v31  ;;  %v13532_v21 = vld [vmem:[#allocation27_spill] sm:$0xff] }
 0x3b7   : > { %13528 = vst [vmem:[#allocation44_spill] sm:$0xff] %v9823_v23  ;;  %v1750_v52 = vsel %vm1723_vm5, %v1717_v43, %v13529_v16 }
 0x3b8   : > { %v3798_v45 = vpop.f32.mrf.mxu3  ;;  %v1783_v61 = vsel %vm1756_vm4, %v1750_v52, %v13530_v60 }
 0x3b9   : > { %v1457_v20 = vpop.permute.xlu1 %1456  ;;  %v1459_v45 = vpop.permute.xlu2 %1458  ;;  %v1816_v24 = vsel %vm1789_vm6, %v1783_v61, %v8896_v10  ;;  %v3215_v10 = vsel %vm3200_vm0, %v9383_v13, %v2599_v42  ;;  %v13535_v61 = vld [vmem:[#allocation101_spill] sm:$0xff]  ;;  %v13538_v42 = vld [vmem:[#allocation26_spill] sm:$0xff] }
 0x3ba   : > { %v1849_v30 = vsel %vm1822_vm8, %v1816_v24, %v1453_v48  ;;  %v2601_v60 = vpop.permute.xlu0 %2600  ;;  %v13536_v48 = vld [vmem:[#allocation116_spill] sm:$0xff] }
 0x3bc   : > { %3524 = vmatmul.f32.gmra.mxu1 %v3214_v28 }
 0x3bd   : > { %3945 = vmatmul.f32.gmra.mxu0 %v3214_v28  ;;  %v7452_v28 = vld [vmem:[%s7688_s11 + $0xd8] sm:$0xff] }
 0x3be   : > { %6842 = vmatmul.msk.f32.gmra.mxu3 %vm3200_vm0, %v9823_v23  ;;  %v1652_v58 = vsel %vm1624_vm1, %v7452_v28, %v13532_v21  ;;  %v13534_v23 = vld [vmem:[#allocation75_spill] sm:$0xff] }
 0x3bf   : > { %v1685_v16 = vsel %vm1657_vm2, %v1652_v58, %v13533_v8 }
 0x3c0   : > { %v9833_v19 = vpop.f32.mrf.mxu3  ;;  %v1718_v52 = vsel %vm1690_vm3, %v1685_v16, %v13534_v23 }
 0x3c1   : > { %13531 = vst [vmem:[#allocation78_spill] sm:$0xff] %v9833_v19  ;;  %v1581_v31 = vpop.permute.xlu1 %1580  ;;  %v1751_v28 = vsel %vm1723_vm5, %v1718_v52, %v13535_v61  ;;  %v1583_v23 = vpop.permute.xlu2 %1582  ;;  %v13539_v52 = vld [vmem:[#allocation53_spill] sm:$0xff] }
 0x3c2   : > { %v1882_v43 = vsel %vm1855_vm7, %v1849_v30, %v1581_v31  ;;  %v1784_v24 = vsel %vm1756_vm4, %v1751_v28, %v13536_v48  ;;  %v7453_v30 = vld [vmem:[%s7688_s11 + $0xe0] sm:$0xff]  ;;  %v2603_v61 = vpop.permute.xlu0 %2602 }
 0x3c3   : > { %6810 = vmatmul.msk.f32.gmra.mxu2 %vm1903_vm9, %v1882_v43  ;;  %v1817_v8 = vsel %vm1789_vm6, %v1784_v24, %v8894_v55  ;;  %v1653_v16 = vsel %vm1624_vm1, %v7453_v30, %v13538_v42  ;;  %v3216_v43 = vsel %vm3200_vm0, %v9393_v6, %v2601_v60  ;;  %v13541_v28 = vld [vmem:[#allocation100_spill] sm:$0xff]  ;;  %v13542_v24 = vld [vmem:[#allocation127_spill] sm:$0xff] }
 0x3c4   : > { %3527 = vmatmul.f32.gmra.mxu1 %v3215_v10  ;;  %v1850_v31 = vsel %vm1822_vm8, %v1817_v8, %v1455_v47  ;;  %v1686_v55 = vsel %vm1657_vm2, %v1653_v16, %v13539_v52  ;;  %v13540_v47 = vld [vmem:[#allocation67_spill] sm:$0xff]  ;;  %v7454_v52 = vld [vmem:[%s7688_s11 + $0xe8] sm:$0xff]  ;;  %s7561_s11 = smov 96  }
 0x3c5   : > { %3948 = vmatmul.f32.gmra.mxu0 %v3215_v10  ;;  %v1883_v58 = vsel %vm1855_vm7, %v1850_v31, %v1583_v23  ;;  %v1719_v10 = vsel %vm1690_vm3, %v1686_v55, %v13540_v47  ;;  %v3217_v47 = vsel %vm3200_vm0, %v9411_v49, %v2603_v61 }
 0x3c6   : > { %v1752_v48 = vsel %vm1723_vm5, %v1719_v10, %v13541_v28  ;;  %v13545_v10 = vld [vmem:[#allocation52_spill] sm:$0xff] }
 0x3c7   : > { %v1785_v8 = vsel %vm1756_vm4, %v1752_v48, %v13542_v24  ;;  %v13547_v24 = vld [vmem:[#allocation93_spill] sm:$0xff] }
 0x3c8   : > { %v9854_v21 = vpop.f32.mrf.mxu3  ;;  %v1818_v23 = vsel %vm1789_vm6, %v1785_v8, %v8877_v33 }
 0x3c9   : > { %13537 = vst [vmem:[#allocation104_spill] sm:$0xff] %v9854_v21  ;;  %v1585_v31 = vpop.permute.xlu1 %1584  ;;  %v7068_v28 = vpop.permute.xlu2 %7067 }
 0x3cb   : > { %6811 = vmatmul.msk.f32.gmra.mxu2 %vm1903_vm9, %v1883_v58  ;;  %v1851_v58 = vsel %vm1822_vm8, %v1818_v23, %v1457_v20  ;;  %v13546_v20 = vld [vmem:[#allocation79_spill] sm:$0xff] }
 0x3cc   : > { %3529 = vmatmul.f32.gmra.mxu1 %v3216_v43  ;;  %v1884_v16 = vsel %vm1855_vm7, %v1851_v58, %v1585_v31  ;;  %v13548_v31 = vld [vmem:[#allocation126_spill] sm:$0xff]  ;;  %v1587_v58 = vpop.permute.xlu0 %1586 }
 0x3cd   : > { %3950 = vmatmul.f32.gmra.mxu0 %v3216_v43  ;;  %v13544_v43 = vld [vmem:[#allocation19_spill] sm:$0xff] }
 0x3ce   : > { %v1654_v55 = vsel %vm1624_vm1, %v7454_v52, %v13544_v43 }
 0x3cf   : > { %v1687_v33 = vsel %vm1657_vm2, %v1654_v55, %v13545_v10  ;;  %v7070_v10 = vunpack.i.h.bf16 %v7068_v28 }
 0x3d0   : > { %v3806_v60 = vpop.f32.mrf.mxu3  ;;  %v1720_v48 = vsel %vm1690_vm3, %v1687_v33, %v13546_v20 }
 0x3d1   : > { %v9874_v30 = vpop.f32.mrf.mxu1  ;;  %v3919_v42 = vpop.f32.mrf.mxu0  ;;  %v1753_v8 = vsel %vm1723_vm5, %v1720_v48, %v13547_v24  ;;  %v7069_v60 = vunpack.i.l.bf16 %v7068_v28 }
 0x3d2   : > { %13543 = vst [vmem:[#allocation119_spill] sm:$0xff] %v9874_v30  ;;  %v1786_v23 = vsel %vm1756_vm4, %v1753_v8, %v13548_v31 }
 0x3d3   : > { %6812 = vmatmul.msk.f32.gmra.mxu2 %vm1903_vm9, %v1884_v16  ;;  %v1819_v61 = vsel %vm1789_vm6, %v1786_v23, %v8892_v63 }
 0x3d4   : > { %3532 = vmatmul.f32.gmra.mxu1 %v3217_v47  ;;  %v1852_v16 = vsel %vm1822_vm8, %v1819_v61, %v1459_v45  ;;  %v3219_v45 = vsel %vm3200_vm0, %v9464_v54, %v7070_v10 }
 0x3d5   : > { %3953 = vmatmul.f32.gmra.mxu0 %v3217_v47  ;;  %v1885_v55 = vsel %vm1855_vm7, %v1852_v16, %v1587_v58  ;;  %v3218_v47 = vsel %vm3200_vm0, %v9424_v4, %v7069_v60  ;;  %v2159_v60 = vadd.s32 9, %v8921_v57 }
 0x3d7   : > { %vm2175_vm1 = vcmp.ge.s32.totalorder %v2159_v60, 0  ;;  %vm2191_vm2 = vcmp.lt.s32.totalorder %v2159_v60, 16 }
 0x3d8   : > { %v9893_v42 = vpop.f32.mrf.mxu3  ;;  %vm9914_vm3 = vmand %vm2175_vm1, %vm2191_vm2 }
 0x3d9   : > { %13549 = vst [vmem:[#allocation8_spill] sm:$0xff] %v9893_v42  ;;  %v9896_v52 = vpop.f32.mrf.mxu1  ;;  %v3921_v43 = vpop.f32.mrf.mxu0 }
 0x3da   : > { %13550 = vst [vmem:[#allocation39_spill] sm:$0xff] %v9896_v52 }
 0x3db   : > { %6813 = vmatmul.msk.f32.gmra.mxu2 %vm1903_vm9, %v1885_v55 }
 0x3dc   : > { %3535 = vmatmul.f32.gmra.mxu1 %v3218_v47 }
 0x3dd   : > { %3956 = vmatmul.f32.gmra.mxu0 %v3218_v47 }
 0x3e0   : > { %v9902_v33 = vpop.f32.mrf.mxu3 }
 0x3e1   : > { %13551 = vst [vmem:[#allocation66_spill] sm:$0xff] %v9902_v33  ;;  %v3496_v63 = vpop.f32.mrf.mxu1  ;;  %v3923_v20 = vpop.f32.mrf.mxu0 }
 0x3e4   : > { %3537 = vmatmul.f32.gmra.mxu1 %v3219_v45  ;;  %v7073_v48 = vpop.permute.xlu1 %7072 }
 0x3e5   : > { %3958 = vmatmul.f32.gmra.mxu0 %v3219_v45  ;;  %v7074_v24 = vunpack.i.l.bf16 %v7073_v48  ;;  %v7075_v58 = vunpack.i.h.bf16 %v7073_v48  ;;  %v7078_v45 = vpop.permute.xlu2 %7077 }
 0x3e7   : > { %v3220_v28 = vsel %vm3200_vm0, %v9476_v3, %v7074_v24  ;;  %v3221_v20 = vsel %vm3200_vm0, %v9515_v50, %v7075_v58 }
 0x3e8   : > { %v3814_v8 = vpop.f32.mrf.mxu3 }
 0x3e9   : > { %v9906_v31 = vpop.f32.mrf.mxu1  ;;  %v2524_v8 = vrot.slane %v9806_v1, 1 }
 0x3ea   : > { %13552 = vst [vmem:[#allocation81_spill] sm:$0xff] %v9906_v31  ;;  %v3925_v23 = vpop.f32.mrf.mxu0 }
 0x3eb   : > { %v7079_v23 = vunpack.i.l.bf16 %v7078_v45 }
 0x3ec   : > { %3540 = vmatmul.f32.gmra.mxu1 %v3220_v28 }
 0x3ed   : > { %3961 = vmatmul.f32.gmra.mxu0 %v3220_v28 }
 0x3ef   : > { %v2075_v61 = vpop.f32.mrf.mxu2 }
 0x3f0   : > { %v2076_v16 = vadd.f32 %v9606_v15, %v2075_v61  ;;  %v9912_v43 = vpop.f32.mrf.mxu3 }
 0x3f1   : > { %13553 = vst [vmem:[#allocation114_spill] sm:$0xff] %v9912_v43  ;;  %v9918_v47 = vpop.f32.mrf.mxu1  ;;  %v13561_v43 = vrot.slane %v9673_v56, 1 }
 0x3f2   : > { %13556 = vst [vmem:[#allocation29_spill] sm:$0xff] %v9918_v47  ;;  %v2135_v10 = vmax.f32 %v2076_v16, 0.0  ;;  %v3927_v63 = vpop.f32.mrf.mxu0 }
 0x3f3   : > { %v2525_v33 = vsel %vm2472_vm14, %v13561_v43, %v2524_v8  ;;  %v7080_v43 = vunpack.i.h.bf16 %v7078_v45 }
 0x3f4   : > { %v2264_v48 = vsel %vm9914_vm3, %v2135_v10, 0.0  ;;  %3543 = vmatmul.f32.gmra.mxu1 %v3221_v20 }
 0x3f5   : > { %v2338_v24 = vrot.slane %v2264_v48, 6  ;;  %3964 = vmatmul.f32.gmra.mxu0 %v3221_v20  ;;  %v13559_v20 = vrot.slane %v9806_v1, 4 }
 0x3f7   : > { %v9926_v60 = vsel %vm2310_vm13, 0.0, %v2338_v24  ;;  %v2078_v28 = vpop.f32.mrf.mxu2 }
 0x3f8   : > { %13557 = vst [vmem:[#allocation55_spill] sm:$0xff] %v9926_v60  ;;  %v2526_v61 = vrot.slane %v9926_v60, 1  ;;  %v2079_v16 = vadd.f32 %v9606_v15, %v2078_v28  ;;  %v9930_v63 = vpop.f32.mrf.mxu3  ;;  %v3156_v58 = vrot.slane %v9926_v60, 4 }
 0x3f9   : > { %13558 = vst [vmem:[#allocation18_spill] sm:$0xff] %v9930_v63  ;;  %v3504_v30 = vpop.f32.mrf.mxu1 }
 0x3fa   : > { %v2136_v10 = vmax.f32 %v2079_v16, 0.0  ;;  %v3929_v52 = vpop.f32.mrf.mxu0  ;;  %v9936_v48 = vsel %vm3102_vm11, %v13559_v20, %v3156_v58  ;;  %v2527_v59 = vsel %vm2472_vm14, %v2524_v8, %v2526_v61  ;;  %v3222_v30 = vsel %vm3200_vm0, %v9534_v37, %v7079_v23 }
 0x3fb   : > { %13560 = vst [vmem:[#allocation70_spill] sm:$0xff] %v9936_v48  ;;  %6843 = vmatmul.msk.f32.gmra.mxu3 %vm3200_vm0, %v9936_v48  ;;  %v7086_v28 = vpack.i.bf16 %v2527_v59, %v2525_v33  ;;  %v2160_v52 = vadd.s32 10, %v8921_v57 }
 0x3fc   : > { %v2265_v16 = vsel %vm9914_vm3, %v2136_v10, 0.0  ;;  %3545 = vmatmul.f32.gmra.mxu1 %v3222_v30 }
 0x3fd   : > { %v2339_v20 = vrot.slane %v2265_v16, 6  ;;  %7087 = vrot.lane.b32.xlu1 %v7086_v28, %s7559_s21  ;;  %3966 = vmatmul.f32.gmra.mxu0 %v3222_v30  ;;  %vm2176_vm4 = vcmp.ge.s32.totalorder %v2160_v52, 0  ;;  %vm2192_vm5 = vcmp.lt.s32.totalorder %v2160_v52, 16 }
 0x3fe   : > { %vm9962_vm6 = vmand %vm2176_vm4, %vm2192_vm5 }
 0x3ff   : > { %v9951_v8 = vsel %vm2310_vm13, %v2338_v24, %v2339_v20  ;;  %v9954_v48 = vsel %vm2310_vm13, %v2339_v20, 0.0  ;;  %v2161_v24 = vadd.s32 11, %v8921_v57 }
 0x400   : > { %13562 = vst [vmem:[#allocation32_spill] sm:$0xff] %v9951_v8  ;;  %v2530_v59 = vrot.slane %v9954_v48, 1  ;;  %v2081_v33 = vpop.f32.mrf.mxu2  ;;  %v3158_v55 = vrot.slane %v9951_v8, 4  ;;  %v2528_v23 = vrot.slane %v9951_v8, 1 }
 0x401   : > { %13563 = vst [vmem:[#allocation103_spill] sm:$0xff] %v9954_v48  ;;  %v2082_v10 = vadd.f32 %v9606_v15, %v2081_v33  ;;  %v9960_v28 = vpop.f32.mrf.mxu1  ;;  %v3822_v45 = vpop.f32.mrf.mxu3  ;;  %vm2177_vm7 = vcmp.ge.s32.totalorder %v2161_v24, 0  ;;  %vm2193_vm8 = vcmp.lt.s32.totalorder %v2161_v24, 16 }
 0x402   : > { %13564 = vst [vmem:[#allocation65_spill] sm:$0xff] %v9960_v28  ;;  %v3931_v30 = vpop.f32.mrf.mxu0  ;;  %v9967_v16 = vsel %vm3102_vm11, %v3156_v58, %v3158_v55  ;;  %v2529_v52 = vsel %vm2472_vm14, %v2526_v61, %v2528_v23  ;;  %v2531_v20 = vsel %vm2472_vm14, %v2528_v23, %v2530_v59  ;;  %v3223_v45 = vsel %vm3200_vm0, %v9597_v7, %v7080_v43  ;;  %v7083_v42 = vpop.permute.xlu0 %7082  ;;  %vm10017_vm9 = vmand %vm2177_vm7, %vm2193_vm8 }
 0x403   : > { %13567 = vst [vmem:[#allocation130_spill] sm:$0xff] %v9967_v16  ;;  %v2137_v63 = vmax.f32 %v2082_v10, 0.0  ;;  %6844 = vmatmul.msk.f32.gmra.mxu3 %vm3200_vm0, %v9967_v16  ;;  %v7091_v33 = vpack.i.bf16 %v2531_v20, %v2529_v52  ;;  %v3160_v61 = vrot.slane %v9954_v48, 4  ;;  %v7084_v23 = vunpack.i.l.bf16 %v7083_v42 }
 0x404   : > { %3548 = vmatmul.f32.gmra.mxu1 %v3223_v45 }
 0x405   : > { %v2266_v30 = vsel %vm9962_vm6, %v2137_v63, 0.0  ;;  %7092 = vrot.lane.b32.xlu2 %v7091_v33, %s7559_s21  ;;  %3969 = vmatmul.f32.gmra.mxu0 %v3223_v45  ;;  %v9985_v20 = vsel %vm3102_vm11, %v3158_v55, %v3160_v61  ;;  %v3224_v45 = vsel %vm3200_vm0, %v9600_v18, %v7084_v23 }
 0x406   : > { %v2341_v58 = vrot.slane %v2266_v30, 6  ;;  %13570 = vst [vmem:[#allocation17_spill] sm:$0xff] %v9985_v20 }
 0x408   : > { %v2084_v10 = vpop.f32.mrf.mxu2  ;;  %v9988_v63 = vsel %vm2310_vm13, 0.0, %v2341_v58 }
 0x409   : > { %v2085_v21 = vadd.f32 %v9606_v15, %v2084_v10  ;;  %v9980_v16 = vpop.f32.mrf.mxu1  ;;  %v9982_v52 = vpop.f32.mrf.mxu3  ;;  %13571 = vst [vmem:[#allocation43_spill] sm:$0xff] %v9988_v63  ;;  %v2532_v55 = vrot.slane %v9988_v63, 1 }
 0x40a   : > { %13568 = vst [vmem:[#allocation92_spill] sm:$0xff] %v9980_v16  ;;  %v3933_v43 = vpop.f32.mrf.mxu0 }
 0x40b   : > { %13569 = vst [vmem:[#allocation106_spill] sm:$0xff] %v9982_v52  ;;  %v2138_v33 = vmax.f32 %v2085_v21, 0.0  ;;  %6845 = vmatmul.msk.f32.gmra.mxu3 %vm3200_vm0, %v9985_v20  ;;  %v3162_v43 = vrot.slane %v9988_v63, 4  ;;  %v7085_v52 = vunpack.i.h.bf16 %v7083_v42 }
 0x40c   : > { %3551 = vmatmul.f32.gmra.mxu1 %v3224_v45 }
 0x40d   : > { %v2267_v30 = vsel %vm9962_vm6, %v2138_v33, 0.0  ;;  %3972 = vmatmul.f32.gmra.mxu0 %v3224_v45  ;;  %v10005_v16 = vsel %vm3102_vm11, %v3160_v61, %v3162_v43  ;;  %v3225_v42 = vsel %vm3200_vm0, %v9659_v22, %v7085_v52 }
 0x40e   : > { %v2342_v10 = vrot.slane %v2267_v30, 6  ;;  %13573 = vst [vmem:[#allocation91_spill] sm:$0xff] %v10005_v16 }
 0x410   : > { %v9999_v19 = vsel %vm2310_vm13, %v2341_v58, %v2342_v10  ;;  %v2533_v58 = vsel %vm2472_vm14, %v2530_v59, %v2532_v55 }
 0x411   : > { %v3512_v21 = vpop.f32.mrf.mxu1  ;;  %v10001_v32 = vpop.f32.mrf.mxu3  ;;  %v2534_v20 = vrot.slane %v9999_v19, 1  ;;  %v3164_v61 = vrot.slane %v9999_v19, 4 }
 0x412   : > { %13572 = vst [vmem:[#allocation57_spill] sm:$0xff] %v10001_v32  ;;  %v3935_v23 = vpop.f32.mrf.mxu0 }
 0x413   : > { %6846 = vmatmul.msk.f32.gmra.mxu3 %vm3200_vm0, %v10005_v16  ;;  %v2535_v33 = vsel %vm2472_vm14, %v2532_v55, %v2534_v20 }
 0x414   : > { %3553 = vmatmul.f32.gmra.mxu1 %v3225_v42  ;;  %v7096_v45 = vpack.i.bf16 %v2535_v33, %v2533_v58  ;;  %v10027_v58 = vsel %vm2310_vm13, %v2342_v10, 0.0 }
 0x415   : > { %3974 = vmatmul.f32.gmra.mxu0 %v3225_v42  ;;  %v10024_v42 = vsel %vm3102_vm11, %v3162_v43, %v3164_v61 }
 0x416   : > { %7097 = vrot.lane.b32.xlu0 %v7096_v45, %s7559_s21  ;;  %13577 = vst [vmem:[#allocation9_spill] sm:$0xff] %v10024_v42  ;;  %v2536_v45 = vrot.slane %v10027_v58, 1 }
 0x417   : > { %v2087_v30 = vpop.f32.mrf.mxu2 }
 0x418   : > { %v2088_v21 = vadd.f32 %v9606_v15, %v2087_v30  ;;  %v3166_v30 = vrot.slane %v10027_v58, 4  ;;  %v2537_v51 = vsel %vm2472_vm14, %v2534_v20, %v2536_v45 }
 0x419   : > { %v10021_v52 = vpop.f32.mrf.mxu1  ;;  %v3830_v59 = vpop.f32.mrf.mxu3 }
 0x41a   : > { %13576 = vst [vmem:[#allocation118_spill] sm:$0xff] %v10021_v52  ;;  %v2139_v55 = vmax.f32 %v2088_v21, 0.0  ;;  %v3937_v16 = vpop.f32.mrf.mxu0  ;;  %v10046_v52 = vsel %vm3102_vm11, %v3164_v61, %v3166_v30 }
 0x41b   : > { %6847 = vmatmul.msk.f32.gmra.mxu3 %vm3200_vm0, %v10024_v42  ;;  %v2162_v42 = vadd.s32 12, %v8921_v57  ;;  %13580 = vst [vmem:[#allocation69_spill] sm:$0xff] %v10046_v52 }
 0x41c   : > { %v2268_v24 = vsel %vm10017_vm9, %v2139_v55, 0.0 }
 0x41d   : > { %v2344_v33 = vrot.slane %v2268_v24, 6  ;;  %vm2178_vm12 = vcmp.ge.s32.totalorder %v2162_v42, 0  ;;  %vm2194_vm15 = vcmp.lt.s32.totalorder %v2162_v42, 16 }
 0x41e   : > { %vm10065_vm10 = vmand %vm2178_vm12, %vm2194_vm15  ;;  %vm2860_vm12 = vcmask 1044480   ;;  %vm2714_vm15 = vcmask 1045504  }
 0x41f   : > { %v10036_v21 = vsel %vm2310_vm13, 0.0, %v2344_v33  ;;  %v2090_v16 = vpop.f32.mrf.mxu2 }
 0x420   : > { %v2538_v43 = vrot.slane %v10036_v21, 1  ;;  %v2091_v10 = vadd.f32 %v9606_v15, %v2090_v16 }
 0x421   : > { %v10040_v59 = vpop.f32.mrf.mxu1  ;;  %v10042_v32 = vpop.f32.mrf.mxu3 }
 0x422   : > { %13578 = vst [vmem:[#allocation42_spill] sm:$0xff] %v10040_v59  ;;  %v2140_v55 = vmax.f32 %v2091_v10, 0.0  ;;  %v3939_v24 = vpop.f32.mrf.mxu0  ;;  %v2539_v28 = vsel %vm2472_vm14, %v2536_v45, %v2538_v43  ;;  %v3168_v10 = vrot.slane %v10036_v21, 4 }
 0x423   : > { %13579 = vst [vmem:[#allocation129_spill] sm:$0xff] %v10042_v32  ;;  %6848 = vmatmul.msk.f32.gmra.mxu3 %vm3200_vm0, %v10046_v52  ;;  %v7101_v34 = vpack.i.bf16 %v2539_v28, %v2537_v51 }
 0x424   : > { %v2269_v16 = vsel %vm10017_vm9, %v2140_v55, 0.0 }
 0x425   : > { %v2345_v59 = vrot.slane %v2269_v16, 6  ;;  %7102 = vrot.lane.b32.xlu1 %v7101_v34, %s7559_s21  ;;  %v10072_v16 = vsel %vm3102_vm11, %v3166_v30, %v3168_v10 }
 0x426   : > { %13584 = vst [vmem:[#allocation117_spill] sm:$0xff] %v10072_v16 }
 0x427   : > { %v10057_v61 = vsel %vm2310_vm13, %v2344_v33, %v2345_v59  ;;  %v10060_v20 = vsel %vm2310_vm13, %v2345_v59, 0.0  ;;  %v2093_v45 = vpop.f32.mrf.mxu2 }
 0x428   : > { %v2542_v24 = vrot.slane %v10060_v20, 1  ;;  %v2094_v51 = vadd.f32 %v9606_v15, %v2093_v45  ;;  %v2540_v28 = vrot.slane %v10057_v61, 1 }
 0x429   : > { %v3520_v34 = vpop.f32.mrf.mxu1  ;;  %v10069_v42 = vpop.f32.mrf.mxu3 }
 0x42a   : > { %13583 = vst [vmem:[#allocation82_spill] sm:$0xff] %v10069_v42  ;;  %v2141_v55 = vmax.f32 %v2094_v51, 0.0  ;;  %v3941_v33 = vpop.f32.mrf.mxu0  ;;  %v2541_v59 = vsel %vm2472_vm14, %v2538_v43, %v2540_v28  ;;  %v2543_v52 = vsel %vm2472_vm14, %v2540_v28, %v2542_v24  ;;  %v3170_v34 = vrot.slane %v10057_v61, 4 }
 0x42b   : > { %6849 = vmatmul.msk.f32.gmra.mxu3 %vm3200_vm0, %v10072_v16  ;;  %v7106_v45 = vpack.i.bf16 %v2543_v52, %v2541_v59 }
 0x42c   : > { %v2270_v32 = vsel %vm10065_vm10, %v2141_v55, 0.0  ;;  %v10088_v16 = vsel %vm3102_vm11, %v3168_v10, %v3170_v34 }
 0x42d   : > { %7107 = vrot.lane.b32.xlu2 %v7106_v45, %s7559_s21  ;;  %v2347_v51 = vrot.slane %v2270_v32, 6  ;;  %13587 = vst [vmem:[#allocation33_spill] sm:$0xff] %v10088_v16  ;;  %v3172_v45 = vrot.slane %v10060_v20, 4 }
 0x42f   : > { %v2096_v33 = vpop.f32.mrf.mxu2  ;;  %v10091_v52 = vsel %vm2310_vm13, 0.0, %v2347_v51 }
 0x430   : > { %v2097_v30 = vadd.f32 %v9606_v15, %v2096_v33  ;;  %13588 = vst [vmem:[#allocation68_spill] sm:$0xff] %v10091_v52  ;;  %v2544_v59 = vrot.slane %v10091_v52, 1 }
 0x431   : > { %v10083_v42 = vpop.f32.mrf.mxu1  ;;  %v3838_v43 = vpop.f32.mrf.mxu3 }
 0x432   : > { %13585 = vst [vmem:[#allocation128_spill] sm:$0xff] %v10083_v42  ;;  %v2142_v47 = vmax.f32 %v2097_v30, 0.0  ;;  %v10085_v28 = vpop.f32.mrf.mxu0  ;;  %v2545_v23 = vsel %vm2472_vm14, %v2542_v24, %v2544_v59 }
 0x433   : > { %13586 = vst [vmem:[#allocation21_spill] sm:$0xff] %v10085_v28  ;;  %6850 = vmatmul.msk.f32.gmra.mxu3 %vm3200_vm0, %v10088_v16  ;;  %v10108_v28 = vsel %vm3102_vm11, %v3170_v34, %v3172_v45 }
 0x434   : > { %v2271_v32 = vsel %vm10065_vm10, %v2142_v47, 0.0  ;;  %13592 = vst [vmem:[#allocation46_spill] sm:$0xff] %v10108_v28 }
 0x435   : > { %v2348_v55 = vrot.slane %v2271_v32, 6 }
 0x437   : > { %v10100_v33 = vsel %vm2310_vm13, %v2347_v51, %v2348_v55  ;;  %v3174_v51 = vrot.slane %v10091_v52, 4 }
 0x438   : > { %13589 = vst [vmem:[#allocation95_spill] sm:$0xff] %v10100_v33  ;;  %v2546_v10 = vrot.slane %v10100_v33, 1  ;;  %v3176_v34 = vrot.slane %v10100_v33, 4  ;;  %v13202_v33 = vrot.slane %v9260_v41, 3 }
 0x439   : > { %v10103_v30 = vpop.f32.mrf.mxu1 }
 0x43a   : > { %13590 = vst [vmem:[#allocation107_spill] sm:$0xff] %v10103_v30  ;;  %v10105_v43 = vpop.f32.mrf.mxu0  ;;  %v2547_v47 = vsel %vm2472_vm14, %v2544_v59, %v2546_v10  ;;  %v2163_v30 = vadd.s32 13, %v8921_v57 }
 0x43b   : > { %13591 = vst [vmem:[#allocation20_spill] sm:$0xff] %v10105_v43  ;;  %6851 = vmatmul.msk.f32.gmra.mxu3 %vm3200_vm0, %v10108_v28  ;;  %v7111_v32 = vpack.i.bf16 %v2547_v47, %v2545_v23  ;;  %v10118_v43 = vsel %vm3102_vm11, %v3172_v45, %v3174_v51  ;;  %v2165_v23 = vadd.s32 15, %v8921_v57 }
 0x43c   : > { %13593 = vst [vmem:[#allocation58_spill] sm:$0xff] %v10118_v43  ;;  %vm2179_vm1 = vcmp.ge.s32.totalorder %v2163_v30, 0  ;;  %vm2195_vm2 = vcmp.lt.s32.totalorder %v2163_v30, 16 }
 0x43d   : > { %7112 = vrot.lane.b32.xlu0 %v7111_v32, %s7559_s21  ;;  %vm10127_vm3 = vmand %vm2179_vm1, %vm2195_vm2  ;;  %v10134_v32 = vsel %vm2310_vm13, %v2348_v55, 0.0  ;;  %vm2181_vm4 = vcmp.ge.s32.totalorder %v2165_v23, 0  ;;  %vm2197_vm5 = vcmp.lt.s32.totalorder %v2165_v23, 16 }
 0x43e   : > { %13597 = vst [vmem:[#allocation121_spill] sm:$0xff] %v10134_v32  ;;  %v2548_v55 = vrot.slane %v10134_v32, 1  ;;  %vm2213_vm6 = vmand %vm2181_vm4, %vm2197_vm5 }
 0x440   : > { %v2549_v23 = vsel %vm2472_vm14, %v2546_v10, %v2548_v55  ;;  %v3359_v10 = vld [vmem:[%s13133_s3 + $0x1f0] sm:$0xff] }
 0x441   : > { %v3528_v16 = vpop.f32.mrf.mxu1  ;;  %3616 = vmatpush.msrb.mxu2 %v3359_v10 }
 0x442   : > { %v3949_v42 = vpop.f32.mrf.mxu0  ;;  %v2115_v16 = vadd.f32 %v9606_v15, %v9555_v12 }
 0x443   : > { %6852 = vmatmul.msk.f32.gmra.mxu3 %vm3200_vm0, %v10118_v43  ;;  %v10139_v43 = vsel %vm3102_vm11, %v3174_v51, %v3176_v34 }
 0x444   : > { %13599 = vst [vmem:[#allocation45_spill] sm:$0xff] %v10139_v43 }
 0x446   : > { %v2099_v24 = vpop.f32.mrf.mxu2 }
 0x447   : > { %v2100_v59 = vadd.f32 %v9606_v15, %v2099_v24  ;;  %v2112_v24 = vadd.f32 %v9606_v15, %v9517_v25 }
 0x449   : > { %v2143_v45 = vmax.f32 %v2100_v59, 0.0  ;;  %v10131_v47 = vpop.f32.mrf.mxu1  ;;  %v2148_v59 = vmax.f32 %v2115_v16, 0.0  ;;  %v2147_v5 = vmax.f32 %v2112_v24, 0.0 }
 0x44a   : > { %13596 = vst [vmem:[#allocation94_spill] sm:$0xff] %v10131_v47  ;;  %v10136_v30 = vpop.f32.mrf.mxu0  ;;  %v3178_v47 = vrot.slane %v10134_v32, 4 }
 0x44b   : > { %13598 = vst [vmem:[#allocation10_spill] sm:$0xff] %v10136_v30  ;;  %v2272_v12 = vsel %vm10127_vm3, %v2143_v45, 0.0  ;;  %6853 = vmatmul.msk.f32.gmra.mxu3 %vm3200_vm0, %v10139_v43  ;;  %v2277_v31 = vsel %vm2213_vm6, %v2148_v59, 0.0  ;;  %v2276_v29 = vsel %vm2213_vm6, %v2147_v5, 0.0 }
 0x44c   : > { %v2350_v28 = vrot.slane %v2272_v12, 6  ;;  %v2164_v12 = vadd.s32 14, %v8921_v57  ;;  %v10162_v38 = vsel %vm3102_vm11, %v3176_v34, %v3178_v47  ;;  %v2357_v59 = vrot.slane %v2277_v31, 6 }
 0x44d   : > { %13602 = vst [vmem:[#allocation120_spill] sm:$0xff] %v10162_v38  ;;  %v2356_v57 = vrot.slane %v2276_v29, 6 }
 0x44e   : > { %v10149_v30 = vsel %vm2310_vm13, 0.0, %v2350_v28  ;;  %v2102_v51 = vpop.f32.mrf.mxu2  ;;  %vm2180_vm7 = vcmp.ge.s32.totalorder %v2164_v12, 0  ;;  %vm2196_vm8 = vcmp.lt.s32.totalorder %v2164_v12, 16  ;;  %v10186_v29 = vsel %vm2310_vm13, %v2357_v59, 0.0 }
 0x44f   : > { %v2550_v25 = vrot.slane %v10149_v30, 1  ;;  %v2103_v45 = vadd.f32 %v9606_v15, %v2102_v51  ;;  %v3180_v42 = vrot.slane %v10149_v30, 4  ;;  %vm10188_vm9 = vmand %vm2180_vm7, %vm2196_vm8 }
 0x451   : > { %v2144_v43 = vmax.f32 %v2103_v45, 0.0  ;;  %v10154_v11 = vpop.f32.mrf.mxu1  ;;  %v2551_v16 = vsel %vm2472_vm14, %v2548_v55, %v2550_v25 }
 0x452   : > { %13600 = vst [vmem:[#allocation72_spill] sm:$0xff] %v10154_v11  ;;  %v10159_v36 = vpop.f32.mrf.mxu0  ;;  %v7116_v24 = vpack.i.bf16 %v2551_v16, %v2549_v23  ;;  %v10183_v16 = vsel %vm2310_vm13, %v2356_v57, %v2357_v59  ;;  %v13187_v59 = vrot.slane %v10186_v29, 1 }
 0x453   : > { %13601 = vst [vmem:[#allocation84_spill] sm:$0xff] %v10159_v36  ;;  %v2273_v51 = vsel %vm10127_vm3, %v2144_v43, 0.0  ;;  %6854 = vmatmul.msk.f32.gmra.mxu3 %vm3200_vm0, %v10162_v38  ;;  %v10198_v36 = vsel %vm3102_vm11, %v3178_v47, %v3180_v42  ;;  %vm5558_vm3 = vcmask 261120  }
 0x454   : > { %v2351_v55 = vrot.slane %v2273_v51, 6  ;;  %7117 = vrot.lane.b32.xlu1 %v7116_v24, %s7559_s21  ;;  %13605 = vst [vmem:[#allocation23_spill] sm:$0xff] %v10198_v36 }
 0x456   : > { %v10173_v5 = vsel %vm2310_vm13, %v2350_v28, %v2351_v55  ;;  %v10176_v43 = vsel %vm2310_vm13, %v2351_v55, 0.0  ;;  %v2105_v34 = vpop.f32.mrf.mxu2  ;;  %v10195_v55 = vsel %vm2310_vm13, 0.0, %v2356_v57  ;;  %v3357_v57 = vld [vmem:[%s13133_s3 + $0x1e0] sm:$0xff] }
 0x457   : > { %v2554_v45 = vrot.slane %v10176_v43, 1  ;;  %v2106_v31 = vadd.f32 %v9606_v15, %v2105_v34  ;;  %v2552_v23 = vrot.slane %v10173_v5, 1  ;;  %3617 = vmatpush.msrb.mxu2 %v3357_v57  ;;  %v2562_v47 = vrot.slane %v10195_v55, 1 }
 0x458   : > { %v3184_v28 = vrot.slane %v10176_v43, 4 }
 0x459   : > { %v2145_v12 = vmax.f32 %v2106_v31, 0.0  ;;  %v3536_v24 = vpop.f32.mrf.mxu1  ;;  %v2553_v51 = vsel %vm2472_vm14, %v2550_v25, %v2552_v23  ;;  %v2555_v10 = vsel %vm2472_vm14, %v2552_v23, %v2554_v45  ;;  %v2564_v25 = vrot.slane %v10183_v16, 1 }
 0x45a   : > { %v3957_v34 = vpop.f32.mrf.mxu0  ;;  %v7121_v38 = vpack.i.bf16 %v2555_v10, %v2553_v51  ;;  %v3182_v24 = vrot.slane %v10173_v5, 4 }
 0x45b   : > { %v2274_v11 = vsel %vm10188_vm9, %v2145_v12, 0.0  ;;  %6855 = vmatmul.msk.f32.gmra.mxu3 %vm3200_vm0, %v10198_v36  ;;  %v2565_v51 = vsel %vm2472_vm14, %v2562_v47, %v2564_v25  ;;  %v2567_v10 = vsel %vm2472_vm14, %v2564_v25, %v13187_v59 }
 0x45c   : > { %7122 = vrot.lane.b32.xlu2 %v7121_v38, %s7559_s21  ;;  %v2353_v31 = vrot.slane %v2274_v11, 6  ;;  %v3355_v38 = vld [vmem:[%s13133_s3 + $0x1d0] sm:$0xff] }
 0x45d   : > { %3618 = vmatpush.msrb.mxu2 %v3355_v38 }
 0x45e   : > { %v2108_v23 = vpop.f32.mrf.mxu2  ;;  %v10223_v11 = vsel %vm2310_vm13, 0.0, %v2353_v31 }
 0x45f   : > { %v2109_v12 = vadd.f32 %v9606_v15, %v2108_v23  ;;  %v10228_v15 = vsel %vm3102_vm11, %v3180_v42, %v3182_v24  ;;  %v7136_v23 = vpack.i.bf16 %v2567_v10, %v2565_v51  ;;  %v2556_v42 = vrot.slane %v10223_v11, 1 }
 0x460   : > { %13608 = vst [vmem:[#allocation97_spill] sm:$0xff] %v10228_v15 }
 0x461   : > { %v2146_v34 = vmax.f32 %v2109_v12, 0.0  ;;  %v10217_v36 = vpop.f32.mrf.mxu1  ;;  %v2868_v12 = vrot.slane %v9091_v53, 3 }
 0x462   : > { %13606 = vst [vmem:[#allocation35_spill] sm:$0xff] %v10217_v36  ;;  %v10225_v57 = vpop.f32.mrf.mxu0  ;;  %v2557_v36 = vsel %vm2472_vm14, %v2554_v45, %v2556_v42  ;;  %v2880_v45 = vrot.slane %v9239_v17, 3 }
 0x463   : > { %13607 = vst [vmem:[#allocation71_spill] sm:$0xff] %v10225_v57  ;;  %v2275_v25 = vsel %vm10188_vm9, %v2146_v34, 0.0  ;;  %6856 = vmatmul.msk.f32.gmra.mxu3 %vm3200_vm0, %v10228_v15  ;;  %v2866_v57 = vrot.slane %v9058_v14, 3  ;;  %v3353_v14 = vld [vmem:[%s13133_s3 + $0x1c0] sm:$0xff] }
 0x464   : > { %v2354_v59 = vrot.slane %v2275_v25, 6  ;;  %7137 = vrot.lane.b32.xlu2 %v7136_v23, %s7559_s21  ;;  %v2871_v23 = vsel %vm2860_vm12, %v2868_v12, %v13193_v39  ;;  %3619 = vmatpush.msrb.mxu2 %v3353_v14  ;;  %v2878_v14 = vrot.slane %v9198_v27, 3 }
 0x465   : > { %v2869_v38 = vsel %vm2860_vm12, %v2866_v57, %v2868_v12  ;;  %v10264_v12 = vsel %vm3102_vm11, %v3182_v24, %v3184_v28 }
 0x466   : > { %v10240_v51 = vsel %vm2310_vm13, %v2353_v31, %v2354_v59  ;;  %v10243_v10 = vsel %vm2310_vm13, %v2354_v59, 0.0  ;;  %13611 = vst [vmem:[#allocation48_spill] sm:$0xff] %v10264_v12  ;;  %v7151_v39 = vpack.i.bf16 %v2871_v23, %v2869_v38  ;;  %v2883_v23 = vsel %vm2860_vm12, %v2880_v45, %v13202_v33 }
 0x467   : > { %v2560_v34 = vrot.slane %v10243_v10, 1  ;;  %v2558_v25 = vrot.slane %v10240_v51, 1 }
 0x469   : > { %v10252_v15 = vpop.f32.mrf.mxu1  ;;  %v2561_v31 = vsel %vm2472_vm14, %v2558_v25, %v2560_v34  ;;  %v2563_v59 = vsel %vm2472_vm14, %v2560_v34, %v2562_v47  ;;  %v2559_v53 = vsel %vm2472_vm14, %v2556_v42, %v2558_v25  ;;  %v10270_v47 = vpop.f32.mrf.mxu3  ;;  %v13198_v42 = vmov 0.0  }
 0x46a   : > { %13609 = vst [vmem:[#allocation110_spill] sm:$0xff] %v10252_v15  ;;  %v10261_v32 = vpop.f32.mrf.mxu0  ;;  %v7131_v52 = vpack.i.bf16 %v2563_v59, %v2561_v31  ;;  %v7126_v15 = vpack.i.bf16 %v2559_v53, %v2557_v36  ;;  %v10275_v24 = vrot.slane %v13198_v42, 1  ;;  %v2864_v53 = vrot.slane %v9009_v9, 3 }
 0x46b   : > { %13610 = vst [vmem:[#allocation22_spill] sm:$0xff] %v10261_v32  ;;  %6857 = vmatmul.msk.f32.gmra.mxu3 %vm3200_vm0, %v10264_v12  ;;  %v2862_v36 = vrot.slane %v8994_v62, 3  ;;  %v3186_v34 = vrot.slane %v10223_v11, 4  ;;  %v2861_v25 = vrot.slane %v8988_v2, 3  ;;  %v13614_v59 = vrot.slane %v10186_v29, 1 }
 0x46c   : > { %13612 = vst [vmem:[#allocation61_spill] sm:$0xff] %v10270_v47  ;;  %7152 = vrot.lane.b32.xlu2 %v7151_v39, %s7559_s21  ;;  %7132 = vrot.lane.b32.xlu1 %v7131_v52, %s7559_s21  ;;  %v3351_v39 = vld [vmem:[%s13133_s3 + $0x1b0] sm:$0xff]  ;;  %v2881_v52 = vsel %vm2860_vm12, %v2878_v14, %v2880_v45 }
 0x46d   : > { %13613 = vst [vmem:[#allocation96_spill] sm:$0xff] %v10275_v24  ;;  %7127 = vrot.lane.b32.xlu0 %v7126_v15, %s7559_s21  ;;  %3620 = vmatpush.msrb.mxu2 %v3351_v39  ;;  %v2867_v15 = vsel %vm2860_vm12, %v2864_v53, %v2866_v57  ;;  %v2569_v42 = vsel %vm2472_vm14, %v13614_v59, %v10275_v24  ;;  %v13203_v57 = vrot.slane %v9424_v4, 3 }
 0x46e   : > { %v2865_v12 = vsel %vm2860_vm12, %v2862_v36, %v2864_v53  ;;  %v10299_v45 = vsel %vm3102_vm11, %v3184_v28, %v3186_v34  ;;  %v7166_v39 = vpack.i.bf16 %v2883_v23, %v2881_v52  ;;  %v2863_v33 = vsel %vm2860_vm12, %v2861_v25, %v2862_v36 }
 0x46f   : > { %v7088_v38 = vpop.permute.xlu1 %7087  ;;  %13615 = vst [vmem:[#allocation123_spill] sm:$0xff] %v10299_v45  ;;  %v7146_v59 = vpack.i.bf16 %v2867_v15, %v2865_v12  ;;  %v2892_v53 = vrot.slane %v9411_v49, 3  ;;  %v2872_v28 = vrot.slane %v9134_v46, 3  ;;  %v2890_v52 = vrot.slane %v9393_v6, 3  ;;  %v3349_v15 = vld [vmem:[%s13133_s3 + $0x1a0] sm:$0xff] }
 0x470   : > { %v7089_v31 = vunpack.i.l.bf16 %v7088_v38  ;;  %v2876_v36 = vrot.slane %v9172_v0, 3  ;;  %v3188_v12 = vrot.slane %v10240_v51, 4  ;;  %3621 = vmatpush.msrb.mxu2 %v3349_v15 }
 0x471   : > { %v3544_v32 = vpop.f32.mrf.mxu1  ;;  %v10313_v23 = vpop.f32.mrf.mxu3 }
 0x472   : > { %v3965_v47 = vpop.f32.mrf.mxu0  ;;  %v3226_v17 = vsel %vm3200_vm0, %v9673_v56, %v7089_v31  ;;  %v7141_v32 = vpack.i.bf16 %v2863_v33, %v2569_v42  ;;  %13616 = vst [vmem:[#allocation13_spill] sm:$0xff] %v10313_v23  ;;  %v7090_v33 = vunpack.i.h.bf16 %v7088_v38  ;;  %v2895_v42 = vsel %vm2860_vm12, %v2892_v53, %v13203_v57  ;;  %v7093_v23 = vpop.permute.xlu2 %7092 }
 0x473   : > { %3556 = vmatmul.f32.gmra.mxu1 %v3226_v17  ;;  %6858 = vmatmul.msk.f32.gmra.mxu3 %vm3200_vm0, %v10299_v45  ;;  %v2874_v47 = vrot.slane %v9158_v35, 3  ;;  %v2879_v25 = vsel %vm2860_vm12, %v2876_v36, %v2878_v14  ;;  %v13618_v38 = vrot.slane %v9113_v26, 3  ;;  %v10335_v14 = vsel %vm3102_vm11, %v3186_v34, %v3188_v12 }
 0x474   : > { %3977 = vmatmul.f32.gmra.mxu0 %v3226_v17  ;;  %7167 = vrot.lane.b32.xlu2 %v7166_v39, %s7559_s21  ;;  %v2893_v17 = vsel %vm2860_vm12, %v2890_v52, %v2892_v53  ;;  %v3227_v53 = vsel %vm3200_vm0, %v9806_v1, %v7090_v33  ;;  %13620 = vst [vmem:[#allocation87_spill] sm:$0xff] %v10335_v14  ;;  %v13207_v45 = vrot.slane %v9600_v18, 3  ;;  %v2886_v34 = vrot.slane %v9355_v44, 3 }
 0x475   : > { %7147 = vrot.lane.b32.xlu1 %v7146_v59, %s7559_s21  ;;  %7142 = vrot.lane.b32.xlu0 %v7141_v32, %s7559_s21  ;;  %v2875_v31 = vsel %vm2860_vm12, %v2872_v28, %v2874_v47  ;;  %v2873_v59 = vsel %vm2860_vm12, %v13618_v38, %v2872_v28  ;;  %v7181_v57 = vpack.i.bf16 %v2895_v42, %v2893_v17  ;;  %v2904_v38 = vrot.slane %v9597_v7, 3 }
 0x476   : > { %v2877_v24 = vsel %vm2860_vm12, %v2874_v47, %v2876_v36  ;;  %v7156_v15 = vpack.i.bf16 %v2875_v31, %v2873_v59  ;;  %v2884_v33 = vrot.slane %v9315_v40, 3  ;;  %v2902_v47 = vrot.slane %v9534_v37, 3 }
 0x477   : > { %v7161_v28 = vpack.i.bf16 %v2879_v25, %v2877_v24  ;;  %v2888_v36 = vrot.slane %v9383_v13, 3  ;;  %v7094_v17 = vunpack.i.l.bf16 %v7093_v23  ;;  %v3190_v42 = vrot.slane %v10243_v10, 4 }
 0x478   : > { %v2905_v25 = vsel %vm2860_vm12, %v2902_v47, %v2904_v38  ;;  %v2907_v31 = vsel %vm2860_vm12, %v2904_v38, %v13207_v45 }
 0x479   : > { %v10325_v39 = vpop.f32.mrf.mxu1  ;;  %v2891_v59 = vsel %vm2860_vm12, %v2888_v36, %v2890_v52  ;;  %v7196_v38 = vpack.i.bf16 %v2907_v31, %v2905_v25  ;;  %v13209_v52 = vrot.slane %v9954_v48, 3  ;;  %v2914_v25 = vrot.slane %v9926_v60, 3 }
 0x47a   : > { %13617 = vst [vmem:[#allocation47_spill] sm:$0xff] %v10325_v39  ;;  %v10330_v32 = vpop.f32.mrf.mxu0  ;;  %v10369_v39 = vsel %vm3102_vm11, %v3188_v12, %v3190_v42  ;;  %v2896_v12 = vrot.slane %v9464_v54, 3 }
 0x47b   : > { %13619 = vst [vmem:[#allocation74_spill] sm:$0xff] %v10330_v32  ;;  %3559 = vmatmul.f32.gmra.mxu1 %v3227_v53  ;;  %6859 = vmatmul.msk.f32.gmra.mxu3 %vm3200_vm0, %v10335_v14  ;;  %v3228_v14 = vsel %vm3200_vm0, %v9926_v60, %v7094_v17  ;;  %v2898_v17 = vrot.slane %v9476_v3, 3 }
 0x47c   : > { %3980 = vmatmul.f32.gmra.mxu0 %v3227_v53  ;;  %7182 = vrot.lane.b32.xlu2 %v7181_v57, %s7559_s21  ;;  %v3347_v57 = vld [vmem:[%s13133_s3 + $0x190] sm:$0xff]  ;;  %v2887_v53 = vsel %vm2860_vm12, %v2884_v33, %v2886_v34  ;;  %13624 = vst [vmem:[#allocation38_spill] sm:$0xff] %v10369_v39 }
 0x47d   : > { %7162 = vrot.lane.b32.xlu1 %v7161_v28, %s7559_s21  ;;  %7157 = vrot.lane.b32.xlu0 %v7156_v15, %s7559_s21  ;;  %v13622_v15 = vrot.slane %v9260_v41, 3 }
 0x47e   : > { %v3846_v24 = vpop.f32.mrf.mxu3  ;;  %3622 = vmatpush.msrb.mxu2 %v3347_v57  ;;  %v2889_v57 = vsel %vm2860_vm12, %v2886_v34, %v2888_v36  ;;  %v2900_v34 = vrot.slane %v9515_v50, 3  ;;  %v7095_v36 = vunpack.i.h.bf16 %v7093_v23  ;;  %v3192_v23 = vrot.slane %v10195_v55, 4 }
 0x47f   : > { %v2885_v24 = vsel %vm2860_vm12, %v13622_v15, %v2884_v33  ;;  %v7176_v45 = vpack.i.bf16 %v2891_v59, %v2889_v57  ;;  %v2916_v33 = vrot.slane %v9951_v8, 3  ;;  %v3345_v59 = vld [vmem:[%s13133_s3 + $0x180] sm:$0xff]  ;;  %v2899_v15 = vsel %vm2860_vm12, %v2896_v12, %v2898_v17 }
 0x480   : > { %3623 = vmatpush.msrb.mxu2 %v3345_v59  ;;  %v13213_v59 = vrot.slane %v10060_v20, 3 }
 0x481   : > { %v10359_v28 = vpop.f32.mrf.mxu1 }
 0x482   : > { %13621 = vst [vmem:[#allocation122_spill] sm:$0xff] %v10359_v28  ;;  %v10364_v32 = vpop.f32.mrf.mxu0  ;;  %v7171_v28 = vpack.i.bf16 %v2887_v53, %v2885_v24  ;;  %v2917_v53 = vsel %vm2860_vm12, %v2914_v25, %v2916_v33 }
 0x483   : > { %13623 = vst [vmem:[#allocation25_spill] sm:$0xff] %v10364_v32  ;;  %3561 = vmatmul.f32.gmra.mxu1 %v3228_v14  ;;  %6860 = vmatmul.msk.f32.gmra.mxu3 %vm3200_vm0, %v10369_v39  ;;  %v3229_v39 = vsel %vm3200_vm0, %v9951_v8, %v7095_v36  ;;  %v2912_v36 = vrot.slane %v9806_v1, 3 }
 0x484   : > { %3982 = vmatmul.f32.gmra.mxu0 %v3228_v14  ;;  %7197 = vrot.lane.b32.xlu2 %v7196_v38, %s7559_s21  ;;  %v3360_v14 = vld [vmem:[%s13133_s3 + $0x1f8] sm:$0xff]  ;;  %v13626_v38 = vrot.slane %v9424_v4, 3 }
 0x485   : > { %7177 = vrot.lane.b32.xlu1 %v7176_v45, %s7559_s21  ;;  %7172 = vrot.lane.b32.xlu0 %v7171_v28, %s7559_s21  ;;  %v2919_v45 = vsel %vm2860_vm12, %v2916_v33, %v13209_v52  ;;  %v2903_v28 = vsel %vm2860_vm12, %v2900_v34, %v2902_v47 }
 0x486   : > { %v10383_v31 = vpop.f32.mrf.mxu3  ;;  %4039 = vmatpush.msra.mxu3 %v3360_v14  ;;  %v2897_v57 = vsel %vm2860_vm12, %v13626_v38, %v2896_v12  ;;  %v7211_v33 = vpack.i.bf16 %v2919_v45, %v2917_v53  ;;  %v2901_v14 = vsel %vm2860_vm12, %v2898_v17, %v2900_v34  ;;  %v2926_v12 = vrot.slane %v10036_v21, 3 }
 0x487   : > { %13625 = vst [vmem:[#allocation73_spill] sm:$0xff] %v10383_v31  ;;  %v10404_v31 = vsel %vm3102_vm11, %v3190_v42, %v3192_v23  ;;  %v7186_v52 = vpack.i.bf16 %v2899_v15, %v2897_v57  ;;  %v2910_v42 = vrot.slane %v9673_v56, 3  ;;  %v3194_v17 = vrot.slane %v10183_v16, 4 }
 0x488   : > { %13627 = vst [vmem:[#allocation99_spill] sm:$0xff] %v10404_v31  ;;  %v7098_v47 = vpop.permute.xlu0 %7097  ;;  %v2908_v34 = vrot.slane %v9659_v22, 3  ;;  %v2915_v38 = vsel %vm2860_vm12, %v2912_v36, %v2914_v25 }
 0x489   : > { %v3552_v24 = vpop.f32.mrf.mxu1  ;;  %v7099_v53 = vunpack.i.l.bf16 %v7098_v47 }
 0x48a   : > { %v3973_v32 = vpop.f32.mrf.mxu0  ;;  %v7191_v24 = vpack.i.bf16 %v2903_v28, %v2901_v14  ;;  %v3376_v28 = vld [vmem:[%s13133_s3 + $0x278] sm:$0xff]  ;;  %v2911_v57 = vsel %vm2860_vm12, %v2908_v34, %v2910_v42 }
 0x48b   : > { %3564 = vmatmul.f32.gmra.mxu1 %v3229_v39  ;;  %6861 = vmatmul.msk.f32.gmra.mxu3 %vm3200_vm0, %v10404_v31  ;;  %v2928_v32 = vrot.slane %v10057_v61, 3  ;;  %v3230_v14 = vsel %vm3200_vm0, %v9954_v48, %v7099_v53  ;;  %v2913_v31 = vsel %vm2860_vm12, %v2910_v42, %v2912_v36  ;;  %v2922_v53 = vrot.slane %v9999_v19, 3 }
 0x48c   : > { %3985 = vmatmul.f32.gmra.mxu0 %v3229_v39  ;;  %7212 = vrot.lane.b32.xlu2 %v7211_v33, %s7559_s21  ;;  %v3343_v39 = vld [vmem:[%s13133_s3 + $0x170] sm:$0xff]  ;;  %v10434_v33 = vsel %vm3102_vm11, %v3192_v23, %v3194_v17  ;;  %v7206_v25 = vpack.i.bf16 %v2915_v38, %v2913_v31  ;;  %v2940_v23 = vrot.slane %v10173_v5, 3  ;;  %v2938_v42 = vrot.slane %v10149_v30, 3 }
 0x48d   : > { %7192 = vrot.lane.b32.xlu1 %v7191_v24, %s7559_s21  ;;  %7187 = vrot.lane.b32.xlu0 %v7186_v52, %s7559_s21  ;;  %v2929_v15 = vsel %vm2860_vm12, %v2926_v12, %v2928_v32  ;;  %v2931_v52 = vsel %vm2860_vm12, %v2928_v32, %v13213_v59  ;;  %13629 = vst [vmem:[#allocation24_spill] sm:$0xff] %v10434_v33  ;;  %v13212_v32 = vrot.slane %v10176_v43, 3  ;;  %v2920_v36 = vrot.slane %v9988_v63, 3 }
 0x48e   : > { %v10419_v45 = vpop.f32.mrf.mxu3  ;;  %3624 = vmatpush.msrb.mxu2 %v3343_v39  ;;  %4184 = vmatpush.msrb.mxu1 %v3376_v28  ;;  %v7226_v24 = vpack.i.bf16 %v2931_v52, %v2929_v15  ;;  %v2924_v31 = vrot.slane %v10027_v58, 3  ;;  %v3341_v28 = vld [vmem:[%s13133_s3 + $0x160] sm:$0xff]  ;;  %v2941_v15 = vsel %vm2860_vm12, %v2938_v42, %v2940_v23 }
 0x48f   : > { %13628 = vst [vmem:[#allocation113_spill] sm:$0xff] %v10419_v45  ;;  %v13630_v45 = vrot.slane %v9600_v18, 3  ;;  %v2943_v52 = vsel %vm2860_vm12, %v2940_v23, %v13212_v32  ;;  %v2954_v23 = vrot.slane %v10186_v29, 3  ;;  %v2952_v32 = vrot.slane %v10183_v16, 3 }
 0x490   : > { %3625 = vmatpush.msrb.mxu2 %v3341_v28  ;;  %v2927_v38 = vsel %vm2860_vm12, %v2924_v31, %v2926_v12 }
 0x491   : > { %v2909_v8 = vsel %vm2860_vm12, %v13630_v45, %v2908_v34  ;;  %v3196_v34 = vrot.slane %v10186_v29, 4 }
 0x492   : > { %v7201_v39 = vpack.i.bf16 %v2911_v57, %v2909_v8  ;;  %v7100_v8 = vunpack.i.h.bf16 %v7098_v47  ;;  %v2923_v57 = vsel %vm2860_vm12, %v2920_v36, %v2922_v53 }
 0x493   : > { %3567 = vmatmul.f32.gmra.mxu1 %v3230_v14  ;;  %6862 = vmatmul.msk.f32.gmra.mxu3 %vm3200_vm0, %v10434_v33 }
 0x494   : > { %3988 = vmatmul.f32.gmra.mxu0 %v3230_v14  ;;  %7227 = vrot.lane.b32.xlu2 %v7226_v24, %s7559_s21  ;;  %v10464_v14 = vsel %vm3102_vm11, %v3194_v17, %v3196_v34  ;;  %v3231_v47 = vsel %vm3200_vm0, %v9988_v63, %v7100_v8  ;;  %v7241_v24 = vpack.i.bf16 %v2943_v52, %v2941_v15  ;;  %v13633_v8 = vld [vmem:[#allocation95_spill] sm:$0xff]  ;;  %v13634_v15 = vmov 0.0  }
 0x495   : > { %7207 = vrot.lane.b32.xlu1 %v7206_v25, %s7559_s21  ;;  %7202 = vrot.lane.b32.xlu0 %v7201_v39, %s7559_s21  ;;  %13631 = vst [vmem:[#allocation50_spill] sm:$0xff] %v10464_v14  ;;  %v2925_v25 = vsel %vm2860_vm12, %v2922_v53, %v2924_v31  ;;  %v13632_v39 = vrot.slane %v9954_v48, 3  ;;  %v2934_v53 = vrot.slane %v13633_v8, 3  ;;  %v2950_v31 = vrot.slane %v10195_v55, 3 }
 0x496   : > { %v3854_v45 = vpop.f32.mrf.mxu3  ;;  %v7221_v12 = vpack.i.bf16 %v2927_v38, %v2925_v25  ;;  %v10485_v52 = vrot.slane %v13634_v15, 4  ;;  %v13636_v38 = vld [vmem:[#allocation68_spill] sm:$0xff]  ;;  %v13640_v48 = vrot.slane %v10060_v20, 3 }
 0x497   : > { %v2921_v45 = vsel %vm2860_vm12, %v13632_v39, %v2920_v36  ;;  %v7103_v28 = vpop.permute.xlu1 %7102  ;;  %v3339_v36 = vld [vmem:[%s13133_s3 + $0x150] sm:$0xff]  ;;  %v2953_v59 = vsel %vm2860_vm12, %v2950_v31, %v2952_v32 }
 0x498   : > { %v7216_v17 = vpack.i.bf16 %v2923_v57, %v2921_v45  ;;  %13635 = vst [vmem:[#allocation64_spill] sm:$0xff] %v10485_v52  ;;  %v2932_v57 = vrot.slane %v13636_v38, 3  ;;  %3626 = vmatpush.msrb.mxu2 %v3339_v36  ;;  %v3358_v45 = vld [vmem:[%s13133_s3 + $0x1e8] sm:$0xff]  ;;  %v10502_v33 = vsel %vm3102_vm11, %v3196_v34, %v10485_v52  ;;  %v2946_v34 = vrot.slane %v10240_v51, 3 }
 0x499   : > { %4040 = vmatpush.msra.mxu3 %v3358_v45  ;;  %13639 = vst [vmem:[#allocation125_spill] sm:$0xff] %v10502_v33  ;;  %v2948_v45 = vrot.slane %v10243_v10, 3 }
 0x49a   : > { %v2933_v60 = vsel %vm2860_vm12, %v13640_v48, %v2932_v57  ;;  %v2944_v48 = vrot.slane %v10223_v11, 3 }
 0x49b   : > { %3569 = vmatmul.f32.gmra.mxu1 %v3231_v47  ;;  %6863 = vmatmul.msk.f32.gmra.mxu3 %vm3200_vm0, %v10464_v14  ;;  %v2935_v14 = vsel %vm2860_vm12, %v2932_v57, %v2934_v53 }
 0x49c   : > { %3990 = vmatmul.f32.gmra.mxu0 %v3231_v47  ;;  %7242 = vrot.lane.b32.xlu2 %v7241_v24, %s7559_s21  ;;  %v13637_v47 = vld [vmem:[#allocation121_spill] sm:$0xff]  ;;  %v7104_v24 = vunpack.i.l.bf16 %v7103_v28  ;;  %v2947_v57 = vsel %vm2860_vm12, %v2944_v48, %v2946_v34 }
 0x49d   : > { %7222 = vrot.lane.b32.xlu1 %v7221_v12, %s7559_s21  ;;  %7217 = vrot.lane.b32.xlu0 %v7216_v17, %s7559_s21  ;;  %v2936_v25 = vrot.slane %v13637_v47, 3  ;;  %v2955_v12 = vsel %vm2860_vm12, %v2952_v32, %v2954_v23 }
 0x49e   : > { %v10489_v39 = vpop.f32.mrf.mxu3  ;;  %v3232_v36 = vsel %vm3200_vm0, %v9999_v19, %v7104_v24  ;;  %v13641_v24 = vrot.slane %v10176_v43, 3 }
 0x49f   : > { %13638 = vst [vmem:[#allocation98_spill] sm:$0xff] %v10489_v39  ;;  %v2939_v17 = vsel %vm2860_vm12, %v2936_v25, %v2938_v42  ;;  %v7256_v39 = vpack.i.bf16 %v2955_v12, %v2953_v59  ;;  %v2937_v63 = vsel %vm2860_vm12, %v2934_v53, %v2936_v25  ;;  %v7231_v42 = vpack.i.bf16 %v2935_v14, %v2933_v60  ;;  %v3337_v59 = vld [vmem:[%s13133_s3 + $0x140] sm:$0xff]  ;;  %v7108_v12 = vpop.permute.xlu2 %7107 }
 0x4a0   : > { %v7236_v32 = vpack.i.bf16 %v2939_v17, %v2937_v63  ;;  %v7105_v53 = vunpack.i.h.bf16 %v7103_v28  ;;  %3627 = vmatpush.msrb.mxu2 %v3337_v59  ;;  %v2949_v60 = vsel %vm2860_vm12, %v2946_v34, %v2948_v45  ;;  %v2951_v14 = vsel %vm2860_vm12, %v2948_v45, %v2950_v31  ;;  %v3354_v45 = vld [vmem:[%s13133_s3 + $0x1c8] sm:$0xff] }
 0x4a1   : > { %v7251_v17 = vpack.i.bf16 %v2951_v14, %v2949_v60  ;;  %v7109_v31 = vunpack.i.l.bf16 %v7108_v12  ;;  %v10543_v34 = vrot.slane %v13634_v15, 3  ;;  %v3333_v60 = vld [vmem:[%s13133_s3 + $0x120] sm:$0xff]  ;;  %v7110_v14 = vunpack.i.h.bf16 %v7108_v12 }
 0x4a2   : > { %v3233_v25 = vsel %vm3200_vm0, %v10027_v58, %v7105_v53  ;;  %v3352_v53 = vld [vmem:[%s13133_s3 + $0x1b8] sm:$0xff] }
 0x4a3   : > { %3572 = vmatmul.f32.gmra.mxu1 %v3232_v36  ;;  %6864 = vmatmul.msk.f32.gmra.mxu3 %vm3200_vm0, %v10502_v33  ;;  %13642 = vst [vmem:[#allocation16_spill] sm:$0xff] %v10543_v34  ;;  %v3234_v59 = vsel %vm3200_vm0, %v10036_v21, %v7109_v31 }
 0x4a4   : > { %3993 = vmatmul.f32.gmra.mxu0 %v3232_v36  ;;  %7257 = vrot.lane.b32.xlu2 %v7256_v39, %s7559_s21  ;;  %v2945_v39 = vsel %vm2860_vm12, %v13641_v24, %v2944_v48  ;;  %v3335_v36 = vld [vmem:[%s13133_s3 + $0x130] sm:$0xff]  ;;  %v2957_v48 = vsel %vm2860_vm12, %v2954_v23, %v10543_v34  ;;  %v3348_v23 = vld [vmem:[%s13133_s3 + $0x198] sm:$0xff]  ;;  %v3346_v24 = vld [vmem:[%s13133_s3 + $0x188] sm:$0xff] }
 0x4a5   : > { %7237 = vrot.lane.b32.xlu1 %v7236_v32, %s7559_s21  ;;  %7232 = vrot.lane.b32.xlu0 %v7231_v42, %s7559_s21  ;;  %v7246_v28 = vpack.i.bf16 %v2947_v57, %v2945_v39  ;;  %v3356_v42 = vld [vmem:[%s13133_s3 + $0x1d8] sm:$0xff]  ;;  %v3235_v39 = vsel %vm3200_vm0, %v10057_v61, %v7110_v14 }
 0x4a6   : > { %v10521_v63 = vpop.f32.mrf.mxu3  ;;  %3628 = vmatpush.msrb.mxu2 %v3335_v36  ;;  %4041 = vmatpush.msra.mxu3 %v3356_v42  ;;  %v3374_v42 = vld [vmem:[%s13133_s3 + $0x268] sm:$0xff] }
 0x4a7   : > { %4185 = vmatpush.msrb.mxu1 %v3374_v42 }
 0x4a8   : > { %4042 = vmatpush.msra.mxu3 %v3354_v45  ;;  %3629 = vmatpush.msrb.mxu2 %v3333_v60  ;;  %v3340_v45 = vld [vmem:[%s13133_s3 + $0x158] sm:$0xff] }
 0x4a9   : > { %v3336_v60 = vld [vmem:[%s13133_s3 + $0x138] sm:$0xff] }
 0x4aa   : > { %4043 = vmatpush.msra.mxu3 %v3352_v53  ;;  %v3329_v53 = vld [vmem:[%s13133_s3 + $0x100] sm:$0xff] }
 0x4ab   : > { %3575 = vmatmul.f32.gmra.mxu1 %v3233_v25 }
 0x4ac   : > { %3996 = vmatmul.f32.gmra.mxu0 %v3233_v25  ;;  %v3350_v25 = vld [vmem:[%s13133_s3 + $0x1a8] sm:$0xff] }
 0x4ad   : > { %7252 = vrot.lane.b32.xlu1 %v7251_v17, %s7559_s21  ;;  %7247 = vrot.lane.b32.xlu0 %v7246_v28, %s7559_s21  ;;  %v3331_v17 = vld [vmem:[%s13133_s3 + $0x110] sm:$0xff]  ;;  %v3344_v28 = vld [vmem:[%s13133_s3 + $0x178] sm:$0xff] }
 0x4ae   : > { %v3862_v32 = vpop.f32.mrf.mxu3  ;;  %4044 = vmatpush.msra.mxu3 %v3350_v25  ;;  %3630 = vmatpush.msrb.mxu2 %v3331_v17 }
 0x4af   : > { %v7113_v12 = vpop.permute.xlu0 %7112  ;;  %v3342_v32 = vld [vmem:[%s13133_s3 + $0x168] sm:$0xff] }
 0x4b0   : > { %4045 = vmatpush.msra.mxu3 %v3348_v23  ;;  %v7114_v36 = vunpack.i.l.bf16 %v7113_v12  ;;  %3631 = vmatpush.msrb.mxu2 %v3329_v53  ;;  %v7115_v14 = vunpack.i.h.bf16 %v7113_v12  ;;  %v3334_v23 = vld [vmem:[%s13133_s3 + $0x128] sm:$0xff] }
 0x4b2   : > { %4046 = vmatpush.msra.mxu3 %v3346_v24  ;;  %v3332_v24 = vld [vmem:[%s13133_s3 + $0x118] sm:$0xff]  ;;  %v3237_v17 = vsel %vm3200_vm0, %v13636_v38, %v7115_v14 }
 0x4b3   : > { %3577 = vmatmul.f32.gmra.mxu1 %v3234_v59 }
 0x4b4   : > { %3998 = vmatmul.f32.gmra.mxu0 %v3234_v59  ;;  %4047 = vmatpush.msra.mxu3 %v3344_v28  ;;  %v3338_v59 = vld [vmem:[%s13133_s3 + $0x148] sm:$0xff] }
 0x4b5   : > { %3052 = vrot.lane.b32.xlu0 %v2957_v48, %s7559_s21  ;;  %v3236_v48 = vsel %vm3200_vm0, %v10060_v20, %v7114_v36 }
 0x4b6   : > { %v10558_v57 = vpop.f32.mrf.mxu3  ;;  %4048 = vmatpush.msra.mxu3 %v3342_v32 }
 0x4b7   : > { %13643 = vst [vmem:[#allocation49_spill] sm:$0xff] %v10558_v57 }
 0x4b8   : > { %4049 = vmatpush.msra.mxu3 %v3340_v45 }
 0x4ba   : > { %4050 = vmatpush.msra.mxu3 %v3338_v59 }
 0x4bb   : > { %3580 = vmatmul.f32.gmra.mxu1 %v3235_v39 }
 0x4bc   : > { %4001 = vmatmul.f32.gmra.mxu0 %v3235_v39  ;;  %4051 = vmatpush.msra.mxu3 %v3336_v60  ;;  %v3330_v39 = vld [vmem:[%s13133_s3 + $0x108] sm:$0xff] }
 0x4be   : > { %v10577_v31 = vpop.f32.mrf.mxu3  ;;  %4052 = vmatpush.msra.mxu3 %v3334_v23 }
 0x4bf   : > { %13644 = vst [vmem:[#allocation76_spill] sm:$0xff] %v10577_v31 }
 0x4c0   : > { %4053 = vmatpush.msra.mxu3 %v3332_v24  ;;  %v2716_v24 = vrot.slane %v8994_v62, 2 }
 0x4c2   : > { %4054 = vmatpush.msra.mxu3 %v3330_v39 }
 0x4c3   : > { %3583 = vmatmul.f32.gmra.mxu1 %v3236_v48 }
 0x4c4   : > { %4004 = vmatmul.f32.gmra.mxu0 %v3236_v48  ;;  %v7123_v48 = vpop.permute.xlu2 %7122 }
 0x4c5   : > { %v7124_v53 = vunpack.i.l.bf16 %v7123_v48  ;;  %v7125_v39 = vunpack.i.h.bf16 %v7123_v48 }
 0x4c6   : > { %v3870_v25 = vpop.f32.mrf.mxu3  ;;  %v7118_v28 = vpop.permute.xlu1 %7117 }
 0x4c7   : > { %v7119_v12 = vunpack.i.l.bf16 %v7118_v28  ;;  %v7120_v42 = vunpack.i.h.bf16 %v7118_v28  ;;  %v3240_v23 = vsel %vm3200_vm0, %v10149_v30, %v7124_v53 }
 0x4c9   : > { %v3238_v32 = vsel %vm3200_vm0, %v13633_v8, %v7119_v12  ;;  %v3239_v59 = vsel %vm3200_vm0, %v13637_v47, %v7120_v42  ;;  %v2715_v12 = vrot.slane %v8988_v2, 2  ;;  %v2718_v2 = vrot.slane %v9009_v9, 2 }
 0x4cb   : > { %3585 = vmatmul.f32.gmra.mxu1 %v3237_v17  ;;  %v2717_v53 = vsel %vm2714_vm15, %v2715_v12, %v2716_v24  ;;  %v3372_v12 = vld [vmem:[%s13133_s3 + $0x258] sm:$0xff] }
 0x4cc   : > { %4006 = vmatmul.f32.gmra.mxu0 %v3237_v17  ;;  %4186 = vmatpush.msrb.mxu1 %v3372_v12 }
 0x4ce   : > { %v10610_v36 = vpop.f32.mrf.mxu3 }
 0x4cf   : > { %13645 = vst [vmem:[#allocation90_spill] sm:$0xff] %v10610_v36 }
 0x4d3   : > { %3588 = vmatmul.f32.gmra.mxu1 %v3238_v32 }
 0x4d4   : > { %4009 = vmatmul.f32.gmra.mxu0 %v3238_v32  ;;  %v10628_v32 = vpop.f32.mrf.mxu1 }
 0x4d6   : > { %v10614_v45 = vpop.f32.mrf.mxu3 }
 0x4d7   : > { %13646 = vst [vmem:[#allocation124_spill] sm:$0xff] %v10614_v45 }
 0x4db   : > { %3591 = vmatmul.f32.gmra.mxu1 %v3239_v59 }
 0x4dc   : > { %4012 = vmatmul.f32.gmra.mxu0 %v3239_v59  ;;  %v10631_v59 = vpop.f32.mrf.mxu0 }
 0x4de   : > { %v3878_v60 = vpop.f32.mrf.mxu3  ;;  %v10618_v25 = vpop.permute.xlu1 %7132 }
 0x4df   : > { %v7128_v14 = vpop.permute.xlu0 %7127  ;;  %v3241_v60 = vsel %vm3200_vm0, %v10173_v5, %v7125_v39  ;;  %v10645_v39 = vpop.permute.xlu2 %7137 }
 0x4e0   : > { %v7130_v12 = vunpack.i.h.bf16 %v7128_v14 }
 0x4e3   : > { %3593 = vmatmul.f32.gmra.mxu1 %v3240_v23 }
 0x4e4   : > { %4014 = vmatmul.f32.gmra.mxu0 %v3240_v23  ;;  %v7129_v23 = vunpack.i.l.bf16 %v7128_v14  ;;  %v7134_v14 = vunpack.i.l.bf16 %v10618_v25 }
 0x4e6   : > { %v10623_v17 = vpop.f32.mrf.mxu3  ;;  %v3242_v9 = vsel %vm3200_vm0, %v10176_v43, %v7129_v23 }
 0x4e7   : > { %13647 = vst [vmem:[#allocation27_spill] sm:$0xff] %v10623_v17  ;;  %v10625_v28 = vpop.permute.xlu0 %7142  ;;  %v7148_v48 = vpop.permute.xlu1 %7147 }
 0x4e8   : > { %v7145_v42 = vunpack.i.h.bf16 %v10625_v28  ;;  %v7149_v52 = vunpack.i.l.bf16 %v7148_v48  ;;  %v7150_v33 = vunpack.i.h.bf16 %v7148_v48 }
 0x4ea   : > { %v3249_v62 = vsel %vm3200_vm0, %v2717_v53, %v7145_v42  ;;  %v2719_v53 = vsel %vm2714_vm15, %v2716_v24, %v2718_v2  ;;  %v3243_v24 = vsel %vm3200_vm0, %v10223_v11, %v7130_v12  ;;  %v7135_v12 = vunpack.i.h.bf16 %v10618_v25 }
 0x4eb   : > { %3596 = vmatmul.f32.gmra.mxu1 %v3241_v60  ;;  %3632 = vmatmul.f32.vlgmr.msrb.gmra.mxu2 %v3249_v62 }
 0x4ec   : > { %4017 = vmatmul.f32.gmra.mxu0 %v3241_v60  ;;  %4055 = vmatmul.f32.vlgmr.msra.gmra.mxu3 %v3249_v62  ;;  %v3250_v60 = vsel %vm3200_vm0, %v2719_v53, %v7149_v52  ;;  %v13650_v62 = vld [vmem:[#allocation51_spill] sm:$0xff]  ;;  %v3245_v25 = vsel %vm3200_vm0, %v10243_v10, %v7135_v12 }
 0x4ed   : > { %v13651_v52 = vld [vmem:[#allocation83_spill] sm:$0xff] }
 0x4ee   : > { %v10638_v34 = vpop.f32.mrf.mxu3  ;;  %v2722_v53 = vrot.slane %v13651_v52, 2 }
 0x4ef   : > { %13648 = vst [vmem:[#allocation41_spill] sm:$0xff] %v10638_v34  ;;  %v2720_v34 = vrot.slane %v13650_v62, 2 }
 0x4f0   : > { %v10643_v17 = vpop.f32.mrf.mxu1 }
 0x4f1   : > { %v10647_v42 = vpop.f32.mrf.mxu0  ;;  %v2721_v57 = vsel %vm2714_vm15, %v2718_v2, %v2720_v34  ;;  %v2723_v48 = vsel %vm2714_vm15, %v2720_v34, %v2722_v53  ;;  %v2724_v34 = vrot.slane %v9113_v26, 2  ;;  %v3364_v26 = vld [vmem:[%s13133_s3 + $0x218] sm:$0xff] }
 0x4f2   : > { %13649 = vst [vmem:[#allocation75_spill] sm:$0xff] %v10647_v42  ;;  %v3251_v23 = vsel %vm3200_vm0, %v2721_v57, %v7150_v33  ;;  %v7153_v42 = vpop.permute.xlu2 %7152  ;;  %v3370_v33 = vld [vmem:[%s13133_s3 + $0x248] sm:$0xff]  ;;  %v3244_v57 = vsel %vm3200_vm0, %v10240_v51, %v7134_v14 }
 0x4f3   : > { %3599 = vmatmul.f32.gmra.mxu1 %v3242_v9  ;;  %3635 = vmatmul.f32.gmra.mxu2 %v3250_v60  ;;  %v7155_v62 = vunpack.i.h.bf16 %v7153_v42  ;;  %v2725_v14 = vsel %vm2714_vm15, %v2722_v53, %v2724_v34  ;;  %v2726_v53 = vrot.slane %v9134_v46, 2  ;;  %v2728_v46 = vrot.slane %v9158_v35, 2 }
 0x4f4   : > { %4020 = vmatmul.f32.gmra.mxu0 %v3242_v9  ;;  %4057 = vmatmul.f32.gmra.mxu3 %v3250_v60  ;;  %v7154_v9 = vunpack.i.l.bf16 %v7153_v42  ;;  %v3368_v60 = vld [vmem:[%s13133_s3 + $0x238] sm:$0xff]  ;;  %v2730_v35 = vrot.slane %v9172_v0, 2  ;;  %v2732_v0 = vrot.slane %v9198_v27, 2 }
 0x4f5   : > { %4187 = vmatpush.msrb.mxu1 %v3370_v33  ;;  %v3253_v42 = vsel %vm3200_vm0, %v2725_v14, %v7155_v62  ;;  %v7158_v33 = vpop.permute.xlu0 %7157  ;;  %v2727_v62 = vsel %vm2714_vm15, %v2724_v34, %v2726_v53  ;;  %v2729_v34 = vsel %vm2714_vm15, %v2726_v53, %v2728_v46 }
 0x4f6   : > { %v3886_v45 = vpop.f32.mrf.mxu3  ;;  %v3252_v2 = vsel %vm3200_vm0, %v2723_v48, %v7154_v9  ;;  %v3362_v48 = vld [vmem:[%s13133_s3 + $0x208] sm:$0xff]  ;;  %v2731_v53 = vsel %vm2714_vm15, %v2728_v46, %v2730_v35 }
 0x4f7   : > { %4188 = vmatpush.msrb.mxu1 %v3368_v60 }
 0x4f8   : > { %v3560_v36 = vpop.f32.mrf.mxu1 }
 0x4f9   : > { %v3981_v31 = vpop.f32.mrf.mxu0 }
 0x4fa   : > { %v7168_v46 = vpop.permute.xlu2 %7167 }
 0x4fb   : > { %3601 = vmatmul.f32.gmra.mxu1 %v3243_v24  ;;  %3638 = vmatmul.f32.gmra.mxu2 %v3251_v23 }
 0x4fc   : > { %4022 = vmatmul.f32.gmra.mxu0 %v3243_v24  ;;  %4059 = vmatmul.f32.gmra.mxu3 %v3251_v23  ;;  %v3366_v23 = vld [vmem:[%s13133_s3 + $0x228] sm:$0xff] }
 0x4fd   : > { %4189 = vmatpush.msrb.mxu1 %v3366_v23 }
 0x4fe   : > { %v10660_v45 = vpop.f32.mrf.mxu3 }
 0x4ff   : > { %13652 = vst [vmem:[#allocation101_spill] sm:$0xff] %v10660_v45  ;;  %4190 = vmatpush.msrb.mxu1 %v3364_v26 }
 0x500   : > { %v10662_v31 = vpop.f32.mrf.mxu1 }
 0x501   : > { %v10664_v36 = vpop.f32.mrf.mxu0  ;;  %4191 = vmatpush.msrb.mxu1 %v3362_v48 }
 0x502   : > { %v7183_v45 = vpop.permute.xlu2 %7182 }
 0x503   : > { %3604 = vmatmul.f32.gmra.mxu1 %v3244_v57  ;;  %3640 = vmatmul.f32.gmra.mxu2 %v3252_v2 }
 0x504   : > { %4025 = vmatmul.f32.gmra.mxu0 %v3244_v57  ;;  %4061 = vmatmul.f32.gmra.mxu3 %v3252_v2  ;;  %v7139_v57 = vunpack.i.l.bf16 %v10645_v39  ;;  %v7159_v2 = vunpack.i.l.bf16 %v7158_v33 }
 0x506   : > { %v10678_v24 = vpop.f32.mrf.mxu3  ;;  %v3246_v14 = vsel %vm3200_vm0, %v10195_v55, %v7139_v57  ;;  %v3254_v26 = vsel %vm3200_vm0, %v2727_v62, %v7159_v2 }
 0x507   : > { %13653 = vst [vmem:[#allocation116_spill] sm:$0xff] %v10678_v24  ;;  %v13654_v24 = vld [vmem:[#allocation109_spill] sm:$0xff] }
 0x508   : > { %v10683_v52 = vpop.f32.mrf.mxu1 }
 0x509   : > { %v10685_v9 = vpop.f32.mrf.mxu0 }
 0x50b   : > { %3607 = vmatmul.f32.gmra.mxu1 %v3245_v25  ;;  %3643 = vmatmul.f32.gmra.mxu2 %v3253_v42 }
 0x50c   : > { %4028 = vmatmul.f32.gmra.mxu0 %v3245_v25  ;;  %4063 = vmatmul.f32.gmra.mxu3 %v3253_v42  ;;  %v7140_v25 = vunpack.i.h.bf16 %v10645_v39  ;;  %v7160_v42 = vunpack.i.h.bf16 %v7158_v33  ;;  %v7144_v39 = vunpack.i.l.bf16 %v10625_v28 }
 0x50e   : > { %v3894_v60 = vpop.f32.mrf.mxu3  ;;  %v3247_v57 = vsel %vm3200_vm0, %v10183_v16, %v7140_v25  ;;  %v3255_v2 = vsel %vm3200_vm0, %v2729_v34, %v7160_v42  ;;  %v3248_v25 = vsel %vm3200_vm0, %v10186_v29, %v7144_v39  ;;  %v13655_v39 = vld [vmem:[#allocation108_spill] sm:$0xff] }
 0x510   : > { %v3568_v12 = vpop.f32.mrf.mxu1 }
 0x511   : > { %v3989_v23 = vpop.f32.mrf.mxu0 }
 0x512   : > { %v7163_v23 = vpop.permute.xlu1 %7162 }
 0x513   : > { %3609 = vmatmul.f32.gmra.mxu1 %v3246_v14  ;;  %3646 = vmatmul.f32.gmra.mxu2 %v3254_v26  ;;  %v7164_v33 = vunpack.i.l.bf16 %v7163_v23  ;;  %v7165_v28 = vunpack.i.h.bf16 %v7163_v23 }
 0x514   : > { %4030 = vmatmul.f32.gmra.mxu0 %v3246_v14  ;;  %4065 = vmatmul.f32.gmra.mxu3 %v3254_v26 }
 0x515   : > { %v3256_v42 = vsel %vm3200_vm0, %v2731_v53, %v7164_v33  ;;  %v2734_v33 = vrot.slane %v13655_v39, 2  ;;  %v7169_v53 = vunpack.i.l.bf16 %v7168_v46  ;;  %v2738_v39 = vrot.slane %v9315_v40, 2 }
 0x516   : > { %v3896_v48 = vpop.f32.mrf.mxu3 }
 0x517   : > { %v2735_v23 = vsel %vm2714_vm15, %v2732_v0, %v2734_v33 }
 0x518   : > { %v10705_v60 = vpop.f32.mrf.mxu1 }
 0x519   : > { %v10707_v12 = vpop.f32.mrf.mxu0 }
 0x51b   : > { %3611 = vmatmul.f32.gmra.mxu1 %v3247_v57  ;;  %3648 = vmatmul.f32.gmra.mxu2 %v3255_v2 }
 0x51c   : > { %4033 = vmatmul.f32.gmra.mxu0 %v3247_v57  ;;  %4067 = vmatmul.f32.gmra.mxu3 %v3255_v2  ;;  %v2733_v2 = vsel %vm2714_vm15, %v2730_v35, %v2732_v0  ;;  %v13656_v35 = vld [vmem:[#allocation6_spill] sm:$0xff] }
 0x51d   : > { %v13657_v0 = vld [vmem:[#allocation34_spill] sm:$0xff] }
 0x51e   : > { %v3898_v62 = vpop.f32.mrf.mxu3 }
 0x51f   : > { %v3257_v62 = vsel %vm3200_vm0, %v2733_v2, %v7165_v28  ;;  %v2736_v28 = vrot.slane %v9260_v41, 2 }
 0x520   : > { %v10715_v14 = vpop.f32.mrf.mxu1 }
 0x521   : > { %v10717_v26 = vpop.f32.mrf.mxu0 }
 0x523   : > { %3613 = vmatmul.f32.gmra.mxu1 %v3248_v25  ;;  %3651 = vmatmul.f32.gmra.mxu2 %v3256_v42 }
 0x524   : > { %4036 = vmatmul.f32.gmra.mxu0 %v3248_v25  ;;  %4069 = vmatmul.f32.gmra.mxu3 %v3256_v42  ;;  %v3258_v42 = vsel %vm3200_vm0, %v2735_v23, %v7169_v53 }
 0x526   : > { %v3900_v48 = vpop.f32.mrf.mxu3 }
 0x528   : > { %v3576_v34 = vpop.f32.mrf.mxu1 }
 0x529   : > { %v3997_v57 = vpop.f32.mrf.mxu0 }
 0x52a   : > { %v2737_v57 = vsel %vm2714_vm15, %v2734_v33, %v2736_v28  ;;  %v2740_v33 = vrot.slane %v9355_v44, 2 }
 0x52b   : > { %3654 = vmatmul.f32.gmra.mxu2 %v3257_v62  ;;  %6865 = vmatmul.msk.f32.vlgmr.msrb.gmra.mxu1 %vm3200_vm0, %v13654_v24  ;;  %v7170_v24 = vunpack.i.h.bf16 %v7168_v46  ;;  %v2739_v46 = vsel %vm2714_vm15, %v2736_v28, %v2738_v39  ;;  %v13659_v28 = vld [vmem:[#allocation77_spill] sm:$0xff] }
 0x52c   : > { %4071 = vmatmul.f32.gmra.mxu3 %v3257_v62  ;;  %v7173_v62 = vpop.permute.xlu0 %7172  ;;  %v2741_v40 = vsel %vm2714_vm15, %v2738_v39, %v2740_v33  ;;  %v13661_v39 = vld [vmem:[#allocation12_spill] sm:$0xff] }
 0x52d   : > { %v3259_v2 = vsel %vm3200_vm0, %v2737_v57, %v7170_v24  ;;  %v7174_v53 = vunpack.i.l.bf16 %v7173_v62  ;;  %v7175_v24 = vunpack.i.h.bf16 %v7173_v62 }
 0x530   : > { %v10729_v25 = vpop.f32.mrf.mxu1 }
 0x531   : > { %v10731_v27 = vpop.f32.mrf.mxu0 }
 0x533   : > { %3656 = vmatmul.f32.gmra.mxu2 %v3258_v42  ;;  %6866 = vmatmul.msk.f32.gmra.mxu1 %vm3200_vm0, %v13656_v35  ;;  %v13658_v35 = vld [vmem:[#allocation60_spill] sm:$0xff] }
 0x534   : > { %4073 = vmatmul.f32.gmra.mxu3 %v3258_v42  ;;  %v3260_v42 = vsel %vm3200_vm0, %v2739_v46, %v7174_v53  ;;  %v2742_v53 = vrot.slane %v9383_v13, 2 }
 0x536   : > { %v2743_v62 = vsel %vm2714_vm15, %v2740_v33, %v2742_v53  ;;  %v2746_v33 = vrot.slane %v9411_v49, 2 }
 0x538   : > { %v10738_v48 = vpop.f32.mrf.mxu1 }
 0x539   : > { %v10740_v34 = vpop.f32.mrf.mxu0 }
 0x53b   : > { %3659 = vmatmul.f32.gmra.mxu2 %v3259_v2  ;;  %6867 = vmatmul.msk.f32.gmra.mxu1 %vm3200_vm0, %v13657_v0  ;;  %v3261_v0 = vsel %vm3200_vm0, %v2741_v40, %v7175_v24 }
 0x53c   : > { %4075 = vmatmul.f32.gmra.mxu3 %v3259_v2 }
 0x540   : > { %v3584_v23 = vpop.f32.mrf.mxu1 }
 0x541   : > { %v4005_v41 = vpop.f32.mrf.mxu0  ;;  %v7178_v23 = vpop.permute.xlu1 %7177 }
 0x542   : > { %v7179_v41 = vunpack.i.l.bf16 %v7178_v23  ;;  %v7180_v24 = vunpack.i.h.bf16 %v7178_v23 }
 0x543   : > { %3662 = vmatmul.f32.gmra.mxu2 %v3260_v42  ;;  %6868 = vmatmul.msk.f32.gmra.mxu1 %vm3200_vm0, %v13658_v35  ;;  %v2744_v35 = vrot.slane %v9393_v6, 2 }
 0x544   : > { %4077 = vmatmul.f32.gmra.mxu3 %v3260_v42  ;;  %v3262_v42 = vsel %vm3200_vm0, %v2743_v62, %v7179_v41  ;;  %v7184_v41 = vunpack.i.l.bf16 %v7183_v45 }
 0x545   : > { %v2745_v13 = vsel %vm2714_vm15, %v2742_v53, %v2744_v35  ;;  %v2747_v6 = vsel %vm2714_vm15, %v2744_v35, %v2746_v33  ;;  %v13663_v53 = vld [vmem:[#allocation59_spill] sm:$0xff]  ;;  %v13665_v35 = vld [vmem:[#allocation86_spill] sm:$0xff] }
 0x546   : > { %v3264_v23 = vsel %vm3200_vm0, %v2747_v6, %v7184_v41 }
 0x548   : > { %v10752_v57 = vpop.f32.mrf.mxu1 }
 0x549   : > { %v10754_v2 = vpop.f32.mrf.mxu0 }
 0x54b   : > { %3664 = vmatmul.f32.gmra.mxu2 %v3261_v0  ;;  %6869 = vmatmul.msk.f32.gmra.mxu1 %vm3200_vm0, %v13659_v28  ;;  %v3263_v28 = vsel %vm3200_vm0, %v2745_v13, %v7180_v24  ;;  %v7188_v13 = vpop.permute.xlu0 %7187 }
 0x54c   : > { %4079 = vmatmul.f32.gmra.mxu3 %v3261_v0  ;;  %v7189_v41 = vunpack.i.l.bf16 %v7188_v13 }
 0x550   : > { %v10761_v46 = vpop.f32.mrf.mxu1 }
 0x551   : > { %v10763_v44 = vpop.f32.mrf.mxu0 }
 0x552   : > { %13660 = vst [vmem:[#allocation26_spill] sm:$0xff] %v10763_v44  ;;  %v13662_v44 = vld [vmem:[#allocation28_spill] sm:$0xff] }
 0x553   : > { %3667 = vmatmul.f32.gmra.mxu2 %v3262_v42  ;;  %6870 = vmatmul.msk.f32.gmra.mxu1 %vm3200_vm0, %v13661_v39  ;;  %v2748_v39 = vrot.slane %v9424_v4, 2 }
 0x554   : > { %4082 = vmatmul.f32.gmra.mxu3 %v3262_v42 }
 0x558   : > { %v3592_v40 = vpop.f32.mrf.mxu1 }
 0x559   : > { %v4013_v0 = vpop.f32.mrf.mxu0  ;;  %v2749_v40 = vsel %vm2714_vm15, %v2746_v33, %v2748_v39 }
 0x55b   : > { %3670 = vmatmul.f32.gmra.mxu2 %v3263_v28  ;;  %6871 = vmatmul.msk.f32.gmra.mxu1 %vm3200_vm0, %v13662_v44  ;;  %v7185_v44 = vunpack.i.h.bf16 %v7183_v45 }
 0x55c   : > { %4085 = vmatmul.f32.gmra.mxu3 %v3263_v28  ;;  %v2750_v28 = vrot.slane %v9464_v54, 2 }
 0x55d   : > { %v3265_v0 = vsel %vm3200_vm0, %v2749_v40, %v7185_v44  ;;  %v13667_v44 = vld [vmem:[#allocation102_spill] sm:$0xff]  ;;  %v2752_v40 = vrot.slane %v9476_v3, 2  ;;  %v2754_v3 = vrot.slane %v9515_v50, 2 }
 0x560   : > { %v10775_v62 = vpop.f32.mrf.mxu1 }
 0x561   : > { %v10777_v42 = vpop.f32.mrf.mxu0 }
 0x563   : > { %3672 = vmatmul.f32.gmra.mxu2 %v3264_v23  ;;  %6872 = vmatmul.msk.f32.gmra.mxu1 %vm3200_vm0, %v13663_v53  ;;  %v2751_v53 = vsel %vm2714_vm15, %v2748_v39, %v2750_v28 }
 0x564   : > { %4087 = vmatmul.f32.gmra.mxu3 %v3264_v23  ;;  %v3266_v33 = vsel %vm3200_vm0, %v2751_v53, %v7189_v41  ;;  %v7193_v41 = vpop.permute.xlu1 %7192 }
 0x568   : > { %v10784_v24 = vpop.f32.mrf.mxu1 }
 0x569   : > { %v10786_v49 = vpop.f32.mrf.mxu0 }
 0x56a   : > { %13664 = vst [vmem:[#allocation53_spill] sm:$0xff] %v10786_v49 }
 0x56b   : > { %3675 = vmatmul.f32.gmra.mxu2 %v3265_v0  ;;  %6873 = vmatmul.msk.f32.gmra.mxu1 %vm3200_vm0, %v13665_v35 }
 0x56c   : > { %4090 = vmatmul.f32.gmra.mxu3 %v3265_v0  ;;  %v7190_v0 = vunpack.i.h.bf16 %v7188_v13  ;;  %v7194_v13 = vunpack.i.l.bf16 %v7193_v41 }
 0x56e   : > { %v10793_v6 = vpop.f32.mrf.mxu2 }
 0x56f   : > { %13666 = vst [vmem:[#allocation67_spill] sm:$0xff] %v10793_v6  ;;  %v4056_v4 = vpop.f32.mrf.mxu3  ;;  %v2755_v6 = vsel %vm2714_vm15, %v2752_v40, %v2754_v3 }
 0x570   : > { %v3600_v45 = vpop.f32.mrf.mxu1 }
 0x571   : > { %v4021_v23 = vpop.f32.mrf.mxu0  ;;  %v2753_v45 = vsel %vm2714_vm15, %v2750_v28, %v2752_v40  ;;  %v3268_v28 = vsel %vm3200_vm0, %v2755_v6, %v7194_v13  ;;  %v7198_v13 = vpop.permute.xlu2 %7197 }
 0x572   : > { %v3267_v39 = vsel %vm3200_vm0, %v2753_v45, %v7190_v0  ;;  %v13670_v23 = vld [vmem:[#allocation11_spill] sm:$0xff]  ;;  %v13673_v0 = vld [vmem:[#allocation37_spill] sm:$0xff]  ;;  %v2756_v45 = vrot.slane %v9534_v37, 2  ;;  %v13677_v37 = vld [vmem:[#allocation54_spill] sm:$0xff] }
 0x573   : > { %3678 = vmatmul.f32.gmra.mxu2 %v3266_v33  ;;  %6874 = vmatmul.msk.f32.gmra.mxu1 %vm3200_vm0, %v13667_v44 }
 0x574   : > { %4093 = vmatmul.f32.gmra.mxu3 %v3266_v33  ;;  %v2757_v40 = vsel %vm2714_vm15, %v2754_v3, %v2756_v45 }
 0x576   : > { %v10800_v35 = vpop.f32.mrf.mxu2 }
 0x577   : > { %13668 = vst [vmem:[#allocation100_spill] sm:$0xff] %v10800_v35  ;;  %v4058_v54 = vpop.f32.mrf.mxu3 }
 0x578   : > { %v10802_v49 = vpop.f32.mrf.mxu1 }
 0x579   : > { %13669 = vst [vmem:[#allocation127_spill] sm:$0xff] %v10802_v49  ;;  %v10804_v4 = vpop.f32.mrf.mxu0 }
 0x57b   : > { %3680 = vmatmul.f32.gmra.mxu2 %v3267_v39  ;;  %6875 = vmatmul.msk.f32.gmra.mxu1 %vm3200_vm0, %v13670_v23  ;;  %v13674_v23 = vld [vmem:[#allocation81_spill] sm:$0xff] }
 0x57c   : > { %4095 = vmatmul.f32.gmra.mxu3 %v3267_v39  ;;  %v7195_v39 = vunpack.i.h.bf16 %v7193_v41  ;;  %v7199_v41 = vunpack.i.l.bf16 %v7198_v13 }
 0x57e   : > { %v3639_v53 = vpop.f32.mrf.mxu2  ;;  %v3269_v6 = vsel %vm3200_vm0, %v2757_v40, %v7195_v39  ;;  %v2760_v40 = vrot.slane %v9600_v18, 2 }
 0x57f   : > { %v4060_v33 = vpop.f32.mrf.mxu3 }
 0x580   : > { %v10811_v44 = vpop.f32.mrf.mxu1 }
 0x581   : > { %13671 = vst [vmem:[#allocation19_spill] sm:$0xff] %v10811_v44  ;;  %v10813_v54 = vpop.f32.mrf.mxu0  ;;  %v13675_v44 = vld [vmem:[#allocation62_spill] sm:$0xff] }
 0x582   : > { %13672 = vst [vmem:[#allocation52_spill] sm:$0xff] %v10813_v54 }
 0x583   : > { %3683 = vmatmul.f32.gmra.mxu2 %v3268_v28  ;;  %6876 = vmatmul.msk.f32.gmra.mxu1 %vm3200_vm0, %v13673_v0 }
 0x584   : > { %4098 = vmatmul.f32.gmra.mxu3 %v3268_v28  ;;  %v13678_v28 = vld [vmem:[#allocation29_spill] sm:$0xff] }
 0x586   : > { %v3641_v50 = vpop.f32.mrf.mxu2 }
 0x587   : > { %v3642_v53 = vadd.f32 %v3641_v50, %v13674_v23  ;;  %v4062_v33 = vpop.f32.mrf.mxu3  ;;  %v13679_v50 = vld [vmem:[#allocation105_spill] sm:$0xff] }
 0x588   : > { %v3608_v35 = vpop.f32.mrf.mxu1 }
 0x589   : > { %v10822_v49 = vadd.f32 %v13675_v44, %v3642_v53  ;;  %v4029_v54 = vpop.f32.mrf.mxu0  ;;  %v2758_v35 = vrot.slane %v9597_v7, 2  ;;  %v13681_v7 = vld [vmem:[#allocation85_spill] sm:$0xff] }
 0x58b   : > { %13676 = vst [vmem:[#allocation79_spill] sm:$0xff] %v10822_v49  ;;  %3686 = vmatmul.f32.gmra.mxu2 %v3269_v6  ;;  %4337 = vrot.lane.b32.xlu1 %v10822_v49, %s7561_s11  ;;  %v2759_v53 = vsel %vm2714_vm15, %v2756_v45, %v2758_v35  ;;  %v2761_v45 = vsel %vm2714_vm15, %v2758_v35, %v2760_v40  ;;  %v13701_v49 = vld [vmem:[#allocation128_spill] sm:$0xff] }
 0x58c   : > { %4101 = vmatmul.f32.gmra.mxu3 %v3269_v6  ;;  %6877 = vmatmul.msk.f32.gmra.mxu1 %vm3200_vm0, %v13677_v37  ;;  %v3270_v33 = vsel %vm3200_vm0, %v2759_v53, %v7199_v41  ;;  %v7200_v6 = vunpack.i.h.bf16 %v7198_v13  ;;  %v13683_v13 = vld [vmem:[#allocation65_spill] sm:$0xff] }
 0x58e   : > { %v3644_v44 = vpop.f32.mrf.mxu2  ;;  %v3271_v41 = vsel %vm3200_vm0, %v2761_v45, %v7200_v6 }
 0x58f   : > { %v3645_v54 = vadd.f32 %v3644_v44, %v13678_v28  ;;  %v4064_v0 = vpop.f32.mrf.mxu3 }
 0x590   : > { %v3610_v3 = vpop.f32.mrf.mxu1  ;;  %v7203_v0 = vpop.permute.xlu0 %7202 }
 0x591   : > { %v10833_v39 = vadd.f32 %v13679_v50, %v3645_v54  ;;  %v10835_v23 = vpop.f32.mrf.mxu0  ;;  %v13682_v3 = vld [vmem:[#allocation112_spill] sm:$0xff]  ;;  %v2762_v50 = vrot.slane %v9659_v22, 2  ;;  %v7204_v53 = vunpack.i.l.bf16 %v7203_v0  ;;  %v13685_v22 = vld [vmem:[#allocation7_spill] sm:$0xff] }
 0x593   : > { %13680 = vst [vmem:[#allocation93_spill] sm:$0xff] %v10833_v39  ;;  %3688 = vmatmul.f32.gmra.mxu2 %v3270_v33  ;;  %4339 = vrot.lane.b32.xlu2 %v10833_v39, %s7561_s11  ;;  %v2763_v6 = vsel %vm2714_vm15, %v2760_v40, %v2762_v50 }
 0x594   : > { %4103 = vmatmul.f32.gmra.mxu3 %v3270_v33  ;;  %6878 = vmatmul.msk.f32.gmra.mxu1 %vm3200_vm0, %v13681_v7  ;;  %v3272_v45 = vsel %vm3200_vm0, %v2763_v6, %v7204_v53  ;;  %v7208_v6 = vpop.permute.xlu1 %7207 }
 0x596   : > { %v3647_v37 = vpop.f32.mrf.mxu2 }
 0x597   : > { %v4066_v44 = vpop.f32.mrf.mxu3 }
 0x598   : > { %v3612_v28 = vpop.f32.mrf.mxu1  ;;  %v13684_v44 = vld [vmem:[#allocation56_spill] sm:$0xff] }
 0x599   : > { %v10844_v54 = vpop.f32.mrf.mxu0 }
 0x59b   : > { %3691 = vmatmul.f32.gmra.mxu2 %v3271_v41 }
 0x59c   : > { %4106 = vmatmul.f32.gmra.mxu3 %v3271_v41  ;;  %6879 = vmatmul.msk.f32.gmra.mxu1 %vm3200_vm0, %v13682_v3  ;;  %v2764_v41 = vrot.slane %v9673_v56, 2  ;;  %v7205_v3 = vunpack.i.h.bf16 %v7203_v0  ;;  %v13688_v56 = vld [vmem:[#allocation36_spill] sm:$0xff]  ;;  %v2766_v0 = vrot.slane %v9806_v1, 2 }
 0x59e   : > { %v3649_v18 = vpop.f32.mrf.mxu2  ;;  %v2765_v53 = vsel %vm2714_vm15, %v2762_v50, %v2764_v41 }
 0x59f   : > { %v3650_v33 = vadd.f32 %v3649_v18, %v13683_v13  ;;  %v4068_v7 = vpop.f32.mrf.mxu3  ;;  %v13686_v13 = vld [vmem:[#allocation92_spill] sm:$0xff] }
 0x5a0   : > { %v3614_v37 = vpop.f32.mrf.mxu1 }
 0x5a1   : > { %v10853_v28 = vadd.f32 %v13684_v44, %v3650_v33  ;;  %v4037_v35 = vpop.f32.mrf.mxu0  ;;  %v13687_v44 = vld [vmem:[#allocation115_spill] sm:$0xff] }
 0x5a2   : > { %v3273_v35 = vsel %vm3200_vm0, %v2765_v53, %v7205_v3  ;;  %v13689_v3 = vld [vmem:[#allocation80_spill] sm:$0xff] }
 0x5a3   : > { %3694 = vmatmul.f32.gmra.mxu2 %v3272_v45  ;;  %4341 = vrot.lane.b32.xlu0 %v10853_v28, %s7561_s11 }
 0x5a4   : > { %4109 = vmatmul.f32.gmra.mxu3 %v3272_v45  ;;  %6880 = vmatmul.msk.f32.gmra.mxu1 %vm3200_vm0, %v13685_v22  ;;  %v7209_v45 = vunpack.i.l.bf16 %v7208_v6 }
 0x5a6   : > { %v3652_v18 = vpop.f32.mrf.mxu2 }
 0x5a7   : > { %v3653_v33 = vadd.f32 %v3652_v18, %v13686_v13  ;;  %v4070_v7 = vpop.f32.mrf.mxu3 }
 0x5a8   : > { %v4193_v37 = vpop.f32.mrf.mxu1  ;;  %v13690_v7 = vld [vmem:[#allocation55_spill] sm:$0xff] }
 0x5a9   : > { %v10864_v40 = vadd.f32 %v13687_v44, %v3653_v33  ;;  %v2767_v33 = vsel %vm2714_vm15, %v2764_v41, %v2766_v0  ;;  %v2768_v37 = vrot.slane %v13690_v7, 2  ;;  %v7210_v44 = vunpack.i.h.bf16 %v7208_v6  ;;  %v13694_v6 = vld [vmem:[#allocation32_spill] sm:$0xff]  ;;  %v13695_v7 = vld [vmem:[#allocation42_spill] sm:$0xff] }
 0x5aa   : > { %v3274_v50 = vsel %vm3200_vm0, %v2767_v33, %v7209_v45  ;;  %v13693_v33 = vld [vmem:[#allocation15_spill] sm:$0xff] }
 0x5ab   : > { %3696 = vmatmul.f32.gmra.mxu2 %v3273_v35  ;;  %4343 = vrot.lane.b32.xlu1 %v10864_v40, %s7561_s11  ;;  %v2769_v41 = vsel %vm2714_vm15, %v2766_v0, %v2768_v37  ;;  %v13696_v0 = vld [vmem:[#allocation104_spill] sm:$0xff] }
 0x5ac   : > { %4111 = vmatmul.f32.gmra.mxu3 %v3273_v35  ;;  %6881 = vmatmul.msk.f32.gmra.mxu1 %vm3200_vm0, %v13688_v56  ;;  %v13691_v35 = vld [vmem:[#allocation118_spill] sm:$0xff]  ;;  %v3275_v45 = vsel %vm3200_vm0, %v2769_v41, %v7210_v44  ;;  %v13697_v41 = vld [vmem:[#allocation31_spill] sm:$0xff] }
 0x5ae   : > { %v3655_v22 = vpop.f32.mrf.mxu2 }
 0x5af   : > { %v4072_v18 = vpop.f32.mrf.mxu3  ;;  %v13692_v22 = vld [vmem:[#allocation78_spill] sm:$0xff] }
 0x5b0   : > { %v4195_v13 = vpop.f32.mrf.mxu1 }
 0x5b1   : > { %v7213_v13 = vpop.permute.xlu2 %7212 }
 0x5b3   : > { %3699 = vmatmul.f32.gmra.mxu2 %v3274_v50 }
 0x5b4   : > { %4114 = vmatmul.f32.gmra.mxu3 %v3274_v50  ;;  %6882 = vmatmul.msk.f32.gmra.mxu1 %vm3200_vm0, %v13689_v3  ;;  %v2770_v50 = vrot.slane %v13694_v6, 2  ;;  %v7214_v3 = vunpack.i.l.bf16 %v7213_v13  ;;  %v7215_v6 = vunpack.i.h.bf16 %v7213_v13 }
 0x5b6   : > { %v3657_v53 = vpop.f32.mrf.mxu2  ;;  %v2771_v44 = vsel %vm2714_vm15, %v2768_v37, %v2770_v50 }
 0x5b7   : > { %v3658_v56 = vadd.f32 %v3657_v53, %v13691_v35  ;;  %v4074_v1 = vpop.f32.mrf.mxu3 }
 0x5b8   : > { %v4197_v39 = vpop.f32.mrf.mxu1 }
 0x5b9   : > { %v10880_v18 = vadd.f32 %v13692_v22, %v3658_v56  ;;  %v3276_v22 = vsel %vm3200_vm0, %v2771_v44, %v7214_v3  ;;  %v13699_v3 = vld [vmem:[#allocation89_spill] sm:$0xff] }
 0x5bb   : > { %3702 = vmatmul.f32.gmra.mxu2 %v3275_v45  ;;  %4345 = vrot.lane.b32.xlu2 %v10880_v18, %s7561_s11 }
 0x5bc   : > { %4117 = vmatmul.f32.gmra.mxu3 %v3275_v45  ;;  %6883 = vmatmul.msk.f32.gmra.mxu1 %vm3200_vm0, %v13693_v33  ;;  %v13698_v45 = vld [vmem:[#allocation103_spill] sm:$0xff] }
 0x5bd   : > { %v2772_v33 = vrot.slane %v13698_v45, 2 }
 0x5be   : > { %v3660_v39 = vpop.f32.mrf.mxu2 }
 0x5bf   : > { %v3661_v53 = vadd.f32 %v3660_v39, %v13695_v7  ;;  %v4076_v35 = vpop.f32.mrf.mxu3 }
 0x5c0   : > { %v4199_v56 = vpop.f32.mrf.mxu1 }
 0x5c1   : > { %v10891_v1 = vadd.f32 %v13696_v0, %v3661_v53  ;;  %v2773_v53 = vsel %vm2714_vm15, %v2770_v50, %v2772_v33  ;;  %v7218_v56 = vpop.permute.xlu0 %7217  ;;  %v13700_v0 = vld [vmem:[#allocation43_spill] sm:$0xff] }
 0x5c2   : > { %v3277_v37 = vsel %vm3200_vm0, %v2773_v53, %v7215_v6  ;;  %v2774_v44 = vrot.slane %v13700_v0, 2  ;;  %v13704_v53 = vld [vmem:[#allocation14_spill] sm:$0xff]  ;;  %v13705_v0 = vld [vmem:[#allocation107_spill] sm:$0xff] }
 0x5c3   : > { %3704 = vmatmul.f32.gmra.mxu2 %v3276_v22  ;;  %4347 = vrot.lane.b32.xlu0 %v10891_v1, %s7561_s11 }
 0x5c4   : > { %4119 = vmatmul.f32.gmra.mxu3 %v3276_v22  ;;  %6884 = vmatmul.msk.f32.gmra.mxu1 %vm3200_vm0, %v13697_v41  ;;  %v7219_v22 = vunpack.i.l.bf16 %v7218_v56  ;;  %v2775_v50 = vsel %vm2714_vm15, %v2772_v33, %v2774_v44  ;;  %v13706_v33 = vld [vmem:[#allocation66_spill] sm:$0xff] }
 0x5c6   : > { %v3663_v39 = vpop.f32.mrf.mxu2  ;;  %v3278_v6 = vsel %vm3200_vm0, %v2775_v50, %v7219_v22 }
 0x5c7   : > { %v4078_v7 = vpop.f32.mrf.mxu3 }
 0x5c8   : > { %v4201_v35 = vpop.f32.mrf.mxu1  ;;  %v13703_v7 = vld [vmem:[#allocation8_spill] sm:$0xff] }
 0x5cb   : > { %3707 = vmatmul.f32.gmra.mxu2 %v3277_v37 }
 0x5cc   : > { %4122 = vmatmul.f32.gmra.mxu3 %v3277_v37  ;;  %6885 = vmatmul.msk.f32.gmra.mxu1 %vm3200_vm0, %v13699_v3  ;;  %v7220_v37 = vunpack.i.h.bf16 %v7218_v56  ;;  %v2778_v56 = vrot.slane %v10027_v58, 2 }
 0x5ce   : > { %v3665_v41 = vpop.f32.mrf.mxu2 }
 0x5cf   : > { %v3666_v45 = vadd.f32 %v3665_v41, %v13701_v49  ;;  %v10906_v13 = vpop.f32.mrf.mxu3  ;;  %v2776_v49 = vrot.slane %v9999_v19, 2  ;;  %v13707_v19 = vld [vmem:[#allocation40_spill] sm:$0xff] }
 0x5d0   : > { %13702 = vst [vmem:[#allocation126_spill] sm:$0xff] %v10906_v13  ;;  %v4203_v39 = vpop.f32.mrf.mxu1 }
 0x5d1   : > { %v10909_v35 = vadd.f32 %v13703_v7, %v3666_v45  ;;  %v2777_v22 = vsel %vm2714_vm15, %v2774_v44, %v2776_v49 }
 0x5d2   : > { %v3279_v50 = vsel %vm3200_vm0, %v2777_v22, %v7220_v37  ;;  %v13708_v37 = vld [vmem:[#allocation88_spill] sm:$0xff] }
 0x5d3   : > { %3710 = vmatmul.f32.gmra.mxu2 %v3278_v6  ;;  %4349 = vrot.lane.b32.xlu1 %v10909_v35, %s7561_s11 }
 0x5d4   : > { %4125 = vmatmul.f32.gmra.mxu3 %v3278_v6  ;;  %6886 = vmatmul.msk.f32.gmra.mxu1 %vm3200_vm0, %v13704_v53  ;;  %v7223_v6 = vpop.permute.xlu1 %7222 }
 0x5d5   : > { %v7224_v53 = vunpack.i.l.bf16 %v7223_v6  ;;  %v7225_v22 = vunpack.i.h.bf16 %v7223_v6  ;;  %v2782_v6 = vrot.slane %v10057_v61, 2  ;;  %v13715_v61 = vld [vmem:[#allocation44_spill] sm:$0xff] }
 0x5d6   : > { %v3668_v3 = vpop.f32.mrf.mxu2 }
 0x5d7   : > { %v3669_v41 = vadd.f32 %v3668_v3, %v13705_v0  ;;  %v10919_v45 = vpop.f32.mrf.mxu3 }
 0x5d8   : > { %v4205_v39 = vpop.f32.mrf.mxu1 }
 0x5d9   : > { %v10922_v7 = vadd.f32 %v13706_v33, %v3669_v41  ;;  %v2779_v39 = vsel %vm2714_vm15, %v2776_v49, %v2778_v56  ;;  %v2780_v33 = vrot.slane %v10036_v21, 2  ;;  %v13711_v21 = vld [vmem:[#allocation30_spill] sm:$0xff] }
 0x5da   : > { %v3280_v44 = vsel %vm3200_vm0, %v2779_v39, %v7224_v53  ;;  %v7228_v39 = vpop.permute.xlu2 %7227 }
 0x5db   : > { %3712 = vmatmul.f32.gmra.mxu2 %v3279_v50  ;;  %4351 = vrot.lane.b32.xlu2 %v10922_v7, %s7561_s11  ;;  %v2781_v49 = vsel %vm2714_vm15, %v2778_v56, %v2780_v33 }
 0x5dc   : > { %4127 = vmatmul.f32.gmra.mxu3 %v3279_v50  ;;  %6887 = vmatmul.msk.f32.gmra.mxu1 %vm3200_vm0, %v13707_v19  ;;  %v13709_v19 = vld [vmem:[#allocation94_spill] sm:$0xff]  ;;  %v3281_v53 = vsel %vm3200_vm0, %v2781_v49, %v7225_v22 }
 0x5de   : > { %v3671_v3 = vpop.f32.mrf.mxu2 }
 0x5df   : > { %v4086_v0 = vpop.f32.mrf.mxu3 }
 0x5e0   : > { %v4207_v41 = vpop.f32.mrf.mxu1  ;;  %v13710_v0 = vld [vmem:[#allocation114_spill] sm:$0xff] }
 0x5e3   : > { %3715 = vmatmul.f32.gmra.mxu2 %v3280_v44 }
 0x5e4   : > { %4130 = vmatmul.f32.gmra.mxu3 %v3280_v44  ;;  %6888 = vmatmul.msk.f32.gmra.mxu1 %vm3200_vm0, %v13708_v37  ;;  %v7229_v44 = vunpack.i.l.bf16 %v7228_v39 }
 0x5e6   : > { %v3673_v50 = vpop.f32.mrf.mxu2 }
 0x5e7   : > { %v3674_v13 = vadd.f32 %v3673_v50, %v13709_v19  ;;  %v10937_v58 = vpop.f32.mrf.mxu3  ;;  %v13712_v50 = vld [vmem:[#allocation72_spill] sm:$0xff] }
 0x5e8   : > { %v4209_v3 = vpop.f32.mrf.mxu1 }
 0x5e9   : > { %v10940_v41 = vadd.f32 %v13710_v0, %v3674_v13  ;;  %v13714_v3 = vld [vmem:[#allocation18_spill] sm:$0xff]  ;;  %v2783_v0 = vsel %vm2714_vm15, %v2780_v33, %v2782_v6 }
 0x5ea   : > { %v3282_v49 = vsel %vm3200_vm0, %v2783_v0, %v7229_v44  ;;  %v13716_v44 = vld [vmem:[#allocation70_spill] sm:$0xff]  ;;  %v2786_v0 = vrot.slane %v13636_v38, 2 }
 0x5eb   : > { %3718 = vmatmul.f32.gmra.mxu2 %v3281_v53  ;;  %4353 = vrot.lane.b32.xlu0 %v10940_v41, %s7561_s11  ;;  %v13720_v38 = vld [vmem:[#allocation130_spill] sm:$0xff] }
 0x5ec   : > { %4133 = vmatmul.f32.gmra.mxu3 %v3281_v53  ;;  %6889 = vmatmul.msk.f32.gmra.mxu1 %vm3200_vm0, %v13711_v21  ;;  %v2784_v53 = vrot.slane %v10060_v20, 2  ;;  %v7230_v21 = vunpack.i.h.bf16 %v7228_v39 }
 0x5ee   : > { %v3676_v37 = vpop.f32.mrf.mxu2 }
 0x5ef   : > { %v3677_v13 = vadd.f32 %v3676_v37, %v13712_v50  ;;  %v10950_v19 = vpop.f32.mrf.mxu3 }
 0x5f0   : > { %13713 = vst [vmem:[#allocation95_spill] sm:$0xff] %v10950_v19  ;;  %v4211_v56 = vpop.f32.mrf.mxu1  ;;  %v13717_v19 = vld [vmem:[#allocation35_spill] sm:$0xff] }
 0x5f1   : > { %v10953_v22 = vadd.f32 %v13714_v3, %v3677_v13  ;;  %v2785_v13 = vsel %vm2714_vm15, %v2782_v6, %v2784_v53  ;;  %v7233_v3 = vpop.permute.xlu0 %7232  ;;  %v2787_v6 = vsel %vm2714_vm15, %v2784_v53, %v2786_v0 }
 0x5f2   : > { %v3283_v33 = vsel %vm3200_vm0, %v2785_v13, %v7230_v21  ;;  %v7235_v13 = vunpack.i.h.bf16 %v7233_v3 }
 0x5f3   : > { %3720 = vmatmul.f32.gmra.mxu2 %v3282_v49  ;;  %4355 = vrot.lane.b32.xlu1 %v10953_v22, %s7561_s11 }
 0x5f4   : > { %4135 = vmatmul.f32.gmra.mxu3 %v3282_v49  ;;  %6890 = vmatmul.msk.f32.gmra.mxu1 %vm3200_vm0, %v13715_v61  ;;  %v7234_v49 = vunpack.i.l.bf16 %v7233_v3  ;;  %v2790_v3 = vrot.slane %v13637_v47, 2 }
 0x5f6   : > { %v3679_v37 = vpop.f32.mrf.mxu2  ;;  %v3284_v21 = vsel %vm3200_vm0, %v2787_v6, %v7234_v49 }
 0x5f7   : > { %v4094_v50 = vpop.f32.mrf.mxu3 }
 0x5f8   : > { %v4213_v56 = vpop.f32.mrf.mxu1  ;;  %v13719_v50 = vld [vmem:[#allocation106_spill] sm:$0xff] }
 0x5fb   : > { %3723 = vmatmul.f32.gmra.mxu2 %v3283_v33 }
 0x5fc   : > { %4138 = vmatmul.f32.gmra.mxu3 %v3283_v33  ;;  %6891 = vmatmul.msk.f32.gmra.mxu1 %vm3200_vm0, %v13716_v44  ;;  %v13721_v44 = vld [vmem:[#allocation110_spill] sm:$0xff] }
 0x5fe   : > { %v3681_v61 = vpop.f32.mrf.mxu2 }
 0x5ff   : > { %v3682_v20 = vadd.f32 %v3681_v61, %v13717_v19  ;;  %v10968_v39 = vpop.f32.mrf.mxu3  ;;  %v2788_v19 = vrot.slane %v13633_v8, 2  ;;  %v13725_v8 = vld [vmem:[#allocation17_spill] sm:$0xff] }
 0x600   : > { %13718 = vst [vmem:[#allocation68_spill] sm:$0xff] %v10968_v39  ;;  %v4215_v37 = vpop.f32.mrf.mxu1 }
 0x601   : > { %v10971_v56 = vadd.f32 %v13719_v50, %v3682_v20  ;;  %v13723_v37 = vld [vmem:[#allocation57_spill] sm:$0xff]  ;;  %v2789_v50 = vsel %vm2714_vm15, %v2786_v0, %v2788_v19  ;;  %v2791_v0 = vsel %vm2714_vm15, %v2788_v19, %v2790_v3 }
 0x602   : > { %v3285_v6 = vsel %vm3200_vm0, %v2789_v50, %v7235_v13  ;;  %v2792_v50 = vrot.slane %v10149_v30, 2  ;;  %v13729_v30 = vld [vmem:[#allocation9_spill] sm:$0xff] }
 0x603   : > { %3726 = vmatmul.f32.gmra.mxu2 %v3284_v21  ;;  %4357 = vrot.lane.b32.xlu2 %v10971_v56, %s7561_s11 }
 0x604   : > { %4141 = vmatmul.f32.gmra.mxu3 %v3284_v21  ;;  %6892 = vmatmul.msk.f32.gmra.mxu1 %vm3200_vm0, %v13720_v38  ;;  %v7238_v21 = vpop.permute.xlu1 %7237  ;;  %v2793_v19 = vsel %vm2714_vm15, %v2790_v3, %v2792_v50  ;;  %v13731_v3 = vld [vmem:[#allocation82_spill] sm:$0xff] }
 0x605   : > { %v7239_v38 = vunpack.i.l.bf16 %v7238_v21 }
 0x606   : > { %v3684_v33 = vpop.f32.mrf.mxu2 }
 0x607   : > { %v3685_v61 = vadd.f32 %v3684_v33, %v13721_v44  ;;  %v10981_v20 = vpop.f32.mrf.mxu3  ;;  %v3286_v13 = vsel %vm3200_vm0, %v2791_v0, %v7239_v38  ;;  %v7243_v0 = vpop.permute.xlu2 %7242 }
 0x608   : > { %13722 = vst [vmem:[#allocation121_spill] sm:$0xff] %v10981_v20  ;;  %v13727_v20 = vld [vmem:[#allocation47_spill] sm:$0xff] }
 0x609   : > { %v10984_v53 = vadd.f32 %v13723_v37, %v3685_v61  ;;  %v10986_v49 = vpop.f32.mrf.mxu1  ;;  %v13726_v37 = vld [vmem:[#allocation91_spill] sm:$0xff] }
 0x60a   : > { %13724 = vst [vmem:[#allocation51_spill] sm:$0xff] %v10986_v49 }
 0x60b   : > { %3728 = vmatmul.f32.gmra.mxu2 %v3285_v6  ;;  %4359 = vrot.lane.b32.xlu0 %v10984_v53, %s7561_s11 }
 0x60c   : > { %4143 = vmatmul.f32.gmra.mxu3 %v3285_v6  ;;  %6893 = vmatmul.msk.f32.gmra.mxu1 %vm3200_vm0, %v13725_v8  ;;  %v7240_v6 = vunpack.i.h.bf16 %v7238_v21  ;;  %v7244_v21 = vunpack.i.l.bf16 %v7243_v0 }
 0x60e   : > { %v3687_v33 = vpop.f32.mrf.mxu2  ;;  %v3287_v38 = vsel %vm3200_vm0, %v2793_v19, %v7240_v6 }
 0x60f   : > { %v4102_v44 = vpop.f32.mrf.mxu3  ;;  %v13728_v33 = vld [vmem:[#allocation129_spill] sm:$0xff] }
 0x611   : > { %v10995_v61 = vpop.f32.mrf.mxu1 }
 0x613   : > { %3731 = vmatmul.f32.gmra.mxu2 %v3286_v13 }
 0x614   : > { %4146 = vmatmul.f32.gmra.mxu3 %v3286_v13  ;;  %6894 = vmatmul.msk.f32.gmra.mxu1 %vm3200_vm0, %v13726_v37  ;;  %v13730_v37 = vld [vmem:[#allocation122_spill] sm:$0xff] }
 0x616   : > { %v3689_v8 = vpop.f32.mrf.mxu2 }
 0x617   : > { %v3690_v47 = vadd.f32 %v3689_v8, %v13727_v20  ;;  %v11003_v39 = vpop.f32.mrf.mxu3  ;;  %v2794_v20 = vrot.slane %v10173_v5, 2  ;;  %v13734_v5 = vld [vmem:[#allocation69_spill] sm:$0xff] }
 0x619   : > { %v11006_v44 = vadd.f32 %v13728_v33, %v3690_v47  ;;  %v4223_v49 = vpop.f32.mrf.mxu1  ;;  %v2795_v33 = vsel %vm2714_vm15, %v2792_v50, %v2794_v20  ;;  %v5683_v50 = vld [vmem:[%s13135_s5 + $0x78] sm:$0xff] }
 0x61a   : > { %v3288_v19 = vsel %vm3200_vm0, %v2795_v33, %v7244_v21  ;;  %5760 = vmatpush.msra.mxu2 %v5683_v50  ;;  %v7248_v33 = vpop.permute.xlu0 %7247  ;;  %v5687_v50 = vld [vmem:[%s13135_s5 + $0x98] sm:$0xff] }
 0x61b   : > { %3734 = vmatmul.f32.gmra.mxu2 %v3287_v38  ;;  %4361 = vrot.lane.b32.xlu1 %v11006_v44, %s7561_s11 }
 0x61c   : > { %4149 = vmatmul.f32.gmra.mxu3 %v3287_v38  ;;  %6895 = vmatmul.msk.f32.gmra.mxu1 %vm3200_vm0, %v13729_v30  ;;  %v2796_v38 = vrot.slane %v10176_v43, 2  ;;  %v7245_v30 = vunpack.i.h.bf16 %v7243_v0  ;;  %v2798_v43 = vrot.slane %v10223_v11, 2  ;;  %v7249_v0 = vunpack.i.l.bf16 %v7248_v33  ;;  %v13738_v11 = vld [vmem:[#allocation33_spill] sm:$0xff] }
 0x61d   : > { %5885 = vmatpush.msra.mxu0 %v5687_v50 }
 0x61e   : > { %v3692_v13 = vpop.f32.mrf.mxu2 }
 0x61f   : > { %v3693_v8 = vadd.f32 %v3692_v13, %v13730_v37  ;;  %v11016_v49 = vpop.f32.mrf.mxu3 }
 0x621   : > { %v11019_v47 = vadd.f32 %v13731_v3, %v3693_v8  ;;  %v11021_v6 = vpop.f32.mrf.mxu1  ;;  %v2797_v3 = vsel %vm2714_vm15, %v2794_v20, %v2796_v38 }
 0x622   : > { %13733 = vst [vmem:[#allocation109_spill] sm:$0xff] %v11021_v6  ;;  %v3289_v21 = vsel %vm3200_vm0, %v2797_v3, %v7245_v30  ;;  %v2799_v30 = vsel %vm2714_vm15, %v2796_v38, %v2798_v43 }
 0x623   : > { %13732 = vst [vmem:[#allocation83_spill] sm:$0xff] %v11019_v47  ;;  %3736 = vmatmul.f32.gmra.mxu2 %v3288_v19  ;;  %4363 = vrot.lane.b32.xlu2 %v11019_v47, %s7561_s11  ;;  %v3290_v3 = vsel %vm3200_vm0, %v2799_v30, %v7249_v0  ;;  %v13739_v0 = vld [vmem:[#allocation13_spill] sm:$0xff] }
 0x624   : > { %4151 = vmatmul.f32.gmra.mxu3 %v3288_v19  ;;  %6896 = vmatmul.msk.f32.gmra.mxu1 %vm3200_vm0, %v13734_v5  ;;  %v13736_v19 = vld [vmem:[#allocation117_spill] sm:$0xff] }
 0x626   : > { %v3695_v13 = vpop.f32.mrf.mxu2 }
 0x627   : > { %v4110_v37 = vpop.f32.mrf.mxu3 }
 0x628   : > { %v13737_v37 = vld [vmem:[#allocation61_spill] sm:$0xff] }
 0x629   : > { %v11030_v8 = vpop.f32.mrf.mxu1 }
 0x62a   : > { %13735 = vst [vmem:[#allocation108_spill] sm:$0xff] %v11030_v8 }
 0x62b   : > { %3739 = vmatmul.f32.gmra.mxu2 %v3289_v21 }
 0x62c   : > { %4154 = vmatmul.f32.gmra.mxu3 %v3289_v21  ;;  %6897 = vmatmul.msk.f32.gmra.mxu1 %vm3200_vm0, %v13736_v19 }
 0x62e   : > { %v3697_v5 = vpop.f32.mrf.mxu2 }
 0x62f   : > { %v3698_v13 = vadd.f32 %v3697_v5, %v10628_v32  ;;  %v11041_v20 = vpop.f32.mrf.mxu3  ;;  %v2800_v32 = vrot.slane %v10240_v51, 2  ;;  %v13740_v51 = vld [vmem:[#allocation46_spill] sm:$0xff] }
 0x631   : > { %v11044_v8 = vadd.f32 %v13737_v37, %v3698_v13  ;;  %v4231_v6 = vpop.f32.mrf.mxu1  ;;  %v2801_v37 = vsel %vm2714_vm15, %v2798_v43, %v2800_v32 }
 0x632   : > { %v7250_v6 = vunpack.i.h.bf16 %v7248_v33 }
 0x633   : > { %3742 = vmatmul.f32.gmra.mxu2 %v3290_v3  ;;  %4365 = vrot.lane.b32.xlu0 %v11044_v8, %s7561_s11 }
 0x634   : > { %4157 = vmatmul.f32.gmra.mxu3 %v3290_v3  ;;  %6898 = vmatmul.msk.f32.gmra.mxu1 %vm3200_vm0, %v13738_v11  ;;  %v3291_v30 = vsel %vm3200_vm0, %v2801_v37, %v7250_v6  ;;  %v7253_v3 = vpop.permute.xlu1 %7252  ;;  %v5682_v6 = vld [vmem:[%s13135_s5 + $0x70] sm:$0xff] }
 0x635   : > { %v7254_v33 = vunpack.i.l.bf16 %v7253_v3  ;;  %5761 = vmatpush.msra.mxu2 %v5682_v6  ;;  %v7258_v6 = vpop.permute.xlu2 %7257 }
 0x636   : > { %v3700_v21 = vpop.f32.mrf.mxu2 }
 0x637   : > { %v3701_v38 = vadd.f32 %v3700_v21, %v10643_v17  ;;  %v11057_v19 = vpop.f32.mrf.mxu3  ;;  %v2802_v17 = vrot.slane %v10243_v10, 2  ;;  %v7255_v10 = vunpack.i.h.bf16 %v7253_v3  ;;  %v13745_v3 = vld [vmem:[#allocation45_spill] sm:$0xff] }
 0x639   : > { %v11060_v5 = vadd.f32 %v13739_v0, %v3701_v38  ;;  %v11062_v13 = vpop.f32.mrf.mxu1  ;;  %v2803_v43 = vsel %vm2714_vm15, %v2800_v32, %v2802_v17  ;;  %v13742_v0 = vld [vmem:[#allocation58_spill] sm:$0xff]  ;;  %v2804_v32 = vrot.slane %v10195_v55, 2  ;;  %v7259_v55 = vunpack.i.l.bf16 %v7258_v6 }
 0x63a   : > { %v3292_v38 = vsel %vm3200_vm0, %v2803_v43, %v7254_v33 }
 0x63b   : > { %3744 = vmatmul.f32.gmra.mxu2 %v3291_v30  ;;  %4367 = vrot.lane.b32.xlu1 %v11060_v5, %s7561_s11  ;;  %v2805_v33 = vsel %vm2714_vm15, %v2802_v17, %v2804_v32  ;;  %v13746_v17 = vld [vmem:[#allocation113_spill] sm:$0xff] }
 0x63c   : > { %4159 = vmatmul.f32.gmra.mxu3 %v3291_v30  ;;  %6899 = vmatmul.msk.f32.gmra.mxu1 %vm3200_vm0, %v13740_v51  ;;  %v3293_v43 = vsel %vm3200_vm0, %v2805_v33, %v7255_v10  ;;  %v7260_v33 = vunpack.i.h.bf16 %v7258_v6 }
 0x63e   : > { %v3703_v50 = vpop.f32.mrf.mxu2 }
 0x63f   : > { %v4118_v11 = vpop.f32.mrf.mxu3  ;;  %v13743_v50 = vld [vmem:[#allocation73_spill] sm:$0xff] }
 0x641   : > { %v11071_v21 = vpop.f32.mrf.mxu1 }
 0x642   : > { %13741 = vst [vmem:[#allocation6_spill] sm:$0xff] %v11071_v21 }
 0x643   : > { %3747 = vmatmul.f32.gmra.mxu2 %v3292_v38 }
 0x644   : > { %4162 = vmatmul.f32.gmra.mxu3 %v3292_v38  ;;  %6900 = vmatmul.msk.f32.gmra.mxu1 %vm3200_vm0, %v13742_v0 }
 0x646   : > { %v3705_v37 = vpop.f32.mrf.mxu2 }
 0x647   : > { %v3706_v30 = vadd.f32 %v3705_v37, %v10662_v31  ;;  %v11081_v51 = vpop.f32.mrf.mxu3  ;;  %v2806_v31 = vrot.slane %v10183_v16, 2  ;;  %v13748_v16 = vld [vmem:[#allocation120_spill] sm:$0xff] }
 0x649   : > { %v11085_v11 = vadd.f32 %v13743_v50, %v3706_v30  ;;  %v4239_v21 = vpop.f32.mrf.mxu1  ;;  %v2807_v30 = vsel %vm2714_vm15, %v2804_v32, %v2806_v31  ;;  %v5681_v32 = vld [vmem:[%s13135_s5 + $0x68] sm:$0xff] }
 0x64a   : > { %v3294_v50 = vsel %vm3200_vm0, %v2807_v30, %v7259_v55  ;;  %5762 = vmatpush.msra.mxu2 %v5681_v32  ;;  %v3053_v30 = vpop.permute.xlu0 %3052 }
 0x64b   : > { %13744 = vst [vmem:[#allocation34_spill] sm:$0xff] %v11085_v11  ;;  %3750 = vmatmul.f32.gmra.mxu2 %v3293_v43  ;;  %4369 = vrot.lane.b32.xlu2 %v11085_v11, %s7561_s11 }
 0x64c   : > { %4165 = vmatmul.f32.gmra.mxu3 %v3293_v43  ;;  %6901 = vmatmul.msk.f32.gmra.mxu1 %vm3200_vm0, %v13745_v3 }
 0x64e   : > { %v3708_v38 = vpop.f32.mrf.mxu2 }
 0x64f   : > { %v3709_v0 = vadd.f32 %v3708_v38, %v10683_v52  ;;  %v11095_v21 = vpop.f32.mrf.mxu3  ;;  %v2808_v52 = vrot.slane %v10186_v29, 2  ;;  %v11119_v29 = vrot.slane %v13634_v15, 2  ;;  %v13753_v15 = vld [vmem:[#allocation97_spill] sm:$0xff] }
 0x651   : > { %v11098_v37 = vadd.f32 %v13746_v17, %v3709_v0  ;;  %v11100_v10 = vpop.f32.mrf.mxu1  ;;  %v2809_v0 = vsel %vm2714_vm15, %v2806_v31, %v2808_v52  ;;  %v13749_v17 = vld [vmem:[#allocation23_spill] sm:$0xff]  ;;  %13750 = vst [vmem:[#allocation77_spill] sm:$0xff] %v11119_v29 }
 0x652   : > { %v3295_v55 = vsel %vm3200_vm0, %v2809_v0, %v7260_v33  ;;  %v2811_v33 = vsel %vm2714_vm15, %v2808_v52, %v11119_v29 }
 0x653   : > { %13747 = vst [vmem:[#allocation60_spill] sm:$0xff] %v11098_v37  ;;  %3752 = vmatmul.f32.gmra.mxu2 %v3294_v50  ;;  %4371 = vrot.lane.b32.xlu0 %v11098_v37, %s7561_s11  ;;  %v3296_v0 = vsel %vm3200_vm0, %v2811_v33, %v3053_v30 }
 0x654   : > { %4167 = vmatmul.f32.gmra.mxu3 %v3294_v50  ;;  %6902 = vmatmul.msk.f32.gmra.mxu1 %vm3200_vm0, %v13748_v16  ;;  %v13751_v16 = vld [vmem:[#allocation98_spill] sm:$0xff] }
 0x656   : > { %v3711_v43 = vpop.f32.mrf.mxu2 }
 0x657   : > { %v4126_v3 = vpop.f32.mrf.mxu3 }
 0x659   : > { %v11109_v38 = vpop.f32.mrf.mxu1 }
 0x65b   : > { %3754 = vmatmul.f32.gmra.mxu2 %v3295_v55 }
 0x65c   : > { %4170 = vmatmul.f32.gmra.mxu3 %v3295_v55  ;;  %6903 = vmatmul.msk.f32.gmra.mxu1 %vm3200_vm0, %v13749_v17  ;;  %v4113_v17 = vadd.f32 %v11041_v20, %v10631_v59  ;;  %v13759_v20 = vld [vmem:[#allocation123_spill] sm:$0xff] }
 0x65e   : > { %v3713_v6 = vpop.f32.mrf.mxu2 }
 0x65f   : > { %v3714_v50 = vadd.f32 %v3713_v6, %v10705_v60  ;;  %v11122_v31 = vpop.f32.mrf.mxu3 }
 0x661   : > { %v11125_v43 = vadd.f32 %v13751_v16, %v3714_v50  ;;  %v4247_v3 = vpop.f32.mrf.mxu1  ;;  %v13756_v50 = vld [vmem:[#allocation48_spill] sm:$0xff] }
 0x663   : > { %13752 = vst [vmem:[#allocation12_spill] sm:$0xff] %v11125_v43  ;;  %3756 = vmatmul.f32.gmra.mxu2 %v3296_v0  ;;  %4373 = vrot.lane.b32.xlu1 %v11125_v43, %s7561_s11 }
 0x664   : > { %4173 = vmatmul.f32.gmra.mxu3 %v3296_v0  ;;  %6904 = vmatmul.msk.f32.gmra.mxu1 %vm3200_vm0, %v13753_v15 }
 0x666   : > { %v3716_v60 = vpop.f32.mrf.mxu2 }
 0x667   : > { %v3717_v32 = vadd.f32 %v3716_v60, %v10715_v14  ;;  %v11135_v55 = vpop.f32.mrf.mxu3  ;;  %v13757_v14 = vld [vmem:[#allocation75_spill] sm:$0xff] }
 0x668   : > { %v4116_v33 = vadd.f32 %v11057_v19, %v13757_v14 }
 0x669   : > { %v11140_v52 = vadd.f32 %v10521_v63, %v3717_v32  ;;  %v4249_v6 = vpop.f32.mrf.mxu1  ;;  %v5680_v63 = vld [vmem:[%s13135_s5 + $0x60] sm:$0xff] }
 0x66a   : > { %v11142_v30 = vadd.f32 %v4249_v6, %v4113_v17  ;;  %5763 = vmatpush.msra.mxu2 %v5680_v63  ;;  %v13760_v17 = vld [vmem:[#allocation49_spill] sm:$0xff] }
 0x66b   : > { %13754 = vst [vmem:[#allocation28_spill] sm:$0xff] %v11140_v52  ;;  %4375 = vrot.lane.b32.xlu2 %v11140_v52, %s7561_s11 }
 0x66c   : > { %13755 = vst [vmem:[#allocation59_spill] sm:$0xff] %v11142_v30  ;;  %6905 = vmatmul.msk.f32.gmra.mxu1 %vm3200_vm0, %v13756_v50  ;;  %v13762_v50 = vld [vmem:[#allocation87_spill] sm:$0xff] }
 0x66e   : > { %v3719_v16 = vpop.f32.mrf.mxu2 }
 0x66f   : > { %v4134_v3 = vpop.f32.mrf.mxu3 }
 0x671   : > { %v4252_v0 = vpop.f32.mrf.mxu1 }
 0x672   : > { %v11153_v59 = vadd.f32 %v4252_v0, %v4116_v33  ;;  %v13763_v33 = vld [vmem:[#allocation76_spill] sm:$0xff] }
 0x674   : > { %13758 = vst [vmem:[#allocation86_spill] sm:$0xff] %v11153_v59  ;;  %6906 = vmatmul.msk.f32.gmra.mxu1 %vm3200_vm0, %v13759_v20 }
 0x676   : > { %v3721_v15 = vpop.f32.mrf.mxu2 }
 0x677   : > { %v3722_v60 = vadd.f32 %v3721_v15, %v10729_v25  ;;  %v11158_v32 = vpop.f32.mrf.mxu3  ;;  %v4121_v25 = vadd.f32 %v11081_v51, %v10664_v36  ;;  %v13766_v15 = vld [vmem:[#allocation38_spill] sm:$0xff] }
 0x678   : > { %v5679_v36 = vld [vmem:[%s13135_s5 + $0x58] sm:$0xff] }
 0x679   : > { %v11161_v6 = vadd.f32 %v13760_v17, %v3722_v60  ;;  %v4255_v19 = vpop.f32.mrf.mxu1  ;;  %5764 = vmatpush.msra.mxu2 %v5679_v36 }
 0x67b   : > { %13761 = vst [vmem:[#allocation102_spill] sm:$0xff] %v11161_v6  ;;  %4377 = vrot.lane.b32.xlu0 %v11161_v6, %s7561_s11 }
 0x67c   : > { %6907 = vmatmul.msk.f32.gmra.mxu1 %vm3200_vm0, %v13762_v50  ;;  %v13768_v50 = vld [vmem:[#allocation99_spill] sm:$0xff] }
 0x67e   : > { %v3724_v16 = vpop.f32.mrf.mxu2 }
 0x67f   : > { %v3725_v3 = vadd.f32 %v3724_v16, %v10738_v48  ;;  %v11168_v14 = vpop.f32.mrf.mxu3  ;;  %v4124_v48 = vadd.f32 %v11095_v21, %v10685_v9  ;;  %v13769_v9 = vld [vmem:[#allocation90_spill] sm:$0xff] }
 0x681   : > { %v11173_v0 = vadd.f32 %v13763_v33, %v3725_v3  ;;  %v4257_v63 = vpop.f32.mrf.mxu1 }
 0x682   : > { %v11175_v20 = vadd.f32 %v4257_v63, %v4121_v25  ;;  %v5686_v63 = vld [vmem:[%s13135_s5 + $0x90] sm:$0xff] }
 0x683   : > { %13764 = vst [vmem:[#allocation11_spill] sm:$0xff] %v11173_v0  ;;  %4379 = vrot.lane.b32.xlu1 %v11173_v0, %s7561_s11  ;;  %5886 = vmatpush.msra.mxu0 %v5686_v63 }
 0x684   : > { %13765 = vst [vmem:[#allocation37_spill] sm:$0xff] %v11175_v20  ;;  %6908 = vmatmul.msk.f32.gmra.mxu1 %vm3200_vm0, %v13766_v15  ;;  %v13770_v15 = vld [vmem:[#allocation24_spill] sm:$0xff] }
 0x686   : > { %v3727_v60 = vpop.f32.mrf.mxu2 }
 0x687   : > { %v4142_v17 = vpop.f32.mrf.mxu3 }
 0x689   : > { %v4260_v19 = vpop.f32.mrf.mxu1 }
 0x68a   : > { %v11186_v51 = vadd.f32 %v4260_v19, %v4124_v48  ;;  %v4129_v48 = vadd.f32 %v11122_v31, %v10707_v12  ;;  %v13771_v19 = vld [vmem:[#allocation124_spill] sm:$0xff]  ;;  %v4132_v31 = vadd.f32 %v11135_v55, %v10717_v26 }
 0x68b   : > { %4435 = vrot.lane.b32.xlu1 %v10853_v28, %s7559_s21 }
 0x68c   : > { %13767 = vst [vmem:[#allocation81_spill] sm:$0xff] %v11186_v51  ;;  %6909 = vmatmul.msk.f32.gmra.mxu1 %vm3200_vm0, %v13768_v50 }
 0x68e   : > { %v3729_v16 = vpop.f32.mrf.mxu2 }
 0x68f   : > { %v3730_v3 = vadd.f32 %v3729_v16, %v10752_v57  ;;  %v11193_v25 = vpop.f32.mrf.mxu3 }
 0x691   : > { %v11196_v21 = vadd.f32 %v13769_v9, %v3730_v3  ;;  %v4263_v33 = vpop.f32.mrf.mxu1 }
 0x692   : > { %v5678_v33 = vld [vmem:[%s13135_s5 + $0x50] sm:$0xff] }
 0x693   : > { %4441 = vrot.lane.b32.xlu1 %v10891_v1, %s7559_s21  ;;  %4381 = vrot.lane.b32.xlu2 %v11196_v21, %s7561_s11 }
 0x694   : > { %6910 = vmatmul.msk.f32.gmra.mxu1 %vm3200_vm0, %v13770_v15  ;;  %5765 = vmatpush.msra.mxu2 %v5678_v33  ;;  %v13775_v15 = vld [vmem:[#allocation125_spill] sm:$0xff] }
 0x696   : > { %v3732_v57 = vpop.f32.mrf.mxu2 }
 0x697   : > { %v3733_v60 = vadd.f32 %v3732_v57, %v10761_v46  ;;  %v11208_v17 = vpop.f32.mrf.mxu3  ;;  %v13773_v46 = vld [vmem:[#allocation50_spill] sm:$0xff] }
 0x699   : > { %v11213_v36 = vadd.f32 %v13771_v19, %v3733_v60  ;;  %v4265_v50 = vpop.f32.mrf.mxu1  ;;  %v4137_v19 = vadd.f32 %v11158_v32, %v10731_v27  ;;  %v5677_v32 = vld [vmem:[%s13135_s5 + $0x48] sm:$0xff] }
 0x69a   : > { %v11215_v16 = vadd.f32 %v4265_v50, %v4129_v48  ;;  %5766 = vmatpush.msra.mxu2 %v5677_v32 }
 0x69b   : > { %4447 = vrot.lane.b32.xlu1 %v10940_v41, %s7559_s21  ;;  %4437 = vrot.lane.b32.xlu2 %v10864_v40, %s7559_s21 }
 0x69c   : > { %13772 = vst [vmem:[#allocation62_spill] sm:$0xff] %v11215_v16  ;;  %4383 = vrot.lane.b32.xlu0 %v11213_v36, %s7561_s11  ;;  %6911 = vmatmul.msk.f32.gmra.mxu1 %vm3200_vm0, %v13773_v46  ;;  %v5676_v16 = vld [vmem:[%s13135_s5 + $0x40] sm:$0xff] }
 0x69d   : > { %5767 = vmatpush.msra.mxu2 %v5676_v16 }
 0x69e   : > { %v3735_v3 = vpop.f32.mrf.mxu2 }
 0x69f   : > { %v4150_v12 = vpop.f32.mrf.mxu3  ;;  %v11260_v3 = vpop.permute.xlu2 %4339 }
 0x6a1   : > { %v4268_v9 = vpop.f32.mrf.mxu1 }
 0x6a2   : > { %v11230_v63 = vadd.f32 %v4268_v9, %v4132_v31  ;;  %v4140_v9 = vadd.f32 %v11168_v14, %v10740_v34 }
 0x6a3   : > { %4453 = vrot.lane.b32.xlu1 %v10984_v53, %s7559_s21  ;;  %4443 = vrot.lane.b32.xlu2 %v10909_v35, %s7559_s21 }
 0x6a4   : > { %13774 = vst [vmem:[#allocation54_spill] sm:$0xff] %v11230_v63  ;;  %4439 = vrot.lane.b32.xlu0 %v10880_v18, %s7559_s21  ;;  %6912 = vmatmul.msk.f32.gmra.mxu1 %vm3200_vm0, %v13775_v15  ;;  %v11275_v15 = vpop.permute.xlu1 %4337 }
 0x6a6   : > { %v3737_v26 = vpop.f32.mrf.mxu2 }
 0x6a7   : > { %v11240_v55 = vpop.f32.mrf.mxu3  ;;  %v11277_v34 = vpop.permute.xlu2 %4345  ;;  %v3738_v51 = vadd.f32 %v3737_v26, %v10775_v62 }
 0x6a9   : > { %v4271_v57 = vpop.f32.mrf.mxu1 }
 0x6ab   : > { %4459 = vrot.lane.b32.xlu1 %v11044_v8, %s7559_s21  ;;  %4449 = vrot.lane.b32.xlu2 %v10953_v22, %s7559_s21 }
 0x6ac   : > { %4445 = vrot.lane.b32.xlu0 %v10922_v7, %s7559_s21 }
 0x6ae   : > { %v3740_v60 = vpop.f32.mrf.mxu2 }
 0x6af   : > { %v11248_v48 = vpop.f32.mrf.mxu3  ;;  %v3741_v26 = vadd.f32 %v3740_v60, %v10784_v24 }
 0x6b1   : > { %v4273_v50 = vpop.f32.mrf.mxu1 }
 0x6b2   : > { %v11252_v46 = vadd.f32 %v4273_v50, %v4137_v19  ;;  %v11289_v50 = vpop.permute.xlu1 %4343 }
 0x6b3   : > { %4465 = vrot.lane.b32.xlu1 %v11098_v37, %s7559_s21  ;;  %4455 = vrot.lane.b32.xlu2 %v11006_v44, %s7559_s21 }
 0x6b4   : > { %13776 = vst [vmem:[#allocation29_spill] sm:$0xff] %v11252_v46  ;;  %4451 = vrot.lane.b32.xlu0 %v10971_v56, %s7559_s21 }
 0x6b6   : > { %v3743_v12 = vpop.f32.mrf.mxu2 }
 0x6b7   : > { %v4158_v31 = vpop.f32.mrf.mxu3  ;;  %v11291_v12 = vpop.permute.xlu2 %4351 }
 0x6b9   : > { %v4276_v27 = vpop.f32.mrf.mxu1 }
 0x6ba   : > { %v11267_v33 = vadd.f32 %v4276_v27, %v4140_v9  ;;  %v4145_v27 = vadd.f32 %v11193_v25, %v10754_v2  ;;  %v11307_v29 = vpop.permute.xlu1 %4349 }
 0x6bb   : > { %4471 = vrot.lane.b32.xlu1 %v11161_v6, %s7559_s21  ;;  %4461 = vrot.lane.b32.xlu2 %v11060_v5, %s7559_s21 }
 0x6bc   : > { %13777 = vst [vmem:[#allocation105_spill] sm:$0xff] %v11267_v33  ;;  %4457 = vrot.lane.b32.xlu0 %v11019_v47, %s7559_s21 }
 0x6be   : > { %v11279_v14 = vpop.f32.mrf.mxu2 }
 0x6bf   : > { %v11281_v57 = vpop.f32.mrf.mxu3  ;;  %v11309_v46 = vpop.permute.xlu2 %4357 }
 0x6c1   : > { %v4279_v19 = vpop.f32.mrf.mxu1 }
 0x6c2   : > { %v11328_v62 = vpop.permute.xlu1 %4355 }
 0x6c3   : > { %4467 = vrot.lane.b32.xlu2 %v11125_v43, %s7559_s21  ;;  %4477 = vrot.lane.b32.xlu1 %v11213_v36, %s7559_s21 }
 0x6c4   : > { %4463 = vrot.lane.b32.xlu0 %v11085_v11, %s7559_s21 }
 0x6c6   : > { %v11293_v31 = vpop.f32.mrf.mxu2 }
 0x6c7   : > { %v11295_v9 = vpop.f32.mrf.mxu3 }
 0x6c9   : > { %v4281_v32 = vpop.f32.mrf.mxu1 }
 0x6ca   : > { %v11299_v19 = vadd.f32 %v4281_v32, %v4145_v27  ;;  %v13779_v27 = vld [vmem:[#allocation26_spill] sm:$0xff] }
 0x6cb   : > { %4473 = vrot.lane.b32.xlu2 %v11173_v0, %s7559_s21  ;;  %4533 = vrot.lane.b32.xlu1 %v10880_v18, %s7562_s17  ;;  %v4148_v32 = vadd.f32 %v11208_v17, %v13779_v27  ;;  %v11332_v17 = vpop.permute.xlu0 %4341  ;;  %v11343_v27 = vpop.permute.xlu1 %4361 }
 0x6cc   : > { %13778 = vst [vmem:[#allocation85_spill] sm:$0xff] %v11299_v19  ;;  %4469 = vrot.lane.b32.xlu0 %v11140_v52, %s7559_s21  ;;  %v13780_v19 = vld [vmem:[#allocation27_spill] sm:$0xff] }
 0x6cd   : > { %v11315_v33 = vadd.f32 %v13780_v19, %v3738_v51  ;;  %v11330_v51 = vpop.permute.xlu2 %4363 }
 0x6ce   : > { %v3751_v2 = vpop.f32.mrf.mxu2 }
 0x6cf   : > { %v4166_v25 = vpop.f32.mrf.mxu3  ;;  %v13782_v2 = vld [vmem:[#allocation41_spill] sm:$0xff] }
 0x6d0   : > { %v3884_v25 = vadd.f32 %v13782_v2, %v3741_v26  ;;  %v4153_v26 = vadd.f32 %v11240_v55, %v10777_v42  ;;  %v13785_v55 = vld [vmem:[#allocation53_spill] sm:$0xff] }
 0x6d1   : > { %v4284_v30 = vpop.f32.mrf.mxu1 }
 0x6d2   : > { %v11320_v20 = vadd.f32 %v4284_v30, %v4148_v32 }
 0x6d3   : > { %4539 = vrot.lane.b32.xlu1 %v10922_v7, %s7562_s17  ;;  %4479 = vrot.lane.b32.xlu2 %v11315_v33, %s7559_s21  ;;  %v11361_v2 = vpop.permute.xlu1 %4367 }
 0x6d4   : > { %13781 = vst [vmem:[#allocation112_spill] sm:$0xff] %v11320_v20  ;;  %4475 = vrot.lane.b32.xlu0 %v11196_v21, %s7559_s21  ;;  %v11347_v20 = vpop.permute.xlu0 %4347 }
 0x6d5   : > { %v11345_v32 = vpop.permute.xlu2 %4369 }
 0x6d6   : > { %v3753_v30 = vpop.f32.mrf.mxu2 }
 0x6d7   : > { %v11335_v19 = vpop.f32.mrf.mxu3 }
 0x6d9   : > { %v4287_v16 = vpop.f32.mrf.mxu1 }
 0x6db   : > { %4545 = vrot.lane.b32.xlu1 %v10971_v56, %s7562_s17  ;;  %4535 = vrot.lane.b32.xlu2 %v10891_v1, %s7562_s17 }
 0x6dc   : > { %4481 = vrot.lane.b32.xlu0 %v3884_v25, %s7559_s21  ;;  %v11365_v59 = vpop.permute.xlu0 %4353 }
 0x6de   : > { %v3755_v24 = vpop.f32.mrf.mxu2 }
 0x6df   : > { %v11349_v60 = vpop.f32.mrf.mxu3  ;;  %v11363_v24 = vpop.permute.xlu2 %4375 }
 0x6e0   : > { %13784 = vst [vmem:[#allocation56_spill] sm:$0xff] %v11363_v24 }
 0x6e1   : > { %v4289_v30 = vpop.f32.mrf.mxu1 }
 0x6e2   : > { %v11353_v16 = vadd.f32 %v4289_v30, %v4153_v26  ;;  %v4156_v26 = vadd.f32 %v11248_v48, %v13785_v55 }
 0x6e3   : > { %4551 = vrot.lane.b32.xlu1 %v11019_v47, %s7562_s17  ;;  %4541 = vrot.lane.b32.xlu2 %v10940_v41, %s7562_s17 }
 0x6e4   : > { %13783 = vst [vmem:[#allocation65_spill] sm:$0xff] %v11353_v16  ;;  %4537 = vrot.lane.b32.xlu0 %v10909_v35, %s7562_s17  ;;  %v5675_v16 = vld [vmem:[%s13135_s5 + $0x38] sm:$0xff] }
 0x6e5   : > { %5768 = vmatpush.msra.mxu2 %v5675_v16  ;;  %v5685_v16 = vld [vmem:[%s13135_s5 + $0x88] sm:$0xff] }
 0x6e6   : > { %v3757_v63 = vpop.f32.mrf.mxu2  ;;  %5887 = vmatpush.msra.mxu0 %v5685_v16 }
 0x6e7   : > { %v4174_v42 = vpop.f32.mrf.mxu3  ;;  %v11380_v63 = vpop.permute.xlu1 %4373 }
 0x6e8   : > { %13787 = vst [vmem:[#allocation92_spill] sm:$0xff] %v11380_v63  ;;  %v11384_v42 = vpop.permute.xlu0 %4359 }
 0x6e9   : > { %v4292_v30 = vpop.f32.mrf.mxu1 }
 0x6ea   : > { %v11372_v47 = vadd.f32 %v4292_v30, %v4156_v26 }
 0x6eb   : > { %4557 = vrot.lane.b32.xlu1 %v11085_v11, %s7562_s17  ;;  %4547 = vrot.lane.b32.xlu2 %v10984_v53, %s7562_s17  ;;  %v13791_v11 = vld [vmem:[#allocation52_spill] sm:$0xff] }
 0x6ec   : > { %13786 = vst [vmem:[#allocation7_spill] sm:$0xff] %v11372_v47  ;;  %4543 = vrot.lane.b32.xlu0 %v10953_v22, %s7562_s17 }
 0x6ed   : > { %v11382_v48 = vpop.permute.xlu2 %4381 }
 0x6ee   : > { %13788 = vst [vmem:[#allocation115_spill] sm:$0xff] %v11382_v48 }
 0x6f0   : > { %v11399_v48 = vpop.permute.xlu0 %4365 }
 0x6f1   : > { %v4295_v55 = vpop.f32.mrf.mxu1 }
 0x6f2   : > { %v4161_v55 = vadd.f32 %v11281_v57, %v10804_v4  ;;  %v4164_v4 = vadd.f32 %v11295_v9, %v13791_v11 }
 0x6f3   : > { %4563 = vrot.lane.b32.xlu1 %v11140_v52, %s7562_s17  ;;  %4553 = vrot.lane.b32.xlu2 %v11044_v8, %s7562_s17 }
 0x6f4   : > { %4549 = vrot.lane.b32.xlu0 %v11006_v44, %s7562_s17 }
 0x6f5   : > { %v11395_v26 = vpop.permute.xlu1 %4379  ;;  %v11397_v30 = vpop.permute.xlu2 %4437 }
 0x6f6   : > { %13789 = vst [vmem:[#allocation36_spill] sm:$0xff] %v11395_v26 }
 0x6f8   : > { %v11415_v52 = vpop.permute.xlu0 %4371 }
 0x6f9   : > { %v4297_v47 = vpop.f32.mrf.mxu1 }
 0x6fa   : > { %v11403_v63 = vadd.f32 %v4297_v47, %v4161_v55 }
 0x6fb   : > { %4569 = vrot.lane.b32.xlu1 %v11196_v21, %s7562_s17  ;;  %4559 = vrot.lane.b32.xlu2 %v11098_v37, %s7562_s17  ;;  %v5674_v21 = vld [vmem:[%s13135_s5 + $0x30] sm:$0xff] }
 0x6fc   : > { %13790 = vst [vmem:[#allocation80_spill] sm:$0xff] %v11403_v63  ;;  %4555 = vrot.lane.b32.xlu0 %v11060_v5, %s7562_s17  ;;  %5769 = vmatpush.msra.mxu2 %v5674_v21 }
 0x6fd   : > { %v11411_v16 = vpop.permute.xlu1 %4435  ;;  %v11413_v26 = vpop.permute.xlu2 %4443 }
 0x700   : > { %v11433_v11 = vpop.permute.xlu0 %4377 }
 0x701   : > { %v4300_v47 = vpop.f32.mrf.mxu1  ;;  %13793 = vst [vmem:[#allocation118_spill] sm:$0xff] %v11433_v11  ;;  %v13797_v11 = vld [vmem:[#allocation101_spill] sm:$0xff] }
 0x702   : > { %v11422_v57 = vadd.f32 %v4300_v47, %v4164_v4  ;;  %v13794_v4 = vld [vmem:[#allocation127_spill] sm:$0xff] }
 0x703   : > { %4565 = vrot.lane.b32.xlu2 %v11161_v6, %s7562_s17  ;;  %4575 = vrot.lane.b32.xlu1 %v3884_v25, %s7562_s17  ;;  %v3746_v47 = vadd.f32 %v11279_v14, %v13794_v4  ;;  %v13801_v4 = vld [vmem:[#allocation19_spill] sm:$0xff] }
 0x704   : > { %13792 = vst [vmem:[#allocation55_spill] sm:$0xff] %v11422_v57  ;;  %4561 = vrot.lane.b32.xlu0 %v11125_v43, %s7562_s17  ;;  %v4169_v43 = vadd.f32 %v11335_v19, %v10835_v23  ;;  %v4172_v23 = vadd.f32 %v11349_v60, %v10844_v54 }
 0x705   : > { %v11429_v55 = vpop.permute.xlu1 %4441  ;;  %v11431_v63 = vpop.permute.xlu2 %4449 }
 0x709   : > { %v4303_v9 = vpop.f32.mrf.mxu1 }
 0x70a   : > { %v3889_v9 = vadd.f32 %v13797_v11, %v3746_v47 }
 0x70b   : > { %4571 = vrot.lane.b32.xlu2 %v11213_v36, %s7562_s17 }
 0x70c   : > { %4567 = vrot.lane.b32.xlu0 %v11173_v0, %s7562_s17 }
 0x70d   : > { %v11441_v25 = vpop.permute.xlu1 %4447  ;;  %v11443_v21 = vpop.permute.xlu2 %4455 }
 0x70e   : > { %13795 = vst [vmem:[#allocation78_spill] sm:$0xff] %v11443_v21  ;;  %v11445_v57 = vpop.permute.xlu0 %4383  ;;  %v13833_v21 = vld [vmem:[#allocation121_spill] sm:$0xff] }
 0x70f   : > { %13796 = vst [vmem:[#allocation15_spill] sm:$0xff] %v11445_v57  ;;  %v3749_v57 = vadd.f32 %v11293_v31, %v13801_v4  ;;  %v5673_v31 = vld [vmem:[%s13135_s5 + $0x28] sm:$0xff]  ;;  %v13811_v4 = vld [vmem:[#allocation39_spill] sm:$0xff] }
 0x710   : > { %5770 = vmatpush.msra.mxu2 %v5673_v31  ;;  %v5684_v31 = vld [vmem:[%s13135_s5 + $0x80] sm:$0xff] }
 0x711   : > { %v4305_v6 = vpop.f32.mrf.mxu1  ;;  %5888 = vmatpush.msra.mxu0 %v5684_v31 }
 0x712   : > { %v11450_v24 = vadd.f32 %v4305_v6, %v4169_v43  ;;  %v13803_v43 = vld [vmem:[#allocation116_spill] sm:$0xff] }
 0x713   : > { %4577 = vrot.lane.b32.xlu2 %v3889_v9, %s7562_s17  ;;  %v3892_v6 = vadd.f32 %v13803_v43, %v3749_v57 }
 0x714   : > { %13798 = vst [vmem:[#allocation32_spill] sm:$0xff] %v11450_v24  ;;  %4573 = vrot.lane.b32.xlu0 %v11315_v33, %s7562_s17 }
 0x715   : > { %v11455_v36 = vpop.permute.xlu1 %4453  ;;  %v11457_v14 = vpop.permute.xlu2 %4461 }
 0x716   : > { %13799 = vst [vmem:[#allocation42_spill] sm:$0xff] %v11455_v36  ;;  %v11461_v0 = vpop.permute.xlu0 %4439 }
 0x717   : > { %13800 = vst [vmem:[#allocation104_spill] sm:$0xff] %v11457_v14  ;;  %v13834_v14 = vld [vmem:[#allocation79_spill] sm:$0xff] }
 0x718   : > { %13802 = vst [vmem:[#allocation31_spill] sm:$0xff] %v11461_v0  ;;  %v11540_v37 = vadd.f32 %v11332_v17, %v13834_v14  ;;  %v13840_v14 = vld [vmem:[#allocation109_spill] sm:$0xff] }
 0x719   : > { %v4308_v19 = vpop.f32.mrf.mxu1 }
 0x71a   : > { %v11466_v11 = vadd.f32 %v4308_v19, %v4172_v23  ;;  %v13812_v23 = vld [vmem:[#allocation100_spill] sm:$0xff] }
 0x71b   : > { %v3637_v19 = vadd.f32 %v13812_v23, %v13811_v4  ;;  %v13819_v4 = vld [vmem:[#allocation20_spill] sm:$0xff] }
 0x71c   : > { %13804 = vst [vmem:[#allocation103_spill] sm:$0xff] %v11466_v11  ;;  %4579 = vrot.lane.b32.xlu0 %v3892_v6, %s7562_s17  ;;  %v13816_v11 = vld [vmem:[#allocation111_spill] sm:$0xff]  ;;  %v4084_v23 = vadd.f32 %v10919_v45, %v13819_v4 }
 0x71d   : > { %v11469_v33 = vpop.permute.xlu1 %4459  ;;  %v11471_v47 = vpop.permute.xlu2 %4467 }
 0x71e   : > { %13805 = vst [vmem:[#allocation89_spill] sm:$0xff] %v11469_v33  ;;  %v11473_v9 = vpop.permute.xlu0 %4445 }
 0x71f   : > { %13806 = vst [vmem:[#allocation43_spill] sm:$0xff] %v11471_v47  ;;  %v3780_v47 = vadd.f32 %v13816_v11, %v3637_v19  ;;  %v4221_v11 = vadd.f32 %v10995_v61, %v4084_v23  ;;  %v11519_v61 = vstv %s6913_s19  ;;  %v13826_v23 = vld [vmem:[#allocation10_spill] sm:$0xff] }
 0x720   : > { %13807 = vst [vmem:[#allocation128_spill] sm:$0xff] %v11473_v9  ;;  %vm4718_vm10 = vcmp.ge.s32.totalorder %v11519_v61, 0  ;;  %vm4730_vm1 = vcmp.lt.s32.totalorder %v11519_v61, 16 }
 0x721   : > { %v4311_v24 = vpop.f32.mrf.mxu1  ;;  %vm11548_vm2 = vmand %vm4718_vm10, %vm4730_vm1 }
 0x725   : > { %v11478_v54 = vpop.permute.xlu1 %4465  ;;  %v11480_v60 = vpop.permute.xlu2 %4473 }
 0x726   : > { %13808 = vst [vmem:[#allocation8_spill] sm:$0xff] %v11478_v54  ;;  %v11482_v57 = vpop.permute.xlu0 %4451  ;;  %v13818_v54 = vld [vmem:[#allocation67_spill] sm:$0xff] }
 0x727   : > { %13809 = vst [vmem:[#allocation14_spill] sm:$0xff] %v11480_v60  ;;  %v4410_v60 = vadd.f32 %v11260_v3, %v3780_v47  ;;  %v11510_v3 = vld [vmem:[%s13134_s4] ss:$0 sm:$0xff] }
 0x728   : > { %13810 = vst [vmem:[#allocation107_spill] sm:$0xff] %v11482_v57  ;;  %v13817_v57 = vld [vmem:[#allocation119_spill] sm:$0xff] }
 0x729   : > { %v3634_v9 = vadd.f32 %v13818_v54, %v13817_v57  ;;  %v13823_v47 = vld [vmem:[#allocation63_spill] sm:$0xff] }
 0x72b   : > { %v3777_v54 = vadd.f32 %v13823_v47, %v3634_v9 }
 0x72d   : > { %v11486_v43 = vpop.permute.xlu1 %4471  ;;  %v11488_v6 = vpop.permute.xlu2 %4479 }
 0x72e   : > { %13813 = vst [vmem:[#allocation66_spill] sm:$0xff] %v11486_v43  ;;  %v11490_v24 = vpop.permute.xlu0 %4457  ;;  %v4508_v43 = vadd.f32 %v11397_v30, %v4410_v60  ;;  %v5672_v30 = vld [vmem:[%s13135_s5 + $0x20] sm:$0xff]  ;;  %v4409_v60 = vadd.f32 %v11275_v15, %v3777_v54 }
 0x72f   : > { %13814 = vst [vmem:[#allocation40_spill] sm:$0xff] %v11488_v6  ;;  %5771 = vmatpush.msra.mxu2 %v5672_v30  ;;  %v13827_v15 = vld [vmem:[#allocation51_spill] sm:$0xff] }
 0x730   : > { %13815 = vst [vmem:[#allocation88_spill] sm:$0xff] %v11490_v24  ;;  %v4507_v4 = vadd.f32 %v11411_v16, %v4409_v60  ;;  %v13832_v60 = vld [vmem:[#allocation22_spill] sm:$0xff] }
 0x731   : > { %v4100_v36 = vadd.f32 %v13833_v21, %v13832_v60 }
 0x735   : > { %v11502_v6 = vpop.permute.xlu1 %4477  ;;  %v4536_v24 = vpop.permute.xlu2 %4535 }
 0x736   : > { %13820 = vst [vmem:[#allocation94_spill] sm:$0xff] %v11502_v6  ;;  %v11505_v19 = vpop.permute.xlu0 %4463  ;;  %v4606_v33 = vadd.f32 %v4536_v24, %v4508_v43  ;;  %v13824_v43 = vld [vmem:[#allocation21_spill] sm:$0xff]  ;;  %v13825_v24 = vld [vmem:[#allocation126_spill] sm:$0xff]  ;;  %v13829_v6 = vld [vmem:[#allocation95_spill] sm:$0xff] }
 0x737   : > { %13821 = vst [vmem:[#allocation114_spill] sm:$0xff] %v11505_v19  ;;  %v4081_v31 = vadd.f32 %v13825_v24, %v13824_v43  ;;  %v13830_v43 = vld [vmem:[#allocation71_spill] sm:$0xff]  ;;  %v13831_v24 = vld [vmem:[#allocation68_spill] sm:$0xff] }
 0x738   : > { %v4630_v45 = vadd.f32 %v4606_v33, %v4221_v11  ;;  %v4089_v11 = vadd.f32 %v10937_v58, %v13826_v23  ;;  %v4097_v16 = vadd.f32 %v13831_v24, %v13830_v43  ;;  %v4413_v58 = vadd.f32 %v11277_v34, %v10853_v28  ;;  %v13838_v23 = vld [vmem:[#allocation93_spill] sm:$0xff]  ;;  %v13841_v28 = vld [vmem:[#allocation108_spill] sm:$0xff] }
 0x739   : > { %v4218_v47 = vadd.f32 %v13827_v15, %v4081_v31  ;;  %v13835_v31 = vld [vmem:[#allocation74_spill] sm:$0xff]  ;;  %v4412_v21 = vadd.f32 %v11289_v50, %v13838_v23 }
 0x73a   : > { %v4658_v57 = vadd.f32 %v11510_v3, %v4630_v45  ;;  %v13828_v45 = vld [vmem:[#allocation84_spill] sm:$0xff]  ;;  %v11557_v15 = vadd.f32 %v13840_v14, %v4089_v11  ;;  %v13842_v50 = vld [vmem:[#allocation6_spill] sm:$0xff] }
 0x73b   : > { %v4092_v19 = vadd.f32 %v13829_v6, %v13828_v45  ;;  %v4416_v45 = vadd.f32 %v11291_v12, %v10891_v1  ;;  %v11569_v43 = vadd.f32 %v13842_v50, %v4100_v36  ;;  %v11579_v1 = vadd.f32 %v11365_v59, %v10909_v35 }
 0x73c   : > { %v4682_v0 = vmax.f32 %v4658_v57, 0.0  ;;  %v13839_v57 = vld [vmem:[#allocation25_spill] sm:$0xff]  ;;  %v11584_v12 = vadd.f32 %v11309_v46, %v10940_v41  ;;  %v11598_v59 = vadd.f32 %v11343_v27, %v10971_v56  ;;  %v11612_v56 = vadd.s32 2, %v11519_v61 }
 0x73d   : > { %v4534_v33 = vpop.permute.xlu1 %4533  ;;  %v4542_v9 = vpop.permute.xlu2 %4541  ;;  %v4108_v17 = vadd.f32 %v11016_v49, %v13839_v57  ;;  %v4229_v34 = vadd.f32 %v13841_v28, %v4092_v19  ;;  %v4415_v49 = vadd.f32 %v11307_v29, %v10880_v18  ;;  %v11588_v18 = vadd.f32 %v11328_v62, %v10922_v7 }
 0x73e   : > { %v4605_v54 = vadd.f32 %v4534_v33, %v4507_v4  ;;  %v11530_v30 = vpop.permute.xlu0 %4469  ;;  %v4105_v4 = vadd.f32 %v11003_v39, %v13835_v31  ;;  %v11562_v39 = vadd.f32 %v11347_v20, %v10864_v40  ;;  %v4779_v19 = vsel %vm11548_vm2, %v4682_v0, 0.0 }
 0x73f   : > { %v4245_v40 = vadd.f32 %v11109_v38, %v4108_v17  ;;  %v4422_v38 = vadd.f32 %v11330_v51, %v10984_v53  ;;  %v4827_v0 = vrot.slane %v4779_v19, 6  ;;  %v4511_v62 = vadd.f32 %v11413_v26, %v4413_v58  ;;  %v13843_v19 = vld [vmem:[#allocation83_spill] sm:$0xff] }
 0x740   : > { %v4629_v33 = vadd.f32 %v4605_v54, %v4218_v47  ;;  %v4234_v47 = vadd.f32 %v11062_v13, %v4097_v16  ;;  %v4242_v11 = vadd.f32 %v11100_v10, %v4105_v4  ;;  %v4514_v13 = vadd.f32 %v11431_v63, %v4416_v45 }
 0x741   : > { %v11592_v10 = vadd.f32 %v11384_v42, %v10953_v22  ;;  %v11606_v22 = vadd.f32 %v11399_v48, %v11006_v44  ;;  %v4510_v53 = vadd.f32 %v11429_v55, %v4412_v21  ;;  %v4513_v63 = vadd.f32 %v11441_v25, %v4415_v49 }
 0x742   : > { %v4657_v54 = vadd.f32 %v11510_v3, %v4629_v33  ;;  %v4709_v27 = vadd.s32 3, %v11519_v61  ;;  %v4609_v44 = vadd.f32 %v4542_v9, %v4511_v62  ;;  %v11622_v48 = vsel %vm2310_vm13, %v4827_v0, 0.0 }
 0x743   : > { %v4949_v50 = vrot.slane %v11622_v48, 1  ;;  %v11646_v49 = vadd.f32 %v11345_v32, %v11044_v8  ;;  %v13845_v8 = vld [vmem:[#allocation56_spill] sm:$0xff]  ;;  %vm4720_vm6 = vcmp.ge.s32.totalorder %v11612_v56, 0  ;;  %vm4732_vm8 = vcmp.lt.s32.totalorder %v11612_v56, 16 }
 0x744   : > { %v4681_v20 = vmax.f32 %v4657_v54, 0.0  ;;  %vm4721_vm4 = vcmp.ge.s32.totalorder %v4709_v27, 0  ;;  %vm4733_vm5 = vcmp.lt.s32.totalorder %v4709_v27, 16  ;;  %v4633_v14 = vadd.f32 %v4609_v44, %v4234_v47  ;;  %vm11702_vm1 = vmand %vm4720_vm6, %vm4732_vm8 }
 0x745   : > { %v4540_v35 = vpop.permute.xlu1 %4539  ;;  %v4548_v29 = vpop.permute.xlu2 %4547  ;;  %v11654_v47 = vadd.f32 %v11415_v52, %v11060_v5  ;;  %vm11665_vm7 = vmand %vm4721_vm4, %vm4733_vm5 }
 0x746   : > { %v4778_v41 = vsel %vm11548_vm2, %v4681_v20, 0.0  ;;  %v11602_v46 = vpop.permute.xlu0 %4475  ;;  %v4612_v7 = vadd.f32 %v4548_v29, %v4514_v13  ;;  %v4608_v26 = vadd.f32 %v4540_v35, %v4510_v53  ;;  %v4707_v13 = vadd.s32 1, %v11519_v61 }
 0x747   : > { %v4826_v51 = vrot.slane %v4778_v41, 6  ;;  %v13846_v41 = vld [vmem:[#allocation104_spill] sm:$0xff]  ;;  %v4661_v52 = vadd.f32 %v11510_v3, %v4633_v14  ;;  %v5489_v53 = vrot.slane %v11622_v48, 4 }
 0x748   : > { %v4636_v42 = vadd.f32 %v4612_v7, %v4245_v40  ;;  %v4632_v28 = vadd.f32 %v4608_v26, %v4229_v34  ;;  %v4424_v40 = vadd.f32 %v11361_v2, %v13843_v19  ;;  %v4520_v7 = vadd.f32 %v13846_v41, %v4422_v38  ;;  %v5671_v38 = vld [vmem:[%s13135_s5 + $0x18] sm:$0xff] }
 0x749   : > { %v11616_v36 = vsel %vm2310_vm13, %v4826_v51, %v4827_v0  ;;  %v11619_v24 = vsel %vm2310_vm13, 0.0, %v4826_v51  ;;  %v13844_v0 = vld [vmem:[#allocation60_spill] sm:$0xff]  ;;  %vm4719_vm9 = vcmp.ge.s32.totalorder %v4707_v13, 0  ;;  %v5309_v51 = vrot.slane %v11622_v48, 3  ;;  %5772 = vmatpush.msra.mxu2 %v5671_v38  ;;  %v13849_v26 = vld [vmem:[#allocation34_spill] sm:$0xff] }
 0x74a   : > { %v5486_v55 = vrot.slane %v11619_v24, 4  ;;  %v5487_v25 = vrot.slane %v11616_v36, 4  ;;  %v5306_v16 = vrot.slane %v11619_v24, 3  ;;  %v5307_v60 = vrot.slane %v11616_v36, 3  ;;  %v13860_v41 = vld [vmem:[#allocation54_spill] sm:$0xff] }
 0x74b   : > { %v5126_v58 = vrot.slane %v11619_v24, 2  ;;  %v5127_v31 = vrot.slane %v11616_v36, 2  ;;  %v4664_v9 = vadd.f32 %v11510_v3, %v4636_v42  ;;  %v4946_v6 = vrot.slane %v11619_v24, 1 }
 0x74c   : > { %v5488_v4 = vsel %vm3102_vm11, %v5486_v55, %v5487_v25  ;;  %v5308_v21 = vsel %vm2860_vm12, %v5306_v16, %v5307_v60  ;;  %v4947_v17 = vrot.slane %v11616_v36, 1  ;;  %v4428_v32 = vadd.f32 %v13845_v8, %v13844_v0  ;;  %v13850_v55 = vld [vmem:[#allocation92_spill] sm:$0xff]  ;;  %v13859_v0 = vld [vmem:[#allocation78_spill] sm:$0xff] }
 0x74d   : > { %v4546_v33 = vpop.permute.xlu1 %4545  ;;  %v11633_v23 = vpop.permute.xlu2 %4553  ;;  %6914 = vmatmul.msk.f32.vlgmr.msra.gmra.mxu0 %vm5558_vm3, %v5488_v4  ;;  %v5128_v57 = vsel %vm2714_vm15, %v5126_v58, %v5127_v31  ;;  %5378 = vrot.lane.b32.xlu0 %v5308_v21, %s7561_s11  ;;  %v4688_v20 = vmax.f32 %v4664_v9, 0.0  ;;  %vm4731_vm10 = vcmp.lt.s32.totalorder %v4707_v13, 16  ;;  %v5490_v44 = vsel %vm3102_vm11, %v5487_v25, %v5489_v53  ;;  %v13851_v58 = vld [vmem:[#allocation31_spill] sm:$0xff] }
 0x74e   : > { %v4611_v45 = vadd.f32 %v4546_v33, %v4513_v63  ;;  %v11639_v54 = vpop.permute.xlu0 %4481  ;;  %5198 = vrot.lane.b32.xlu2 %v5128_v57, %s7559_s21  ;;  %v4948_v34 = vsel %vm2472_vm14, %v4946_v6, %v4947_v17  ;;  %v4950_v29 = vsel %vm2472_vm14, %v4947_v17, %v4949_v50  ;;  %v5129_v63 = vrot.slane %v11622_v48, 2  ;;  %vm11716_vm2 = vmand %vm4719_vm9, %vm4731_vm10 }
 0x74f   : > { %v7261_v5 = vpack.i.bf16 %v4950_v29, %v4948_v34  ;;  %v11682_v27 = vsel %vm11665_vm7, %v4688_v20, 0.0  ;;  %v4427_v16 = vadd.f32 %v13850_v55, %v13849_v26  ;;  %v4509_v9 = vadd.f32 %v13851_v58, %v11540_v37  ;;  %v13857_v20 = vld [vmem:[#allocation28_spill] sm:$0xff]  ;;  %v13864_v55 = vld [vmem:[#allocation14_spill] sm:$0xff] }
 0x750   : > { %v4635_v35 = vadd.f32 %v4611_v45, %v4242_v11  ;;  %v4660_v11 = vadd.f32 %v11510_v3, %v4632_v28  ;;  %v5310_v33 = vsel %vm2860_vm12, %v5307_v60, %v5309_v51  ;;  %v5130_v21 = vsel %vm2714_vm15, %v5127_v31, %v5129_v63  ;;  %v13854_v31 = vld [vmem:[#allocation42_spill] sm:$0xff] }
 0x751   : > { %7262 = vrot.lane.b32.xlu1 %v7261_v5, %s7562_s17  ;;  %v4685_v37 = vmax.f32 %v4661_v52, 0.0  ;;  %v4516_v28 = vadd.f32 %v13854_v31, %v11588_v18  ;;  %v4836_v45 = vrot.slane %v11682_v27, 6  ;;  %v4517_v8 = vadd.f32 %v13859_v0, %v11584_v12 }
 0x752   : > { %v4663_v62 = vadd.f32 %v11510_v3, %v4635_v35  ;;  %v4684_v57 = vmax.f32 %v4660_v11, 0.0  ;;  %v13858_v35 = vld [vmem:[#allocation36_spill] sm:$0xff]  ;;  %v4712_v18 = vadd.s32 6, %v11519_v61  ;;  %v4526_v58 = vadd.f32 %v13864_v55, %v4428_v32  ;;  %v13867_v32 = vld [vmem:[#allocation66_spill] sm:$0xff] }
 0x753   : > { %v11724_v29 = vadd.f32 %v13858_v35, %v13857_v20  ;;  %v11744_v38 = vsel %vm11702_vm1, %v4685_v37, 0.0  ;;  %v13866_v37 = vld [vmem:[#allocation86_spill] sm:$0xff]  ;;  %v11763_v31 = vadd.f32 %v13867_v32, %v4427_v16  ;;  %v11770_v35 = vadd.s32 5, %v11519_v61 }
 0x754   : > { %v4687_v42 = vmax.f32 %v4663_v62, 0.0  ;;  %v13862_v62 = vld [vmem:[#allocation128_spill] sm:$0xff]  ;;  %vm4724_vm4 = vcmp.ge.s32.totalorder %v4712_v18, 0  ;;  %vm4736_vm5 = vcmp.lt.s32.totalorder %v4712_v18, 16 }
 0x755   : > { %v4552_v4 = vpop.permute.xlu1 %4551  ;;  %v4560_v6 = vpop.permute.xlu2 %4559  ;;  %6915 = vmatmul.msk.f32.gmra.mxu0 %vm5558_vm3, %v5490_v44  ;;  %5380 = vrot.lane.b32.xlu0 %v5310_v33, %s7561_s11  ;;  %v4512_v12 = vadd.f32 %v13862_v62, %v11562_v39  ;;  %v13863_v44 = vld [vmem:[#allocation8_spill] sm:$0xff]  ;;  %v13865_v39 = vld [vmem:[#allocation107_spill] sm:$0xff]  ;;  %v4832_v33 = vrot.slane %v11744_v38, 6  ;;  %vm4723_vm9 = vcmp.ge.s32.totalorder %v11770_v35, 0 }
 0x756   : > { %v11708_v17 = vsel %vm11665_vm7, %v4687_v42, 0.0  ;;  %v4618_v14 = vadd.f32 %v4560_v6, %v4520_v7  ;;  %v4538_v60 = vpop.permute.xlu0 %4537  ;;  %5200 = vrot.lane.b32.xlu2 %v5130_v21, %s7559_s21  ;;  %v13861_v7 = vld [vmem:[#allocation89_spill] sm:$0xff]  ;;  %v4614_v52 = vadd.f32 %v4552_v4, %v4516_v28  ;;  %v11750_v26 = vadd.f32 %v13863_v44, %v4424_v40  ;;  %v13868_v28 = vld [vmem:[#allocation88_spill] sm:$0xff]  ;;  %vm11773_vm7 = vmand %vm4724_vm4, %vm4736_vm5 }
 0x757   : > { %v4835_v19 = vrot.slane %v11708_v17, 6  ;;  %v4607_v34 = vadd.f32 %v4538_v60, %v4509_v9  ;;  %v4519_v2 = vadd.f32 %v13861_v7, %v11598_v59  ;;  %v4781_v59 = vsel %vm11716_vm2, %v4684_v57, 0.0  ;;  %v13872_v7 = vld [vmem:[#allocation62_spill] sm:$0xff] }
 0x758   : > { %v4642_v13 = vadd.f32 %v4618_v14, %v13860_v41  ;;  %v4710_v9 = vadd.s32 4, %v11519_v61  ;;  %v4515_v4 = vadd.f32 %v13865_v39, %v11579_v1  ;;  %v4615_v6 = vadd.f32 %v11633_v23, %v4517_v8  ;;  %v13871_v41 = vld [vmem:[#allocation37_spill] sm:$0xff] }
 0x759   : > { %v11737_v5 = vsel %vm2310_vm13, %v4835_v19, %v4836_v45  ;;  %v4631_v11 = vadd.f32 %v4607_v34, %v11557_v15  ;;  %v4830_v21 = vrot.slane %v4781_v59, 6  ;;  %v4638_v57 = vadd.f32 %v4614_v52, %v13866_v37 }
 0x75a   : > { %v4670_v42 = vadd.f32 %v11510_v3, %v4642_v13  ;;  %v11767_v34 = vadd.f32 %v13868_v28, %v11592_v10  ;;  %vm4722_vm6 = vcmp.ge.s32.totalorder %v4710_v9, 0  ;;  %v4639_v13 = vadd.f32 %v4615_v6, %v13871_v41 }
 0x75b   : > { %v4659_v15 = vadd.f32 %v11510_v3, %v4631_v11  ;;  %vm4734_vm8 = vcmp.lt.s32.totalorder %v4710_v9, 16  ;;  %v11784_v52 = vsel %vm2310_vm13, 0.0, %v4832_v33  ;;  %v11787_v18 = vsel %vm2310_vm13, %v4830_v21, 0.0  ;;  %v13875_v9 = vld [vmem:[#allocation7_spill] sm:$0xff] }
 0x75c   : > { %v4694_v1 = vmax.f32 %v4670_v42, 0.0  ;;  %v4666_v11 = vadd.f32 %v11510_v3, %v4638_v57  ;;  %v11808_v39 = vadd.f32 %v11510_v3, %v4639_v13  ;;  %v4955_v37 = vrot.slane %v11787_v18, 1  ;;  %vm11830_vm10 = vmand %vm4722_vm6, %vm4734_vm8 }
 0x75d   : > { %v4683_v40 = vmax.f32 %v4659_v15, 0.0  ;;  %v4558_v14 = vpop.permute.xlu1 %4557  ;;  %v11760_v60 = vpop.permute.xlu2 %4565 }
 0x75e   : > { %v4617_v23 = vadd.f32 %v4558_v14, %v4519_v2  ;;  %v4544_v20 = vpop.permute.xlu0 %4543  ;;  %v11793_v62 = vsel %vm11773_vm7, %v4694_v1, 0.0 }
 0x75f   : > { %v4780_v16 = vsel %vm11716_vm2, %v4683_v40, 0.0  ;;  %v4610_v8 = vadd.f32 %v4544_v20, %v4512_v12  ;;  %v4845_v20 = vrot.slane %v11793_v62, 6  ;;  %vm4735_vm2 = vcmp.lt.s32.totalorder %v11770_v35, 16 }
 0x760   : > { %v4829_v10 = vrot.slane %v4780_v16, 6  ;;  %v4641_v2 = vadd.f32 %v4617_v23, %v13872_v7  ;;  %v4690_v23 = vmax.f32 %v4666_v11, 0.0  ;;  %v13876_v11 = vld [vmem:[#allocation59_spill] sm:$0xff] }
 0x761   : > { %v4634_v56 = vadd.f32 %v4610_v8, %v11569_v43 }
 0x762   : > { %v11796_v12 = vsel %vm2310_vm13, %v4829_v10, %v4830_v21  ;;  %v11799_v59 = vsel %vm2310_vm13, 0.0, %v4829_v10  ;;  %v4669_v42 = vadd.f32 %v11510_v3, %v4641_v2  ;;  %v4957_v2 = vrot.slane %v11784_v52, 1 }
 0x763   : > { %v4662_v44 = vadd.f32 %v11510_v3, %v4634_v56  ;;  %v5491_v55 = vrot.slane %v11799_v59, 4  ;;  %v5131_v43 = vrot.slane %v11799_v59, 2  ;;  %v5133_v15 = vrot.slane %v11796_v12, 2 }
 0x764   : > { %v4693_v6 = vmax.f32 %v4669_v42, 0.0  ;;  %v4951_v21 = vrot.slane %v11799_v59, 1 }
 0x765   : > { %v4686_v57 = vmax.f32 %v4662_v44, 0.0  ;;  %v4564_v40 = vpop.permute.xlu1 %4563  ;;  %v4572_v14 = vpop.permute.xlu2 %4571  ;;  %v5492_v32 = vsel %vm3102_vm11, %v5489_v53, %v5491_v55  ;;  %v5134_v28 = vsel %vm2714_vm15, %v5131_v43, %v5133_v15  ;;  %v5132_v1 = vsel %vm2714_vm15, %v5129_v63, %v5131_v43  ;;  %v13882_v53 = vld [vmem:[#allocation105_spill] sm:$0xff] }
 0x766   : > { %v11824_v16 = vsel %vm11773_vm7, %v4693_v6, 0.0  ;;  %v4624_v8 = vadd.f32 %v4572_v14, %v4526_v58  ;;  %v4550_v41 = vpop.permute.xlu0 %4549  ;;  %6916 = vmatmul.msk.f32.gmra.mxu0 %vm5558_vm3, %v5492_v32  ;;  %5204 = vrot.lane.b32.xlu0 %v5134_v28, %s7559_s21  ;;  %v4953_v58 = vrot.slane %v11796_v12, 1  ;;  %v4952_v42 = vsel %vm2472_vm14, %v4949_v50, %v4951_v21  ;;  %v5670_v14 = vld [vmem:[%s13135_s5 + $0x10] sm:$0xff] }
 0x767   : > { %v4844_v63 = vrot.slane %v11824_v16, 6  ;;  %v11837_v13 = vsel %vm11702_vm1, %v4686_v57, 0.0  ;;  %v4613_v0 = vadd.f32 %v4550_v41, %v4515_v4  ;;  %5202 = vrot.lane.b32.xlu1 %v5132_v1, %s7559_s21  ;;  %v4715_v4 = vadd.s32 9, %v11519_v61  ;;  %5773 = vmatpush.msra.mxu2 %v5670_v14  ;;  %vm11888_vm1 = vmand %vm4723_vm9, %vm4735_vm2  ;;  %v13881_v14 = vld [vmem:[#allocation114_spill] sm:$0xff] }
 0x768   : > { %v4833_v10 = vrot.slane %v11837_v13, 6  ;;  %v4648_v7 = vadd.f32 %v4624_v8, %v13875_v9  ;;  %v4691_v44 = vmax.f32 %v11808_v39, 0.0  ;;  %v11860_v43 = vsel %vm11830_vm10, %v4690_v23, 0.0 }
 0x769   : > { %v11850_v25 = vsel %vm2310_vm13, %v4844_v63, %v4845_v20  ;;  %v4637_v56 = vadd.f32 %v4613_v0, %v13876_v11  ;;  %v4958_v57 = vsel %vm2472_vm14, %v4955_v37, %v4957_v2  ;;  %v4954_v39 = vsel %vm2472_vm14, %v4951_v21, %v4953_v58  ;;  %v13877_v21 = vld [vmem:[#allocation43_spill] sm:$0xff] }
 0x76a   : > { %v11865_v6 = vsel %vm2310_vm13, %v4832_v33, %v4833_v10  ;;  %v5493_v32 = vrot.slane %v11796_v12, 4  ;;  %v4956_v28 = vsel %vm2472_vm14, %v4953_v58, %v4955_v37  ;;  %v4620_v38 = vadd.f32 %v4564_v40, %v11750_v26 }
 0x76b   : > { %v4665_v50 = vadd.f32 %v11510_v3, %v4637_v56  ;;  %v4676_v33 = vadd.f32 %v11510_v3, %v4648_v7  ;;  %v7266_v1 = vpack.i.bf16 %v4954_v39, %v4952_v42  ;;  %v7271_v23 = vpack.i.bf16 %v4958_v57, %v4956_v28  ;;  %v13880_v42 = vld [vmem:[#allocation65_spill] sm:$0xff] }
 0x76c   : > { %v5494_v13 = vsel %vm3102_vm11, %v5491_v55, %v5493_v32  ;;  %v5311_v0 = vrot.slane %v11799_v59, 3  ;;  %v5313_v9 = vrot.slane %v11796_v12, 3  ;;  %v4523_v11 = vadd.f32 %v13877_v21, %v11646_v49 }
 0x76d   : > { %v4689_v8 = vmax.f32 %v4665_v50, 0.0  ;;  %v4570_v41 = vpop.permute.xlu1 %4569  ;;  %vm4727_vm4 = vcmp.ge.s32.totalorder %v4715_v4, 0  ;;  %vm4739_vm5 = vcmp.lt.s32.totalorder %v4715_v4, 16  ;;  %7267 = vrot.lane.b32.xlu2 %v7266_v1, %s7562_s17  ;;  %v4839_v40 = vrot.slane %v11860_v43, 6 }
 0x76e   : > { %v4623_v55 = vadd.f32 %v4570_v41, %v11763_v31  ;;  %v4556_v37 = vpop.permute.xlu0 %4555  ;;  %6917 = vmatmul.msk.f32.gmra.mxu0 %vm5558_vm3, %v5494_v13  ;;  %v4713_v49 = vadd.s32 7, %v11519_v61  ;;  %7272 = vrot.lane.b32.xlu0 %v7271_v23, %s7562_s17  ;;  %v4700_v7 = vmax.f32 %v4676_v33, 0.0  ;;  %v5314_v57 = vsel %vm2860_vm12, %v5311_v0, %v5313_v9  ;;  %vm11915_vm6 = vmand %vm4727_vm4, %vm4739_vm5  ;;  %v13885_v33 = vld [vmem:[#allocation81_spill] sm:$0xff] }
 0x76f   : > { %v11899_v35 = vsel %vm11830_vm10, %v4689_v8, 0.0  ;;  %v4616_v58 = vadd.f32 %v4556_v37, %v11767_v34  ;;  %v4521_v50 = vadd.f32 %v13881_v14, %v11606_v22  ;;  %v11910_v39 = vsel %vm11888_vm1, %v4691_v44, 0.0  ;;  %5384 = vrot.lane.b32.xlu1 %v5314_v57, %s7561_s11 }
 0x770   : > { %v4838_v56 = vrot.slane %v11899_v35, 6  ;;  %v4647_v31 = vadd.f32 %v4623_v55, %v13880_v42  ;;  %v4644_v28 = vadd.f32 %v4620_v38, %v13882_v53  ;;  %v4621_v23 = vadd.f32 %v11760_v60, %v4523_v11  ;;  %v13886_v42 = vld [vmem:[#allocation85_spill] sm:$0xff] }
 0x771   : > { %v4640_v1 = vadd.f32 %v4616_v58, %v13885_v33  ;;  %v5495_v4 = vrot.slane %v11787_v18, 4  ;;  %vm4725_vm7 = vcmp.ge.s32.totalorder %v4713_v49, 0  ;;  %vm4737_vm8 = vcmp.lt.s32.totalorder %v4713_v49, 16 }
 0x772   : > { %v11927_v22 = vsel %vm2310_vm13, %v4838_v56, %v4839_v40  ;;  %v4675_v44 = vadd.f32 %v11510_v3, %v4647_v31  ;;  %v5135_v8 = vrot.slane %v11787_v18, 2  ;;  %v4841_v41 = vrot.slane %v11910_v39, 6  ;;  %vm11985_vm9 = vmand %vm4725_vm7, %vm4737_vm8 }
 0x773   : > { %v4668_v38 = vadd.f32 %v11510_v3, %v4640_v1  ;;  %v11935_v60 = vsel %vm2310_vm13, %v4833_v10, 0.0  ;;  %v11939_v13 = vsel %vm11915_vm6, %v4700_v7, 0.0  ;;  %v4672_v11 = vadd.f32 %v11510_v3, %v4644_v28 }
 0x774   : > { %v4699_v21 = vmax.f32 %v4675_v44, 0.0  ;;  %v5312_v37 = vsel %vm2860_vm12, %v5309_v51, %v5311_v0  ;;  %v5496_v58 = vsel %vm3102_vm11, %v5493_v32, %v5495_v4  ;;  %v4645_v31 = vadd.f32 %v4621_v23, %v13886_v42  ;;  %v13887_v23 = vld [vmem:[#allocation29_spill] sm:$0xff] }
 0x775   : > { %v4692_v55 = vmax.f32 %v4668_v38, 0.0  ;;  %5382 = vrot.lane.b32.xlu2 %v5312_v37, %s7561_s11  ;;  %v5136_v57 = vsel %vm2714_vm15, %v5133_v15, %v5135_v8  ;;  %v5315_v14 = vrot.slane %v11787_v18, 3  ;;  %v13232_v51 = vrot.slane %v11939_v13, 6  ;;  %v13888_v38 = vld [vmem:[#allocation102_spill] sm:$0xff] }
 0x776   : > { %v11949_v10 = vsel %vm11915_vm6, %v4699_v21, 0.0  ;;  %v4562_v7 = vpop.permute.xlu0 %4561  ;;  %6918 = vmatmul.msk.f32.gmra.mxu0 %vm5558_vm3, %v5496_v58  ;;  %5206 = vrot.lane.b32.xlu0 %v5136_v57, %s7559_s21  ;;  %v4959_v33 = vrot.slane %v11865_v6, 1  ;;  %v4961_v15 = vrot.slane %v11935_v60, 1  ;;  %v4696_v1 = vmax.f32 %v4672_v11, 0.0 }
 0x777   : > { %v13233_v32 = vrot.slane %v11949_v10, 6  ;;  %v11961_v0 = vsel %vm11888_vm1, %v4692_v55, 0.0  ;;  %v4619_v53 = vadd.f32 %v4562_v7, %v4521_v50  ;;  %v5316_v34 = vsel %vm2860_vm12, %v5313_v9, %v5315_v14  ;;  %v13889_v9 = vld [vmem:[#allocation115_spill] sm:$0xff]  ;;  %v13890_v55 = vld [vmem:[#allocation94_spill] sm:$0xff]  ;;  %v4576_v7 = vpop.permute.xlu1 %4575 }
 0x778   : > { %v4842_v28 = vrot.slane %v11961_v0, 6  ;;  %5386 = vrot.lane.b32.xlu1 %v5316_v34, %s7561_s11  ;;  %v5137_v44 = vrot.slane %v11784_v52, 2  ;;  %v4431_v21 = vadd.f32 %v13889_v9, %v13888_v38  ;;  %v4528_v37 = vadd.f32 %v13890_v55, %v11724_v29  ;;  %v13893_v55 = vld [vmem:[#allocation12_spill] sm:$0xff] }
 0x779   : > { %v11973_v26 = vsel %vm2310_vm13, %v13233_v32, %v13232_v51  ;;  %v4643_v50 = vadd.f32 %v4619_v53, %v13887_v23  ;;  %v4714_v11 = vadd.s32 8, %v11519_v61  ;;  %v4524_v57 = vadd.f32 %v11530_v30, %v11654_v47 }
 0x77a   : > { %v11994_v42 = vsel %vm2310_vm13, %v4841_v41, %v4842_v28  ;;  %v5138_v49 = vsel %vm2714_vm15, %v5135_v8, %v5137_v44  ;;  %v5497_v53 = vrot.slane %v11784_v52, 4  ;;  %v4673_v34 = vadd.f32 %v11510_v3, %v4645_v31  ;;  %v13894_v31 = vld [vmem:[#allocation118_spill] sm:$0xff] }
 0x77b   : > { %v4671_v29 = vadd.f32 %v11510_v3, %v4643_v50  ;;  %v5317_v23 = vrot.slane %v11784_v52, 3  ;;  %v4960_v38 = vsel %vm2472_vm14, %v4957_v2, %v4959_v33  ;;  %v4962_v30 = vsel %vm2472_vm14, %v4959_v33, %v4961_v15 }
 0x77c   : > { %v12013_v47 = vsel %vm11985_vm9, %v4696_v1, 0.0  ;;  %v4626_v50 = vadd.f32 %v4576_v7, %v4528_v37  ;;  %v5498_v9 = vsel %vm3102_vm11, %v5495_v4, %v5497_v53  ;;  %v4429_v51 = vadd.f32 %v13894_v31, %v13893_v55  ;;  %v5669_v1 = vld [vmem:[%s13135_s5 + $0x8] sm:$0xff] }
 0x77d   : > { %v4695_v8 = vmax.f32 %v4671_v29, 0.0  ;;  %vm4726_vm10 = vcmp.ge.s32.totalorder %v4714_v11, 0  ;;  %vm4738_vm2 = vcmp.lt.s32.totalorder %v4714_v11, 16  ;;  %5208 = vrot.lane.b32.xlu2 %v5138_v49, %s7559_s21  ;;  %v5318_v33 = vsel %vm2860_vm12, %v5315_v14, %v5317_v23  ;;  %v13895_v37 = vld [vmem:[#allocation40_spill] sm:$0xff]  ;;  %v4578_v29 = vpop.permute.xlu2 %4577  ;;  %5774 = vmatpush.msra.mxu2 %v5669_v1 }
 0x77e   : > { %v4568_v2 = vpop.permute.xlu0 %4567  ;;  %6919 = vmatmul.msk.f32.gmra.mxu0 %vm5558_vm3, %v5498_v9  ;;  %v4529_v7 = vadd.f32 %v13895_v37, %v4431_v21  ;;  %5388 = vrot.lane.b32.xlu0 %v5318_v33, %s7561_s11  ;;  %v7276_v49 = vpack.i.bf16 %v4962_v30, %v4960_v38  ;;  %v12033_v14 = vsel %vm2310_vm13, 0.0, %v4835_v19  ;;  %v4697_v9 = vmax.f32 %v4673_v34, 0.0  ;;  %vm12039_vm1 = vmand %vm4726_vm10, %vm4738_vm2  ;;  %v13899_v38 = vld [vmem:[#allocation112_spill] sm:$0xff] }
 0x77f   : > { %v12027_v4 = vsel %vm11985_vm9, %v4695_v8, 0.0  ;;  %v4622_v55 = vadd.f32 %v4568_v2, %v4524_v57  ;;  %v13234_v31 = vrot.slane %v12013_v47, 6  ;;  %v13898_v57 = vld [vmem:[#allocation55_spill] sm:$0xff]  ;;  %v5319_v17 = vrot.slane %v11865_v6, 3 }
 0x780   : > { %v13235_v21 = vrot.slane %v12027_v4, 6  ;;  %v4650_v8 = vadd.f32 %v4626_v50, %v13898_v57  ;;  %7277 = vrot.lane.b32.xlu1 %v7276_v49, %s7562_s17  ;;  %v5499_v19 = vrot.slane %v11865_v6, 4  ;;  %v4627_v34 = vadd.f32 %v4578_v29, %v4529_v7 }
 0x781   : > { %v4646_v30 = vadd.f32 %v4622_v55, %v13899_v38  ;;  %v4716_v2 = vadd.s32 10, %v11519_v61  ;;  %v5141_v50 = vrot.slane %v11935_v60, 2  ;;  %v4527_v1 = vadd.f32 %v11602_v46, %v4429_v51 }
 0x782   : > { %v12054_v11 = vsel %vm2310_vm13, %v13235_v21, %v13234_v31  ;;  %v12061_v37 = vsel %vm12039_vm1, %v4697_v9, 0.0  ;;  %v5143_v7 = vrot.slane %v12033_v14, 2  ;;  %v5139_v29 = vrot.slane %v11865_v6, 2  ;;  %v13903_v31 = vld [vmem:[#allocation80_spill] sm:$0xff] }
 0x783   : > { %v4674_v33 = vadd.f32 %v11510_v3, %v4646_v30  ;;  %v4678_v55 = vadd.f32 %v11510_v3, %v4650_v8  ;;  %v5320_v57 = vsel %vm2860_vm12, %v5317_v23, %v5319_v17  ;;  %v5500_v38 = vsel %vm3102_vm11, %v5497_v53, %v5499_v19  ;;  %v13900_v30 = vld [vmem:[#allocation32_spill] sm:$0xff] }
 0x784   : > { %v4651_v32 = vadd.f32 %v4627_v34, %v13900_v30  ;;  %vm4728_vm4 = vcmp.ge.s32.totalorder %v4716_v2, 0  ;;  %vm4740_vm5 = vcmp.lt.s32.totalorder %v4716_v2, 16  ;;  %v5144_v51 = vsel %vm2714_vm15, %v5141_v50, %v5143_v7  ;;  %v13901_v34 = vld [vmem:[#allocation11_spill] sm:$0xff] }
 0x785   : > { %v4698_v49 = vmax.f32 %v4674_v33, 0.0  ;;  %5390 = vrot.lane.b32.xlu2 %v5320_v57, %s7561_s11  ;;  %v4963_v53 = vrot.slane %v12033_v14, 1  ;;  %v4965_v8 = vrot.slane %v11737_v5, 1  ;;  %v13902_v33 = vld [vmem:[#allocation15_spill] sm:$0xff]  ;;  %v5140_v58 = vsel %vm2714_vm15, %v5137_v44, %v5139_v29  ;;  %vm12099_vm6 = vmand %vm4728_vm4, %vm4740_vm5 }
 0x786   : > { %v4574_v46 = vpop.permute.xlu0 %4573  ;;  %6920 = vmatmul.msk.f32.gmra.mxu0 %vm5558_vm3, %v5500_v38  ;;  %5214 = vrot.lane.b32.xlu0 %v5144_v51, %s7559_s21  ;;  %v4432_v57 = vadd.f32 %v13902_v33, %v13901_v34  ;;  %v13237_v38 = vrot.slane %v12061_v37, 6  ;;  %v5501_v51 = vrot.slane %v11935_v60, 4  ;;  %v4717_v34 = vadd.s32 11, %v11519_v61 }
 0x787   : > { %v12078_v9 = vsel %vm12039_vm1, %v4698_v49, 0.0  ;;  %v4625_v23 = vadd.f32 %v4574_v46, %v4527_v1  ;;  %v4702_v49 = vmax.f32 %v4678_v55, 0.0  ;;  %v4964_v46 = vsel %vm2472_vm14, %v4961_v15, %v4963_v53 }
 0x788   : > { %v13236_v30 = vrot.slane %v12078_v9, 6  ;;  %5210 = vrot.lane.b32.xlu1 %v5140_v58, %s7559_s21  ;;  %v5325_v15 = vrot.slane %v11737_v5, 3  ;;  %v12115_v61 = vsel %vm2310_vm13, 0.0, %v4838_v56  ;;  %v4679_v2 = vadd.f32 %v11510_v3, %v4651_v32 }
 0x789   : > { %v4649_v1 = vadd.f32 %v4625_v23, %v13903_v31  ;;  %v5323_v31 = vrot.slane %v12033_v14, 3  ;;  %v4966_v23 = vsel %vm2472_vm14, %v4963_v53, %v4965_v8  ;;  %v4530_v58 = vadd.f32 %v11639_v54, %v4432_v57 }
 0x78a   : > { %v12108_v44 = vsel %vm2310_vm13, %v13237_v38, %v13236_v30  ;;  %v7281_v21 = vpack.i.bf16 %v4966_v23, %v4964_v46  ;;  %v12124_v30 = vsel %vm2310_vm13, %v4836_v45, 0.0  ;;  %v12128_v35 = vsel %vm12099_vm6, %v4702_v49, 0.0  ;;  %v13908_v46 = vld [vmem:[#allocation103_spill] sm:$0xff] }
 0x78b   : > { %v4677_v55 = vadd.f32 %v11510_v3, %v4649_v1  ;;  %v5502_v38 = vsel %vm3102_vm11, %v5499_v19, %v5501_v51  ;;  %vm4729_vm7 = vcmp.ge.s32.totalorder %v4717_v34, 0  ;;  %vm4741_vm8 = vcmp.lt.s32.totalorder %v4717_v34, 16 }
 0x78c   : > { %v5326_v54 = vsel %vm2860_vm12, %v5323_v31, %v5325_v15  ;;  %v4969_v27 = vrot.slane %v12115_v61, 1  ;;  %v4703_v45 = vmax.f32 %v4679_v2, 0.0  ;;  %v4857_v19 = vrot.slane %v12128_v35, 6  ;;  %vm12145_vm9 = vmand %vm4729_vm7, %vm4741_vm8 }
 0x78d   : > { %v4701_v56 = vmax.f32 %v4677_v55, 0.0  ;;  %7282 = vrot.lane.b32.xlu2 %v7281_v21, %s7562_s17  ;;  %v5142_v21 = vsel %vm2714_vm15, %v5139_v29, %v5141_v50  ;;  %v5321_v2 = vrot.slane %v11935_v60, 3  ;;  %v5503_v34 = vrot.slane %v12033_v14, 4 }
 0x78e   : > { %v4580_v32 = vpop.permute.xlu0 %4579  ;;  %6921 = vmatmul.msk.f32.gmra.mxu0 %vm5558_vm3, %v5502_v38  ;;  %5396 = vrot.lane.b32.xlu0 %v5326_v54, %s7561_s11  ;;  %v4967_v38 = vrot.slane %v12124_v30, 1  ;;  %v12164_v23 = vsel %vm12145_vm9, %v4703_v45, 0.0  ;;  %vm5631_vm10 = vcmask 785408   ;;  %vm6388_vm2 = vcmask 1047559  }
 0x78f   : > { %v12137_v53 = vsel %vm12099_vm6, %v4701_v56, 0.0  ;;  %v4628_v57 = vadd.f32 %v4580_v32, %v4530_v58  ;;  %v5322_v32 = vsel %vm2860_vm12, %v5319_v17, %v5321_v2  ;;  %v5504_v54 = vsel %vm3102_vm11, %v5501_v51, %v5503_v34 }
 0x790   : > { %v4856_v49 = vrot.slane %v12137_v53, 6  ;;  %5212 = vrot.lane.b32.xlu1 %v5142_v21, %s7559_s21  ;;  %v4970_v50 = vsel %vm2472_vm14, %v4967_v38, %v4969_v27  ;;  %v4968_v58 = vsel %vm2472_vm14, %v4965_v8, %v4967_v38  ;;  %v4859_v17 = vrot.slane %v12164_v23, 6 }
 0x791   : > { %v4652_v33 = vadd.f32 %v4628_v57, %v13908_v46  ;;  %v7286_v57 = vpack.i.bf16 %v4970_v50, %v4968_v58  ;;  %v5324_v51 = vsel %vm2860_vm12, %v5321_v2, %v5323_v31  ;;  %v5145_v21 = vrot.slane %v11737_v5, 2 }
 0x792   : > { %v12157_v55 = vsel %vm2310_vm13, %v4856_v49, %v4857_v19  ;;  %v5505_v38 = vrot.slane %v11737_v5, 4  ;;  %v5327_v46 = vrot.slane %v12124_v30, 3  ;;  %v12207_v58 = vsel %vm2310_vm13, %v4839_v40, 0.0 }
 0x793   : > { %v4680_v29 = vadd.f32 %v11510_v3, %v4652_v33  ;;  %v5668_v3 = vld [vmem:[%s13135_s5] sm:$0xff]  ;;  %v5149_v33 = vrot.slane %v12115_v61, 2  ;;  %v5146_v31 = vsel %vm2714_vm15, %v5143_v7, %v5145_v21  ;;  %v4971_v7 = vrot.slane %v11927_v22, 1 }
 0x794   : > { %5775 = vmatpush.msra.mxu2 %v5668_v3  ;;  %v5506_v2 = vsel %vm3102_vm11, %v5503_v34, %v5505_v38  ;;  %v5328_v50 = vsel %vm2860_vm12, %v5325_v15, %v5327_v46  ;;  %v5151_v34 = vrot.slane %v11927_v22, 2  ;;  %v5507_v15 = vrot.slane %v12124_v30, 4 }
 0x795   : > { %v4704_v56 = vmax.f32 %v4680_v29, 0.0  ;;  %5392 = vrot.lane.b32.xlu2 %v5322_v32, %s7561_s11  ;;  %v5147_v29 = vrot.slane %v12124_v30, 2  ;;  %v4973_v32 = vrot.slane %v12207_v58, 1  ;;  %v5007_v35 = vrot.slane %v12157_v55, 1 }
 0x796   : > { %6922 = vmatmul.msk.f32.gmra.mxu0 %vm5558_vm3, %v5504_v54  ;;  %7287 = vrot.lane.b32.xlu0 %v7286_v57, %s7562_s17  ;;  %v4972_v54 = vsel %vm2472_vm14, %v4969_v27, %v4971_v7  ;;  %v5508_v57 = vsel %vm3102_vm11, %v5505_v38, %v5507_v15  ;;  %v5152_v3 = vsel %vm2714_vm15, %v5149_v33, %v5151_v34  ;;  %v5509_v27 = vrot.slane %v12115_v61, 4 }
 0x797   : > { %v12178_v45 = vsel %vm12145_vm9, %v4704_v56, 0.0  ;;  %v5150_v56 = vsel %vm2714_vm15, %v5147_v29, %v5149_v33  ;;  %v4974_v43 = vsel %vm2472_vm14, %v4971_v7, %v4973_v32  ;;  %v5148_v40 = vsel %vm2714_vm15, %v5145_v21, %v5147_v29 }
 0x798   : > { %v4860_v8 = vrot.slane %v12178_v45, 6  ;;  %5394 = vrot.lane.b32.xlu1 %v5324_v51, %s7561_s11  ;;  %v7291_v51 = vpack.i.bf16 %v4974_v43, %v4972_v54  ;;  %v12230_v21 = vsel %vm2310_vm13, 0.0, %v4841_v41  ;;  %v5153_v38 = vrot.slane %v12207_v58, 2 }
 0x799   : > { %v4977_v29 = vrot.slane %v11994_v42, 1  ;;  %v4975_v39 = vrot.slane %v12230_v21, 1  ;;  %v5511_v7 = vrot.slane %v11927_v22, 4  ;;  %v12250_v54 = vsel %vm2310_vm13, %v4842_v28, 0.0 }
 0x79a   : > { %v12192_v1 = vsel %vm2310_vm13, %v4859_v17, %v4860_v8  ;;  %v4979_v28 = vrot.slane %v12250_v54, 1  ;;  %vm6391_vm1 = vcmask 130048  }
 0x79c   : > { %v4980_v16 = vsel %vm2472_vm14, %v4977_v29, %v4979_v28 }
 0x79d   : > { %5216 = vrot.lane.b32.xlu2 %v5146_v31, %s7559_s21  ;;  %v5329_v31 = vrot.slane %v12115_v61, 3 }
 0x79e   : > { %6923 = vmatmul.msk.f32.gmra.mxu0 %vm5558_vm3, %v5506_v2  ;;  %5398 = vrot.lane.b32.xlu0 %v5328_v50, %s7561_s11  ;;  %v5331_v2 = vrot.slane %v11927_v22, 3  ;;  %v5510_v50 = vsel %vm3102_vm11, %v5507_v15, %v5509_v27  ;;  %v5333_v15 = vrot.slane %v12207_v58, 3 }
 0x79f   : > { %v5330_v33 = vsel %vm2860_vm12, %v5327_v46, %v5329_v31  ;;  %v4978_v46 = vsel %vm2472_vm14, %v4975_v39, %v4977_v29  ;;  %v5159_v29 = vrot.slane %v12250_v54, 2 }
 0x7a0   : > { %5220 = vrot.lane.b32.xlu1 %v5150_v56, %s7559_s21  ;;  %v5154_v56 = vsel %vm2714_vm15, %v5151_v34, %v5153_v38  ;;  %v5332_v41 = vsel %vm2860_vm12, %v5329_v31, %v5331_v2  ;;  %v4976_v34 = vsel %vm2472_vm14, %v4973_v32, %v4975_v39  ;;  %v5334_v32 = vsel %vm2860_vm12, %v5331_v2, %v5333_v15 }
 0x7a1   : > { %v7296_v43 = vpack.i.bf16 %v4978_v46, %v4976_v34  ;;  %v5155_v31 = vrot.slane %v12230_v21, 2 }
 0x7a5   : > { %5218 = vrot.lane.b32.xlu2 %v5148_v40, %s7559_s21  ;;  %v5335_v40 = vrot.slane %v12230_v21, 3 }
 0x7a6   : > { %6924 = vmatmul.msk.f32.gmra.mxu0 %vm5558_vm3, %v5508_v57  ;;  %5222 = vrot.lane.b32.xlu0 %v5152_v3, %s7559_s21  ;;  %v12257_v57 = vsel %vm2310_vm13, 0.0, %v4844_v63  ;;  %v5512_v3 = vsel %vm3102_vm11, %v5509_v27, %v5511_v7  ;;  %v5513_v27 = vrot.slane %v12207_v58, 4 }
 0x7a7   : > { %v5336_v0 = vsel %vm2860_vm12, %v5333_v15, %v5335_v40  ;;  %v5337_v15 = vrot.slane %v11994_v42, 3 }
 0x7a8   : > { %7292 = vrot.lane.b32.xlu1 %v7291_v51, %s7562_s17  ;;  %v4981_v51 = vrot.slane %v12257_v57, 1  ;;  %v5199_v2 = vpop.permute.xlu2 %5198 }
 0x7aa   : > { %v4982_v63 = vsel %vm2472_vm14, %v4979_v28, %v4981_v51 }
 0x7ab   : > { %v7301_v39 = vpack.i.bf16 %v4982_v63, %v4980_v16 }
 0x7ad   : > { %5400 = vrot.lane.b32.xlu2 %v5330_v33, %s7561_s11  ;;  %v5157_v33 = vrot.slane %v11994_v42, 2 }
 0x7ae   : > { %6925 = vmatmul.msk.f32.gmra.mxu0 %vm5558_vm3, %v5510_v50  ;;  %5224 = vrot.lane.b32.xlu0 %v5154_v56, %s7559_s21  ;;  %v5156_v50 = vsel %vm2714_vm15, %v5153_v38, %v5155_v31  ;;  %v5514_v56 = vsel %vm3102_vm11, %v5511_v7, %v5513_v27  ;;  %v5161_v38 = vrot.slane %v12257_v57, 2  ;;  %v4983_v7 = vrot.slane %v11850_v25, 1 }
 0x7af   : > { %v5158_v46 = vsel %vm2714_vm15, %v5155_v31, %v5157_v33  ;;  %v5160_v34 = vsel %vm2714_vm15, %v5157_v33, %v5159_v29  ;;  %v5163_v33 = vrot.slane %v11850_v25, 2 }
 0x7b0   : > { %5402 = vrot.lane.b32.xlu1 %v5332_v41, %s7561_s11  ;;  %v12281_v41 = vsel %vm2310_vm13, %v4845_v20, 0.0  ;;  %v5515_v20 = vrot.slane %v12230_v21, 4 }
 0x7b1   : > { %v4985_v62 = vrot.slane %v12281_v41, 1 }
 0x7b2   : > { %v5516_v63 = vsel %vm3102_vm11, %v5513_v27, %v5515_v20  ;;  %v5164_v27 = vsel %vm2714_vm15, %v5161_v38, %v5163_v33 }
 0x7b5   : > { %7297 = vrot.lane.b32.xlu2 %v7296_v43, %s7562_s17  ;;  %v5162_v43 = vsel %vm2714_vm15, %v5159_v29, %v5161_v38 }
 0x7b6   : > { %6926 = vmatmul.msk.f32.gmra.mxu0 %vm5558_vm3, %v5512_v3  ;;  %5406 = vrot.lane.b32.xlu0 %v5336_v0, %s7561_s11  ;;  %v4984_v3 = vsel %vm2472_vm14, %v4981_v51, %v4983_v7  ;;  %v4986_v0 = vsel %vm2472_vm14, %v4983_v7, %v4985_v62  ;;  %v7306_v31 = vpack.i.bf16 %v5162_v43, %v5160_v34  ;;  %v5517_v7 = vrot.slane %v11994_v42, 4 }
 0x7b7   : > { %v7311_v51 = vpack.i.bf16 %v4986_v0, %v4984_v3  ;;  %v5339_v3 = vrot.slane %v12250_v54, 3 }
 0x7b8   : > { %5404 = vrot.lane.b32.xlu1 %v5334_v32, %s7561_s11  ;;  %v5338_v32 = vsel %vm2860_vm12, %v5335_v40, %v5337_v15  ;;  %v5518_v38 = vsel %vm3102_vm11, %v5515_v20, %v5517_v7 }
 0x7bd   : > { %5226 = vrot.lane.b32.xlu2 %v5156_v50, %s7559_s21 }
 0x7be   : > { %6927 = vmatmul.msk.f32.gmra.mxu0 %vm5558_vm3, %v5514_v56  ;;  %7302 = vrot.lane.b32.xlu0 %v7301_v39, %s7562_s17  ;;  %v5165_v56 = vrot.slane %v12281_v41, 2  ;;  %v5201_v39 = vpop.permute.xlu2 %5200 }
 0x7bf   : > { %v5379_v28 = vpop.permute.xlu0 %5378 }
 0x7c0   : > { %5228 = vrot.lane.b32.xlu1 %v5158_v46, %s7559_s21  ;;  %v5166_v29 = vsel %vm2714_vm15, %v5163_v33, %v5165_v56 }
 0x7c1   : > { %v7316_v0 = vpack.i.bf16 %v5166_v29, %v5164_v27  ;;  %v13910_v29 = vrot.slane %v12013_v47, 6  ;;  %v4989_v47 = vrot.slane %v12054_v11, 1 }
 0x7c3   : > { %v7263_v16 = vpop.permute.xlu1 %7262 }
 0x7c4   : > { %v7264_v50 = vunpack.i.l.bf16 %v7263_v16  ;;  %v7265_v34 = vunpack.i.h.bf16 %v7263_v16 }
 0x7c5   : > { %5408 = vrot.lane.b32.xlu2 %v5338_v32, %s7561_s11  ;;  %v5341_v32 = vrot.slane %v12257_v57, 3 }
 0x7c6   : > { %6928 = vmatmul.msk.f32.gmra.mxu0 %vm5558_vm3, %v5516_v63  ;;  %7307 = vrot.lane.b32.xlu0 %v7306_v31, %s7559_s21  ;;  %v5559_v40 = vsel %vm5558_vm3, %v11619_v24, %v7264_v50  ;;  %v13909_v24 = vrot.slane %v12027_v4, 6  ;;  %v5340_v4 = vsel %vm2860_vm12, %v5337_v15, %v5339_v3  ;;  %v5169_v50 = vrot.slane %v12054_v11, 2 }
 0x7c7   : > { %v5595_v46 = vsel %vm3200_vm0, %v5559_v40, %v5199_v2  ;;  %v5342_v2 = vsel %vm2860_vm12, %v5339_v3, %v5341_v32  ;;  %v5381_v16 = vpop.permute.xlu0 %5380  ;;  %v7268_v31 = vpop.permute.xlu2 %7267  ;;  %v12339_v15 = vsel %vm2310_vm13, %v13910_v29, 0.0 }
 0x7c8   : > { %7312 = vrot.lane.b32.xlu1 %v7311_v51, %s7562_s17  ;;  %v5632_v43 = vsel %vm5631_vm10, %v5595_v46, %v5379_v28  ;;  %v12317_v63 = vsel %vm2310_vm13, 0.0, %v13909_v24  ;;  %v5560_v28 = vsel %vm5558_vm3, %v11616_v36, %v7265_v34  ;;  %v5343_v51 = vrot.slane %v11850_v25, 3 }
 0x7c9   : > { %5776 = vmatmul.f32.vlgmr.msra.gmra.mxu2 %v5632_v43  ;;  %v5167_v33 = vrot.slane %v12317_v63, 2  ;;  %v5596_v40 = vsel %vm3200_vm0, %v5560_v28, %v5201_v39  ;;  %v5519_v36 = vrot.slane %v12250_v54, 4  ;;  %v5345_v46 = vrot.slane %v12281_v41, 3 }
 0x7ca   : > { %v12329_v20 = vpop.f32.mrf.mxu0  ;;  %v5633_v27 = vsel %vm5631_vm10, %v5596_v40, %v5381_v16  ;;  %v4987_v39 = vrot.slane %v12317_v63, 1  ;;  %v7269_v3 = vunpack.i.l.bf16 %v7268_v31 }
 0x7cb   : > { %v5168_v34 = vsel %vm2714_vm15, %v5165_v56, %v5167_v33  ;;  %v5170_v43 = vsel %vm2714_vm15, %v5167_v33, %v5169_v50  ;;  %v5520_v24 = vsel %vm3102_vm11, %v5517_v7, %v5519_v36  ;;  %v13911_v56 = vrot.slane %v12061_v37, 6 }
 0x7cc   : > { %v7326_v28 = vpack.i.bf16 %v5170_v43, %v5168_v34  ;;  %v4988_v7 = vsel %vm2472_vm14, %v4985_v62, %v4987_v39  ;;  %v5561_v37 = vsel %vm5558_vm3, %v11622_v48, %v7269_v3  ;;  %v13912_v34 = vrot.slane %v12078_v9, 6 }
 0x7cd   : > { %7317 = vrot.lane.b32.xlu2 %v7316_v0, %s7559_s21  ;;  %v5344_v0 = vsel %vm2860_vm12, %v5341_v32, %v5343_v51  ;;  %v4991_v32 = vrot.slane %v12339_v15, 1 }
 0x7ce   : > { %6929 = vmatmul.msk.f32.gmra.mxu0 %vm5558_vm3, %v5518_v38  ;;  %5412 = vrot.lane.b32.xlu0 %v5342_v2, %s7561_s11  ;;  %v5346_v38 = vsel %vm2860_vm12, %v5343_v51, %v5345_v46  ;;  %v12356_v2 = vsel %vm2310_vm13, 0.0, %v13911_v56  ;;  %v12373_v43 = vsel %vm2310_vm13, %v13912_v34, 0.0  ;;  %v7270_v56 = vunpack.i.h.bf16 %v7268_v31 }
 0x7cf   : > { %v5383_v51 = vpop.permute.xlu2 %5382  ;;  %v4993_v29 = vrot.slane %v12356_v2, 1  ;;  %v5533_v45 = vrot.slane %v12356_v2, 4 }
 0x7d0   : > { %5410 = vrot.lane.b32.xlu1 %v5340_v4, %s7561_s11  ;;  %v4990_v4 = vsel %vm2472_vm14, %v4987_v39, %v4989_v47  ;;  %v5521_v39 = vrot.slane %v12257_v57, 4  ;;  %v5562_v31 = vsel %vm5558_vm3, %v11799_v59, %v7270_v56 }
 0x7d1   : > { %5779 = vmatmul.f32.gmra.mxu2 %v5633_v27  ;;  %v4992_v27 = vsel %vm2472_vm14, %v4989_v47, %v4991_v32  ;;  %v7321_v48 = vpack.i.bf16 %v4990_v4, %v4988_v7  ;;  %v4994_v3 = vsel %vm2472_vm14, %v4991_v32, %v4993_v29  ;;  %v5349_v47 = vrot.slane %v12054_v11, 3 }
 0x7d2   : > { %v7331_v9 = vpack.i.bf16 %v4994_v3, %v4992_v27  ;;  %v5173_v7 = vrot.slane %v12356_v2, 2 }
 0x7d5   : > { %5414 = vrot.lane.b32.xlu2 %v5344_v0, %s7561_s11  ;;  %v12375_v0 = vpop.f32.mrf.mxu0 }
 0x7d6   : > { %6930 = vmatmul.msk.f32.gmra.mxu0 %vm5558_vm3, %v5520_v24  ;;  %5416 = vrot.lane.b32.xlu0 %v5346_v38, %s7561_s11  ;;  %v5347_v24 = vrot.slane %v12317_v63, 3  ;;  %v5522_v38 = vsel %vm3102_vm11, %v5519_v36, %v5521_v39  ;;  %v5523_v36 = vrot.slane %v11850_v25, 4 }
 0x7d8   : > { %v5205_v16 = vpop.permute.xlu0 %5204  ;;  %7327 = vrot.lane.b32.xlu1 %v7326_v28, %s7559_s21  ;;  %v5175_v28 = vrot.slane %v12108_v44, 2  ;;  %v5350_v32 = vsel %vm2860_vm12, %v5347_v24, %v5349_v47  ;;  %v5524_v59 = vsel %vm3102_vm11, %v5521_v39, %v5523_v36 }
 0x7d9   : > { %v5203_v33 = vpop.permute.xlu1 %5202  ;;  %v5598_v27 = vsel %vm3200_vm0, %v5562_v31, %v5205_v16  ;;  %v4995_v31 = vrot.slane %v12108_v44, 1 }
 0x7da   : > { %v5597_v40 = vsel %vm3200_vm0, %v5561_v37, %v5203_v33  ;;  %v5177_v37 = vrot.slane %v12373_v43, 2  ;;  %v5176_v33 = vsel %vm2714_vm15, %v5173_v7, %v5175_v28 }
 0x7db   : > { %v5634_v62 = vsel %vm5631_vm10, %v5597_v40, %v5383_v51  ;;  %v5171_v40 = vrot.slane %v12339_v15, 2 }
 0x7dc   : > { %5782 = vmatmul.f32.gmra.mxu2 %v5634_v62  ;;  %v5178_v51 = vsel %vm2714_vm15, %v5175_v28, %v5177_v37  ;;  %v5209_v28 = vpop.permute.xlu2 %5208 }
 0x7dd   : > { %7322 = vrot.lane.b32.xlu2 %v7321_v48, %s7562_s17  ;;  %v5172_v3 = vsel %vm2714_vm15, %v5169_v50, %v5171_v40  ;;  %v7346_v56 = vpack.i.bf16 %v5178_v51, %v5176_v33  ;;  %v5174_v16 = vsel %vm2714_vm15, %v5171_v40, %v5173_v7  ;;  %v4997_v50 = vrot.slane %v12373_v43, 1 }
 0x7de   : > { %6931 = vmatmul.msk.f32.gmra.mxu0 %vm5558_vm3, %v5522_v38  ;;  %7332 = vrot.lane.b32.xlu0 %v7331_v9, %s7562_s17  ;;  %v5348_v9 = vsel %vm2860_vm12, %v5345_v46, %v5347_v24  ;;  %v5351_v24 = vrot.slane %v12339_v15, 3  ;;  %v5353_v7 = vrot.slane %v12356_v2, 3 }
 0x7e0   : > { %5420 = vrot.lane.b32.xlu1 %v5350_v32, %s7561_s11  ;;  %v7273_v4 = vpop.permute.xlu0 %7272  ;;  %v7336_v32 = vpack.i.bf16 %v5174_v16, %v5172_v3  ;;  %v5181_v16 = vrot.slane %v11973_v26, 2 }
 0x7e1   : > { %v5385_v34 = vpop.permute.xlu1 %5384  ;;  %v7274_v38 = vunpack.i.l.bf16 %v7273_v4  ;;  %v7275_v33 = vunpack.i.h.bf16 %v7273_v4  ;;  %v4998_v4 = vsel %vm2472_vm14, %v4995_v31, %v4997_v50 }
 0x7e2   : > { %v5635_v48 = vsel %vm5631_vm10, %v5598_v27, %v5385_v34  ;;  %v5525_v34 = vrot.slane %v12281_v41, 4 }
 0x7e3   : > { %v5896_v62 = vpop.f32.mrf.mxu0  ;;  %v5563_v39 = vsel %vm5558_vm3, %v11796_v12, %v7274_v38  ;;  %v4996_v12 = vsel %vm2472_vm14, %v4993_v29, %v4995_v31  ;;  %v5354_v38 = vsel %vm2860_vm12, %v5351_v24, %v5353_v7 }
 0x7e4   : > { %5784 = vmatmul.f32.gmra.mxu2 %v5635_v48  ;;  %v13913_v62 = vrot.slane %v11949_v10, 6  ;;  %v5352_v10 = vsel %vm2860_vm12, %v5349_v47, %v5351_v24  ;;  %v7341_v29 = vpack.i.bf16 %v4998_v4, %v4996_v12  ;;  %v5527_v47 = vrot.slane %v12317_v63, 4 }
 0x7e5   : > { %5418 = vrot.lane.b32.xlu2 %v5348_v9, %s7561_s11  ;;  %v5526_v9 = vsel %vm3102_vm11, %v5523_v36, %v5525_v34 }
 0x7e6   : > { %6932 = vmatmul.msk.f32.gmra.mxu0 %vm5558_vm3, %v5524_v59  ;;  %7347 = vrot.lane.b32.xlu0 %v7346_v56, %s7559_s21  ;;  %v12422_v48 = vsel %vm2310_vm13, 0.0, %v13913_v62  ;;  %v5564_v59 = vsel %vm5558_vm3, %v11787_v18, %v7275_v33  ;;  %v12446_v18 = vsel %vm2310_vm13, 0.0, %v4856_v49  ;;  %v13238_v33 = vrot.slane %v11973_v26, 3 }
 0x7e7   : > { %v5179_v56 = vrot.slane %v12422_v48, 2  ;;  %v5359_v24 = vrot.slane %v12422_v48, 3  ;;  %v5355_v62 = vrot.slane %v12108_v44, 3  ;;  %v5528_v12 = vsel %vm3102_vm11, %v5525_v34, %v5527_v47 }
 0x7e8   : > { %7337 = vrot.lane.b32.xlu1 %v7336_v32, %s7559_s21  ;;  %v5207_v46 = vpop.permute.xlu0 %5206  ;;  %v5391_v32 = vpop.permute.xlu2 %5390  ;;  %v5005_v4 = vrot.slane %v12446_v18, 1 }
 0x7e9   : > { %v5599_v51 = vsel %vm3200_vm0, %v5563_v39, %v5207_v46  ;;  %v5180_v31 = vsel %vm2714_vm15, %v5177_v37, %v5179_v56  ;;  %v5600_v46 = vsel %vm3200_vm0, %v5564_v59, %v5209_v28  ;;  %v13914_v28 = vrot.slane %v11939_v13, 6 }
 0x7ea   : > { %v5387_v40 = vpop.permute.xlu1 %5386  ;;  %v5362_v13 = vsel %vm2860_vm12, %v5359_v24, %v13238_v33 }
 0x7eb   : > { %v12416_v27 = vpop.f32.mrf.mxu0  ;;  %v5636_v3 = vsel %vm5631_vm10, %v5599_v51, %v5387_v40  ;;  %v5182_v51 = vsel %vm2714_vm15, %v5179_v56, %v5181_v16  ;;  %v12459_v53 = vsel %vm2310_vm13, %v13914_v28, 0.0 }
 0x7ec   : > { %5787 = vmatmul.f32.gmra.mxu2 %v5636_v3  ;;  %v7356_v49 = vpack.i.bf16 %v5182_v51, %v5180_v31  ;;  %v12465_v3 = vsel %vm2310_vm13, %v4857_v19, 0.0  ;;  %v5001_v19 = vrot.slane %v11973_v26, 1  ;;  %v5003_v34 = vrot.slane %v12459_v53, 1 }
 0x7ed   : > { %5424 = vrot.lane.b32.xlu2 %v5354_v38, %s7561_s11  ;;  %v5008_v31 = vsel %vm2472_vm14, %v5005_v4, %v5007_v35 }
 0x7ee   : > { %6933 = vmatmul.msk.f32.gmra.mxu0 %vm5558_vm3, %v5526_v9  ;;  %5422 = vrot.lane.b32.xlu0 %v5352_v10, %s7561_s11  ;;  %v5356_v9 = vsel %vm2860_vm12, %v5353_v7, %v5355_v62  ;;  %v5009_v10 = vrot.slane %v12465_v3, 1  ;;  %v4999_v7 = vrot.slane %v12422_v48, 1 }
 0x7f0   : > { %7342 = vrot.lane.b32.xlu1 %v7341_v29, %s7562_s17  ;;  %v5389_v36 = vpop.permute.xlu0 %5388  ;;  %v5006_v29 = vsel %vm2472_vm14, %v5003_v34, %v5005_v4  ;;  %v12486_v56 = vpop.permute.xlu2 %7282  ;;  %v5000_v4 = vsel %vm2472_vm14, %v4997_v50, %v4999_v7 }
 0x7f1   : > { %v5637_v39 = vsel %vm5631_vm10, %v5600_v46, %v5389_v36  ;;  %v5529_v36 = vrot.slane %v12054_v11, 4  ;;  %v5010_v46 = vsel %vm2472_vm14, %v5007_v35, %v5009_v10 }
 0x7f2   : > { %v7278_v37 = vpop.permute.xlu1 %7277  ;;  %v7371_v33 = vpack.i.bf16 %v5010_v46, %v5008_v31  ;;  %v5189_v31 = vrot.slane %v12465_v3, 2 }
 0x7f3   : > { %v12454_v40 = vpop.f32.mrf.mxu0  ;;  %v7279_v38 = vunpack.i.l.bf16 %v7278_v37  ;;  %v5530_v35 = vsel %vm3102_vm11, %v5527_v47, %v5529_v36 }
 0x7f4   : > { %5790 = vmatmul.f32.gmra.mxu2 %v5637_v39  ;;  %v5004_v39 = vsel %vm2472_vm14, %v5001_v19, %v5003_v34  ;;  %v5002_v34 = vsel %vm2472_vm14, %v4999_v7, %v5001_v19 }
 0x7f5   : > { %7357 = vrot.lane.b32.xlu2 %v7356_v49, %s7559_s21  ;;  %v5565_v28 = vsel %vm5558_vm3, %v11784_v52, %v7279_v38  ;;  %v5185_v52 = vrot.slane %v12446_v18, 2  ;;  %v5187_v38 = vrot.slane %v12157_v55, 2  ;;  %v7351_v50 = vpack.i.bf16 %v5002_v34, %v5000_v4 }
 0x7f6   : > { %6934 = vmatmul.msk.f32.gmra.mxu0 %vm5558_vm3, %v5528_v12  ;;  %5432 = vrot.lane.b32.xlu0 %v5362_v13, %s7561_s11  ;;  %v7361_v12 = vpack.i.bf16 %v5006_v29, %v5004_v39  ;;  %v7280_v29 = vunpack.i.h.bf16 %v7278_v37 }
 0x7f7   : > { %v5188_v47 = vsel %vm2714_vm15, %v5185_v52, %v5187_v38  ;;  %v5190_v19 = vsel %vm2714_vm15, %v5187_v38, %v5189_v31 }
 0x7f8   : > { %5426 = vrot.lane.b32.xlu1 %v5356_v9, %s7561_s11  ;;  %v12483_v59 = vpop.permute.xlu0 %5214  ;;  %v5566_v37 = vsel %vm5558_vm3, %v11865_v6, %v7280_v29  ;;  %v7376_v4 = vpack.i.bf16 %v5190_v19, %v5188_v47  ;;  %v5367_v6 = vrot.slane %v12157_v55, 3  ;;  %v12552_v47 = vsel %vm2310_vm13, %v4860_v8, 0.0 }
 0x7f9   : > { %v5183_v19 = vrot.slane %v12459_v53, 2 }
 0x7fa   : > { %v5211_v51 = vpop.permute.xlu1 %5210 }
 0x7fb   : > { %v5904_v49 = vpop.f32.mrf.mxu0  ;;  %v5601_v13 = vsel %vm3200_vm0, %v5565_v28, %v5211_v51  ;;  %v5393_v51 = vpop.permute.xlu2 %5392 }
 0x7fc   : > { %v5638_v9 = vsel %vm5631_vm10, %v5601_v13, %v5391_v32  ;;  %v5357_v32 = vrot.slane %v12373_v43, 3 }
 0x7fd   : > { %7362 = vrot.lane.b32.xlu2 %v7361_v12, %s7562_s17  ;;  %5792 = vmatmul.f32.gmra.mxu2 %v5638_v9  ;;  %v5531_v12 = vrot.slane %v12339_v15, 4  ;;  %v5365_v9 = vrot.slane %v12446_v18, 3 }
 0x7fe   : > { %6935 = vmatmul.msk.f32.gmra.mxu0 %vm5558_vm3, %v5530_v35  ;;  %7372 = vrot.lane.b32.xlu0 %v7371_v33, %s7562_s17  ;;  %v12523_v33 = vsel %vm2310_vm13, 0.0, %v4859_v17  ;;  %v5358_v28 = vsel %vm2860_vm12, %v5355_v62, %v5357_v32  ;;  %v7284_v35 = vunpack.i.l.bf16 %v12486_v56  ;;  %v5193_v17 = vrot.slane %v12192_v1, 2 }
 0x7ff   : > { %v5532_v23 = vsel %vm3102_vm11, %v5529_v36, %v5531_v12  ;;  %v5363_v62 = vrot.slane %v12459_v53, 3  ;;  %v5360_v34 = vsel %vm2860_vm12, %v5357_v32, %v5359_v24  ;;  %v5191_v38 = vrot.slane %v12523_v33, 2 }
 0x800   : > { %7352 = vrot.lane.b32.xlu1 %v7351_v50, %s7562_s17  ;;  %v12512_v46 = vpop.permute.xlu0 %5396  ;;  %v5368_v50 = vsel %vm2860_vm12, %v5365_v9, %v5367_v6  ;;  %v5567_v24 = vsel %vm5558_vm3, %v11935_v60, %v7284_v35  ;;  %v5186_v60 = vsel %vm2714_vm15, %v5183_v19, %v5185_v52  ;;  %v5184_v35 = vsel %vm2714_vm15, %v5181_v16, %v5183_v19 }
 0x801   : > { %v5366_v36 = vsel %vm2860_vm12, %v5363_v62, %v5365_v9  ;;  %v5194_v32 = vsel %vm2714_vm15, %v5191_v38, %v5193_v17  ;;  %v5015_v9 = vrot.slane %v12552_v47, 1  ;;  %v7366_v52 = vpack.i.bf16 %v5186_v60, %v5184_v35 }
 0x802   : > { %v5213_v7 = vpop.permute.xlu1 %5212  ;;  %v5535_v16 = vrot.slane %v12108_v44, 4  ;;  %vm6353_vm13 = vcmask 130112  }
 0x803   : > { %v12518_v39 = vpop.f32.mrf.mxu0  ;;  %v5602_v49 = vsel %vm3200_vm0, %v5566_v37, %v5213_v7  ;;  %v5603_v7 = vsel %vm3200_vm0, %v5567_v24, %v12483_v59  ;;  %v5534_v59 = vsel %vm3102_vm11, %v5531_v12, %v5533_v45  ;;  %v5371_v24 = vrot.slane %v12523_v33, 3 }
 0x804   : > { %v5639_v13 = vsel %vm5631_vm10, %v5602_v49, %v5393_v51  ;;  %v5192_v49 = vsel %vm2714_vm15, %v5189_v31, %v5191_v38  ;;  %v5217_v31 = vpop.permute.xlu2 %5216 }
 0x805   : > { %5428 = vrot.lane.b32.xlu2 %v5358_v28, %s7561_s11  ;;  %5795 = vmatmul.f32.gmra.mxu2 %v5639_v13  ;;  %v7386_v28 = vpack.i.bf16 %v5368_v50, %v5366_v36  ;;  %v7396_v13 = vpack.i.bf16 %v5194_v32, %v5192_v49  ;;  %v13915_v36 = vld [vmem:[#allocation96_spill] sm:$0xff]  ;;  %v5011_v32 = vrot.slane %v12523_v33, 1 }
 0x806   : > { %6936 = vmatmul.msk.f32.gmra.mxu0 %vm5558_vm3, %v5532_v23  ;;  %7377 = vrot.lane.b32.xlu0 %v7376_v4, %s7559_s21  ;;  %v5013_v4 = vrot.slane %v12192_v1, 1  ;;  %v7285_v23 = vunpack.i.h.bf16 %v12486_v56  ;;  %v5017_v12 = vsel %vm2472_vm14, %v5015_v9, %v13915_v36 }
 0x807   : > { %v5012_v35 = vsel %vm2472_vm14, %v5009_v10, %v5011_v32  ;;  %v5537_v10 = vrot.slane %v12373_v43, 4 }
 0x808   : > { %5430 = vrot.lane.b32.xlu1 %v5360_v34, %s7561_s11  ;;  %v12543_v29 = vpop.permute.xlu0 %7287  ;;  %v5369_v34 = vrot.slane %v12465_v3, 3  ;;  %v5016_v38 = vsel %vm2472_vm14, %v5013_v4, %v5015_v9  ;;  %v5568_v19 = vsel %vm5558_vm3, %v12033_v14, %v7285_v23  ;;  %v5014_v60 = vsel %vm2472_vm14, %v5011_v32, %v5013_v4  ;;  %v13916_v23 = vld [vmem:[#allocation77_spill] sm:$0xff] }
 0x809   : > { %v5536_v14 = vsel %vm3102_vm11, %v5533_v45, %v5535_v16  ;;  %v7381_v4 = vpack.i.bf16 %v5014_v60, %v5012_v35  ;;  %vm6376_vm14 = vcmask 1041409  }
 0x80a   : > { %v5395_v37 = vpop.permute.xlu1 %5394  ;;  %v5370_v56 = vsel %vm2860_vm12, %v5367_v6, %v5369_v34  ;;  %v5372_v49 = vsel %vm2860_vm12, %v5369_v34, %v5371_v24 }
 0x80b   : > { %v12562_v51 = vpop.f32.mrf.mxu0  ;;  %v5640_v8 = vsel %vm5631_vm10, %v5603_v7, %v5395_v37  ;;  %v7401_v9 = vpack.i.bf16 %v5372_v49, %v5370_v56  ;;  %v7290_v56 = vunpack.i.h.bf16 %v12543_v29 }
 0x80d   : > { %7387 = vrot.lane.b32.xlu2 %v7386_v28, %s7561_s11  ;;  %5798 = vmatmul.f32.gmra.mxu2 %v5640_v8  ;;  %v5604_v28 = vsel %vm3200_vm0, %v5568_v19, %v5217_v31  ;;  %v7391_v8 = vpack.i.bf16 %v5017_v12, %v5016_v38  ;;  %v5219_v31 = vpop.permute.xlu2 %5218  ;;  %v5538_v19 = vsel %vm3102_vm11, %v5535_v16, %v5537_v10 }
 0x80e   : > { %6937 = vmatmul.msk.f32.gmra.mxu0 %vm5558_vm3, %v5534_v59  ;;  %7397 = vrot.lane.b32.xlu0 %v7396_v13, %s7559_s21  ;;  %v7289_v13 = vunpack.i.l.bf16 %v12543_v29  ;;  %v5641_v6 = vsel %vm5631_vm10, %v5604_v28, %v12512_v46  ;;  %v5195_v59 = vrot.slane %v12552_v47, 2  ;;  %v5375_v28 = vrot.slane %v12552_v47, 3 }
 0x80f   : > { %v5373_v29 = vrot.slane %v12192_v1, 3 }
 0x810   : > { %7367 = vrot.lane.b32.xlu1 %v7366_v52, %s7559_s21  ;;  %v5399_v50 = vpop.permute.xlu0 %5398  ;;  %v5196_v46 = vsel %vm2714_vm15, %v5193_v17, %v5195_v59  ;;  %v5197_v52 = vsel %vm2714_vm15, %v5195_v59, %v13916_v23  ;;  %v5569_v45 = vsel %vm5558_vm3, %v11737_v5, %v7289_v13  ;;  %v13917_v5 = vrot.slane %v11973_v26, 3  ;;  %v13918_v59 = vld [vmem:[#allocation16_spill] sm:$0xff] }
 0x811   : > { %v7406_v36 = vpack.i.bf16 %v5197_v52, %v5196_v46  ;;  %v5605_v12 = vsel %vm3200_vm0, %v5569_v45, %v5219_v31  ;;  %v5539_v13 = vrot.slane %v12422_v48, 4  ;;  %v5541_v46 = vrot.slane %v11973_v26, 4 }
 0x812   : > { %v5221_v7 = vpop.permute.xlu1 %5220  ;;  %v5642_v17 = vsel %vm5631_vm10, %v5605_v12, %v5399_v50  ;;  %v5570_v50 = vsel %vm5558_vm3, %v12124_v30, %v7290_v56  ;;  %vm6384_vm15 = vcmask 1045509  }
 0x813   : > { %v5912_v37 = vpop.f32.mrf.mxu0 }
 0x814   : > { %v5364_v37 = vsel %vm2860_vm12, %v13917_v5, %v5363_v62  ;;  %v5376_v62 = vsel %vm2860_vm12, %v5373_v29, %v5375_v28 }
 0x815   : > { %7392 = vrot.lane.b32.xlu2 %v7391_v8, %s7562_s17  ;;  %5800 = vmatmul.f32.gmra.mxu2 %v5641_v6  ;;  %v5606_v8 = vsel %vm3200_vm0, %v5570_v50, %v5221_v7  ;;  %v5401_v60 = vpop.permute.xlu2 %5400  ;;  %v5374_v6 = vsel %vm2860_vm12, %v5371_v24, %v5373_v29  ;;  %v5540_v7 = vsel %vm3102_vm11, %v5537_v10, %v5539_v13  ;;  %v5545_v50 = vrot.slane %v12446_v18, 4 }
 0x816   : > { %6938 = vmatmul.msk.f32.gmra.mxu0 %vm5558_vm3, %v5536_v14  ;;  %7402 = vrot.lane.b32.xlu0 %v7401_v9, %s7561_s11  ;;  %v5377_v14 = vsel %vm2860_vm12, %v5375_v28, %v13918_v59  ;;  %v5643_v30 = vsel %vm5631_vm10, %v5606_v8, %v5401_v60  ;;  %v5542_v10 = vsel %vm3102_vm11, %v5539_v13, %v5541_v46  ;;  %vm6382_vm12 = vcmask 1044484  }
 0x818   : > { %7382 = vrot.lane.b32.xlu1 %v7381_v4, %s7562_s17  ;;  %v5223_v32 = vpop.permute.xlu0 %5222  ;;  %v7411_v4 = vpack.i.bf16 %v5376_v62, %v5374_v6  ;;  %s7565_s17 = smov 125  }
 0x81a   : > { %v7293_v34 = vpop.permute.xlu1 %7292 }
 0x81b   : > { %v12612_v38 = vpop.f32.mrf.mxu0  ;;  %v7294_v9 = vunpack.i.l.bf16 %v7293_v34  ;;  %v7295_v12 = vunpack.i.h.bf16 %v7293_v34 }
 0x81d   : > { %7407 = vrot.lane.b32.xlu2 %v7406_v36, %s7559_s21  ;;  %5803 = vmatmul.f32.gmra.mxu2 %v5642_v17  ;;  %v5571_v24 = vsel %vm5558_vm3, %v12115_v61, %v7294_v9  ;;  %v7298_v36 = vpop.permute.xlu2 %7297  ;;  %v5572_v17 = vsel %vm5558_vm3, %v11927_v22, %v7295_v12  ;;  %s7563_s21 = smov 127  }
 0x81e   : > { %6939 = vmatmul.msk.f32.gmra.mxu0 %vm5558_vm3, %v5538_v19  ;;  %v5607_v45 = vsel %vm3200_vm0, %v5571_v24, %v5223_v32  ;;  %v5543_v32 = vrot.slane %v12459_v53, 4  ;;  %v7299_v29 = vunpack.i.l.bf16 %v7298_v36  ;;  %v7300_v6 = vunpack.i.h.bf16 %v7298_v36 }
 0x820   : > { %5434 = vrot.lane.b32.xlu1 %v5364_v37, %s7561_s11  ;;  %v5225_v35 = vpop.permute.xlu0 %5224  ;;  %v5544_v28 = vsel %vm3102_vm11, %v5541_v46, %v5543_v32  ;;  %v5573_v22 = vsel %vm5558_vm3, %v12207_v58, %v7299_v29  ;;  %v5546_v9 = vsel %vm3102_vm11, %v5543_v32, %v5545_v50  ;;  %v5574_v59 = vsel %vm5558_vm3, %v12230_v21, %v7300_v6 }
 0x821   : > { %v5608_v5 = vsel %vm3200_vm0, %v5572_v17, %v5225_v35  ;;  %v5547_v58 = vrot.slane %v12157_v55, 4 }
 0x822   : > { %v5403_v16 = vpop.permute.xlu1 %5402 }
 0x823   : > { %v12631_v49 = vpop.f32.mrf.mxu0  ;;  %v5644_v31 = vsel %vm5631_vm10, %v5607_v45, %v5403_v16  ;;  %v5548_v46 = vsel %vm3102_vm11, %v5545_v50, %v5547_v58  ;;  %v5551_v50 = vrot.slane %v12523_v33, 4 }
 0x825   : > { %5448 = vrot.lane.b32.xlu2 %v5377_v14, %s7561_s11  ;;  %5806 = vmatmul.f32.gmra.mxu2 %v5643_v30  ;;  %v5227_v34 = vpop.permute.xlu2 %5226 }
 0x826   : > { %6940 = vmatmul.msk.f32.gmra.mxu0 %vm5558_vm3, %v5540_v7  ;;  %v5609_v60 = vsel %vm3200_vm0, %v5573_v22, %v5227_v34 }
 0x828   : > { %7412 = vrot.lane.b32.xlu1 %v7411_v4, %s7561_s11  ;;  %v5407_v56 = vpop.permute.xlu0 %5406  ;;  %s7564_s11 = smov 126  }
 0x829   : > { %v5646_v62 = vsel %vm5631_vm10, %v5609_v60, %v5407_v56 }
 0x82a   : > { %v5405_v23 = vpop.permute.xlu1 %5404 }
 0x82b   : > { %v5920_v52 = vpop.f32.mrf.mxu0  ;;  %v5645_v37 = vsel %vm5631_vm10, %v5608_v5, %v5405_v23 }
 0x82d   : > { %5808 = vmatmul.f32.gmra.mxu2 %v5644_v31  ;;  %v5409_v7 = vpop.permute.xlu2 %5408 }
 0x82e   : > { %6941 = vmatmul.msk.f32.gmra.mxu0 %vm5558_vm3, %v5542_v10  ;;  %v5549_v10 = vrot.slane %v12465_v3, 4 }
 0x830   : > { %v7303_v8 = vpop.permute.xlu0 %7302  ;;  %v5550_v17 = vsel %vm3102_vm11, %v5547_v58, %v5549_v10 }
 0x831   : > { %v7304_v23 = vunpack.i.l.bf16 %v7303_v8 }
 0x832   : > { %v5229_v61 = vpop.permute.xlu1 %5228 }
 0x833   : > { %v12652_v19 = vpop.f32.mrf.mxu0  ;;  %v5610_v14 = vsel %vm3200_vm0, %v5574_v59, %v5229_v61  ;;  %v5575_v21 = vsel %vm5558_vm3, %v11994_v42, %v7304_v23  ;;  %v7305_v61 = vunpack.i.h.bf16 %v7303_v8  ;;  %v5552_v8 = vsel %vm3102_vm11, %v5549_v10, %v5551_v50 }
 0x834   : > { %v5647_v4 = vsel %vm5631_vm10, %v5610_v14, %v5409_v7  ;;  %v5553_v14 = vrot.slane %v12192_v1, 4 }
 0x835   : > { %5811 = vmatmul.f32.gmra.mxu2 %v5645_v37  ;;  %v7318_v12 = vpop.permute.xlu2 %7317 }
 0x836   : > { %6942 = vmatmul.msk.f32.gmra.mxu0 %vm5558_vm3, %v5544_v28  ;;  %v5576_v28 = vsel %vm5558_vm3, %v12250_v54, %v7305_v61 }
 0x838   : > { %v7308_v35 = vpop.permute.xlu0 %7307 }
 0x839   : > { %v7309_v52 = vunpack.i.l.bf16 %v7308_v35  ;;  %v7310_v5 = vunpack.i.h.bf16 %v7308_v35 }
 0x83a   : > { %v7313_v13 = vpop.permute.xlu1 %7312 }
 0x83b   : > { %v12662_v16 = vpop.f32.mrf.mxu0  ;;  %v5611_v31 = vsel %vm3200_vm0, %v5575_v21, %v7309_v52  ;;  %v7314_v37 = vunpack.i.l.bf16 %v7313_v13  ;;  %v5612_v34 = vsel %vm3200_vm0, %v5576_v28, %v7310_v5  ;;  %v7315_v7 = vunpack.i.h.bf16 %v7313_v13 }
 0x83c   : > { %v5555_v52 = vrot.slane %v12552_v47, 4 }
 0x83d   : > { %5814 = vmatmul.f32.gmra.mxu2 %v5646_v62  ;;  %v5577_v6 = vsel %vm5558_vm3, %v12257_v57, %v7314_v37  ;;  %v7319_v62 = vunpack.i.l.bf16 %v7318_v12  ;;  %v5415_v54 = vpop.permute.xlu2 %5414  ;;  %v5578_v57 = vsel %vm5558_vm3, %v11850_v25, %v7315_v7 }
 0x83e   : > { %6943 = vmatmul.msk.f32.gmra.mxu0 %vm5558_vm3, %v5546_v9  ;;  %v5556_v5 = vsel %vm3102_vm11, %v5553_v14, %v5555_v52 }
 0x83f   : > { %v5613_v59 = vsel %vm3200_vm0, %v5577_v6, %v7319_v62 }
 0x840   : > { %v5413_v42 = vpop.permute.xlu0 %5412  ;;  %v5650_v35 = vsel %vm5631_vm10, %v5613_v59, %v5415_v54 }
 0x841   : > { %v5649_v22 = vsel %vm5631_vm10, %v5612_v34, %v5413_v42 }
 0x842   : > { %v5411_v24 = vpop.permute.xlu1 %5410 }
 0x843   : > { %v5928_v30 = vpop.f32.mrf.mxu0  ;;  %v5648_v36 = vsel %vm5631_vm10, %v5611_v31, %v5411_v24 }
 0x845   : > { %5816 = vmatmul.f32.gmra.mxu2 %v5647_v4  ;;  %v5554_v4 = vsel %vm3102_vm11, %v5551_v50, %v5553_v14  ;;  %v7323_v23 = vpop.permute.xlu2 %7322 }
 0x846   : > { %6944 = vmatmul.msk.f32.gmra.mxu0 %vm5558_vm3, %v5548_v46  ;;  %v7320_v46 = vunpack.i.h.bf16 %v7318_v12  ;;  %v7324_v10 = vunpack.i.l.bf16 %v7323_v23  ;;  %v7325_v6 = vunpack.i.h.bf16 %v7323_v23 }
 0x848   : > { %v5417_v30 = vpop.permute.xlu0 %5416  ;;  %v5614_v13 = vsel %vm3200_vm0, %v5578_v57, %v7320_v46  ;;  %v5579_v42 = vsel %vm5558_vm3, %v12281_v41, %v7324_v10  ;;  %v5580_v14 = vsel %vm5558_vm3, %v12317_v63, %v7325_v6 }
 0x84a   : > { %v12686_v32 = vpop.permute.xlu1 %7327 }
 0x84b   : > { %v12677_v45 = vpop.f32.mrf.mxu0  ;;  %v7330_v41 = vunpack.i.h.bf16 %v12686_v32 }
 0x84c   : > { %v12682_v56 = vpop.f32.mrf.mxu2 }
 0x84d   : > { %5819 = vmatmul.f32.gmra.mxu2 %v5648_v36  ;;  %v5651_v36 = vsel %vm5631_vm10, %v5614_v13, %v5417_v30  ;;  %v5419_v34 = vpop.permute.xlu2 %5418  ;;  %v5616_v30 = vsel %vm3200_vm0, %v5580_v14, %v7330_v41 }
 0x84e   : > { %6945 = vmatmul.msk.f32.gmra.mxu0 %vm5558_vm3, %v5550_v17  ;;  %v7329_v17 = vunpack.i.l.bf16 %v12686_v32 }
 0x850   : > { %v7333_v61 = vpop.permute.xlu0 %7332  ;;  %v5615_v37 = vsel %vm3200_vm0, %v5579_v42, %v7329_v17 }
 0x851   : > { %v5652_v50 = vsel %vm5631_vm10, %v5615_v37, %v5419_v34  ;;  %v7335_v63 = vunpack.i.h.bf16 %v7333_v61 }
 0x852   : > { %v5421_v9 = vpop.permute.xlu1 %5420 }
 0x853   : > { %v12690_v29 = vpop.f32.mrf.mxu0  ;;  %v5653_v7 = vsel %vm5631_vm10, %v5616_v30, %v5421_v9  ;;  %v5582_v17 = vsel %vm5558_vm3, %v12339_v15, %v7335_v63 }
 0x854   : > { %v12696_v60 = vpop.f32.mrf.mxu2 }
 0x855   : > { %5822 = vmatmul.f32.gmra.mxu2 %v5649_v22 }
 0x856   : > { %6946 = vmatmul.msk.f32.gmra.mxu0 %vm5558_vm3, %v5552_v8  ;;  %v13919_v8 = vld [vmem:[#allocation64_spill] sm:$0xff] }
 0x858   : > { %v7348_v62 = vpop.permute.xlu0 %7347 }
 0x859   : > { %v7349_v34 = vunpack.i.l.bf16 %v7348_v62  ;;  %v7350_v14 = vunpack.i.h.bf16 %v7348_v62 }
 0x85a   : > { %v7338_v31 = vpop.permute.xlu1 %7337 }
 0x85b   : > { %v5936_v58 = vpop.f32.mrf.mxu0  ;;  %v7339_v32 = vunpack.i.l.bf16 %v7338_v31  ;;  %v7340_v10 = vunpack.i.h.bf16 %v7338_v31 }
 0x85d   : > { %5824 = vmatmul.f32.gmra.mxu2 %v5650_v35  ;;  %v5425_v35 = vpop.permute.xlu2 %5424 }
 0x85e   : > { %6947 = vmatmul.msk.f32.gmra.mxu0 %vm5558_vm3, %v5554_v4  ;;  %v7334_v4 = vunpack.i.l.bf16 %v7333_v61 }
 0x85f   : > { %v5783_v24 = vpop.f32.mrf.mxu2 }
 0x860   : > { %v5423_v46 = vpop.permute.xlu0 %5422 }
 0x862   : > { %v7343_v22 = vpop.permute.xlu1 %7342 }
 0x863   : > { %v12709_v21 = vpop.f32.mrf.mxu0  ;;  %v7344_v61 = vunpack.i.l.bf16 %v7343_v22 }
 0x865   : > { %5827 = vmatmul.f32.gmra.mxu2 %v5651_v36  ;;  %v7358_v9 = vpop.permute.xlu2 %7357 }
 0x866   : > { %6948 = vmatmul.msk.f32.gmra.mxu0 %vm5558_vm3, %v5556_v5  ;;  %v7360_v63 = vunpack.i.h.bf16 %v7358_v9 }
 0x867   : > { %v5785_v25 = vpop.f32.mrf.mxu2 }
 0x868   : > { %v12717_v12 = vadd.f32 %v12416_v27, %v5785_v25  ;;  %v5557_v27 = vsel %vm3102_vm11, %v5555_v52, %v13919_v8  ;;  %v7345_v8 = vunpack.i.h.bf16 %v7343_v22  ;;  %vm6378_vm11 = vcmask 1042434  }
 0x86a   : > { %6002 = vrot.lane.b32.xlu0 %v12717_v12, %s7563_s21  ;;  %v5427_v24 = vpop.permute.xlu1 %5426 }
 0x86b   : > { %v12724_v28 = vpop.f32.mrf.mxu0 }
 0x86d   : > { %5830 = vmatmul.f32.gmra.mxu2 %v5652_v50  ;;  %v12761_v37 = vpop.permute.xlu2 %7362 }
 0x86e   : > { %6949 = vmatmul.msk.f32.gmra.mxu0 %vm5558_vm3, %v5557_v27 }
 0x86f   : > { %v5788_v54 = vpop.f32.mrf.mxu2 }
 0x870   : > { %v12732_v59 = vadd.f32 %v12454_v40, %v5788_v54  ;;  %v5581_v40 = vsel %vm5558_vm3, %v12054_v11, %v7334_v4  ;;  %v5618_v11 = vsel %vm3200_vm0, %v5582_v17, %v7340_v10  ;;  %v5433_v4 = vpop.permute.xlu0 %5432 }
 0x871   : > { %v5617_v23 = vsel %vm3200_vm0, %v5581_v40, %v7339_v32  ;;  %v5655_v42 = vsel %vm5631_vm10, %v5618_v11, %v5425_v35 }
 0x872   : > { %6004 = vrot.lane.b32.xlu1 %v12732_v59, %s7563_s21  ;;  %v5654_v13 = vsel %vm5631_vm10, %v5617_v23, %v5423_v46  ;;  %v7353_v5 = vpop.permute.xlu1 %7352  ;;  %v7359_v46 = vunpack.i.l.bf16 %v7358_v9  ;;  %v7364_v9 = vunpack.i.l.bf16 %v12761_v37 }
 0x873   : > { %v5944_v58 = vpop.f32.mrf.mxu0  ;;  %v7355_v62 = vunpack.i.h.bf16 %v7353_v5 }
 0x875   : > { %5832 = vmatmul.f32.gmra.mxu2 %v5653_v7  ;;  %v5429_v58 = vpop.permute.xlu2 %5428  ;;  %v7354_v7 = vunpack.i.l.bf16 %v7353_v5 }
 0x877   : > { %v5791_v57 = vpop.f32.mrf.mxu2 }
 0x87a   : > { %v5431_v27 = vpop.permute.xlu1 %5430 }
 0x87b   : > { %v12743_v52 = vpop.f32.mrf.mxu0 }
 0x87d   : > { %5835 = vmatmul.f32.gmra.mxu2 %v5654_v13  ;;  %v7373_v13 = vpop.permute.xlu0 %7372 }
 0x880   : > { %v5793_v36 = vpop.f32.mrf.mxu2 }
 0x881   : > { %v12749_v25 = vadd.f32 %v12518_v39, %v5793_v36  ;;  %v5583_v39 = vsel %vm5558_vm3, %v12356_v2, %v7344_v61  ;;  %v5584_v2 = vsel %vm5558_vm3, %v12108_v44, %v7345_v8 }
 0x882   : > { %v5619_v6 = vsel %vm3200_vm0, %v5583_v39, %v7349_v34  ;;  %v5620_v22 = vsel %vm3200_vm0, %v5584_v2, %v7350_v14  ;;  %v7368_v32 = vpop.permute.xlu1 %7367  ;;  %v5587_v39 = vsel %vm5558_vm3, %v11973_v26, %v7364_v9 }
 0x883   : > { %6068 = vrot.lane.b32.xlu1 %v12749_v25, %s7564_s11  ;;  %6006 = vrot.lane.b32.xlu2 %v12749_v25, %s7563_s21  ;;  %v12756_v31 = vpop.f32.mrf.mxu0  ;;  %v5656_v54 = vsel %vm5631_vm10, %v5619_v6, %v5427_v24  ;;  %v5657_v35 = vsel %vm5631_vm10, %v5620_v22, %v5429_v58  ;;  %v5585_v24 = vsel %vm5558_vm3, %v12373_v43, %v7354_v7  ;;  %v7369_v61 = vunpack.i.l.bf16 %v7368_v32 }
 0x884   : > { %v5621_v40 = vsel %vm3200_vm0, %v5585_v24, %v7359_v46  ;;  %v7374_v7 = vunpack.i.l.bf16 %v7373_v13 }
 0x885   : > { %5838 = vmatmul.f32.gmra.mxu2 %v5655_v42  ;;  %v5658_v43 = vsel %vm5631_vm10, %v5621_v40, %v5431_v27  ;;  %v7378_v42 = vpop.permute.xlu0 %7377  ;;  %v5623_v34 = vsel %vm3200_vm0, %v5587_v39, %v7369_v61  ;;  %v7365_v27 = vunpack.i.h.bf16 %v12761_v37 }
 0x886   : > { %v7380_v40 = vunpack.i.h.bf16 %v7378_v42 }
 0x887   : > { %v5588_v14 = vsel %vm5558_vm3, %v12459_v53, %v7365_v27 }
 0x888   : > { %v5796_v15 = vpop.f32.mrf.mxu2 }
 0x889   : > { %v12764_v50 = vadd.f32 %v12562_v51, %v5796_v15 }
 0x88a   : > { %v12795_v10 = vpop.permute.xlu1 %7382 }
 0x88b   : > { %6070 = vrot.lane.b32.xlu2 %v12764_v50, %s7564_s11  ;;  %6008 = vrot.lane.b32.xlu0 %v12764_v50, %s7563_s21  ;;  %v5952_v41 = vpop.f32.mrf.mxu0  ;;  %v7385_v27 = vunpack.i.h.bf16 %v12795_v10 }
 0x88c   : > { %v7370_v41 = vunpack.i.h.bf16 %v7368_v32 }
 0x88d   : > { %5840 = vmatmul.f32.gmra.mxu2 %v5656_v54  ;;  %v7388_v54 = vpop.permute.xlu2 %7387  ;;  %v7398_v58 = vpop.permute.xlu0 %7397 }
 0x88e   : > { %v5624_v26 = vsel %vm3200_vm0, %v5588_v14, %v7370_v41  ;;  %v7389_v22 = vunpack.i.l.bf16 %v7388_v54  ;;  %v7390_v24 = vunpack.i.h.bf16 %v7388_v54  ;;  %v7399_v61 = vunpack.i.l.bf16 %v7398_v58 }
 0x88f   : > { %v5592_v54 = vsel %vm5558_vm3, %v12523_v33, %v7385_v27 }
 0x890   : > { %v5799_v51 = vpop.f32.mrf.mxu2  ;;  %v5661_v53 = vsel %vm5631_vm10, %v5624_v26, %v7389_v22 }
 0x892   : > { %v5435_v15 = vpop.permute.xlu1 %5434 }
 0x893   : > { %v12775_v30 = vpop.f32.mrf.mxu0  ;;  %v5660_v6 = vsel %vm5631_vm10, %v5623_v34, %v5435_v15 }
 0x895   : > { %5843 = vmatmul.f32.gmra.mxu2 %v5657_v35 }
 0x898   : > { %v5801_v57 = vpop.f32.mrf.mxu2 }
 0x899   : > { %v12781_v44 = vadd.f32 %v12612_v38, %v5801_v57  ;;  %v5586_v38 = vsel %vm5558_vm3, %v12422_v48, %v7355_v62 }
 0x89a   : > { %v5622_v5 = vsel %vm3200_vm0, %v5586_v38, %v7360_v63  ;;  %v7393_v63 = vpop.permute.xlu2 %7392 }
 0x89b   : > { %6134 = vrot.lane.b32.xlu2 %v12781_v44, %s7565_s17  ;;  %6072 = vrot.lane.b32.xlu0 %v12781_v44, %s7564_s11  ;;  %v12788_v23 = vpop.f32.mrf.mxu0  ;;  %v5659_v48 = vsel %vm5631_vm10, %v5622_v5, %v5433_v4  ;;  %v5589_v4 = vsel %vm5558_vm3, %v12446_v18, %v7374_v7  ;;  %v7403_v18 = vpop.permute.xlu0 %7402  ;;  %v7394_v33 = vunpack.i.l.bf16 %v7393_v63 }
 0x89c   : > { %6010 = vrot.lane.b32.xlu1 %v12781_v44, %s7563_s21  ;;  %v7405_v15 = vunpack.i.h.bf16 %v7403_v18 }
 0x89d   : > { %5846 = vmatmul.f32.gmra.mxu2 %v5658_v43  ;;  %v7404_v43 = vunpack.i.l.bf16 %v7403_v18 }
 0x8a0   : > { %v5804_v36 = vpop.f32.mrf.mxu2 }
 0x8a1   : > { %v12798_v17 = vadd.f32 %v12631_v49, %v5804_v36  ;;  %v7384_v36 = vunpack.i.l.bf16 %v12795_v10 }
 0x8a2   : > { %v7408_v39 = vpop.permute.xlu2 %7407 }
 0x8a3   : > { %6136 = vrot.lane.b32.xlu0 %v12798_v17, %s7565_s17  ;;  %6012 = vrot.lane.b32.xlu2 %v12798_v17, %s7563_s21  ;;  %v5960_v11 = vpop.f32.mrf.mxu0  ;;  %v5591_v9 = vsel %vm5558_vm3, %v12465_v3, %v7384_v36 }
 0x8a4   : > { %6074 = vrot.lane.b32.xlu1 %v12798_v17, %s7564_s11 }
 0x8a5   : > { %5848 = vmatmul.f32.gmra.mxu2 %v5659_v48 }
 0x8a8   : > { %v5807_v49 = vpop.f32.mrf.mxu2 }
 0x8aa   : > { %v5449_v7 = vpop.permute.xlu2 %5448 }
 0x8ab   : > { %v12812_v8 = vpop.f32.mrf.mxu0 }
 0x8ad   : > { %5851 = vmatmul.f32.gmra.mxu2 %v5660_v6 }
 0x8b0   : > { %v5809_v2 = vpop.f32.mrf.mxu2 }
 0x8b1   : > { %v12819_v51 = vadd.f32 %v12652_v19, %v5809_v2  ;;  %v7379_v19 = vunpack.i.l.bf16 %v7378_v42  ;;  %v5627_v42 = vsel %vm3200_vm0, %v5591_v9, %v7399_v61  ;;  %v7400_v2 = vunpack.i.h.bf16 %v7398_v58 }
 0x8b2   : > { %v5664_v3 = vsel %vm5631_vm10, %v5627_v42, %v7405_v15  ;;  %v7409_v58 = vunpack.i.l.bf16 %v7408_v39 }
 0x8b3   : > { %6138 = vrot.lane.b32.xlu1 %v12819_v51, %s7565_s17  ;;  %6076 = vrot.lane.b32.xlu2 %v12819_v51, %s7564_s11  ;;  %v12826_v37 = vpop.f32.mrf.mxu0  ;;  %v5625_v57 = vsel %vm3200_vm0, %v5589_v4, %v7379_v19  ;;  %v5628_v10 = vsel %vm3200_vm0, %v5592_v54, %v7400_v2  ;;  %v5593_v19 = vsel %vm5558_vm3, %v12192_v1, %v7394_v33 }
 0x8b4   : > { %6014 = vrot.lane.b32.xlu0 %v12819_v51, %s7563_s21  ;;  %v5662_v62 = vsel %vm5631_vm10, %v5625_v57, %v7390_v24  ;;  %v5629_v4 = vsel %vm3200_vm0, %v5593_v19, %v7409_v58 }
 0x8b5   : > { %5854 = vmatmul.f32.gmra.mxu2 %v5661_v53 }
 0x8b8   : > { %v5812_v35 = vpop.f32.mrf.mxu2 }
 0x8b9   : > { %v12834_v32 = vadd.f32 %v12662_v16, %v5812_v35  ;;  %v7375_v16 = vunpack.i.h.bf16 %v7373_v13 }
 0x8bb   : > { %6140 = vrot.lane.b32.xlu2 %v12834_v32, %s7565_s17  ;;  %6016 = vrot.lane.b32.xlu1 %v12834_v32, %s7563_s21  ;;  %v5968_v46 = vpop.f32.mrf.mxu0  ;;  %v5590_v5 = vsel %vm5558_vm3, %v12157_v55, %v7375_v16 }
 0x8bc   : > { %6200 = vrot.lane.b32.xlu0 %v12819_v51, %s7566_s14  ;;  %v5626_v11 = vsel %vm3200_vm0, %v5590_v5, %v7380_v40  ;;  %v7395_v46 = vunpack.i.h.bf16 %v7393_v63  ;;  %v5894_v40 = vadd.f32 %v12375_v0, %v12696_v60 }
 0x8bd   : > { %5856 = vmatmul.f32.gmra.mxu2 %v5662_v62  ;;  %v5663_v13 = vsel %vm5631_vm10, %v5626_v11, %v7404_v43  ;;  %v7410_v62 = vunpack.i.h.bf16 %v7408_v39 }
 0x8be   : > { %v5594_v1 = vsel %vm5558_vm3, %v12552_v47, %v7395_v46  ;;  %vm6386_vm3 = vcmask 1046534  }
 0x8c0   : > { %v5815_v38 = vpop.f32.mrf.mxu2 }
 0x8c1   : > { %v5630_v38 = vsel %vm3200_vm0, %v5594_v1, %v7410_v62  ;;  %v7567_v1 = vmov 0   ;;  %vm6380_vm0 = vcmask 1043459  }
 0x8c2   : > { %v5667_v63 = vsel %vm5631_vm10, %v5630_v38, %v5449_v7  ;;  %7416 = vset.pattern.permute.xlu1 %v7567_v1  ;;  %7417 = vset.pattern.permute.xlu2 %v7567_v1 }
 0x8c3   : > { %6202 = vrot.lane.b32.xlu1 %v12834_v32, %s7566_s14  ;;  %v12850_v48 = vpop.f32.mrf.mxu0  ;;  %7418 = vset.pattern.permute.xlu0 %v7567_v1 }
 0x8c4   : > { %6078 = vrot.lane.b32.xlu0 %v12834_v32, %s7564_s11 }
 0x8c5   : > { %5859 = vmatmul.f32.gmra.mxu2 %v5663_v13 }
 0x8c8   : > { %v5817_v49 = vpop.f32.mrf.mxu2 }
 0x8c9   : > { %v12858_v55 = vadd.f32 %v12677_v45, %v5817_v49  ;;  %v7413_v45 = vpop.permute.xlu1 %7412 }
 0x8ca   : > { %v7414_v6 = vunpack.i.l.bf16 %v7413_v45 }
 0x8cb   : > { %6080 = vrot.lane.b32.xlu1 %v12858_v55, %s7564_s11  ;;  %6018 = vrot.lane.b32.xlu2 %v12858_v55, %s7563_s21  ;;  %v12865_v34 = vpop.f32.mrf.mxu0 }
 0x8cc   : > { %6142 = vrot.lane.b32.xlu0 %v12858_v55, %s7565_s17  ;;  %v5665_v22 = vsel %vm5631_vm10, %v5628_v10, %v7414_v6 }
 0x8cd   : > { %5862 = vmatmul.f32.gmra.mxu2 %v5664_v3 }
 0x8d0   : > { %v5820_v41 = vpop.f32.mrf.mxu2 }
 0x8d1   : > { %v12874_v14 = vadd.f32 %v12690_v29, %v5820_v41  ;;  %v7415_v29 = vunpack.i.h.bf16 %v7413_v45 }
 0x8d3   : > { %6204 = vrot.lane.b32.xlu2 %v12858_v55, %s7566_s14  ;;  %6144 = vrot.lane.b32.xlu1 %v12874_v14, %s7565_s17  ;;  %v5976_v26 = vpop.f32.mrf.mxu0  ;;  %v5666_v57 = vsel %vm5631_vm10, %v5629_v4, %v7415_v29 }
 0x8d4   : > { %6020 = vrot.lane.b32.xlu0 %v12874_v14, %s7563_s21 }
 0x8d5   : > { %5864 = vmatmul.f32.gmra.mxu2 %v5665_v22 }
 0x8d8   : > { %v5823_v53 = vpop.f32.mrf.mxu2 }
 0x8db   : > { %6082 = vrot.lane.b32.xlu2 %v12874_v14, %s7564_s11  ;;  %v12888_v35 = vpop.f32.mrf.mxu0 }
 0x8dc   : > { %6206 = vrot.lane.b32.xlu0 %v12874_v14, %s7566_s14  ;;  %v12935_v61 = vpop.permute.xlu0 %6002 }
 0x8dd   : > { %v6007_v24 = vpop.permute.xlu2 %6006  ;;  %5867 = vmatmul.f32.gmra.mxu2 %v5666_v57 }
 0x8e0   : > { %v5825_v18 = vpop.f32.mrf.mxu2 }
 0x8e1   : > { %v12895_v16 = vadd.f32 %v12709_v21, %v5825_v18 }
 0x8e3   : > { %6146 = vrot.lane.b32.xlu2 %v12895_v16, %s7565_s17  ;;  %6022 = vrot.lane.b32.xlu1 %v12895_v16, %s7563_s21  ;;  %v12905_v43 = vpop.f32.mrf.mxu0 }
 0x8e4   : > { %6084 = vrot.lane.b32.xlu0 %v12895_v16, %s7564_s11  ;;  %v6005_v21 = vpop.permute.xlu1 %6004 }
 0x8e5   : > { %v6051_v47 = vadd.f32 %v6005_v21, %v5894_v40  ;;  %5870 = vmatmul.f32.gmra.mxu2 %v5667_v63  ;;  %v6071_v36 = vpop.permute.xlu2 %6070 }
 0x8e7   : > { %v12911_v0 = vadd.f32 %v6071_v36, %v6051_v47 }
 0x8e8   : > { %v5828_v60 = vpop.f32.mrf.mxu2 }
 0x8e9   : > { %v12914_v5 = vadd.f32 %v12724_v28, %v5828_v60  ;;  %v5891_v60 = vadd.f32 %v12329_v20, %v12682_v56  ;;  %v13014_v56 = vld [vmem:[#allocation2] ss:$0 sm:$0xff] }
 0x8eb   : > { %6208 = vrot.lane.b32.xlu1 %v12895_v16, %s7566_s14  ;;  %6024 = vrot.lane.b32.xlu2 %v12914_v5, %s7563_s21  ;;  %v5984_v11 = vpop.f32.mrf.mxu0 }
 0x8ec   : > { %6148 = vrot.lane.b32.xlu0 %v12914_v5, %s7565_s17 }
 0x8f0   : > { %v5831_v13 = vpop.f32.mrf.mxu2 }
 0x8f1   : > { %v6050_v13 = vadd.f32 %v12935_v61, %v5891_v60 }
 0x8f3   : > { %6086 = vrot.lane.b32.xlu1 %v12914_v5, %s7564_s11  ;;  %6210 = vrot.lane.b32.xlu2 %v12914_v5, %s7566_s14 }
 0x8f5   : > { %v12937_v49 = vpop.permute.xlu2 %6134  ;;  %v6069_v39 = vpop.permute.xlu1 %6068 }
 0x8f8   : > { %v5833_v9 = vpop.f32.mrf.mxu2 }
 0x8f9   : > { %v12927_v28 = vadd.f32 %v12743_v52, %v5833_v9  ;;  %v6116_v9 = vadd.f32 %v6069_v39, %v6050_v13 }
 0x8fb   : > { %6150 = vrot.lane.b32.xlu1 %v12927_v28, %s7565_s17  ;;  %6088 = vrot.lane.b32.xlu2 %v12927_v28, %s7564_s11 }
 0x8fc   : > { %6026 = vrot.lane.b32.xlu0 %v12927_v28, %s7563_s21 }
 0x8fd   : > { %v12948_v52 = vpop.permute.xlu0 %6008  ;;  %v12950_v27 = vpop.permute.xlu2 %6012 }
 0x8fe   : > { %v6053_v20 = vadd.f32 %v12948_v52, %v12732_v59 }
 0x900   : > { %v5836_v42 = vpop.f32.mrf.mxu2 }
 0x901   : > { %v12940_v15 = vadd.f32 %v12756_v31, %v5836_v42  ;;  %v6052_v31 = vadd.f32 %v6007_v24, %v12717_v12 }
 0x903   : > { %6152 = vrot.lane.b32.xlu2 %v12940_v15, %s7565_s17  ;;  %6028 = vrot.lane.b32.xlu1 %v12940_v15, %s7563_s21 }
 0x904   : > { %6212 = vrot.lane.b32.xlu0 %v12927_v28, %s7566_s14 }
 0x908   : > { %v5839_v3 = vpop.f32.mrf.mxu2 }
 0x90b   : > { %6214 = vrot.lane.b32.xlu1 %v12940_v15, %s7566_s14 }
 0x90c   : > { %6090 = vrot.lane.b32.xlu0 %v12940_v15, %s7564_s11 }
 0x90d   : > { %v6073_v45 = vpop.permute.xlu0 %6072  ;;  %v6077_v2 = vpop.permute.xlu2 %6076 }
 0x90e   : > { %v12957_v6 = vadd.f32 %v6073_v45, %v6052_v31  ;;  %v6011_v41 = vpop.permute.xlu1 %6010 }
 0x90f   : > { %v6054_v54 = vadd.f32 %v6011_v41, %v12749_v25 }
 0x910   : > { %v5841_v10 = vpop.f32.mrf.mxu2 }
 0x911   : > { %v12960_v26 = vadd.f32 %v6077_v2, %v6054_v54  ;;  %v5955_v22 = vadd.f32 %v12775_v30, %v5841_v10 }
 0x913   : > { %6092 = vrot.lane.b32.xlu1 %v5955_v22, %s7564_s11  ;;  %6030 = vrot.lane.b32.xlu2 %v5955_v22, %s7563_s21 }
 0x914   : > { %6154 = vrot.lane.b32.xlu0 %v5955_v22, %s7565_s17 }
 0x915   : > { %v6141_v33 = vpop.permute.xlu2 %6140  ;;  %v12970_v58 = vpop.permute.xlu0 %6136 }
 0x916   : > { %v6075_v25 = vpop.permute.xlu1 %6074 }
 0x917   : > { %v6119_v41 = vadd.f32 %v6075_v25, %v6053_v20  ;;  %v6183_v25 = vadd.f32 %v12970_v58, %v12911_v0 }
 0x918   : > { %v5844_v12 = vpop.f32.mrf.mxu2 }
 0x919   : > { %v5958_v7 = vadd.f32 %v12788_v23, %v5844_v12 }
 0x91b   : > { %6216 = vrot.lane.b32.xlu2 %v5955_v22, %s7566_s14  ;;  %6156 = vrot.lane.b32.xlu1 %v5958_v7, %s7565_s17 }
 0x91c   : > { %6032 = vrot.lane.b32.xlu0 %v5958_v7, %s7563_s21  ;;  %s13085_s21 = sshll.u32 %s287_s6, 4  ;;  %s6409_s21 = int_to_ptr.vmem [resolvable:$true] %s13085_s21 }
 0x920   : > { %v5847_v30 = vpop.f32.mrf.mxu2 }
 0x923   : > { %6094 = vrot.lane.b32.xlu2 %v5958_v7, %s7564_s11 }
 0x924   : > { %6218 = vrot.lane.b32.xlu0 %v5958_v7, %s7566_s14  ;;  %v6055_v7 = vadd.f32 %v12950_v27, %v12764_v50 }
 0x925   : > { %v12974_v29 = vpop.permute.xlu1 %6138  ;;  %v12976_v53 = vpop.permute.xlu2 %6018 }
 0x926   : > { %v12978_v23 = vpop.permute.xlu0 %6014  ;;  %v6184_v0 = vadd.f32 %v12974_v29, %v12957_v6  ;;  %v6058_v29 = vadd.f32 %v12976_v53, %v12819_v51 }
 0x927   : > { %v6056_v6 = vadd.f32 %v12978_v23, %v12781_v44 }
 0x928   : > { %v5849_v19 = vpop.f32.mrf.mxu2 }
 0x929   : > { %v5963_v4 = vadd.f32 %v12812_v8, %v5849_v19 }
 0x92b   : > { %6220 = vrot.lane.b32.xlu1 %v5963_v4, %s7566_s14  ;;  %6158 = vrot.lane.b32.xlu2 %v5963_v4, %s7565_s17 }
 0x92c   : > { %6096 = vrot.lane.b32.xlu0 %v5963_v4, %s7564_s11 }
 0x92d   : > { %v12984_v57 = vpop.permute.xlu2 %6204  ;;  %v12986_v46 = vpop.permute.xlu1 %6016 }
 0x92e   : > { %v6201_v24 = vpop.permute.xlu0 %6200 }
 0x930   : > { %v5852_v62 = vpop.f32.mrf.mxu2 }
 0x931   : > { %v5966_v18 = vadd.f32 %v12826_v37, %v5852_v62 }
 0x933   : > { %6222 = vrot.lane.b32.xlu2 %v5966_v18, %s7566_s14  ;;  %6098 = vrot.lane.b32.xlu1 %v5966_v18, %s7564_s11  ;;  %s6410_s11 = sshll.u32 %s6406_s25, 4  ;;  %s6411_s11 = int_to_ptr.hbm [resolvable:$true] %s6410_s11 }
 0x934   : > { %6160 = vrot.lane.b32.xlu0 %v5966_v18, %s7565_s17 }
 0x935   : > { %v12992_v8 = vpop.permute.xlu2 %6082  ;;  %v6203_v21 = vpop.permute.xlu1 %6202 }
 0x936   : > { %v6079_v40 = vpop.permute.xlu0 %6078  ;;  %v6249_v62 = vadd.f32 %v6203_v21, %v6183_v25 }
 0x937   : > { %v6121_v59 = vadd.f32 %v6079_v40, %v6055_v7 }
 0x938   : > { %v5855_v38 = vpop.f32.mrf.mxu2  ;;  %v6269_v27 = vadd.f32 %v13014_v56, %v6249_v62 }
 0x93d   : > { %v12994_v63 = vpop.permute.xlu2 %6146  ;;  %v12999_v11 = vpop.permute.xlu1 %6080 }
 0x93e   : > { %v6143_v47 = vpop.permute.xlu0 %6142 }
 0x93f   : > { %v6186_v38 = vadd.f32 %v6143_v47, %v12960_v26 }
 0x940   : > { %v5857_v36 = vpop.f32.mrf.mxu2 }
 0x941   : > { %v5971_v37 = vadd.f32 %v12850_v48, %v5857_v36  ;;  %v6182_v48 = vadd.f32 %v12937_v49, %v6116_v9 }
 0x943   : > { %6224 = vrot.lane.b32.xlu0 %v5971_v37, %s7566_s14  ;;  %6162 = vrot.lane.b32.xlu1 %v5971_v37, %s7565_s17  ;;  %v6248_v61 = vadd.f32 %v6201_v24, %v6182_v48  ;;  %v6250_v37 = vadd.f32 %v12984_v57, %v6184_v0 }
 0x945   : > { %v13004_v42 = vpop.permute.xlu2 %6024  ;;  %v6145_v39 = vpop.permute.xlu1 %6144  ;;  %v6268_v2 = vadd.f32 %v13014_v56, %v6248_v61 }
 0x946   : > { %v13006_v3 = vpop.permute.xlu0 %6020  ;;  %v6187_v4 = vadd.f32 %v6145_v39, %v6121_v59 }
 0x947   : > { %v6059_v25 = vadd.f32 %v13006_v3, %v12834_v32 }
 0x948   : > { %v5860_v31 = vpop.f32.mrf.mxu2 }
 0x949   : > { %v5974_v45 = vadd.f32 %v12865_v34, %v5860_v31  ;;  %v6185_v34 = vadd.f32 %v6141_v33, %v6119_v41 }
 0x94b   : > { %6226 = vrot.lane.b32.xlu1 %v5974_v45, %s7566_s14  ;;  %6164 = vrot.lane.b32.xlu2 %v5974_v45, %s7565_s17  ;;  %v6122_v45 = vadd.f32 %v12999_v11, %v6056_v6  ;;  %s6394_s17 = scalar_lea.sflag [#allocation4], %s285_s22 }
 0x94d   : > { %v6211_v10 = vpop.permute.xlu2 %6210  ;;  %v6188_v20 = vadd.f32 %v12994_v63, %v6122_v45 }
 0x94e   : > { %v6207_v22 = vpop.permute.xlu0 %6206  ;;  %v6253_v18 = vadd.f32 %v6211_v10, %v6187_v4  ;;  %v6057_v10 = vadd.f32 %v12986_v46, %v12798_v17  ;;  %v6061_v17 = vadd.f32 %v13004_v42, %v12874_v14 }
 0x94f   : > { %v6251_v49 = vadd.f32 %v6207_v22, %v6185_v34 }
 0x950   : > { %v5863_v54 = vpop.f32.mrf.mxu2  ;;  %v6273_v40 = vadd.f32 %v13014_v56, %v6253_v18  ;;  %v6123_v51 = vadd.f32 %v12992_v8, %v6057_v10 }
 0x951   : > { %v6271_v52 = vadd.f32 %v13014_v56, %v6251_v49 }
 0x953   : > { %6301 = vperm.xlu1 %7416, %v6268_v2  }
 0x955   : > { %v13017_v12 = vpop.permute.xlu1 %6022  ;;  %v13025_v24 = vpop.permute.xlu2 %6088 }
 0x956   : > { %v6085_v33 = vpop.permute.xlu0 %6084 }
 0x957   : > { %v6124_v57 = vadd.f32 %v6085_v33, %v6058_v29 }
 0x958   : > { %v5865_v30 = vpop.f32.mrf.mxu2 }
 0x959   : > { %v5979_v19 = vadd.f32 %v12888_v35, %v5865_v30 }
 0x95b   : > { %6310 = vperm.xlu1 %7416, %v6271_v52   ;;  %6228 = vrot.lane.b32.xlu2 %v5979_v19, %s7566_s14 }
 0x95d   : > { %v6209_v1 = vpop.permute.xlu1 %6208  ;;  %v6153_v21 = vpop.permute.xlu2 %6152 }
 0x95e   : > { %v6252_v58 = vadd.f32 %v6209_v1, %v6186_v38  ;;  %v6149_v60 = vpop.permute.xlu0 %6148 }
 0x95f   : > { %v6189_v53 = vadd.f32 %v6149_v60, %v6123_v51 }
 0x960   : > { %v5868_v50 = vpop.f32.mrf.mxu2  ;;  %v6272_v9 = vadd.f32 %v13014_v56, %v6252_v58 }
 0x961   : > { %v5982_v35 = vadd.f32 %v12905_v43, %v5868_v50  ;;  %v6270_v43 = vadd.f32 %v13014_v56, %v6250_v37  ;;  %v6060_v50 = vadd.f32 %v13017_v12, %v12858_v55 }
 0x963   : > { %6316 = vperm.xlu1 %7416, %v6273_v40   ;;  %6304 = vperm.xlu2 %7417, %v6269_v27   ;;  %v6126_v42 = vadd.f32 %v13025_v24, %v6060_v50 }
 0x964   : > { %6230 = vrot.lane.b32.xlu0 %v5982_v35, %s7566_s14  ;;  %s7469_s14 = sshra.s32 %s6411_s11, 4  ;;  %s7470_s14 = int_to_ptr.hbm [resolvable:$true] %s7469_s14 }
 0x965   : > { %v6087_v36 = vpop.permute.xlu1 %6086  ;;  %s7471_s23 = scalar_lea.hbm %s7470_s14, 8  ;;  %p7476_p2 = scmp.lt.s32.totalorder %s7470_s14, %s13137_s7 }
 0x966   : > { %v6125_v62 = vadd.f32 %v6087_v36, %v6059_v25  ;;  %p7472_p13 = scmp.ne.s32.totalorder %s7470_s14, %s7471_s23  ;;  %p7477_p4 = scmp.lt.s32.totalorder %s7475_s24, %s7471_s23 }
 0x968   : > { %v5871_v13 = vpop.f32.mrf.mxu2  ;;  %v6191_v1 = vadd.f32 %v6153_v21, %v6125_v62  ;;  %p7473_p0 = pnand %p7472_p13, %p7662_p3  ;;  %p7478_p5 = por %p7477_p4, %p7476_p2 }
 0x96a   : > { %p7474_p1 = pneg %p7473_p0 }
 0x96b   : > { %6313 = vperm.xlu2 %7417, %v6272_v9  }
 0x96c   : > { %6307 = vperm.xlu0 %7418, %v6270_v43   ;;  %p7479_p6 = pnand %p7478_p5, %p7474_p1 }
 0x96d   : > { %v6151_v26 = vpop.permute.xlu1 %6150  ;;  %v6031_v47 = vpop.permute.xlu2 %6030 }
 0x96e   : > { %v6027_v31 = vpop.permute.xlu0 %6026  ;;  %v6190_v48 = vadd.f32 %v6151_v26, %v6124_v57  ;;  %v6064_v12 = vadd.f32 %v6031_v47, %v12927_v28 }
 0x96f   : > { %v6062_v21 = vadd.f32 %v6027_v31, %v12895_v16 }
 0x975   : > { %v6029_v61 = vpop.permute.xlu1 %6028  ;;  %v6217_v39 = vpop.permute.xlu2 %6216 }
 0x976   : > { %v6213_v41 = vpop.permute.xlu0 %6212  ;;  %v6256_v54 = vadd.f32 %v6217_v39, %v6190_v48  ;;  %v6063_v29 = vadd.f32 %v6029_v61, %v12914_v5 }
 0x977   : > { %v6254_v2 = vadd.f32 %v6213_v41, %v6188_v20 }
 0x978   : > { %v6276_v22 = vadd.f32 %v13014_v56, %v6256_v54 }
 0x979   : > { %v6274_v44 = vadd.f32 %v13014_v56, %v6254_v2 }
 0x97a   : > { %6325 = vperm.xlu1 %7416, %v6276_v22  }
 0x97b   : > { %6319 = vperm.xlu2 %7417, %v6274_v44  }
 0x97d   : > { %v6215_v23 = vpop.permute.xlu1 %6214  ;;  %v6095_v11 = vpop.permute.xlu2 %6094 }
 0x97e   : > { %v6091_v63 = vpop.permute.xlu0 %6090  ;;  %v6255_v34 = vadd.f32 %v6215_v23, %v6189_v53  ;;  %v6129_v48 = vadd.f32 %v6095_v11, %v6063_v29 }
 0x97f   : > { %v6127_v46 = vadd.f32 %v6091_v63, %v6061_v17  ;;  %v6348_v63 = vlaneseq }
 0x980   : > { %v6275_v49 = vadd.f32 %v13014_v56, %v6255_v34 }
 0x982   : > { %6322 = vperm.xlu0 %7418, %v6275_v49   ;;  %v6349_v49 = vand.u32 127, %v6348_v63 }
 0x985   : > { %v6093_v7 = vpop.permute.xlu1 %6092  ;;  %v6159_v30 = vpop.permute.xlu2 %6158 }
 0x986   : > { %v6155_v59 = vpop.permute.xlu0 %6154  ;;  %v6128_v55 = vadd.f32 %v6093_v7, %v6062_v21 }
 0x987   : > { %v6192_v35 = vadd.f32 %v6155_v59, %v6126_v42 }
 0x988   : > { %v6194_v60 = vadd.f32 %v6159_v30, %v6128_v55  ;;  %v6351_v30 = vadd.s32 4294967288, %v6349_v49 }
 0x98d   : > { %v6157_v52 = vpop.permute.xlu1 %6156  ;;  %v6223_v4 = vpop.permute.xlu2 %6222 }
 0x98e   : > { %v6193_v19 = vadd.f32 %v6157_v52, %v6127_v46  ;;  %v6033_v8 = vpop.permute.xlu0 %6032 }
 0x98f   : > { %v6065_v39 = vadd.f32 %v6033_v8, %v12940_v15 }
 0x990   : > { %v6259_v33 = vadd.f32 %v6223_v4, %v6193_v19 }
 0x992   : > { %v6279_v18 = vadd.f32 %v13014_v56, %v6259_v33 }
 0x994   : > { %6334 = vperm.xlu1 %7416, %v6279_v18  }
 0x996   : > { %v6219_v27 = vpop.permute.xlu0 %6218 }
 0x997   : > { %v6257_v40 = vadd.f32 %v6219_v27, %v6191_v1 }
 0x999   : > { %v6277_v14 = vadd.f32 %v13014_v56, %v6257_v40 }
 0x99b   : > { %6328 = vperm.xlu2 %7417, %v6277_v14  }
 0x99d   : > { %v6221_v38 = vpop.permute.xlu1 %6220 }
 0x99e   : > { %v6258_v32 = vadd.f32 %v6221_v38, %v6192_v35  ;;  %v6097_v0 = vpop.permute.xlu0 %6096 }
 0x99f   : > { %v6130_v13 = vadd.f32 %v6097_v0, %v6064_v12 }
 0x9a0   : > { %v6278_v3 = vadd.f32 %v13014_v56, %v6258_v32 }
 0x9a2   : > { %6331 = vperm.xlu0 %7418, %v6278_v3  }
 0x9a5   : > { %v6099_v36 = vpop.permute.xlu1 %6098  ;;  %v6165_v37 = vpop.permute.xlu2 %6164 }
 0x9a6   : > { %v6161_v58 = vpop.permute.xlu0 %6160  ;;  %v6131_v41 = vadd.f32 %v6099_v36, %v6065_v39 }
 0x9a7   : > { %v6195_v16 = vadd.f32 %v6161_v58, %v6129_v48 }
 0x9a8   : > { %v6197_v54 = vadd.f32 %v6165_v37, %v6131_v41 }
 0x9b5   : > { %v6225_v9 = vpop.permute.xlu0 %6224  ;;  %v6163_v24 = vpop.permute.xlu1 %6162 }
 0x9b6   : > { %v6260_v43 = vadd.f32 %v6225_v9, %v6194_v60  ;;  %v6196_v26 = vadd.f32 %v6163_v24, %v6130_v13  ;;  %v6229_v6 = vpop.permute.xlu2 %6228 }
 0x9b8   : > { %v6280_v45 = vadd.f32 %v13014_v56, %v6260_v43  ;;  %v6262_v57 = vadd.f32 %v6229_v6, %v6196_v26 }
 0x9ba   : > { %v6282_v20 = vadd.f32 %v13014_v56, %v6262_v57  ;;  %6337 = vperm.xlu2 %7417, %v6280_v45  }
 0x9bc   : > { %6343 = vperm.xlu1 %7416, %v6282_v20  }
 0x9bd   : > { %v6227_v31 = vpop.permute.xlu1 %6226 }
 0x9be   : > { %v6261_v28 = vadd.f32 %v6227_v31, %v6195_v16  ;;  %v6305_v22 = vpop.permute.xlu2 %6304 }
 0x9bf   : > { %v6352_v52 = vperm.slane %v6305_v22, %v6351_v30 }
 0x9c0   : > { %v6281_v47 = vadd.f32 %v13014_v56, %v6261_v28 }
 0x9c2   : > { %6340 = vperm.xlu0 %7418, %v6281_v47  }
 0x9c5   : > { %v6302_v10 = vpop.permute.xlu1 %6301 }
 0x9c6   : > { %v6314_v51 = vpop.permute.xlu2 %6313 }
 0x9c7   : > { %v6358_v1 = vperm.slane %v6314_v51, %v6349_v49 }
 0x9cd   : > { %v6311_v44 = vpop.permute.xlu1 %6310 }
 0x9ce   : > { %v6356_v17 = vperm.slane %v6311_v44, %v6351_v30 }
 0x9d5   : > { %v6317_v53 = vpop.permute.xlu1 %6316  ;;  %v6320_v11 = vpop.permute.xlu2 %6319 }
 0x9d6   : > { %v6231_v2 = vpop.permute.xlu0 %6230  ;;  %v6359_v4 = vperm.slane %v6317_v53, %v6351_v30  ;;  %v6361_v18 = vperm.slane %v6320_v11, %v6349_v49 }
 0x9d7   : > { %v6263_v5 = vadd.f32 %v6231_v2, %v6197_v54 }
 0x9d8   : > { %v6360_v42 = vsel %vm6353_vm13, %v6359_v4, %v6358_v1 }
 0x9d9   : > { %v6283_v61 = vadd.f32 %v13014_v56, %v6263_v5  ;;  %v6350_v56 = vperm.slane %v6302_v10, %v6349_v49 }
 0x9db   : > { %6346 = vperm.xlu2 %7417, %v6283_v61   ;;  %v6354_v62 = vsel %vm6353_vm13, %v6352_v52, %v6350_v56 }
 0x9de   : > { %v6308_v23 = vpop.permute.xlu0 %6307 }
 0x9df   : > { %v6355_v59 = vperm.slane %v6308_v23, %v6349_v49 }
 0x9e1   : > { %v6357_v19 = vsel %vm6353_vm13, %v6356_v17, %v6355_v59 }
 0x9e2   : > { %v6377_v50 = vsel %vm6376_vm14, %v6357_v19, %v6354_v62 }
 0x9e3   : > { %v6379_v38 = vsel %vm6378_vm11, %v6360_v42, %v6377_v50 }
 0x9ec   : > { %v6326_v34 = vpop.permute.xlu1 %6325 }
 0x9ed   : > { %v6364_v35 = vperm.slane %v6326_v34, %v6349_v49 }
 0x9f4   : > { %v6323_v15 = vpop.permute.xlu0 %6322 }
 0x9f5   : > { %v6329_v7 = vpop.permute.xlu2 %6328  ;;  %v6362_v8 = vperm.slane %v6323_v15, %v6351_v30 }
 0x9f6   : > { %v6365_v27 = vperm.slane %v6329_v7, %v6351_v30 }
 0x9f7   : > { %v6363_v40 = vsel %vm6353_vm13, %v6362_v8, %v6361_v18 }
 0x9f8   : > { %v6366_v3 = vsel %vm6353_vm13, %v6365_v27, %v6364_v35  ;;  %v6381_v0 = vsel %vm6380_vm0, %v6363_v40, %v6379_v38 }
 0x9f9   : > { %v6383_v60 = vsel %vm6382_vm12, %v6366_v3, %v6381_v0 }
 0xa06   : > { %v6335_v46 = vpop.permute.xlu1 %6334 }
 0xa07   : > { %v6368_v32 = vperm.slane %v6335_v46, %v6351_v30 }
 0xa14   : > { %v6332_v25 = vpop.permute.xlu0 %6331  ;;  %v6338_v33 = vpop.permute.xlu2 %6337 }
 0xa15   : > { %v6367_v14 = vperm.slane %v6332_v25, %v6349_v49  ;;  %v6370_v37 = vperm.slane %v6338_v33, %v6349_v49 }
 0xa17   : > { %v6369_v36 = vsel %vm6353_vm13, %v6368_v32, %v6367_v14 }
 0xa18   : > { %v6385_v24 = vsel %vm6384_vm15, %v6369_v36, %v6383_v60 }
 0xa2e   : > { %v6344_v58 = vpop.permute.xlu1 %6343 }
 0xa2f   : > { %v6373_v13 = vperm.slane %v6344_v58, %v6349_v49 }
 0xa34   : > { %v6341_v21 = vpop.permute.xlu0 %6340 }
 0xa35   : > { %v6347_v55 = vpop.permute.xlu2 %6346  ;;  %v6371_v12 = vperm.slane %v6341_v21, %v6351_v30 }
 0xa36   : > { %v6374_v9 = vperm.slane %v6347_v55, %v6351_v30 }
 0xa37   : > { %v6372_v43 = vsel %vm6353_vm13, %v6371_v12, %v6370_v37 }
 0xa38   : > { %v6375_v26 = vsel %vm6353_vm13, %v6374_v9, %v6373_v13  ;;  %v6387_v6 = vsel %vm6386_vm3, %v6372_v43, %v6385_v24 }
 0xa39   : > { %v6389_v29 = vsel %vm6388_vm2, %v6375_v26, %v6387_v6 }
 0xa3a   : > { %6392 = vst.msk [vmem:[%s287_s6] sm:$0xff] %vm6391_vm1, %v6389_v29 }
 0xa3b   : > { %7482 = shalt.err (!%p7479_p6)
}
 0xa3c   : > { %6978 = dma.vmem_to_hbm [thread:$0]  (%p7662_p3), %s6409_s21, 128, %s6411_s11, %s6394_s17  }
 0xa3d PF: > { %p6984_p7 = scmp.ge.s32.totalorder %s7549_s10, 2  ;;  %s6422_s22 = sand.u32 1, %s7521_s26  }
 0xa3e   : > { %s6423_s25 = scalar_lea.sflag [#allocation4], %s6422_s22 }
 0xa3f   : > { %p6981_p9 = pnand %p6984_p7, %p7671_p8 }
 0xa41   : > { %p6982_p10 = pneg %p6981_p9 }
 0xa43   : > { %7516 = dma.done.wait (%p6982_p10), %s6423_s25, 128  }
 0xa44   : > { %7518 = vsyncadd (%p6982_p10), %s6423_s25, 4294967168  ;;  %s22_s10 = sadd.s32 1, %s7549_s10   ;;  %s13920_s26 = smov %s7525_s27 }
 0xa45   : > { %p19_p11 = scmp.ge.s32.totalorder %s22_s10, 6   ;;  %s13921_s27 = smov %s7529_s28 }
 0xa46   : > { %s13922_s28 = smov %s7680_s20  ;;  %s13923_s29 = smov %s7541_s8 }
 0xa47   : > { %s13924_s30 = smov %s7545_s9  ;;  %s13925_s8 = smov %s13928_s12 }
 0xa48   : > { %s13926_s9 = smov %s13932_s13  ;;  %21 = sbr.rel (!%p19_p11) target bundleno = 8 (0x8), region = 92 }
 0xa4d   :  { %6429 = vsyncpa [#allocation4], 1 }
 0xa4e   :  { %6431 = vsyncpa [#allocation4 + $0x1], 1 }

</bundles_post_ra>
